<compile_context>
chip_gen: v5e
topology: v5e:2x2
jax: 0.10.0
libtpu: 0.0.40
codegen_flags: <defaults>
</compile_context>

<pallas_src>
import functools

import jax
import jax.numpy as jnp
from jax.experimental import pallas as pl
from jax.experimental.pallas import tpu as pltpu


# ----------------------------------------------------------------- fused LSTM
def _make_lstm2_kernel(Tc, B, D, H):
    def kernel(x_ref, wih1_ref, whh1_ref, b1_ref, wih2_ref, whh2_ref, b2_ref,
               h0_ref, c0_ref, y_ref, hT_ref, cT_ref,
               h_sc, c_sc, gbuf, h1buf):
        chunk = pl.program_id(0)

        @pl.when(chunk == 0)
        def _():
            h_sc[...] = h0_ref[...]
            c_sc[...] = c0_ref[...]

        def cell(gates, c_prev):
            i_g = jax.nn.sigmoid(gates[:, 0 * H:1 * H])
            f_g = jax.nn.sigmoid(gates[:, 1 * H:2 * H])
            g_g = jnp.tanh(gates[:, 2 * H:3 * H])
            o_g = jax.nn.sigmoid(gates[:, 3 * H:4 * H])
            c_new = f_g * c_prev + i_g * g_g
            h_new = o_g * jnp.tanh(c_new)
            return h_new, c_new

        # ---- layer 1: input projection hoisted over the whole chunk --------
        x_c = x_ref[...].reshape(Tc * B, D)                        # bf16
        gbuf[...] = (jnp.dot(x_c, wih1_ref[...],
                             preferred_element_type=jnp.float32)
                     + b1_ref[...])             # bias broadcast once per chunk

        h1 = h_sc[0]
        c1 = c_sc[0]
        for t in range(Tc):                     # static, fully unrolled
            g = gbuf[t * B:(t + 1) * B, :] + jnp.dot(
                h1.astype(jnp.bfloat16), whh1_ref[...],
                preferred_element_type=jnp.float32)
            h1, c1 = cell(g, c1)
            h1buf[t * B:(t + 1) * B, :] = h1.astype(h1buf.dtype)

        # ---- layer 2: input projection over the chunk of layer-1 outputs ---
        gbuf[...] = (jnp.dot(h1buf[...], wih2_ref[...],
                             preferred_element_type=jnp.float32)
                     + b2_ref[...])

        h2 = h_sc[1]
        c2 = c_sc[1]
        for t in range(Tc):
            g = gbuf[t * B:(t + 1) * B, :] + jnp.dot(
                h2.astype(jnp.bfloat16), whh2_ref[...],
                preferred_element_type=jnp.float32)
            h2, c2 = cell(g, c2)
            y_ref[t] = h2.astype(y_ref.dtype)

        h_sc[0] = h1
        c_sc[0] = c1
        h_sc[1] = h2
        c_sc[1] = c2

        @pl.when(chunk == pl.num_programs(0) - 1)
        def _():
            hT_ref[...] = h_sc[...]
            cT_ref[...] = c_sc[...]

    return kernel


def lstm2_fused(x_tm, lstm_params, h0, c0, *, tc=16):
    """x_tm: (T,B,D) bf16 time-major.  lstm_params = 2x(wih_t, whh_t, bias).
    h0/c0: (2,B,H) f32.  Returns y (T,B,H) bf16, (hT, cT) each (2,B,H) f32."""
    T, B, D = x_tm.shape
    assert len(lstm_params) == 2, "fused kernel implements num_layers=2"
    (wih1, whh1, b1), (wih2, whh2, b2) = lstm_params
    H = whh1.shape[0]
    tc = tc if T % tc == 0 else T
    assert B % 8 == 0 and D % 128 == 0 and H % 128 == 0, "pad B/D/H for TPU tiles"

    kernel = _make_lstm2_kernel(tc, B, D, H)
    y, hT, cT = pl.pallas_call(
        kernel,
        out_shape=(jax.ShapeDtypeStruct((T, B, H), jnp.bfloat16),
                   jax.ShapeDtypeStruct((2, B, H), jnp.float32),
                   jax.ShapeDtypeStruct((2, B, H), jnp.float32)),
        grid_spec=pltpu.PrefetchScalarGridSpec(
            num_scalar_prefetch=0,
            grid=(T // tc,),
            in_specs=[
                pl.BlockSpec((tc, B, D), lambda c: (c, 0, 0)),     # x chunk
                pl.BlockSpec((D, 4 * H), lambda c: (0, 0)),        # W_ih layer1
                pl.BlockSpec((H, 4 * H), lambda c: (0, 0)),        # W_hh layer1
                pl.BlockSpec((1, 4 * H), lambda c: (0, 0)),        # bias layer1
                pl.BlockSpec((H, 4 * H), lambda c: (0, 0)),        # W_ih layer2
                pl.BlockSpec((H, 4 * H), lambda c: (0, 0)),        # W_hh layer2
                pl.BlockSpec((1, 4 * H), lambda c: (0, 0)),        # bias layer2
                pl.BlockSpec((2, B, H), lambda c: (0, 0, 0)),      # h0
                pl.BlockSpec((2, B, H), lambda c: (0, 0, 0)),      # c0
            ],
            out_specs=[
                pl.BlockSpec((tc, B, H), lambda c: (c, 0, 0)),     # y chunk
                pl.BlockSpec((2, B, H), lambda c: (0, 0, 0)),      # h_T
                pl.BlockSpec((2, B, H), lambda c: (0, 0, 0)),      # c_T
            ],
            scratch_shapes=[
                pltpu.VMEM((2, B, H), jnp.float32),                # h state
                pltpu.VMEM((2, B, H), jnp.float32),                # c state
                pltpu.VMEM((tc * B, 4 * H), jnp.float32),          # gate preact
                pltpu.VMEM((tc * B, H), jnp.bfloat16),             # layer-1 out
            ]),
        compiler_params=pltpu.CompilerParams(
            dimension_semantics=("arbitrary",),
            vmem_limit_bytes=48 * 1024 * 1024),
    )(x_tm, wih1, whh1, b1, wih2, whh2, b2, h0, c0)
    return y, hT, cT


# ------------------------------------------------ tiled linear + log_softmax
def _head_kernel(x_ref, w_ref, b_ref, o_ref, lg_sc, m_sc, l_sc):
    p = pl.program_id(1)        # 0: compute logits + stats, 1: write output
    v = pl.program_id(2)        # vocab tile

    @pl.when(jnp.logical_and(p == 0, v == 0))
    def _():
        m_sc[...] = jnp.full_like(m_sc, -jnp.inf)
        l_sc[...] = jnp.zeros_like(l_sc)

    @pl.when(p == 0)
    def _():
        logits = (jnp.dot(x_ref[...], w_ref[...],
                          preferred_element_type=jnp.float32)
                  + b_ref[...])                               # (Nt, Vt) f32
        lg_sc[v] = logits                                     # cache, no recompute
        m_new = jnp.maximum(m_sc[...], jnp.max(logits, axis=-1, keepdims=True))
        l_sc[...] = (l_sc[...] * jnp.exp(m_sc[...] - m_new)
                     + jnp.sum(jnp.exp(logits - m_new), axis=-1, keepdims=True))
        m_sc[...] = m_new

    @pl.when(p == 1)
    def _():
        o_ref[...] = lg_sc[v] - (m_sc[...] + jnp.log(l_sc[...]))


def linear_logsoftmax(x, w_t, bias, *, nt=128, vt=512):
    """x: (N,H) bf16, w_t: (H,V) bf16, bias: (1,V) f32 -> (N,V) f32 log-probs."""
    N, H = x.shape
    V = w_t.shape[-1]
    nt = min(nt, N)
    vt = min(vt, V)
    assert N % nt == 0 and V % vt == 0 and nt % 8 == 0 and vt % 128 == 0
    nb, vb = N // nt, V // vt

    cost = pl.CostEstimate(
        flops=2 * N * H * V,                      # logits computed once
        transcendentals=N * V,
        bytes_accessed=N * H * 2 + H * V * 2 + 4 * V + N * V * 4)

    # Phase-gated index maps: during the write phase (p==1) the W / bias block
    # indices are pinned to 0 (no re-streaming of the vocab weights) and during
    # the stats phase (p==0) the output block index is pinned (no spurious
    # write-backs of unwritten output buffers).
    return pl.pallas_call(
        _head_kernel,
        out_shape=jax.ShapeDtypeStruct((N, V), jnp.float32),
        grid_spec=pltpu.PrefetchScalarGridSpec(
            num_scalar_prefetch=0,
            grid=(nb, 2, vb),
            in_specs=[
                pl.BlockSpec((nt, H), lambda n, p, v: (n, 0)),
                pl.BlockSpec((H, vt), lambda n, p, v: (0, v * (1 - p))),
                pl.BlockSpec((1, vt), lambda n, p, v: (0, v * (1 - p))),
            ],
            out_specs=pl.BlockSpec((nt, vt), lambda n, p, v: (n, v * p)),
            scratch_shapes=[pltpu.VMEM((vb, nt, vt), jnp.float32),  # logits cache
                            pltpu.VMEM((nt, 1), jnp.float32),       # running max
                            pltpu.VMEM((nt, 1), jnp.float32)]),     # running sum
        compiler_params=pltpu.CompilerParams(
            dimension_semantics=("parallel", "arbitrary", "arbitrary"),
            vmem_limit_bytes=48 * 1024 * 1024),   # headroom under v7x's 64 MiB
        cost_estimate=cost,
    )(x, w_t, bias)


# ------------------------------------------------------------------- forward
def lstm_lm2_forward(params, tokens, hidden, *, tc=16):
    """tokens: (B, T) int32; hidden = (h0, c0) each (2, B, H) f32."""
    h0, c0 = hidden
    B, T = tokens.shape
    emb = params["embedding"]
    max_norm = params["max_embed_norm"]

    # Embedding gather directly into time-major (T,B,D): no activation transpose.
    x = jnp.take(emb, tokens.T, axis=0)                         # (T, B, D) f32
    norms = jnp.linalg.norm(x, axis=-1, keepdims=True)
    x = x * jnp.minimum(1.0, max_norm / jnp.maximum(norms, 1e-12))
    # dropout: identity (eval mode).  TODO(synk): training-mode dropout mask.
    x = x.astype(jnp.bfloat16)

    y, hT, cT = lstm2_fused(x, params["lstm"], h0, c0, tc=tc)   # y: (T,B,H) bf16

    # Head consumes batch-major rows so the big (B,T,V) output needs no transpose;
    # only the much smaller (T,B,H) activation is transposed here.
    H = y.shape[-1]
    flat = jnp.transpose(y, (1, 0, 2)).reshape(B * T, H)        # (B*T, H) bf16
    logp = linear_logsoftmax(flat, params["lin_w_t"], params["lin_b"])
    V = logp.shape[-1]
    return logp.reshape(B, T, V), (hT, cT)


# -------------------------------------------------------------- param init
def init_params(key, V, D, H, num_layers=2, max_embed_norm=10.0):
    assert num_layers == 2
    keys = jax.random.split(key, 3 + 3 * num_layers)
    scale = 1.0 / jnp.sqrt(H)
    params = {
        "embedding": jax.random.normal(keys[0], (V, D), jnp.float32),
        "max_embed_norm": jnp.float32(max_embed_norm),
        "lin_w_t": jax.random.uniform(keys[1], (H, V), jnp.float32,
                                      -scale, scale).astype(jnp.bfloat16),
        "lin_b": jax.random.uniform(keys[2], (1, V), jnp.float32, -scale, scale),
    }
    lstm = []
    for layer in range(num_layers):
        in_dim = D if layer == 0 else H
        k0, k1, k2 = keys[3 + 3 * layer: 6 + 3 * layer]
        # stored pre-transposed (in_dim,4H)/(H,4H) in bf16; combined b_ih + b_hh
        wih_t = jax.random.uniform(k0, (in_dim, 4 * H), jnp.float32, -scale, scale)
        whh_t = jax.random.uniform(k1, (H, 4 * H), jnp.float32, -scale, scale)
        bias = jnp.sum(jax.random.uniform(k2, (2, 4 * H), jnp.float32,
                                          -scale, scale), axis=0, keepdims=True)
        lstm.append((wih_t.astype(jnp.bfloat16), whh_t.astype(jnp.bfloat16), bias))
    params["lstm"] = tuple(lstm)
    return params


# ----------------------------------------------------- pure-JAX reference
def reference_forward(params, tokens, hidden):
    h_all, c_all = hidden
    B, T = tokens.shape
    x = jnp.take(params["embedding"], tokens, axis=0)           # (B, T, D)
    norms = jnp.linalg.norm(x, axis=-1, keepdims=True)
    x = x * jnp.minimum(1.0, params["max_embed_norm"] / jnp.maximum(norms, 1e-12))
    inp = x
    hs, cs = [], []
    for layer, (wih, whh, b) in enumerate(params["lstm"]):
        H = whh.shape[0]
        h, c = h_all[layer], c_all[layer]
        outs = []
        for t in range(T):
            g = (jnp.dot(inp[:, t].astype(jnp.bfloat16), wih,
                         preferred_element_type=jnp.float32)
                 + jnp.dot(h.astype(jnp.bfloat16), whh,
                           preferred_element_type=jnp.float32) + b)
            i_g = jax.nn.sigmoid(g[:, :H])
            f_g = jax.nn.sigmoid(g[:, H:2 * H])
            g_g = jnp.tanh(g[:, 2 * H:3 * H])
            o_g = jax.nn.sigmoid(g[:, 3 * H:])
            c = f_g * c + i_g * g_g
            h = o_g * jnp.tanh(c)
            outs.append(h)
        inp = jnp.stack(outs, axis=1)                            # (B, T, H)
        hs.append(h)
        cs.append(c)
    H = inp.shape[-1]
    logits = (jnp.dot(inp.astype(jnp.bfloat16).reshape(B * T, H),
                      params["lin_w_t"], preferred_element_type=jnp.float32)
              + params["lin_b"])
    logp = jax.nn.log_softmax(logits, axis=-1).reshape(B, T, -1)
    return logp, (jnp.stack(hs), jnp.stack(cs))


if __name__ == "__main__":
    # small, TPU-aligned shapes (B multiple of 8, D/H/V multiples of 128)
    B, T, V, D, H, L = 8, 16, 256, 128, 128, 2

    key = jax.random.PRNGKey(0)
    k_par, k_tok, k_h, k_c = jax.random.split(key, 4)
    params = init_params(k_par, V, D, H, L)

    tokens = jax.random.randint(k_tok, (B, T), 0, V, dtype=jnp.int32)
    h0 = 0.1 * jax.random.normal(k_h, (L, B, H), jnp.float32)
    c0 = 0.1 * jax.random.normal(k_c, (L, B, H), jnp.float32)

    # tc=8 -> two time chunks: exercises the cross-chunk h/c carry path.
    fwd = jax.jit(functools.partial(lstm_lm2_forward, params, tc=8))
    log_probs, (h_out, c_out) = fwd(tokens, (h0, c0))
    jax.block_until_ready((log_probs, h_out, c_out))

    assert log_probs.shape == (B, T, V)
    assert h_out.shape == (L, B, H) and c_out.shape == (L, B, H)
    # log_softmax rows must sum to 1 in prob space
    assert jnp.allclose(jnp.sum(jnp.exp(log_probs), axis=-1), 1.0, atol=1e-4)

    # compare against a pure-JAX reference (same bf16 matmul casts)
    ref = jax.jit(functools.partial(reference_forward, params))
    ref_logp, (ref_h, ref_c) = ref(tokens, (h0, c0))
    jax.block_until_ready((ref_logp, ref_h, ref_c))
    assert jnp.allclose(log_probs, ref_logp, atol=3e-2), \
        float(jnp.max(jnp.abs(log_probs - ref_logp)))
    assert jnp.allclose(h_out, ref_h, atol=1e-2)
    assert jnp.allclose(c_out, ref_c, atol=2e-2)

    print("KERNEL_OK")
</pallas_src>

<mosaic_0001>
module attributes {stable_mosaic.version = 11 : i64} {
  func.func @_head_kernel(%arg0: i32, %arg1: i32, %arg2: i32, %arg3: memref<128x128xbf16, #tpu.memory_space<vmem>>, %arg4: memref<128x256xbf16, #tpu.memory_space<vmem>>, %arg5: memref<1x256xf32, #tpu.memory_space<vmem>>, %arg6: memref<128x256xf32, #tpu.memory_space<vmem>>, %arg7: memref<1x128x256xf32, #tpu.memory_space<vmem>>, %arg8: memref<128x1xf32, #tpu.memory_space<vmem>>, %arg9: memref<128x1xf32, #tpu.memory_space<vmem>>) attributes {dimension_semantics = [#tpu.dimension_semantics<parallel>, #tpu.dimension_semantics<arbitrary>, #tpu.dimension_semantics<arbitrary>], iteration_bounds = array<i64: 1, 2, 1>, scalar_prefetch = 0 : i64, scratch_operands = 3 : i64, tpu.core_type = #tpu.core_type<tc>, window_params = [{transform_indices = @transform_0, window_bounds = array<i64: 128, 128>}, {transform_indices = @transform_1, window_bounds = array<i64: 128, 256>}, {transform_indices = @transform_2, window_bounds = array<i64: 1, 256>}, {transform_indices = @transform_3, window_bounds = array<i64: 128, 256>}]} {
    %c0_i32 = arith.constant 0 : i32
    %0 = arith.cmpi eq, %arg1, %c0_i32 : i32
    %c0_i32_0 = arith.constant 0 : i32
    %1 = arith.cmpi eq, %arg2, %c0_i32_0 : i32
    %2 = arith.andi %0, %1 : i1
    %3 = arith.extui %2 : i1 to i32
    %c0_i32_1 = arith.constant 0 : i32
    %4 = arith.cmpi ne, %3, %c0_i32_1 : i32
    scf.if %4 {
      %cst = arith.constant 0xFF800000 : f32
      %11 = vector.broadcast %cst : f32 to vector<128x1xf32>
      %c0 = arith.constant 0 : index
      %c0_5 = arith.constant 0 : index
      %12 = vector.load %arg8[%c0, %c0_5] : memref<128x1xf32, #tpu.memory_space<vmem>>, vector<128x1xf32>
      tpu.vector_store %arg8[%c0, %c0_5], %11 {strides = array<i32>} : memref<128x1xf32, #tpu.memory_space<vmem>>, vector<128x1xf32>,
      %cst_6 = arith.constant 0.000000e+00 : f32
      %13 = vector.broadcast %cst_6 : f32 to vector<128x1xf32>
      %c0_7 = arith.constant 0 : index
      %c0_8 = arith.constant 0 : index
      %14 = vector.load %arg9[%c0_7, %c0_8] : memref<128x1xf32, #tpu.memory_space<vmem>>, vector<128x1xf32>
      tpu.vector_store %arg9[%c0_7, %c0_8], %13 {strides = array<i32>} : memref<128x1xf32, #tpu.memory_space<vmem>>, vector<128x1xf32>,
    } else {
    }
    %c0_i32_2 = arith.constant 0 : i32
    %5 = arith.cmpi eq, %arg1, %c0_i32_2 : i32
    %6 = arith.extui %5 : i1 to i32
    %c0_i32_3 = arith.constant 0 : i32
    %7 = arith.cmpi ne, %6, %c0_i32_3 : i32
    scf.if %7 {
      %c0 = arith.constant 0 : index
      %c0_5 = arith.constant 0 : index
      %11 = vector.load %arg3[%c0, %c0_5] : memref<128x128xbf16, #tpu.memory_space<vmem>>, vector<128x128xbf16>
      %c0_6 = arith.constant 0 : index
      %c0_7 = arith.constant 0 : index
      %12 = vector.load %arg4[%c0_6, %c0_7] : memref<128x256xbf16, #tpu.memory_space<vmem>>, vector<128x256xbf16>
      %cst = arith.constant dense<0.000000e+00> : vector<128x256xf32>
      %13 = tpu.matmul %11, %12, %cst {dimension_numbers = #tpu.dot_dimension_numbers<[1], [0], [0], [1], [0, 0, 1, 1], [], []>} : vector<128x128xbf16>, vector<128x256xbf16>, vector<128x256xf32> -> vector<128x256xf32>
      %c0_8 = arith.constant 0 : index
      %c0_9 = arith.constant 0 : index
      %14 = vector.load %arg5[%c0_8, %c0_9] : memref<1x256xf32, #tpu.memory_space<vmem>>, vector<1x256xf32>
      %15 = vector.broadcast %14 : vector<1x256xf32> to vector<128x256xf32>
      %16 = arith.addf %13, %15 : vector<128x256xf32>
      %17 = arith.index_cast %arg2 : i32 to index
      %c0_10 = arith.constant 0 : index
      %c0_11 = arith.constant 0 : index
      %18 = vector.load %arg7[%17, %c0_10, %c0_11] : memref<1x128x256xf32, #tpu.memory_space<vmem>>, vector<1x128x256xf32>
      %19 = vector.shape_cast %18 : vector<1x128x256xf32> to vector<128x256xf32>
      %20 = vector.shape_cast %16 : vector<128x256xf32> to vector<1x128x256xf32>
      tpu.vector_store %arg7[%17, %c0_10, %c0_11], %20 {strides = array<i32>} : memref<1x128x256xf32, #tpu.memory_space<vmem>>, vector<1x128x256xf32>,
      %c0_12 = arith.constant 0 : index
      %c0_13 = arith.constant 0 : index
      %21 = vector.load %arg8[%c0_12, %c0_13] : memref<128x1xf32, #tpu.memory_space<vmem>>, vector<128x1xf32>
      %cst_14 = arith.constant dense<0xFF800000> : vector<128xf32>
      %22 = vector.multi_reduction <maximumf>, %16, %cst_14 [1] : vector<128x256xf32> to vector<128xf32>
      %23 = vector.shape_cast %22 : vector<128xf32> to vector<128x1xf32>
      %24 = arith.maximumf %21, %23 : vector<128x1xf32>
      %c0_15 = arith.constant 0 : index
      %c0_16 = arith.constant 0 : index
      %25 = vector.load %arg9[%c0_15, %c0_16] : memref<128x1xf32, #tpu.memory_space<vmem>>, vector<128x1xf32>
      %c0_17 = arith.constant 0 : index
      %c0_18 = arith.constant 0 : index
      %26 = vector.load %arg8[%c0_17, %c0_18] : memref<128x1xf32, #tpu.memory_space<vmem>>, vector<128x1xf32>
      %27 = arith.subf %26, %24 : vector<128x1xf32>
      %28 = math.exp %27 : vector<128x1xf32>
      %29 = arith.mulf %25, %28 : vector<128x1xf32>
      %30 = vector.broadcast %24 : vector<128x1xf32> to vector<128x256xf32>
      %31 = arith.subf %16, %30 : vector<128x256xf32>
      %32 = math.exp %31 : vector<128x256xf32>
      %cst_19 = arith.constant dense<0.000000e+00> : vector<128xf32>
      %33 = vector.multi_reduction <add>, %32, %cst_19 [1] : vector<128x256xf32> to vector<128xf32>
      %34 = vector.shape_cast %33 : vector<128xf32> to vector<128x1xf32>
      %35 = arith.addf %29, %34 : vector<128x1xf32>
      %c0_20 = arith.constant 0 : index
      %c0_21 = arith.constant 0 : index
      %36 = vector.load %arg9[%c0_20, %c0_21] : memref<128x1xf32, #tpu.memory_space<vmem>>, vector<128x1xf32>
      tpu.vector_store %arg9[%c0_20, %c0_21], %35 {strides = array<i32>} : memref<128x1xf32, #tpu.memory_space<vmem>>, vector<128x1xf32>,
      %c0_22 = arith.constant 0 : index
      %c0_23 = arith.constant 0 : index
      %37 = vector.load %arg8[%c0_22, %c0_23] : memref<128x1xf32, #tpu.memory_space<vmem>>, vector<128x1xf32>
      tpu.vector_store %arg8[%c0_22, %c0_23], %24 {strides = array<i32>} : memref<128x1xf32, #tpu.memory_space<vmem>>, vector<128x1xf32>,
    } else {
    }
    %c1_i32 = arith.constant 1 : i32
    %8 = arith.cmpi eq, %arg1, %c1_i32 : i32
    %9 = arith.extui %8 : i1 to i32
    %c0_i32_4 = arith.constant 0 : i32
    %10 = arith.cmpi ne, %9, %c0_i32_4 : i32
    scf.if %10 {
      %11 = arith.index_cast %arg2 : i32 to index
      %c0 = arith.constant 0 : index
      %c0_5 = arith.constant 0 : index
      %12 = vector.load %arg7[%11, %c0, %c0_5] : memref<1x128x256xf32, #tpu.memory_space<vmem>>, vector<1x128x256xf32>
      %13 = vector.shape_cast %12 : vector<1x128x256xf32> to vector<128x256xf32>
      %c0_6 = arith.constant 0 : index
      %c0_7 = arith.constant 0 : index
      %14 = vector.load %arg8[%c0_6, %c0_7] : memref<128x1xf32, #tpu.memory_space<vmem>>, vector<128x1xf32>
      %c0_8 = arith.constant 0 : index
      %c0_9 = arith.constant 0 : index
      %15 = vector.load %arg9[%c0_8, %c0_9] : memref<128x1xf32, #tpu.memory_space<vmem>>, vector<128x1xf32>
      %16 = math.log %15 : vector<128x1xf32>
      %17 = arith.addf %14, %16 : vector<128x1xf32>
      %18 = vector.broadcast %17 : vector<128x1xf32> to vector<128x256xf32>
      %19 = arith.subf %13, %18 : vector<128x256xf32>
      %c0_10 = arith.constant 0 : index
      %c0_11 = arith.constant 0 : index
      %20 = vector.load %arg6[%c0_10, %c0_11] : memref<128x256xf32, #tpu.memory_space<vmem>>, vector<128x256xf32>
      tpu.vector_store %arg6[%c0_10, %c0_11], %19 {strides = array<i32>} : memref<128x256xf32, #tpu.memory_space<vmem>>, vector<128x256xf32>,
    } else {
    }
    return
  }
  func.func @transform_0(%arg0: i32, %arg1: i32, %arg2: i32) -> (i32, i32) {
    %c0_i32 = arith.constant 0 : i32
    %c0_i32_0 = arith.constant 0 : i32
    return %arg0, %c0_i32 : i32, i32
  }
  func.func @transform_1(%arg0: i32, %arg1: i32, %arg2: i32) -> (i32, i32) {
    %c1_i32 = arith.constant 1 : i32
    %0 = arith.subi %c1_i32, %arg1 : i32
    %1 = arith.muli %arg2, %0 : i32
    %c0_i32 = arith.constant 0 : i32
    %c0_i32_0 = arith.constant 0 : i32
    return %c0_i32, %1 : i32, i32
  }
  func.func @transform_2(%arg0: i32, %arg1: i32, %arg2: i32) -> (i32, i32) {
    %c1_i32 = arith.constant 1 : i32
    %0 = arith.subi %c1_i32, %arg1 : i32
    %1 = arith.muli %arg2, %0 : i32
    %c0_i32 = arith.constant 0 : i32
    %c0_i32_0 = arith.constant 0 : i32
    return %c0_i32, %1 : i32, i32
  }
  func.func @transform_3(%arg0: i32, %arg1: i32, %arg2: i32) -> (i32, i32) {
    %0 = arith.muli %arg2, %arg1 : i32
    %c0_i32 = arith.constant 0 : i32
    return %arg0, %0 : i32, i32
  }
}

module attributes {stable_mosaic.version = 11 : i64} {
  func.func @kernel(%arg0: i32, %arg1: memref<8x8x128xbf16, #tpu.memory_space<vmem>>, %arg2: memref<128x512xbf16, #tpu.memory_space<vmem>>, %arg3: memref<128x512xbf16, #tpu.memory_space<vmem>>, %arg4: memref<1x512xf32, #tpu.memory_space<vmem>>, %arg5: memref<128x512xbf16, #tpu.memory_space<vmem>>, %arg6: memref<128x512xbf16, #tpu.memory_space<vmem>>, %arg7: memref<1x512xf32, #tpu.memory_space<vmem>>, %arg8: memref<2x8x128xf32, #tpu.memory_space<vmem>>, %arg9: memref<2x8x128xf32, #tpu.memory_space<vmem>>, %arg10: memref<8x8x128xbf16, #tpu.memory_space<vmem>>, %arg11: memref<2x8x128xf32, #tpu.memory_space<vmem>>, %arg12: memref<2x8x128xf32, #tpu.memory_space<vmem>>, %arg13: memref<2x8x128xf32, #tpu.memory_space<vmem>>, %arg14: memref<2x8x128xf32, #tpu.memory_space<vmem>>, %arg15: memref<64x512xf32, #tpu.memory_space<vmem>>, %arg16: memref<64x128xbf16, #tpu.memory_space<vmem>>) attributes {dimension_semantics = [#tpu.dimension_semantics<arbitrary>], iteration_bounds = array<i64: 2>, scalar_prefetch = 0 : i64, scratch_operands = 4 : i64, tpu.core_type = #tpu.core_type<tc>, window_params = [{transform_indices = @transform_0, window_bounds = array<i64: 8, 8, 128>}, {pipeline_mode = #tpu.pipeline_mode<synchronous>, transform_indices = @transform_1, window_bounds = array<i64: 128, 512>}, {pipeline_mode = #tpu.pipeline_mode<synchronous>, transform_indices = @transform_2, window_bounds = array<i64: 128, 512>}, {pipeline_mode = #tpu.pipeline_mode<synchronous>, transform_indices = @transform_3, window_bounds = array<i64: 1, 512>}, {pipeline_mode = #tpu.pipeline_mode<synchronous>, transform_indices = @transform_4, window_bounds = array<i64: 128, 512>}, {pipeline_mode = #tpu.pipeline_mode<synchronous>, transform_indices = @transform_5, window_bounds = array<i64: 128, 512>}, {pipeline_mode = #tpu.pipeline_mode<synchronous>, transform_indices = @transform_6, window_bounds = array<i64: 1, 512>}, {pipeline_mode = #tpu.pipeline_mode<synchronous>, transform_indices = @transform_7, window_bounds = array<i64: 2, 8, 128>}, {pipeline_mode = #tpu.pipeline_mode<synchronous>, transform_indices = @transform_8, window_bounds = array<i64: 2, 8, 128>}, {transform_indices = @transform_9, window_bounds = array<i64: 8, 8, 128>}, {pipeline_mode = #tpu.pipeline_mode<synchronous>, transform_indices = @transform_10, window_bounds = array<i64: 2, 8, 128>}, {pipeline_mode = #tpu.pipeline_mode<synchronous>, transform_indices = @transform_11, window_bounds = array<i64: 2, 8, 128>}]} {
    %c0_i32 = arith.constant 0 : i32
    %0 = arith.cmpi eq, %arg0, %c0_i32 : i32
    %1 = arith.extui %0 : i1 to i32
    %c0_i32_0 = arith.constant 0 : i32
    %2 = arith.cmpi ne, %1, %c0_i32_0 : i32
    scf.if %2 {
      %c0_197 = arith.constant 0 : index
      %c0_198 = arith.constant 0 : index
      %c0_199 = arith.constant 0 : index
      %569 = vector.load %arg8[%c0_197, %c0_198, %c0_199] : memref<2x8x128xf32, #tpu.memory_space<vmem>>, vector<2x8x128xf32>
      %c0_200 = arith.constant 0 : index
      %c0_201 = arith.constant 0 : index
      %c0_202 = arith.constant 0 : index
      %570 = vector.load %arg13[%c0_200, %c0_201, %c0_202] : memref<2x8x128xf32, #tpu.memory_space<vmem>>, vector<2x8x128xf32>
      tpu.vector_store %arg13[%c0_200, %c0_201, %c0_202], %569 {strides = array<i32>} : memref<2x8x128xf32, #tpu.memory_space<vmem>>, vector<2x8x128xf32>,
      %c0_203 = arith.constant 0 : index
      %c0_204 = arith.constant 0 : index
      %c0_205 = arith.constant 0 : index
      %571 = vector.load %arg9[%c0_203, %c0_204, %c0_205] : memref<2x8x128xf32, #tpu.memory_space<vmem>>, vector<2x8x128xf32>
      %c0_206 = arith.constant 0 : index
      %c0_207 = arith.constant 0 : index
      %c0_208 = arith.constant 0 : index
      %572 = vector.load %arg14[%c0_206, %c0_207, %c0_208] : memref<2x8x128xf32, #tpu.memory_space<vmem>>, vector<2x8x128xf32>
      tpu.vector_store %arg14[%c0_206, %c0_207, %c0_208], %571 {strides = array<i32>} : memref<2x8x128xf32, #tpu.memory_space<vmem>>, vector<2x8x128xf32>,
    } else {
    }
    %c0 = arith.constant 0 : index
    %c0_1 = arith.constant 0 : index
    %c0_2 = arith.constant 0 : index
    %3 = vector.load %arg1[%c0, %c0_1, %c0_2] : memref<8x8x128xbf16, #tpu.memory_space<vmem>>, vector<8x8x128xbf16>
    %4 = vector.shape_cast %3 : vector<8x8x128xbf16> to vector<64x128xbf16>
    %c0_3 = arith.constant 0 : index
    %c0_4 = arith.constant 0 : index
    %5 = vector.load %arg2[%c0_3, %c0_4] : memref<128x512xbf16, #tpu.memory_space<vmem>>, vector<128x512xbf16>
    %cst = arith.constant dense<0.000000e+00> : vector<64x512xf32>
    %6 = tpu.matmul %4, %5, %cst {dimension_numbers = #tpu.dot_dimension_numbers<[1], [0], [0], [1], [0, 0, 1, 1], [], []>} : vector<64x128xbf16>, vector<128x512xbf16>, vector<64x512xf32> -> vector<64x512xf32>
    %c0_5 = arith.constant 0 : index
    %c0_6 = arith.constant 0 : index
    %7 = vector.load %arg4[%c0_5, %c0_6] : memref<1x512xf32, #tpu.memory_space<vmem>>, vector<1x512xf32>
    %8 = vector.broadcast %7 : vector<1x512xf32> to vector<64x512xf32>
    %9 = arith.addf %6, %8 : vector<64x512xf32>
    %c0_7 = arith.constant 0 : index
    %c0_8 = arith.constant 0 : index
    %10 = vector.load %arg15[%c0_7, %c0_8] : memref<64x512xf32, #tpu.memory_space<vmem>>, vector<64x512xf32>
    tpu.vector_store %arg15[%c0_7, %c0_8], %9 {strides = array<i32>} : memref<64x512xf32, #tpu.memory_space<vmem>>, vector<64x512xf32>,
    %c0_9 = arith.constant 0 : index
    %c0_10 = arith.constant 0 : index
    %c0_11 = arith.constant 0 : index
    %11 = vector.load %arg13[%c0_9, %c0_10, %c0_11] : memref<2x8x128xf32, #tpu.memory_space<vmem>>, vector<1x8x128xf32>
    %12 = vector.shape_cast %11 : vector<1x8x128xf32> to vector<8x128xf32>
    %c0_12 = arith.constant 0 : index
    %c0_13 = arith.constant 0 : index
    %c0_14 = arith.constant 0 : index
    %13 = vector.load %arg14[%c0_12, %c0_13, %c0_14] : memref<2x8x128xf32, #tpu.memory_space<vmem>>, vector<1x8x128xf32>
    %14 = vector.shape_cast %13 : vector<1x8x128xf32> to vector<8x128xf32>
    %c0_15 = arith.constant 0 : index
    %c0_16 = arith.constant 0 : index
    %15 = vector.load %arg15[%c0_15, %c0_16] : memref<64x512xf32, #tpu.memory_space<vmem>>, vector<8x512xf32>
    %16 = arith.truncf %12 : vector<8x128xf32> to vector<8x128xbf16>
    %c0_17 = arith.constant 0 : index
    %c0_18 = arith.constant 0 : index
    %17 = vector.load %arg3[%c0_17, %c0_18] : memref<128x512xbf16, #tpu.memory_space<vmem>>, vector<128x512xbf16>
    %cst_19 = arith.constant dense<0.000000e+00> : vector<8x512xf32>
    %18 = tpu.matmul %16, %17, %cst_19 {dimension_numbers = #tpu.dot_dimension_numbers<[1], [0], [0], [1], [0, 0, 1, 1], [], []>} : vector<8x128xbf16>, vector<128x512xbf16>, vector<8x512xf32> -> vector<8x512xf32>
    %19 = arith.addf %15, %18 : vector<8x512xf32>
    %20 = vector.extract_strided_slice %19 {offsets = [0, 0], sizes = [8, 128], strides = [1, 1]} : vector<8x512xf32> to vector<8x128xf32>
    %21 = arith.negf %20 : vector<8x128xf32>
    %22 = math.exp %21 : vector<8x128xf32>
    %cst_20 = arith.constant 1.000000e+00 : f32
    %23 = vector.broadcast %cst_20 : f32 to vector<8x128xf32>
    %24 = arith.addf %23, %22 : vector<8x128xf32>
    %25 = arith.divf %23, %24 : vector<8x128xf32>
    %26 = vector.extract_strided_slice %19 {offsets = [0, 128], sizes = [8, 128], strides = [1, 1]} : vector<8x512xf32> to vector<8x128xf32>
    %27 = arith.negf %26 : vector<8x128xf32>
    %28 = math.exp %27 : vector<8x128xf32>
    %cst_21 = arith.constant 1.000000e+00 : f32
    %29 = vector.broadcast %cst_21 : f32 to vector<8x128xf32>
    %30 = arith.addf %29, %28 : vector<8x128xf32>
    %31 = arith.divf %29, %30 : vector<8x128xf32>
    %32 = vector.extract_strided_slice %19 {offsets = [0, 256], sizes = [8, 128], strides = [1, 1]} : vector<8x512xf32> to vector<8x128xf32>
    %33 = math.tanh %32 : vector<8x128xf32>
    %34 = vector.extract_strided_slice %19 {offsets = [0, 384], sizes = [8, 128], strides = [1, 1]} : vector<8x512xf32> to vector<8x128xf32>
    %35 = arith.negf %34 : vector<8x128xf32>
    %36 = math.exp %35 : vector<8x128xf32>
    %cst_22 = arith.constant 1.000000e+00 : f32
    %37 = vector.broadcast %cst_22 : f32 to vector<8x128xf32>
    %38 = arith.addf %37, %36 : vector<8x128xf32>
    %39 = arith.divf %37, %38 : vector<8x128xf32>
    %40 = arith.mulf %31, %14 : vector<8x128xf32>
    %41 = arith.mulf %25, %33 : vector<8x128xf32>
    %42 = arith.addf %40, %41 : vector<8x128xf32>
    %43 = math.tanh %42 : vector<8x128xf32>
    %44 = arith.mulf %39, %43 : vector<8x128xf32>
    %45 = arith.truncf %44 : vector<8x128xf32> to vector<8x128xbf16>
    %c0_23 = arith.constant 0 : index
    %c0_24 = arith.constant 0 : index
    %46 = vector.load %arg16[%c0_23, %c0_24] : memref<64x128xbf16, #tpu.memory_space<vmem>>, vector<8x128xbf16>
    tpu.vector_store %arg16[%c0_23, %c0_24], %45 {strides = array<i32>} : memref<64x128xbf16, #tpu.memory_space<vmem>>, vector<8x128xbf16>,
    %c8 = arith.constant 8 : index
    %c0_25 = arith.constant 0 : index
    %47 = vector.load %arg15[%c8, %c0_25] : memref<64x512xf32, #tpu.memory_space<vmem>>, vector<8x512xf32>
    %48 = arith.truncf %44 : vector<8x128xf32> to vector<8x128xbf16>
    %c0_26 = arith.constant 0 : index
    %c0_27 = arith.constant 0 : index
    %49 = vector.load %arg3[%c0_26, %c0_27] : memref<128x512xbf16, #tpu.memory_space<vmem>>, vector<128x512xbf16>
    %cst_28 = arith.constant dense<0.000000e+00> : vector<8x512xf32>
    %50 = tpu.matmul %48, %49, %cst_28 {dimension_numbers = #tpu.dot_dimension_numbers<[1], [0], [0], [1], [0, 0, 1, 1], [], []>} : vector<8x128xbf16>, vector<128x512xbf16>, vector<8x512xf32> -> vector<8x512xf32>
    %51 = arith.addf %47, %50 : vector<8x512xf32>
    %52 = vector.extract_strided_slice %51 {offsets = [0, 0], sizes = [8, 128], strides = [1, 1]} : vector<8x512xf32> to vector<8x128xf32>
    %53 = arith.negf %52 : vector<8x128xf32>
    %54 = math.exp %53 : vector<8x128xf32>
    %cst_29 = arith.constant 1.000000e+00 : f32
    %55 = vector.broadcast %cst_29 : f32 to vector<8x128xf32>
    %56 = arith.addf %55, %54 : vector<8x128xf32>
    %57 = arith.divf %55, %56 : vector<8x128xf32>
    %58 = vector.extract_strided_slice %51 {offsets = [0, 128], sizes = [8, 128], strides = [1, 1]} : vector<8x512xf32> to vector<8x128xf32>
    %59 = arith.negf %58 : vector<8x128xf32>
    %60 = math.exp %59 : vector<8x128xf32>
    %cst_30 = arith.constant 1.000000e+00 : f32
    %61 = vector.broadcast %cst_30 : f32 to vector<8x128xf32>
    %62 = arith.addf %61, %60 : vector<8x128xf32>
    %63 = arith.divf %61, %62 : vector<8x128xf32>
    %64 = vector.extract_strided_slice %51 {offsets = [0, 256], sizes = [8, 128], strides = [1, 1]} : vector<8x512xf32> to vector<8x128xf32>
    %65 = math.tanh %64 : vector<8x128xf32>
    %66 = vector.extract_strided_slice %51 {offsets = [0, 384], sizes = [8, 128], strides = [1, 1]} : vector<8x512xf32> to vector<8x128xf32>
    %67 = arith.negf %66 : vector<8x128xf32>
    %68 = math.exp %67 : vector<8x128xf32>
    %cst_31 = arith.constant 1.000000e+00 : f32
    %69 = vector.broadcast %cst_31 : f32 to vector<8x128xf32>
    %70 = arith.addf %69, %68 : vector<8x128xf32>
    %71 = arith.divf %69, %70 : vector<8x128xf32>
    %72 = arith.mulf %63, %42 : vector<8x128xf32>
    %73 = arith.mulf %57, %65 : vector<8x128xf32>
    %74 = arith.addf %72, %73 : vector<8x128xf32>
    %75 = math.tanh %74 : vector<8x128xf32>
    %76 = arith.mulf %71, %75 : vector<8x128xf32>
    %77 = arith.truncf %76 : vector<8x128xf32> to vector<8x128xbf16>
    %c8_32 = arith.constant 8 : index
    %c0_33 = arith.constant 0 : index
    %78 = vector.load %arg16[%c8_32, %c0_33] : memref<64x128xbf16, #tpu.memory_space<vmem>>, vector<8x128xbf16>
    tpu.vector_store %arg16[%c8_32, %c0_33], %77 {strides = array<i32>} : memref<64x128xbf16, #tpu.memory_space<vmem>>, vector<8x128xbf16>,
    %c16 = arith.constant 16 : index
    %c0_34 = arith.constant 0 : index
    %79 = vector.load %arg15[%c16, %c0_34] : memref<64x512xf32, #tpu.memory_space<vmem>>, vector<8x512xf32>
    %80 = arith.truncf %76 : vector<8x128xf32> to vector<8x128xbf16>
    %c0_35 = arith.constant 0 : index
    %c0_36 = arith.constant 0 : index
    %81 = vector.load %arg3[%c0_35, %c0_36] : memref<128x512xbf16, #tpu.memory_space<vmem>>, vector<128x512xbf16>
    %cst_37 = arith.constant dense<0.000000e+00> : vector<8x512xf32>
    %82 = tpu.matmul %80, %81, %cst_37 {dimension_numbers = #tpu.dot_dimension_numbers<[1], [0], [0], [1], [0, 0, 1, 1], [], []>} : vector<8x128xbf16>, vector<128x512xbf16>, vector<8x512xf32> -> vector<8x512xf32>
    %83 = arith.addf %79, %82 : vector<8x512xf32>
    %84 = vector.extract_strided_slice %83 {offsets = [0, 0], sizes = [8, 128], strides = [1, 1]} : vector<8x512xf32> to vector<8x128xf32>
    %85 = arith.negf %84 : vector<8x128xf32>
    %86 = math.exp %85 : vector<8x128xf32>
    %cst_38 = arith.constant 1.000000e+00 : f32
    %87 = vector.broadcast %cst_38 : f32 to vector<8x128xf32>
    %88 = arith.addf %87, %86 : vector<8x128xf32>
    %89 = arith.divf %87, %88 : vector<8x128xf32>
    %90 = vector.extract_strided_slice %83 {offsets = [0, 128], sizes = [8, 128], strides = [1, 1]} : vector<8x512xf32> to vector<8x128xf32>
    %91 = arith.negf %90 : vector<8x128xf32>
    %92 = math.exp %91 : vector<8x128xf32>
    %cst_39 = arith.constant 1.000000e+00 : f32
    %93 = vector.broadcast %cst_39 : f32 to vector<8x128xf32>
    %94 = arith.addf %93, %92 : vector<8x128xf32>
    %95 = arith.divf %93, %94 : vector<8x128xf32>
    %96 = vector.extract_strided_slice %83 {offsets = [0, 256], sizes = [8, 128], strides = [1, 1]} : vector<8x512xf32> to vector<8x128xf32>
    %97 = math.tanh %96 : vector<8x128xf32>
    %98 = vector.extract_strided_slice %83 {offsets = [0, 384], sizes = [8, 128], strides = [1, 1]} : vector<8x512xf32> to vector<8x128xf32>
    %99 = arith.negf %98 : vector<8x128xf32>
    %100 = math.exp %99 : vector<8x128xf32>
    %cst_40 = arith.constant 1.000000e+00 : f32
    %101 = vector.broadcast %cst_40 : f32 to vector<8x128xf32>
    %102 = arith.addf %101, %100 : vector<8x128xf32>
    %103 = arith.divf %101, %102 : vector<8x128xf32>
    %104 = arith.mulf %95, %74 : vector<8x128xf32>
    %105 = arith.mulf %89, %97 : vector<8x128xf32>
    %106 = arith.addf %104, %105 : vector<8x128xf32>
    %107 = math.tanh %106 : vector<8x128xf32>
    %108 = arith.mulf %103, %107 : vector<8x128xf32>
    %109 = arith.truncf %108 : vector<8x128xf32> to vector<8x128xbf16>
    %c16_41 = arith.constant 16 : index
    %c0_42 = arith.constant 0 : index
    %110 = vector.load %arg16[%c16_41, %c0_42] : memref<64x128xbf16, #tpu.memory_space<vmem>>, vector<8x128xbf16>
    tpu.vector_store %arg16[%c16_41, %c0_42], %109 {strides = array<i32>} : memref<64x128xbf16, #tpu.memory_space<vmem>>, vector<8x128xbf16>,
    %c24 = arith.constant 24 : index
    %c0_43 = arith.constant 0 : index
    %111 = vector.load %arg15[%c24, %c0_43] : memref<64x512xf32, #tpu.memory_space<vmem>>, vector<8x512xf32>
    %112 = arith.truncf %108 : vector<8x128xf32> to vector<8x128xbf16>
    %c0_44 = arith.constant 0 : index
    %c0_45 = arith.constant 0 : index
    %113 = vector.load %arg3[%c0_44, %c0_45] : memref<128x512xbf16, #tpu.memory_space<vmem>>, vector<128x512xbf16>
    %cst_46 = arith.constant dense<0.000000e+00> : vector<8x512xf32>
    %114 = tpu.matmul %112, %113, %cst_46 {dimension_numbers = #tpu.dot_dimension_numbers<[1], [0], [0], [1], [0, 0, 1, 1], [], []>} : vector<8x128xbf16>, vector<128x512xbf16>, vector<8x512xf32> -> vector<8x512xf32>
    %115 = arith.addf %111, %114 : vector<8x512xf32>
    %116 = vector.extract_strided_slice %115 {offsets = [0, 0], sizes = [8, 128], strides = [1, 1]} : vector<8x512xf32> to vector<8x128xf32>
    %117 = arith.negf %116 : vector<8x128xf32>
    %118 = math.exp %117 : vector<8x128xf32>
    %cst_47 = arith.constant 1.000000e+00 : f32
    %119 = vector.broadcast %cst_47 : f32 to vector<8x128xf32>
    %120 = arith.addf %119, %118 : vector<8x128xf32>
    %121 = arith.divf %119, %120 : vector<8x128xf32>
    %122 = vector.extract_strided_slice %115 {offsets = [0, 128], sizes = [8, 128], strides = [1, 1]} : vector<8x512xf32> to vector<8x128xf32>
    %123 = arith.negf %122 : vector<8x128xf32>
    %124 = math.exp %123 : vector<8x128xf32>
    %cst_48 = arith.constant 1.000000e+00 : f32
    %125 = vector.broadcast %cst_48 : f32 to vector<8x128xf32>
    %126 = arith.addf %125, %124 : vector<8x128xf32>
    %127 = arith.divf %125, %126 : vector<8x128xf32>
    %128 = vector.extract_strided_slice %115 {offsets = [0, 256], sizes = [8, 128], strides = [1, 1]} : vector<8x512xf32> to vector<8x128xf32>
    %129 = math.tanh %128 : vector<8x128xf32>
    %130 = vector.extract_strided_slice %115 {offsets = [0, 384], sizes = [8, 128], strides = [1, 1]} : vector<8x512xf32> to vector<8x128xf32>
    %131 = arith.negf %130 : vector<8x128xf32>
    %132 = math.exp %131 : vector<8x128xf32>
    %cst_49 = arith.constant 1.000000e+00 : f32
    %133 = vector.broadcast %cst_49 : f32 to vector<8x128xf32>
    %134 = arith.addf %133, %132 : vector<8x128xf32>
    %135 = arith.divf %133, %134 : vector<8x128xf32>
    %136 = arith.mulf %127, %106 : vector<8x128xf32>
    %137 = arith.mulf %121, %129 : vector<8x128xf32>
    %138 = arith.addf %136, %137 : vector<8x128xf32>
    %139 = math.tanh %138 : vector<8x128xf32>
    %140 = arith.mulf %135, %139 : vector<8x128xf32>
    %141 = arith.truncf %140 : vector<8x128xf32> to vector<8x128xbf16>
    %c24_50 = arith.constant 24 : index
    %c0_51 = arith.constant 0 : index
    %142 = vector.load %arg16[%c24_50, %c0_51] : memref<64x128xbf16, #tpu.memory_space<vmem>>, vector<8x128xbf16>
    tpu.vector_store %arg16[%c24_50, %c0_51], %141 {strides = array<i32>} : memref<64x128xbf16, #tpu.memory_space<vmem>>, vector<8x128xbf16>,
    %c32 = arith.constant 32 : index
    %c0_52 = arith.constant 0 : index
    %143 = vector.load %arg15[%c32, %c0_52] : memref<64x512xf32, #tpu.memory_space<vmem>>, vector<8x512xf32>
    %144 = arith.truncf %140 : vector<8x128xf32> to vector<8x128xbf16>
    %c0_53 = arith.constant 0 : index
    %c0_54 = arith.constant 0 : index
    %145 = vector.load %arg3[%c0_53, %c0_54] : memref<128x512xbf16, #tpu.memory_space<vmem>>, vector<128x512xbf16>
    %cst_55 = arith.constant dense<0.000000e+00> : vector<8x512xf32>
    %146 = tpu.matmul %144, %145, %cst_55 {dimension_numbers = #tpu.dot_dimension_numbers<[1], [0], [0], [1], [0, 0, 1, 1], [], []>} : vector<8x128xbf16>, vector<128x512xbf16>, vector<8x512xf32> -> vector<8x512xf32>
    %147 = arith.addf %143, %146 : vector<8x512xf32>
    %148 = vector.extract_strided_slice %147 {offsets = [0, 0], sizes = [8, 128], strides = [1, 1]} : vector<8x512xf32> to vector<8x128xf32>
    %149 = arith.negf %148 : vector<8x128xf32>
    %150 = math.exp %149 : vector<8x128xf32>
    %cst_56 = arith.constant 1.000000e+00 : f32
    %151 = vector.broadcast %cst_56 : f32 to vector<8x128xf32>
    %152 = arith.addf %151, %150 : vector<8x128xf32>
    %153 = arith.divf %151, %152 : vector<8x128xf32>
    %154 = vector.extract_strided_slice %147 {offsets = [0, 128], sizes = [8, 128], strides = [1, 1]} : vector<8x512xf32> to vector<8x128xf32>
    %155 = arith.negf %154 : vector<8x128xf32>
    %156 = math.exp %155 : vector<8x128xf32>
    %cst_57 = arith.constant 1.000000e+00 : f32
    %157 = vector.broadcast %cst_57 : f32 to vector<8x128xf32>
    %158 = arith.addf %157, %156 : vector<8x128xf32>
    %159 = arith.divf %157, %158 : vector<8x128xf32>
    %160 = vector.extract_strided_slice %147 {offsets = [0, 256], sizes = [8, 128], strides = [1, 1]} : vector<8x512xf32> to vector<8x128xf32>
    %161 = math.tanh %160 : vector<8x128xf32>
    %162 = vector.extract_strided_slice %147 {offsets = [0, 384], sizes = [8, 128], strides = [1, 1]} : vector<8x512xf32> to vector<8x128xf32>
    %163 = arith.negf %162 : vector<8x128xf32>
    %164 = math.exp %163 : vector<8x128xf32>
    %cst_58 = arith.constant 1.000000e+00 : f32
    %165 = vector.broadcast %cst_58 : f32 to vector<8x128xf32>
    %166 = arith.addf %165, %164 : vector<8x128xf32>
    %167 = arith.divf %165, %166 : vector<8x128xf32>
    %168 = arith.mulf %159, %138 : vector<8x128xf32>
    %169 = arith.mulf %153, %161 : vector<8x128xf32>
    %170 = arith.addf %168, %169 : vector<8x128xf32>
    %171 = math.tanh %170 : vector<8x128xf32>
    %172 = arith.mulf %167, %171 : vector<8x128xf32>
    %173 = arith.truncf %172 : vector<8x128xf32> to vector<8x128xbf16>
    %c32_59 = arith.constant 32 : index
    %c0_60 = arith.constant 0 : index
    %174 = vector.load %arg16[%c32_59, %c0_60] : memref<64x128xbf16, #tpu.memory_space<vmem>>, vector<8x128xbf16>
    tpu.vector_store %arg16[%c32_59, %c0_60], %173 {strides = array<i32>} : memref<64x128xbf16, #tpu.memory_space<vmem>>, vector<8x128xbf16>,
    %c40 = arith.constant 40 : index
    %c0_61 = arith.constant 0 : index
    %175 = vector.load %arg15[%c40, %c0_61] : memref<64x512xf32, #tpu.memory_space<vmem>>, vector<8x512xf32>
    %176 = arith.truncf %172 : vector<8x128xf32> to vector<8x128xbf16>
    %c0_62 = arith.constant 0 : index
    %c0_63 = arith.constant 0 : index
    %177 = vector.load %arg3[%c0_62, %c0_63] : memref<128x512xbf16, #tpu.memory_space<vmem>>, vector<128x512xbf16>
    %cst_64 = arith.constant dense<0.000000e+00> : vector<8x512xf32>
    %178 = tpu.matmul %176, %177, %cst_64 {dimension_numbers = #tpu.dot_dimension_numbers<[1], [0], [0], [1], [0, 0, 1, 1], [], []>} : vector<8x128xbf16>, vector<128x512xbf16>, vector<8x512xf32> -> vector<8x512xf32>
    %179 = arith.addf %175, %178 : vector<8x512xf32>
    %180 = vector.extract_strided_slice %179 {offsets = [0, 0], sizes = [8, 128], strides = [1, 1]} : vector<8x512xf32> to vector<8x128xf32>
    %181 = arith.negf %180 : vector<8x128xf32>
    %182 = math.exp %181 : vector<8x128xf32>
    %cst_65 = arith.constant 1.000000e+00 : f32
    %183 = vector.broadcast %cst_65 : f32 to vector<8x128xf32>
    %184 = arith.addf %183, %182 : vector<8x128xf32>
    %185 = arith.divf %183, %184 : vector<8x128xf32>
    %186 = vector.extract_strided_slice %179 {offsets = [0, 128], sizes = [8, 128], strides = [1, 1]} : vector<8x512xf32> to vector<8x128xf32>
    %187 = arith.negf %186 : vector<8x128xf32>
    %188 = math.exp %187 : vector<8x128xf32>
    %cst_66 = arith.constant 1.000000e+00 : f32
    %189 = vector.broadcast %cst_66 : f32 to vector<8x128xf32>
    %190 = arith.addf %189, %188 : vector<8x128xf32>
    %191 = arith.divf %189, %190 : vector<8x128xf32>
    %192 = vector.extract_strided_slice %179 {offsets = [0, 256], sizes = [8, 128], strides = [1, 1]} : vector<8x512xf32> to vector<8x128xf32>
    %193 = math.tanh %192 : vector<8x128xf32>
    %194 = vector.extract_strided_slice %179 {offsets = [0, 384], sizes = [8, 128], strides = [1, 1]} : vector<8x512xf32> to vector<8x128xf32>
    %195 = arith.negf %194 : vector<8x128xf32>
    %196 = math.exp %195 : vector<8x128xf32>
    %cst_67 = arith.constant 1.000000e+00 : f32
    %197 = vector.broadcast %cst_67 : f32 to vector<8x128xf32>
    %198 = arith.addf %197, %196 : vector<8x128xf32>
    %199 = arith.divf %197, %198 : vector<8x128xf32>
    %200 = arith.mulf %191, %170 : vector<8x128xf32>
    %201 = arith.mulf %185, %193 : vector<8x128xf32>
    %202 = arith.addf %200, %201 : vector<8x128xf32>
    %203 = math.tanh %202 : vector<8x128xf32>
    %204 = arith.mulf %199, %203 : vector<8x128xf32>
    %205 = arith.truncf %204 : vector<8x128xf32> to vector<8x128xbf16>
    %c40_68 = arith.constant 40 : index
    %c0_69 = arith.constant 0 : index
    %206 = vector.load %arg16[%c40_68, %c0_69] : memref<64x128xbf16, #tpu.memory_space<vmem>>, vector<8x128xbf16>
    tpu.vector_store %arg16[%c40_68, %c0_69], %205 {strides = array<i32>} : memref<64x128xbf16, #tpu.memory_space<vmem>>, vector<8x128xbf16>,
    %c48 = arith.constant 48 : index
    %c0_70 = arith.constant 0 : index
    %207 = vector.load %arg15[%c48, %c0_70] : memref<64x512xf32, #tpu.memory_space<vmem>>, vector<8x512xf32>
    %208 = arith.truncf %204 : vector<8x128xf32> to vector<8x128xbf16>
    %c0_71 = arith.constant 0 : index
    %c0_72 = arith.constant 0 : index
    %209 = vector.load %arg3[%c0_71, %c0_72] : memref<128x512xbf16, #tpu.memory_space<vmem>>, vector<128x512xbf16>
    %cst_73 = arith.constant dense<0.000000e+00> : vector<8x512xf32>
    %210 = tpu.matmul %208, %209, %cst_73 {dimension_numbers = #tpu.dot_dimension_numbers<[1], [0], [0], [1], [0, 0, 1, 1], [], []>} : vector<8x128xbf16>, vector<128x512xbf16>, vector<8x512xf32> -> vector<8x512xf32>
    %211 = arith.addf %207, %210 : vector<8x512xf32>
    %212 = vector.extract_strided_slice %211 {offsets = [0, 0], sizes = [8, 128], strides = [1, 1]} : vector<8x512xf32> to vector<8x128xf32>
    %213 = arith.negf %212 : vector<8x128xf32>
    %214 = math.exp %213 : vector<8x128xf32>
    %cst_74 = arith.constant 1.000000e+00 : f32
    %215 = vector.broadcast %cst_74 : f32 to vector<8x128xf32>
    %216 = arith.addf %215, %214 : vector<8x128xf32>
    %217 = arith.divf %215, %216 : vector<8x128xf32>
    %218 = vector.extract_strided_slice %211 {offsets = [0, 128], sizes = [8, 128], strides = [1, 1]} : vector<8x512xf32> to vector<8x128xf32>
    %219 = arith.negf %218 : vector<8x128xf32>
    %220 = math.exp %219 : vector<8x128xf32>
    %cst_75 = arith.constant 1.000000e+00 : f32
    %221 = vector.broadcast %cst_75 : f32 to vector<8x128xf32>
    %222 = arith.addf %221, %220 : vector<8x128xf32>
    %223 = arith.divf %221, %222 : vector<8x128xf32>
    %224 = vector.extract_strided_slice %211 {offsets = [0, 256], sizes = [8, 128], strides = [1, 1]} : vector<8x512xf32> to vector<8x128xf32>
    %225 = math.tanh %224 : vector<8x128xf32>
    %226 = vector.extract_strided_slice %211 {offsets = [0, 384], sizes = [8, 128], strides = [1, 1]} : vector<8x512xf32> to vector<8x128xf32>
    %227 = arith.negf %226 : vector<8x128xf32>
    %228 = math.exp %227 : vector<8x128xf32>
    %cst_76 = arith.constant 1.000000e+00 : f32
    %229 = vector.broadcast %cst_76 : f32 to vector<8x128xf32>
    %230 = arith.addf %229, %228 : vector<8x128xf32>
    %231 = arith.divf %229, %230 : vector<8x128xf32>
    %232 = arith.mulf %223, %202 : vector<8x128xf32>
    %233 = arith.mulf %217, %225 : vector<8x128xf32>
    %234 = arith.addf %232, %233 : vector<8x128xf32>
    %235 = math.tanh %234 : vector<8x128xf32>
    %236 = arith.mulf %231, %235 : vector<8x128xf32>
    %237 = arith.truncf %236 : vector<8x128xf32> to vector<8x128xbf16>
    %c48_77 = arith.constant 48 : index
    %c0_78 = arith.constant 0 : index
    %238 = vector.load %arg16[%c48_77, %c0_78] : memref<64x128xbf16, #tpu.memory_space<vmem>>, vector<8x128xbf16>
    tpu.vector_store %arg16[%c48_77, %c0_78], %237 {strides = array<i32>} : memref<64x128xbf16, #tpu.memory_space<vmem>>, vector<8x128xbf16>,
    %c56 = arith.constant 56 : index
    %c0_79 = arith.constant 0 : index
    %239 = vector.load %arg15[%c56, %c0_79] : memref<64x512xf32, #tpu.memory_space<vmem>>, vector<8x512xf32>
    %240 = arith.truncf %236 : vector<8x128xf32> to vector<8x128xbf16>
    %c0_80 = arith.constant 0 : index
    %c0_81 = arith.constant 0 : index
    %241 = vector.load %arg3[%c0_80, %c0_81] : memref<128x512xbf16, #tpu.memory_space<vmem>>, vector<128x512xbf16>
    %cst_82 = arith.constant dense<0.000000e+00> : vector<8x512xf32>
    %242 = tpu.matmul %240, %241, %cst_82 {dimension_numbers = #tpu.dot_dimension_numbers<[1], [0], [0], [1], [0, 0, 1, 1], [], []>} : vector<8x128xbf16>, vector<128x512xbf16>, vector<8x512xf32> -> vector<8x512xf32>
    %243 = arith.addf %239, %242 : vector<8x512xf32>
    %244 = vector.extract_strided_slice %243 {offsets = [0, 0], sizes = [8, 128], strides = [1, 1]} : vector<8x512xf32> to vector<8x128xf32>
    %245 = arith.negf %244 : vector<8x128xf32>
    %246 = math.exp %245 : vector<8x128xf32>
    %cst_83 = arith.constant 1.000000e+00 : f32
    %247 = vector.broadcast %cst_83 : f32 to vector<8x128xf32>
    %248 = arith.addf %247, %246 : vector<8x128xf32>
    %249 = arith.divf %247, %248 : vector<8x128xf32>
    %250 = vector.extract_strided_slice %243 {offsets = [0, 128], sizes = [8, 128], strides = [1, 1]} : vector<8x512xf32> to vector<8x128xf32>
    %251 = arith.negf %250 : vector<8x128xf32>
    %252 = math.exp %251 : vector<8x128xf32>
    %cst_84 = arith.constant 1.000000e+00 : f32
    %253 = vector.broadcast %cst_84 : f32 to vector<8x128xf32>
    %254 = arith.addf %253, %252 : vector<8x128xf32>
    %255 = arith.divf %253, %254 : vector<8x128xf32>
    %256 = vector.extract_strided_slice %243 {offsets = [0, 256], sizes = [8, 128], strides = [1, 1]} : vector<8x512xf32> to vector<8x128xf32>
    %257 = math.tanh %256 : vector<8x128xf32>
    %258 = vector.extract_strided_slice %243 {offsets = [0, 384], sizes = [8, 128], strides = [1, 1]} : vector<8x512xf32> to vector<8x128xf32>
    %259 = arith.negf %258 : vector<8x128xf32>
    %260 = math.exp %259 : vector<8x128xf32>
    %cst_85 = arith.constant 1.000000e+00 : f32
    %261 = vector.broadcast %cst_85 : f32 to vector<8x128xf32>
    %262 = arith.addf %261, %260 : vector<8x128xf32>
    %263 = arith.divf %261, %262 : vector<8x128xf32>
    %264 = arith.mulf %255, %234 : vector<8x128xf32>
    %265 = arith.mulf %249, %257 : vector<8x128xf32>
    %266 = arith.addf %264, %265 : vector<8x128xf32>
    %267 = math.tanh %266 : vector<8x128xf32>
    %268 = arith.mulf %263, %267 : vector<8x128xf32>
    %269 = arith.truncf %268 : vector<8x128xf32> to vector<8x128xbf16>
    %c56_86 = arith.constant 56 : index
    %c0_87 = arith.constant 0 : index
    %270 = vector.load %arg16[%c56_86, %c0_87] : memref<64x128xbf16, #tpu.memory_space<vmem>>, vector<8x128xbf16>
    tpu.vector_store %arg16[%c56_86, %c0_87], %269 {strides = array<i32>} : memref<64x128xbf16, #tpu.memory_space<vmem>>, vector<8x128xbf16>,
    %c0_88 = arith.constant 0 : index
    %c0_89 = arith.constant 0 : index
    %271 = vector.load %arg16[%c0_88, %c0_89] : memref<64x128xbf16, #tpu.memory_space<vmem>>, vector<64x128xbf16>
    %c0_90 = arith.constant 0 : index
    %c0_91 = arith.constant 0 : index
    %272 = vector.load %arg5[%c0_90, %c0_91] : memref<128x512xbf16, #tpu.memory_space<vmem>>, vector<128x512xbf16>
    %cst_92 = arith.constant dense<0.000000e+00> : vector<64x512xf32>
    %273 = tpu.matmul %271, %272, %cst_92 {dimension_numbers = #tpu.dot_dimension_numbers<[1], [0], [0], [1], [0, 0, 1, 1], [], []>} : vector<64x128xbf16>, vector<128x512xbf16>, vector<64x512xf32> -> vector<64x512xf32>
    %c0_93 = arith.constant 0 : index
    %c0_94 = arith.constant 0 : index
    %274 = vector.load %arg7[%c0_93, %c0_94] : memref<1x512xf32, #tpu.memory_space<vmem>>, vector<1x512xf32>
    %275 = vector.broadcast %274 : vector<1x512xf32> to vector<64x512xf32>
    %276 = arith.addf %273, %275 : vector<64x512xf32>
    %c0_95 = arith.constant 0 : index
    %c0_96 = arith.constant 0 : index
    %277 = vector.load %arg15[%c0_95, %c0_96] : memref<64x512xf32, #tpu.memory_space<vmem>>, vector<64x512xf32>
    tpu.vector_store %arg15[%c0_95, %c0_96], %276 {strides = array<i32>} : memref<64x512xf32, #tpu.memory_space<vmem>>, vector<64x512xf32>,
    %c1 = arith.constant 1 : index
    %c0_97 = arith.constant 0 : index
    %c0_98 = arith.constant 0 : index
    %278 = vector.load %arg13[%c1, %c0_97, %c0_98] : memref<2x8x128xf32, #tpu.memory_space<vmem>>, vector<1x8x128xf32>
    %279 = vector.shape_cast %278 : vector<1x8x128xf32> to vector<8x128xf32>
    %c1_99 = arith.constant 1 : index
    %c0_100 = arith.constant 0 : index
    %c0_101 = arith.constant 0 : index
    %280 = vector.load %arg14[%c1_99, %c0_100, %c0_101] : memref<2x8x128xf32, #tpu.memory_space<vmem>>, vector<1x8x128xf32>
    %281 = vector.shape_cast %280 : vector<1x8x128xf32> to vector<8x128xf32>
    %c0_102 = arith.constant 0 : index
    %c0_103 = arith.constant 0 : index
    %282 = vector.load %arg15[%c0_102, %c0_103] : memref<64x512xf32, #tpu.memory_space<vmem>>, vector<8x512xf32>
    %283 = arith.truncf %279 : vector<8x128xf32> to vector<8x128xbf16>
    %c0_104 = arith.constant 0 : index
    %c0_105 = arith.constant 0 : index
    %284 = vector.load %arg6[%c0_104, %c0_105] : memref<128x512xbf16, #tpu.memory_space<vmem>>, vector<128x512xbf16>
    %cst_106 = arith.constant dense<0.000000e+00> : vector<8x512xf32>
    %285 = tpu.matmul %283, %284, %cst_106 {dimension_numbers = #tpu.dot_dimension_numbers<[1], [0], [0], [1], [0, 0, 1, 1], [], []>} : vector<8x128xbf16>, vector<128x512xbf16>, vector<8x512xf32> -> vector<8x512xf32>
    %286 = arith.addf %282, %285 : vector<8x512xf32>
    %287 = vector.extract_strided_slice %286 {offsets = [0, 0], sizes = [8, 128], strides = [1, 1]} : vector<8x512xf32> to vector<8x128xf32>
    %288 = arith.negf %287 : vector<8x128xf32>
    %289 = math.exp %288 : vector<8x128xf32>
    %cst_107 = arith.constant 1.000000e+00 : f32
    %290 = vector.broadcast %cst_107 : f32 to vector<8x128xf32>
    %291 = arith.addf %290, %289 : vector<8x128xf32>
    %292 = arith.divf %290, %291 : vector<8x128xf32>
    %293 = vector.extract_strided_slice %286 {offsets = [0, 128], sizes = [8, 128], strides = [1, 1]} : vector<8x512xf32> to vector<8x128xf32>
    %294 = arith.negf %293 : vector<8x128xf32>
    %295 = math.exp %294 : vector<8x128xf32>
    %cst_108 = arith.constant 1.000000e+00 : f32
    %296 = vector.broadcast %cst_108 : f32 to vector<8x128xf32>
    %297 = arith.addf %296, %295 : vector<8x128xf32>
    %298 = arith.divf %296, %297 : vector<8x128xf32>
    %299 = vector.extract_strided_slice %286 {offsets = [0, 256], sizes = [8, 128], strides = [1, 1]} : vector<8x512xf32> to vector<8x128xf32>
    %300 = math.tanh %299 : vector<8x128xf32>
    %301 = vector.extract_strided_slice %286 {offsets = [0, 384], sizes = [8, 128], strides = [1, 1]} : vector<8x512xf32> to vector<8x128xf32>
    %302 = arith.negf %301 : vector<8x128xf32>
    %303 = math.exp %302 : vector<8x128xf32>
    %cst_109 = arith.constant 1.000000e+00 : f32
    %304 = vector.broadcast %cst_109 : f32 to vector<8x128xf32>
    %305 = arith.addf %304, %303 : vector<8x128xf32>
    %306 = arith.divf %304, %305 : vector<8x128xf32>
    %307 = arith.mulf %298, %281 : vector<8x128xf32>
    %308 = arith.mulf %292, %300 : vector<8x128xf32>
    %309 = arith.addf %307, %308 : vector<8x128xf32>
    %310 = math.tanh %309 : vector<8x128xf32>
    %311 = arith.mulf %306, %310 : vector<8x128xf32>
    %312 = arith.truncf %311 : vector<8x128xf32> to vector<8x128xbf16>
    %c0_110 = arith.constant 0 : index
    %c0_111 = arith.constant 0 : index
    %c0_112 = arith.constant 0 : index
    %313 = vector.load %arg10[%c0_110, %c0_111, %c0_112] : memref<8x8x128xbf16, #tpu.memory_space<vmem>>, vector<1x8x128xbf16>
    %314 = vector.shape_cast %313 : vector<1x8x128xbf16> to vector<8x128xbf16>
    %315 = vector.shape_cast %312 : vector<8x128xbf16> to vector<1x8x128xbf16>
    tpu.vector_store %arg10[%c0_110, %c0_111, %c0_112], %315 {strides = array<i32>} : memref<8x8x128xbf16, #tpu.memory_space<vmem>>, vector<1x8x128xbf16>,
    %c8_113 = arith.constant 8 : index
    %c0_114 = arith.constant 0 : index
    %316 = vector.load %arg15[%c8_113, %c0_114] : memref<64x512xf32, #tpu.memory_space<vmem>>, vector<8x512xf32>
    %317 = arith.truncf %311 : vector<8x128xf32> to vector<8x128xbf16>
    %c0_115 = arith.constant 0 : index
    %c0_116 = arith.constant 0 : index
    %318 = vector.load %arg6[%c0_115, %c0_116] : memref<128x512xbf16, #tpu.memory_space<vmem>>, vector<128x512xbf16>
    %cst_117 = arith.constant dense<0.000000e+00> : vector<8x512xf32>
    %319 = tpu.matmul %317, %318, %cst_117 {dimension_numbers = #tpu.dot_dimension_numbers<[1], [0], [0], [1], [0, 0, 1, 1], [], []>} : vector<8x128xbf16>, vector<128x512xbf16>, vector<8x512xf32> -> vector<8x512xf32>
    %320 = arith.addf %316, %319 : vector<8x512xf32>
    %321 = vector.extract_strided_slice %320 {offsets = [0, 0], sizes = [8, 128], strides = [1, 1]} : vector<8x512xf32> to vector<8x128xf32>
    %322 = arith.negf %321 : vector<8x128xf32>
    %323 = math.exp %322 : vector<8x128xf32>
    %cst_118 = arith.constant 1.000000e+00 : f32
    %324 = vector.broadcast %cst_118 : f32 to vector<8x128xf32>
    %325 = arith.addf %324, %323 : vector<8x128xf32>
    %326 = arith.divf %324, %325 : vector<8x128xf32>
    %327 = vector.extract_strided_slice %320 {offsets = [0, 128], sizes = [8, 128], strides = [1, 1]} : vector<8x512xf32> to vector<8x128xf32>
    %328 = arith.negf %327 : vector<8x128xf32>
    %329 = math.exp %328 : vector<8x128xf32>
    %cst_119 = arith.constant 1.000000e+00 : f32
    %330 = vector.broadcast %cst_119 : f32 to vector<8x128xf32>
    %331 = arith.addf %330, %329 : vector<8x128xf32>
    %332 = arith.divf %330, %331 : vector<8x128xf32>
    %333 = vector.extract_strided_slice %320 {offsets = [0, 256], sizes = [8, 128], strides = [1, 1]} : vector<8x512xf32> to vector<8x128xf32>
    %334 = math.tanh %333 : vector<8x128xf32>
    %335 = vector.extract_strided_slice %320 {offsets = [0, 384], sizes = [8, 128], strides = [1, 1]} : vector<8x512xf32> to vector<8x128xf32>
    %336 = arith.negf %335 : vector<8x128xf32>
    %337 = math.exp %336 : vector<8x128xf32>
    %cst_120 = arith.constant 1.000000e+00 : f32
    %338 = vector.broadcast %cst_120 : f32 to vector<8x128xf32>
    %339 = arith.addf %338, %337 : vector<8x128xf32>
    %340 = arith.divf %338, %339 : vector<8x128xf32>
    %341 = arith.mulf %332, %309 : vector<8x128xf32>
    %342 = arith.mulf %326, %334 : vector<8x128xf32>
    %343 = arith.addf %341, %342 : vector<8x128xf32>
    %344 = math.tanh %343 : vector<8x128xf32>
    %345 = arith.mulf %340, %344 : vector<8x128xf32>
    %346 = arith.truncf %345 : vector<8x128xf32> to vector<8x128xbf16>
    %c1_121 = arith.constant 1 : index
    %c0_122 = arith.constant 0 : index
    %c0_123 = arith.constant 0 : index
    %347 = vector.load %arg10[%c1_121, %c0_122, %c0_123] : memref<8x8x128xbf16, #tpu.memory_space<vmem>>, vector<1x8x128xbf16>
    %348 = vector.shape_cast %347 : vector<1x8x128xbf16> to vector<8x128xbf16>
    %349 = vector.shape_cast %346 : vector<8x128xbf16> to vector<1x8x128xbf16>
    tpu.vector_store %arg10[%c1_121, %c0_122, %c0_123], %349 {strides = array<i32>} : memref<8x8x128xbf16, #tpu.memory_space<vmem>>, vector<1x8x128xbf16>,
    %c16_124 = arith.constant 16 : index
    %c0_125 = arith.constant 0 : index
    %350 = vector.load %arg15[%c16_124, %c0_125] : memref<64x512xf32, #tpu.memory_space<vmem>>, vector<8x512xf32>
    %351 = arith.truncf %345 : vector<8x128xf32> to vector<8x128xbf16>
    %c0_126 = arith.constant 0 : index
    %c0_127 = arith.constant 0 : index
    %352 = vector.load %arg6[%c0_126, %c0_127] : memref<128x512xbf16, #tpu.memory_space<vmem>>, vector<128x512xbf16>
    %cst_128 = arith.constant dense<0.000000e+00> : vector<8x512xf32>
    %353 = tpu.matmul %351, %352, %cst_128 {dimension_numbers = #tpu.dot_dimension_numbers<[1], [0], [0], [1], [0, 0, 1, 1], [], []>} : vector<8x128xbf16>, vector<128x512xbf16>, vector<8x512xf32> -> vector<8x512xf32>
    %354 = arith.addf %350, %353 : vector<8x512xf32>
    %355 = vector.extract_strided_slice %354 {offsets = [0, 0], sizes = [8, 128], strides = [1, 1]} : vector<8x512xf32> to vector<8x128xf32>
    %356 = arith.negf %355 : vector<8x128xf32>
    %357 = math.exp %356 : vector<8x128xf32>
    %cst_129 = arith.constant 1.000000e+00 : f32
    %358 = vector.broadcast %cst_129 : f32 to vector<8x128xf32>
    %359 = arith.addf %358, %357 : vector<8x128xf32>
    %360 = arith.divf %358, %359 : vector<8x128xf32>
    %361 = vector.extract_strided_slice %354 {offsets = [0, 128], sizes = [8, 128], strides = [1, 1]} : vector<8x512xf32> to vector<8x128xf32>
    %362 = arith.negf %361 : vector<8x128xf32>
    %363 = math.exp %362 : vector<8x128xf32>
    %cst_130 = arith.constant 1.000000e+00 : f32
    %364 = vector.broadcast %cst_130 : f32 to vector<8x128xf32>
    %365 = arith.addf %364, %363 : vector<8x128xf32>
    %366 = arith.divf %364, %365 : vector<8x128xf32>
    %367 = vector.extract_strided_slice %354 {offsets = [0, 256], sizes = [8, 128], strides = [1, 1]} : vector<8x512xf32> to vector<8x128xf32>
    %368 = math.tanh %367 : vector<8x128xf32>
    %369 = vector.extract_strided_slice %354 {offsets = [0, 384], sizes = [8, 128], strides = [1, 1]} : vector<8x512xf32> to vector<8x128xf32>
    %370 = arith.negf %369 : vector<8x128xf32>
    %371 = math.exp %370 : vector<8x128xf32>
    %cst_131 = arith.constant 1.000000e+00 : f32
    %372 = vector.broadcast %cst_131 : f32 to vector<8x128xf32>
    %373 = arith.addf %372, %371 : vector<8x128xf32>
    %374 = arith.divf %372, %373 : vector<8x128xf32>
    %375 = arith.mulf %366, %343 : vector<8x128xf32>
    %376 = arith.mulf %360, %368 : vector<8x128xf32>
    %377 = arith.addf %375, %376 : vector<8x128xf32>
    %378 = math.tanh %377 : vector<8x128xf32>
    %379 = arith.mulf %374, %378 : vector<8x128xf32>
    %380 = arith.truncf %379 : vector<8x128xf32> to vector<8x128xbf16>
    %c2 = arith.constant 2 : index
    %c0_132 = arith.constant 0 : index
    %c0_133 = arith.constant 0 : index
    %381 = vector.load %arg10[%c2, %c0_132, %c0_133] : memref<8x8x128xbf16, #tpu.memory_space<vmem>>, vector<1x8x128xbf16>
    %382 = vector.shape_cast %381 : vector<1x8x128xbf16> to vector<8x128xbf16>
    %383 = vector.shape_cast %380 : vector<8x128xbf16> to vector<1x8x128xbf16>
    tpu.vector_store %arg10[%c2, %c0_132, %c0_133], %383 {strides = array<i32>} : memref<8x8x128xbf16, #tpu.memory_space<vmem>>, vector<1x8x128xbf16>,
    %c24_134 = arith.constant 24 : index
    %c0_135 = arith.constant 0 : index
    %384 = vector.load %arg15[%c24_134, %c0_135] : memref<64x512xf32, #tpu.memory_space<vmem>>, vector<8x512xf32>
    %385 = arith.truncf %379 : vector<8x128xf32> to vector<8x128xbf16>
    %c0_136 = arith.constant 0 : index
    %c0_137 = arith.constant 0 : index
    %386 = vector.load %arg6[%c0_136, %c0_137] : memref<128x512xbf16, #tpu.memory_space<vmem>>, vector<128x512xbf16>
    %cst_138 = arith.constant dense<0.000000e+00> : vector<8x512xf32>
    %387 = tpu.matmul %385, %386, %cst_138 {dimension_numbers = #tpu.dot_dimension_numbers<[1], [0], [0], [1], [0, 0, 1, 1], [], []>} : vector<8x128xbf16>, vector<128x512xbf16>, vector<8x512xf32> -> vector<8x512xf32>
    %388 = arith.addf %384, %387 : vector<8x512xf32>
    %389 = vector.extract_strided_slice %388 {offsets = [0, 0], sizes = [8, 128], strides = [1, 1]} : vector<8x512xf32> to vector<8x128xf32>
    %390 = arith.negf %389 : vector<8x128xf32>
    %391 = math.exp %390 : vector<8x128xf32>
    %cst_139 = arith.constant 1.000000e+00 : f32
    %392 = vector.broadcast %cst_139 : f32 to vector<8x128xf32>
    %393 = arith.addf %392, %391 : vector<8x128xf32>
    %394 = arith.divf %392, %393 : vector<8x128xf32>
    %395 = vector.extract_strided_slice %388 {offsets = [0, 128], sizes = [8, 128], strides = [1, 1]} : vector<8x512xf32> to vector<8x128xf32>
    %396 = arith.negf %395 : vector<8x128xf32>
    %397 = math.exp %396 : vector<8x128xf32>
    %cst_140 = arith.constant 1.000000e+00 : f32
    %398 = vector.broadcast %cst_140 : f32 to vector<8x128xf32>
    %399 = arith.addf %398, %397 : vector<8x128xf32>
    %400 = arith.divf %398, %399 : vector<8x128xf32>
    %401 = vector.extract_strided_slice %388 {offsets = [0, 256], sizes = [8, 128], strides = [1, 1]} : vector<8x512xf32> to vector<8x128xf32>
    %402 = math.tanh %401 : vector<8x128xf32>
    %403 = vector.extract_strided_slice %388 {offsets = [0, 384], sizes = [8, 128], strides = [1, 1]} : vector<8x512xf32> to vector<8x128xf32>
    %404 = arith.negf %403 : vector<8x128xf32>
    %405 = math.exp %404 : vector<8x128xf32>
    %cst_141 = arith.constant 1.000000e+00 : f32
    %406 = vector.broadcast %cst_141 : f32 to vector<8x128xf32>
    %407 = arith.addf %406, %405 : vector<8x128xf32>
    %408 = arith.divf %406, %407 : vector<8x128xf32>
    %409 = arith.mulf %400, %377 : vector<8x128xf32>
    %410 = arith.mulf %394, %402 : vector<8x128xf32>
    %411 = arith.addf %409, %410 : vector<8x128xf32>
    %412 = math.tanh %411 : vector<8x128xf32>
    %413 = arith.mulf %408, %412 : vector<8x128xf32>
    %414 = arith.truncf %413 : vector<8x128xf32> to vector<8x128xbf16>
    %c3 = arith.constant 3 : index
    %c0_142 = arith.constant 0 : index
    %c0_143 = arith.constant 0 : index
    %415 = vector.load %arg10[%c3, %c0_142, %c0_143] : memref<8x8x128xbf16, #tpu.memory_space<vmem>>, vector<1x8x128xbf16>
    %416 = vector.shape_cast %415 : vector<1x8x128xbf16> to vector<8x128xbf16>
    %417 = vector.shape_cast %414 : vector<8x128xbf16> to vector<1x8x128xbf16>
    tpu.vector_store %arg10[%c3, %c0_142, %c0_143], %417 {strides = array<i32>} : memref<8x8x128xbf16, #tpu.memory_space<vmem>>, vector<1x8x128xbf16>,
    %c32_144 = arith.constant 32 : index
    %c0_145 = arith.constant 0 : index
    %418 = vector.load %arg15[%c32_144, %c0_145] : memref<64x512xf32, #tpu.memory_space<vmem>>, vector<8x512xf32>
    %419 = arith.truncf %413 : vector<8x128xf32> to vector<8x128xbf16>
    %c0_146 = arith.constant 0 : index
    %c0_147 = arith.constant 0 : index
    %420 = vector.load %arg6[%c0_146, %c0_147] : memref<128x512xbf16, #tpu.memory_space<vmem>>, vector<128x512xbf16>
    %cst_148 = arith.constant dense<0.000000e+00> : vector<8x512xf32>
    %421 = tpu.matmul %419, %420, %cst_148 {dimension_numbers = #tpu.dot_dimension_numbers<[1], [0], [0], [1], [0, 0, 1, 1], [], []>} : vector<8x128xbf16>, vector<128x512xbf16>, vector<8x512xf32> -> vector<8x512xf32>
    %422 = arith.addf %418, %421 : vector<8x512xf32>
    %423 = vector.extract_strided_slice %422 {offsets = [0, 0], sizes = [8, 128], strides = [1, 1]} : vector<8x512xf32> to vector<8x128xf32>
    %424 = arith.negf %423 : vector<8x128xf32>
    %425 = math.exp %424 : vector<8x128xf32>
    %cst_149 = arith.constant 1.000000e+00 : f32
    %426 = vector.broadcast %cst_149 : f32 to vector<8x128xf32>
    %427 = arith.addf %426, %425 : vector<8x128xf32>
    %428 = arith.divf %426, %427 : vector<8x128xf32>
    %429 = vector.extract_strided_slice %422 {offsets = [0, 128], sizes = [8, 128], strides = [1, 1]} : vector<8x512xf32> to vector<8x128xf32>
    %430 = arith.negf %429 : vector<8x128xf32>
    %431 = math.exp %430 : vector<8x128xf32>
    %cst_150 = arith.constant 1.000000e+00 : f32
    %432 = vector.broadcast %cst_150 : f32 to vector<8x128xf32>
    %433 = arith.addf %432, %431 : vector<8x128xf32>
    %434 = arith.divf %432, %433 : vector<8x128xf32>
    %435 = vector.extract_strided_slice %422 {offsets = [0, 256], sizes = [8, 128], strides = [1, 1]} : vector<8x512xf32> to vector<8x128xf32>
    %436 = math.tanh %435 : vector<8x128xf32>
    %437 = vector.extract_strided_slice %422 {offsets = [0, 384], sizes = [8, 128], strides = [1, 1]} : vector<8x512xf32> to vector<8x128xf32>
    %438 = arith.negf %437 : vector<8x128xf32>
    %439 = math.exp %438 : vector<8x128xf32>
    %cst_151 = arith.constant 1.000000e+00 : f32
    %440 = vector.broadcast %cst_151 : f32 to vector<8x128xf32>
    %441 = arith.addf %440, %439 : vector<8x128xf32>
    %442 = arith.divf %440, %441 : vector<8x128xf32>
    %443 = arith.mulf %434, %411 : vector<8x128xf32>
    %444 = arith.mulf %428, %436 : vector<8x128xf32>
    %445 = arith.addf %443, %444 : vector<8x128xf32>
    %446 = math.tanh %445 : vector<8x128xf32>
    %447 = arith.mulf %442, %446 : vector<8x128xf32>
    %448 = arith.truncf %447 : vector<8x128xf32> to vector<8x128xbf16>
    %c4 = arith.constant 4 : index
    %c0_152 = arith.constant 0 : index
    %c0_153 = arith.constant 0 : index
    %449 = vector.load %arg10[%c4, %c0_152, %c0_153] : memref<8x8x128xbf16, #tpu.memory_space<vmem>>, vector<1x8x128xbf16>
    %450 = vector.shape_cast %449 : vector<1x8x128xbf16> to vector<8x128xbf16>
    %451 = vector.shape_cast %448 : vector<8x128xbf16> to vector<1x8x128xbf16>
    tpu.vector_store %arg10[%c4, %c0_152, %c0_153], %451 {strides = array<i32>} : memref<8x8x128xbf16, #tpu.memory_space<vmem>>, vector<1x8x128xbf16>,
    %c40_154 = arith.constant 40 : index
    %c0_155 = arith.constant 0 : index
    %452 = vector.load %arg15[%c40_154, %c0_155] : memref<64x512xf32, #tpu.memory_space<vmem>>, vector<8x512xf32>
    %453 = arith.truncf %447 : vector<8x128xf32> to vector<8x128xbf16>
    %c0_156 = arith.constant 0 : index
    %c0_157 = arith.constant 0 : index
    %454 = vector.load %arg6[%c0_156, %c0_157] : memref<128x512xbf16, #tpu.memory_space<vmem>>, vector<128x512xbf16>
    %cst_158 = arith.constant dense<0.000000e+00> : vector<8x512xf32>
    %455 = tpu.matmul %453, %454, %cst_158 {dimension_numbers = #tpu.dot_dimension_numbers<[1], [0], [0], [1], [0, 0, 1, 1], [], []>} : vector<8x128xbf16>, vector<128x512xbf16>, vector<8x512xf32> -> vector<8x512xf32>
    %456 = arith.addf %452, %455 : vector<8x512xf32>
    %457 = vector.extract_strided_slice %456 {offsets = [0, 0], sizes = [8, 128], strides = [1, 1]} : vector<8x512xf32> to vector<8x128xf32>
    %458 = arith.negf %457 : vector<8x128xf32>
    %459 = math.exp %458 : vector<8x128xf32>
    %cst_159 = arith.constant 1.000000e+00 : f32
    %460 = vector.broadcast %cst_159 : f32 to vector<8x128xf32>
    %461 = arith.addf %460, %459 : vector<8x128xf32>
    %462 = arith.divf %460, %461 : vector<8x128xf32>
    %463 = vector.extract_strided_slice %456 {offsets = [0, 128], sizes = [8, 128], strides = [1, 1]} : vector<8x512xf32> to vector<8x128xf32>
    %464 = arith.negf %463 : vector<8x128xf32>
    %465 = math.exp %464 : vector<8x128xf32>
    %cst_160 = arith.constant 1.000000e+00 : f32
    %466 = vector.broadcast %cst_160 : f32 to vector<8x128xf32>
    %467 = arith.addf %466, %465 : vector<8x128xf32>
    %468 = arith.divf %466, %467 : vector<8x128xf32>
    %469 = vector.extract_strided_slice %456 {offsets = [0, 256], sizes = [8, 128], strides = [1, 1]} : vector<8x512xf32> to vector<8x128xf32>
    %470 = math.tanh %469 : vector<8x128xf32>
    %471 = vector.extract_strided_slice %456 {offsets = [0, 384], sizes = [8, 128], strides = [1, 1]} : vector<8x512xf32> to vector<8x128xf32>
    %472 = arith.negf %471 : vector<8x128xf32>
    %473 = math.exp %472 : vector<8x128xf32>
    %cst_161 = arith.constant 1.000000e+00 : f32
    %474 = vector.broadcast %cst_161 : f32 to vector<8x128xf32>
    %475 = arith.addf %474, %473 : vector<8x128xf32>
    %476 = arith.divf %474, %475 : vector<8x128xf32>
    %477 = arith.mulf %468, %445 : vector<8x128xf32>
    %478 = arith.mulf %462, %470 : vector<8x128xf32>
    %479 = arith.addf %477, %478 : vector<8x128xf32>
    %480 = math.tanh %479 : vector<8x128xf32>
    %481 = arith.mulf %476, %480 : vector<8x128xf32>
    %482 = arith.truncf %481 : vector<8x128xf32> to vector<8x128xbf16>
    %c5 = arith.constant 5 : index
    %c0_162 = arith.constant 0 : index
    %c0_163 = arith.constant 0 : index
    %483 = vector.load %arg10[%c5, %c0_162, %c0_163] : memref<8x8x128xbf16, #tpu.memory_space<vmem>>, vector<1x8x128xbf16>
    %484 = vector.shape_cast %483 : vector<1x8x128xbf16> to vector<8x128xbf16>
    %485 = vector.shape_cast %482 : vector<8x128xbf16> to vector<1x8x128xbf16>
    tpu.vector_store %arg10[%c5, %c0_162, %c0_163], %485 {strides = array<i32>} : memref<8x8x128xbf16, #tpu.memory_space<vmem>>, vector<1x8x128xbf16>,
    %c48_164 = arith.constant 48 : index
    %c0_165 = arith.constant 0 : index
    %486 = vector.load %arg15[%c48_164, %c0_165] : memref<64x512xf32, #tpu.memory_space<vmem>>, vector<8x512xf32>
    %487 = arith.truncf %481 : vector<8x128xf32> to vector<8x128xbf16>
    %c0_166 = arith.constant 0 : index
    %c0_167 = arith.constant 0 : index
    %488 = vector.load %arg6[%c0_166, %c0_167] : memref<128x512xbf16, #tpu.memory_space<vmem>>, vector<128x512xbf16>
    %cst_168 = arith.constant dense<0.000000e+00> : vector<8x512xf32>
    %489 = tpu.matmul %487, %488, %cst_168 {dimension_numbers = #tpu.dot_dimension_numbers<[1], [0], [0], [1], [0, 0, 1, 1], [], []>} : vector<8x128xbf16>, vector<128x512xbf16>, vector<8x512xf32> -> vector<8x512xf32>
    %490 = arith.addf %486, %489 : vector<8x512xf32>
    %491 = vector.extract_strided_slice %490 {offsets = [0, 0], sizes = [8, 128], strides = [1, 1]} : vector<8x512xf32> to vector<8x128xf32>
    %492 = arith.negf %491 : vector<8x128xf32>
    %493 = math.exp %492 : vector<8x128xf32>
    %cst_169 = arith.constant 1.000000e+00 : f32
    %494 = vector.broadcast %cst_169 : f32 to vector<8x128xf32>
    %495 = arith.addf %494, %493 : vector<8x128xf32>
    %496 = arith.divf %494, %495 : vector<8x128xf32>
    %497 = vector.extract_strided_slice %490 {offsets = [0, 128], sizes = [8, 128], strides = [1, 1]} : vector<8x512xf32> to vector<8x128xf32>
    %498 = arith.negf %497 : vector<8x128xf32>
    %499 = math.exp %498 : vector<8x128xf32>
    %cst_170 = arith.constant 1.000000e+00 : f32
    %500 = vector.broadcast %cst_170 : f32 to vector<8x128xf32>
    %501 = arith.addf %500, %499 : vector<8x128xf32>
    %502 = arith.divf %500, %501 : vector<8x128xf32>
    %503 = vector.extract_strided_slice %490 {offsets = [0, 256], sizes = [8, 128], strides = [1, 1]} : vector<8x512xf32> to vector<8x128xf32>
    %504 = math.tanh %503 : vector<8x128xf32>
    %505 = vector.extract_strided_slice %490 {offsets = [0, 384], sizes = [8, 128], strides = [1, 1]} : vector<8x512xf32> to vector<8x128xf32>
    %506 = arith.negf %505 : vector<8x128xf32>
    %507 = math.exp %506 : vector<8x128xf32>
    %cst_171 = arith.constant 1.000000e+00 : f32
    %508 = vector.broadcast %cst_171 : f32 to vector<8x128xf32>
    %509 = arith.addf %508, %507 : vector<8x128xf32>
    %510 = arith.divf %508, %509 : vector<8x128xf32>
    %511 = arith.mulf %502, %479 : vector<8x128xf32>
    %512 = arith.mulf %496, %504 : vector<8x128xf32>
    %513 = arith.addf %511, %512 : vector<8x128xf32>
    %514 = math.tanh %513 : vector<8x128xf32>
    %515 = arith.mulf %510, %514 : vector<8x128xf32>
    %516 = arith.truncf %515 : vector<8x128xf32> to vector<8x128xbf16>
    %c6 = arith.constant 6 : index
    %c0_172 = arith.constant 0 : index
    %c0_173 = arith.constant 0 : index
    %517 = vector.load %arg10[%c6, %c0_172, %c0_173] : memref<8x8x128xbf16, #tpu.memory_space<vmem>>, vector<1x8x128xbf16>
    %518 = vector.shape_cast %517 : vector<1x8x128xbf16> to vector<8x128xbf16>
    %519 = vector.shape_cast %516 : vector<8x128xbf16> to vector<1x8x128xbf16>
    tpu.vector_store %arg10[%c6, %c0_172, %c0_173], %519 {strides = array<i32>} : memref<8x8x128xbf16, #tpu.memory_space<vmem>>, vector<1x8x128xbf16>,
    %c56_174 = arith.constant 56 : index
    %c0_175 = arith.constant 0 : index
    %520 = vector.load %arg15[%c56_174, %c0_175] : memref<64x512xf32, #tpu.memory_space<vmem>>, vector<8x512xf32>
    %521 = arith.truncf %515 : vector<8x128xf32> to vector<8x128xbf16>
    %c0_176 = arith.constant 0 : index
    %c0_177 = arith.constant 0 : index
    %522 = vector.load %arg6[%c0_176, %c0_177] : memref<128x512xbf16, #tpu.memory_space<vmem>>, vector<128x512xbf16>
    %cst_178 = arith.constant dense<0.000000e+00> : vector<8x512xf32>
    %523 = tpu.matmul %521, %522, %cst_178 {dimension_numbers = #tpu.dot_dimension_numbers<[1], [0], [0], [1], [0, 0, 1, 1], [], []>} : vector<8x128xbf16>, vector<128x512xbf16>, vector<8x512xf32> -> vector<8x512xf32>
    %524 = arith.addf %520, %523 : vector<8x512xf32>
    %525 = vector.extract_strided_slice %524 {offsets = [0, 0], sizes = [8, 128], strides = [1, 1]} : vector<8x512xf32> to vector<8x128xf32>
    %526 = arith.negf %525 : vector<8x128xf32>
    %527 = math.exp %526 : vector<8x128xf32>
    %cst_179 = arith.constant 1.000000e+00 : f32
    %528 = vector.broadcast %cst_179 : f32 to vector<8x128xf32>
    %529 = arith.addf %528, %527 : vector<8x128xf32>
    %530 = arith.divf %528, %529 : vector<8x128xf32>
    %531 = vector.extract_strided_slice %524 {offsets = [0, 128], sizes = [8, 128], strides = [1, 1]} : vector<8x512xf32> to vector<8x128xf32>
    %532 = arith.negf %531 : vector<8x128xf32>
    %533 = math.exp %532 : vector<8x128xf32>
    %cst_180 = arith.constant 1.000000e+00 : f32
    %534 = vector.broadcast %cst_180 : f32 to vector<8x128xf32>
    %535 = arith.addf %534, %533 : vector<8x128xf32>
    %536 = arith.divf %534, %535 : vector<8x128xf32>
    %537 = vector.extract_strided_slice %524 {offsets = [0, 256], sizes = [8, 128], strides = [1, 1]} : vector<8x512xf32> to vector<8x128xf32>
    %538 = math.tanh %537 : vector<8x128xf32>
    %539 = vector.extract_strided_slice %524 {offsets = [0, 384], sizes = [8, 128], strides = [1, 1]} : vector<8x512xf32> to vector<8x128xf32>
    %540 = arith.negf %539 : vector<8x128xf32>
    %541 = math.exp %540 : vector<8x128xf32>
    %cst_181 = arith.constant 1.000000e+00 : f32
    %542 = vector.broadcast %cst_181 : f32 to vector<8x128xf32>
    %543 = arith.addf %542, %541 : vector<8x128xf32>
    %544 = arith.divf %542, %543 : vector<8x128xf32>
    %545 = arith.mulf %536, %513 : vector<8x128xf32>
    %546 = arith.mulf %530, %538 : vector<8x128xf32>
    %547 = arith.addf %545, %546 : vector<8x128xf32>
    %548 = math.tanh %547 : vector<8x128xf32>
    %549 = arith.mulf %544, %548 : vector<8x128xf32>
    %550 = arith.truncf %549 : vector<8x128xf32> to vector<8x128xbf16>
    %c7 = arith.constant 7 : index
    %c0_182 = arith.constant 0 : index
    %c0_183 = arith.constant 0 : index
    %551 = vector.load %arg10[%c7, %c0_182, %c0_183] : memref<8x8x128xbf16, #tpu.memory_space<vmem>>, vector<1x8x128xbf16>
    %552 = vector.shape_cast %551 : vector<1x8x128xbf16> to vector<8x128xbf16>
    %553 = vector.shape_cast %550 : vector<8x128xbf16> to vector<1x8x128xbf16>
    tpu.vector_store %arg10[%c7, %c0_182, %c0_183], %553 {strides = array<i32>} : memref<8x8x128xbf16, #tpu.memory_space<vmem>>, vector<1x8x128xbf16>,
    %c0_184 = arith.constant 0 : index
    %c0_185 = arith.constant 0 : index
    %c0_186 = arith.constant 0 : index
    %554 = vector.load %arg13[%c0_184, %c0_185, %c0_186] : memref<2x8x128xf32, #tpu.memory_space<vmem>>, vector<1x8x128xf32>
    %555 = vector.shape_cast %554 : vector<1x8x128xf32> to vector<8x128xf32>
    %556 = vector.shape_cast %268 : vector<8x128xf32> to vector<1x8x128xf32>
    tpu.vector_store %arg13[%c0_184, %c0_185, %c0_186], %556 {strides = array<i32>} : memref<2x8x128xf32, #tpu.memory_space<vmem>>, vector<1x8x128xf32>,
    %c0_187 = arith.constant 0 : index
    %c0_188 = arith.constant 0 : index
    %c0_189 = arith.constant 0 : index
    %557 = vector.load %arg14[%c0_187, %c0_188, %c0_189] : memref<2x8x128xf32, #tpu.memory_space<vmem>>, vector<1x8x128xf32>
    %558 = vector.shape_cast %557 : vector<1x8x128xf32> to vector<8x128xf32>
    %559 = vector.shape_cast %266 : vector<8x128xf32> to vector<1x8x128xf32>
    tpu.vector_store %arg14[%c0_187, %c0_188, %c0_189], %559 {strides = array<i32>} : memref<2x8x128xf32, #tpu.memory_space<vmem>>, vector<1x8x128xf32>,
    %c1_190 = arith.constant 1 : index
    %c0_191 = arith.constant 0 : index
    %c0_192 = arith.constant 0 : index
    %560 = vector.load %arg13[%c1_190, %c0_191, %c0_192] : memref<2x8x128xf32, #tpu.memory_space<vmem>>, vector<1x8x128xf32>
    %561 = vector.shape_cast %560 : vector<1x8x128xf32> to vector<8x128xf32>
    %562 = vector.shape_cast %549 : vector<8x128xf32> to vector<1x8x128xf32>
    tpu.vector_store %arg13[%c1_190, %c0_191, %c0_192], %562 {strides = array<i32>} : memref<2x8x128xf32, #tpu.memory_space<vmem>>, vector<1x8x128xf32>,
    %c1_193 = arith.constant 1 : index
    %c0_194 = arith.constant 0 : index
    %c0_195 = arith.constant 0 : index
    %563 = vector.load %arg14[%c1_193, %c0_194, %c0_195] : memref<2x8x128xf32, #tpu.memory_space<vmem>>, vector<1x8x128xf32>
    %564 = vector.shape_cast %563 : vector<1x8x128xf32> to vector<8x128xf32>
    %565 = vector.shape_cast %547 : vector<8x128xf32> to vector<1x8x128xf32>
    tpu.vector_store %arg14[%c1_193, %c0_194, %c0_195], %565 {strides = array<i32>} : memref<2x8x128xf32, #tpu.memory_space<vmem>>, vector<1x8x128xf32>,
    %c1_i32 = arith.constant 1 : i32
    %566 = arith.cmpi eq, %arg0, %c1_i32 : i32
    %567 = arith.extui %566 : i1 to i32
    %c0_i32_196 = arith.constant 0 : i32
    %568 = arith.cmpi ne, %567, %c0_i32_196 : i32
    scf.if %568 {
      %c0_197 = arith.constant 0 : index
      %c0_198 = arith.constant 0 : index
      %c0_199 = arith.constant 0 : index
      %569 = vector.load %arg13[%c0_197, %c0_198, %c0_199] : memref<2x8x128xf32, #tpu.memory_space<vmem>>, vector<2x8x128xf32>
      %c0_200 = arith.constant 0 : index
      %c0_201 = arith.constant 0 : index
      %c0_202 = arith.constant 0 : index
      %570 = vector.load %arg11[%c0_200, %c0_201, %c0_202] : memref<2x8x128xf32, #tpu.memory_space<vmem>>, vector<2x8x128xf32>
      tpu.vector_store %arg11[%c0_200, %c0_201, %c0_202], %569 {strides = array<i32>} : memref<2x8x128xf32, #tpu.memory_space<vmem>>, vector<2x8x128xf32>,
      %c0_203 = arith.constant 0 : index
      %c0_204 = arith.constant 0 : index
      %c0_205 = arith.constant 0 : index
      %571 = vector.load %arg14[%c0_203, %c0_204, %c0_205] : memref<2x8x128xf32, #tpu.memory_space<vmem>>, vector<2x8x128xf32>
      %c0_206 = arith.constant 0 : index
      %c0_207 = arith.constant 0 : index
      %c0_208 = arith.constant 0 : index
      %572 = vector.load %arg12[%c0_206, %c0_207, %c0_208] : memref<2x8x128xf32, #tpu.memory_space<vmem>>, vector<2x8x128xf32>
      tpu.vector_store %arg12[%c0_206, %c0_207, %c0_208], %571 {strides = array<i32>} : memref<2x8x128xf32, #tpu.memory_space<vmem>>, vector<2x8x128xf32>,
    } else {
    }
    return
  }
  func.func @transform_0(%arg0: i32) -> (i32, i32, i32) {
    %c0_i32 = arith.constant 0 : i32
    %c0_i32_0 = arith.constant 0 : i32
    %c0_i32_1 = arith.constant 0 : i32
    return %arg0, %c0_i32, %c0_i32_0 : i32, i32, i32
  }
  func.func @transform_1(%arg0: i32) -> (i32, i32) {
    %c0_i32 = arith.constant 0 : i32
    %c0_i32_0 = arith.constant 0 : i32
    %c0_i32_1 = arith.constant 0 : i32
    return %c0_i32, %c0_i32_0 : i32, i32
  }
  func.func @transform_2(%arg0: i32) -> (i32, i32) {
    %c0_i32 = arith.constant 0 : i32
    %c0_i32_0 = arith.constant 0 : i32
    %c0_i32_1 = arith.constant 0 : i32
    return %c0_i32, %c0_i32_0 : i32, i32
  }
  func.func @transform_3(%arg0: i32) -> (i32, i32) {
    %c0_i32 = arith.constant 0 : i32
    %c0_i32_0 = arith.constant 0 : i32
    %c0_i32_1 = arith.constant 0 : i32
    return %c0_i32, %c0_i32_0 : i32, i32
  }
  func.func @transform_4(%arg0: i32) -> (i32, i32) {
    %c0_i32 = arith.constant 0 : i32
    %c0_i32_0 = arith.constant 0 : i32
    %c0_i32_1 = arith.constant 0 : i32
    return %c0_i32, %c0_i32_0 : i32, i32
  }
  func.func @transform_5(%arg0: i32) -> (i32, i32) {
    %c0_i32 = arith.constant 0 : i32
    %c0_i32_0 = arith.constant 0 : i32
    %c0_i32_1 = arith.constant 0 : i32
    return %c0_i32, %c0_i32_0 : i32, i32
  }
  func.func @transform_6(%arg0: i32) -> (i32, i32) {
    %c0_i32 = arith.constant 0 : i32
    %c0_i32_0 = arith.constant 0 : i32
    %c0_i32_1 = arith.constant 0 : i32
    return %c0_i32, %c0_i32_0 : i32, i32
  }
  func.func @transform_7(%arg0: i32) -> (i32, i32, i32) {
    %c0_i32 = arith.constant 0 : i32
    %c0_i32_0 = arith.constant 0 : i32
    %c0_i32_1 = arith.constant 0 : i32
    %c0_i32_2 = arith.constant 0 : i32
    return %c0_i32, %c0_i32_0, %c0_i32_1 : i32, i32, i32
  }
  func.func @transform_8(%arg0: i32) -> (i32, i32, i32) {
    %c0_i32 = arith.constant 0 : i32
    %c0_i32_0 = arith.constant 0 : i32
    %c0_i32_1 = arith.constant 0 : i32
    %c0_i32_2 = arith.constant 0 : i32
    return %c0_i32, %c0_i32_0, %c0_i32_1 : i32, i32, i32
  }
  func.func @transform_9(%arg0: i32) -> (i32, i32, i32) {
    %c0_i32 = arith.constant 0 : i32
    %c0_i32_0 = arith.constant 0 : i32
    %c0_i32_1 = arith.constant 0 : i32
    return %arg0, %c0_i32, %c0_i32_0 : i32, i32, i32
  }
  func.func @transform_10(%arg0: i32) -> (i32, i32, i32) {
    %c0_i32 = arith.constant 0 : i32
    %c0_i32_0 = arith.constant 0 : i32
    %c0_i32_1 = arith.constant 0 : i32
    %c0_i32_2 = arith.constant 0 : i32
    return %c0_i32, %c0_i32_0, %c0_i32_1 : i32, i32, i32
  }
  func.func @transform_11(%arg0: i32) -> (i32, i32, i32) {
    %c0_i32 = arith.constant 0 : i32
    %c0_i32_0 = arith.constant 0 : i32
    %c0_i32_1 = arith.constant 0 : i32
    %c0_i32_2 = arith.constant 0 : i32
    return %c0_i32, %c0_i32_0, %c0_i32_1 : i32, i32, i32
  }
}

</mosaic_0001>

<bundles_post_ra>
// kernel: lstm_lm2_forward.3
= control target key start
LH: loop header
LB: loop body
LE: loop exit
PB: predicated region body
PF: predicated region fallthrough
CT: control target
= control target key end

     0   :  { %8 = vsyncpa [#allocation6], 0  ;;  %s2459_s0 = inlined_call_operand.vmem [shape: bf16[128,128], index: 0, kind: input, shape index: {}]   ;;  %s2460_s1 = inlined_call_operand.vmem [shape: bf16[128,256], index: 1, kind: input, shape index: {}]   ;;  %s2461_s2 = inlined_call_operand.vmem [shape: f32[1,256], index: 2, kind: input, shape index: {}]   ;;  %s2462_s3 = inlined_call_operand.hbm [shape: f32[128,256], index: 3, kind: output, shape index: {}]  }
   0x1   :  { %10 = vsyncpa [#allocation6 + $0x1], 0  ;;  %s1838_s12 = smov 0   ;;  %s1840_s13 = smov 0  }
   0x2   :  { %s1842_s14 = smov 0  }
   0x3 LB: > { %s1427_s15 = sadd.s32 4294967295, %s1809_s14   ;;  %s1428_s16 = sadd.s32 4294967294, %s1809_s14   ;;  %s1809_s14 = sphi %s1842_s14, %s16_s14   ;;  %s1805_s13 = sphi %s1840_s13, %s2522_s13   ;;  %s1801_s12 = sphi %s1838_s12, %s2521_s12  }
   0x4   : > { %s31_s17 = sadd.s32 1, %s1805_s13  ;;  %p1434_p0 = scmp.ge.s32.totalorder %s1809_s14, 1 }
   0x5   : > { %p33_p1 = scmp.ge.s32.totalorder %s31_s17, 2  ;;  %p201_p2 = scmp.lt.s32.totalorder %s1809_s14, 3 }
   0x7   : > { %s2524_s17 = smov (%p33_p1, %s31_s17), 0  ;;  %p202_p3 = pnand %p1434_p0, %p201_p2 }
   0x8   : > { %p266_p4 = scmp.eq.s32.totalorder (!%p202_p3), %s1801_s12, 0 }
   0x9   : > { %205 = sbr.rel (%p202_p3) target bundleno = 831 (0x33f), region = 32 }
   0xe   : > { %271 = sbr.rel (!%p266_p4) target bundleno = 47 (0x2f), region = 36  ;;  %vm272_vm0 = vcmask (%p266_p4), 7168   ;;  %v1811_v0 = vmov (%p266_p4), -inf   ;;  %v1812_v1 = vmov (%p266_p4), 0.0  }
   0xf   : > { %273 = vst.msk [vmem:[#allocation3] sm:$0xff] (%p266_p4), %vm272_vm0, %v1811_v0 }
  0x10   : > { %274 = vst.msk [vmem:[#allocation3 + $0x8] sm:$0xff] (%p266_p4), %vm272_vm0, %v1811_v0 }
  0x11   : > { %275 = vst.msk [vmem:[#allocation3 + $0x10] sm:$0xff] (%p266_p4), %vm272_vm0, %v1811_v0 }
  0x12   : > { %276 = vst.msk [vmem:[#allocation3 + $0x18] sm:$0xff] (%p266_p4), %vm272_vm0, %v1811_v0 }
  0x13   : > { %277 = vst.msk [vmem:[#allocation3 + $0x20] sm:$0xff] %vm272_vm0, %v1811_v0 }
  0x14   : > { %278 = vst.msk [vmem:[#allocation3 + $0x28] sm:$0xff] %vm272_vm0, %v1811_v0 }
  0x15   : > { %279 = vst.msk [vmem:[#allocation3 + $0x30] sm:$0xff] %vm272_vm0, %v1811_v0 }
  0x16   : > { %280 = vst.msk [vmem:[#allocation3 + $0x38] sm:$0xff] %vm272_vm0, %v1811_v0 }
  0x17   : > { %281 = vst.msk [vmem:[#allocation3 + $0x40] sm:$0xff] %vm272_vm0, %v1811_v0 }
  0x18   : > { %282 = vst.msk [vmem:[#allocation3 + $0x48] sm:$0xff] %vm272_vm0, %v1811_v0 }
  0x19   : > { %283 = vst.msk [vmem:[#allocation3 + $0x50] sm:$0xff] %vm272_vm0, %v1811_v0 }
  0x1a   : > { %284 = vst.msk [vmem:[#allocation3 + $0x58] sm:$0xff] %vm272_vm0, %v1811_v0 }
  0x1b   : > { %285 = vst.msk [vmem:[#allocation3 + $0x60] sm:$0xff] %vm272_vm0, %v1811_v0 }
  0x1c   : > { %286 = vst.msk [vmem:[#allocation3 + $0x68] sm:$0xff] %vm272_vm0, %v1811_v0 }
  0x1d   : > { %287 = vst.msk [vmem:[#allocation3 + $0x70] sm:$0xff] %vm272_vm0, %v1811_v0 }
  0x1e   : > { %288 = vst.msk [vmem:[#allocation3 + $0x78] sm:$0xff] %vm272_vm0, %v1811_v0 }
  0x1f   : > { %289 = vst.msk [vmem:[#allocation4] sm:$0xff] %vm272_vm0, %v1812_v1 }
  0x20   : > { %290 = vst.msk [vmem:[#allocation4 + $0x8] sm:$0xff] %vm272_vm0, %v1812_v1 }
  0x21   : > { %291 = vst.msk [vmem:[#allocation4 + $0x10] sm:$0xff] %vm272_vm0, %v1812_v1 }
  0x22   : > { %292 = vst.msk [vmem:[#allocation4 + $0x18] sm:$0xff] %vm272_vm0, %v1812_v1 }
  0x23   : > { %293 = vst.msk [vmem:[#allocation4 + $0x20] sm:$0xff] %vm272_vm0, %v1812_v1 }
  0x24   : > { %294 = vst.msk [vmem:[#allocation4 + $0x28] sm:$0xff] %vm272_vm0, %v1812_v1 }
  0x25   : > { %295 = vst.msk [vmem:[#allocation4 + $0x30] sm:$0xff] %vm272_vm0, %v1812_v1 }
  0x26   : > { %296 = vst.msk [vmem:[#allocation4 + $0x38] sm:$0xff] %vm272_vm0, %v1812_v1 }
  0x27   : > { %297 = vst.msk [vmem:[#allocation4 + $0x40] sm:$0xff] %vm272_vm0, %v1812_v1 }
  0x28   : > { %298 = vst.msk [vmem:[#allocation4 + $0x48] sm:$0xff] %vm272_vm0, %v1812_v1 }
  0x29   : > { %299 = vst.msk [vmem:[#allocation4 + $0x50] sm:$0xff] %vm272_vm0, %v1812_v1 }
  0x2a   : > { %300 = vst.msk [vmem:[#allocation4 + $0x58] sm:$0xff] %vm272_vm0, %v1812_v1 }
  0x2b   : > { %301 = vst.msk [vmem:[#allocation4 + $0x60] sm:$0xff] %vm272_vm0, %v1812_v1 }
  0x2c   : > { %302 = vst.msk [vmem:[#allocation4 + $0x68] sm:$0xff] %vm272_vm0, %v1812_v1 }
  0x2d   : > { %303 = vst.msk [vmem:[#allocation4 + $0x70] sm:$0xff] %vm272_vm0, %v1812_v1 }
  0x2e   : > { %304 = vst.msk [vmem:[#allocation4 + $0x78] sm:$0xff] %vm272_vm0, %v1812_v1 }
  0x2f PF: > { %p1436_p5 = scmp.ne.s32.totalorder %s1801_s12, 0 }
  0x31   : > { %307 = sbr.rel (%p1436_p5) target bundleno = 647 (0x287), region = 40 }
  0x36   : > { %v1527_v2 = vld [vmem:[%s2460_s1 + $0x70] sm:$0xf]  ;;  %v1562_v3 = vld [vmem:[%s2460_s1 + $0x74] sm:$0xf0]  ;;  %v1561_v4 = vld [vmem:[%s2460_s1 + $0x74] sm:$0xf] }
  0x37   : > { %v1528_v5 = vor.u32 %v1562_v3, %v1527_v2  ;;  %v1529_v6 = vld [vmem:[%s2460_s1 + $0x78] sm:$0xf0]  ;;  %v1519_v7 = vld [vmem:[%s2460_s1 + $0x60] sm:$0xf]  ;;  %v1560_v8 = vld [vmem:[%s2460_s1 + $0x64] sm:$0xf0] }
  0x38   : > { %v1532_v9 = vor.u32 %v1561_v4, %v1529_v6  ;;  %v1559_v10 = vld [vmem:[%s2460_s1 + $0x64] sm:$0xf]  ;;  %v1521_v11 = vld [vmem:[%s2460_s1 + $0x68] sm:$0xf0]  ;;  %v1520_v12 = vor.u32 %v1560_v8, %v1519_v7  ;;  %v1511_v14 = vld [vmem:[%s2460_s1 + $0x50] sm:$0xf] }
  0x39   : > { %474 = vmatpush.bf16.msra.mxu0 %v1528_v5  ;;  %1563 = vmatpush.bf16.msra.mxu2 %v1528_v5  ;;  %v1524_v13 = vor.u32 %v1559_v10, %v1521_v11  ;;  %v1558_v15 = vld [vmem:[%s2460_s1 + $0x54] sm:$0xf0]  ;;  %v1557_v16 = vld [vmem:[%s2460_s1 + $0x54] sm:$0xf]  ;;  %v1513_v17 = vld [vmem:[%s2460_s1 + $0x58] sm:$0xf0] }
  0x3a   : > { %523 = vmatpush.bf16.msra.mxu1 %v1532_v9  ;;  %1571 = vmatpush.bf16.msra.mxu3 %v1532_v9  ;;  %v1512_v18 = vor.u32 %v1558_v15, %v1511_v14  ;;  %v1516_v19 = vor.u32 %v1557_v16, %v1513_v17  ;;  %v1503_v20 = vld [vmem:[%s2460_s1 + $0x40] sm:$0xf]  ;;  %v1556_v21 = vld [vmem:[%s2460_s1 + $0x44] sm:$0xf0]  ;;  %v1555_v22 = vld [vmem:[%s2460_s1 + $0x44] sm:$0xf] }
  0x3b   : > { %v1505_v23 = vld [vmem:[%s2460_s1 + $0x48] sm:$0xf0]  ;;  %v1504_v24 = vor.u32 %v1556_v21, %v1503_v20  ;;  %v1495_v26 = vld [vmem:[%s2460_s1 + $0x30] sm:$0xf]  ;;  %v1554_v27 = vld [vmem:[%s2460_s1 + $0x34] sm:$0xf0] }
  0x3c   : > { %v1508_v25 = vor.u32 %v1555_v22, %v1505_v23  ;;  %v1553_v28 = vld [vmem:[%s2460_s1 + $0x34] sm:$0xf]  ;;  %v1497_v29 = vld [vmem:[%s2460_s1 + $0x38] sm:$0xf0]  ;;  %v1496_v30 = vor.u32 %v1554_v27, %v1495_v26  ;;  %v1487_v32 = vld [vmem:[%s2460_s1 + $0x20] sm:$0xf] }
  0x3d   : > { %475 = vmatpush.bf16.msra.mxu0 %v1520_v12  ;;  %1564 = vmatpush.bf16.msra.mxu2 %v1520_v12  ;;  %v1500_v31 = vor.u32 %v1553_v28, %v1497_v29  ;;  %v1552_v33 = vld [vmem:[%s2460_s1 + $0x24] sm:$0xf0]  ;;  %v1551_v34 = vld [vmem:[%s2460_s1 + $0x24] sm:$0xf]  ;;  %v1489_v35 = vld [vmem:[%s2460_s1 + $0x28] sm:$0xf0] }
  0x3e   : > { %524 = vmatpush.bf16.msra.mxu1 %v1524_v13  ;;  %1572 = vmatpush.bf16.msra.mxu3 %v1524_v13  ;;  %v1488_v36 = vor.u32 %v1552_v33, %v1487_v32  ;;  %v1492_v37 = vor.u32 %v1551_v34, %v1489_v35  ;;  %v1479_v38 = vld [vmem:[%s2460_s1 + $0x10] sm:$0xf]  ;;  %v1550_v39 = vld [vmem:[%s2460_s1 + $0x14] sm:$0xf0]  ;;  %v1549_v40 = vld [vmem:[%s2460_s1 + $0x14] sm:$0xf] }
  0x3f   : > { %v1481_v41 = vld [vmem:[%s2460_s1 + $0x18] sm:$0xf0]  ;;  %v1480_v42 = vor.u32 %v1550_v39, %v1479_v38  ;;  %v1471_v44 = vld [vmem:[%s2460_s1] sm:$0xf]  ;;  %v1548_v45 = vld [vmem:[%s2460_s1 + $0x4] sm:$0xf0] }
  0x40   : > { %v1484_v43 = vor.u32 %v1549_v40, %v1481_v41  ;;  %v1547_v46 = vld [vmem:[%s2460_s1 + $0x4] sm:$0xf]  ;;  %v1473_v47 = vld [vmem:[%s2460_s1 + $0x8] sm:$0xf0]  ;;  %v1472_v48 = vor.u32 %v1548_v45, %v1471_v44  ;;  %v1541_v54 = vld [vmem:[%s2459_s0 + $0x10] sm:$0xff]  ;;  %vm1007_vm1 = vcmask 7168  }
  0x41   : > { %476 = vmatpush.bf16.msra.mxu0 %v1512_v18  ;;  %1565 = vmatpush.bf16.msra.mxu2 %v1512_v18  ;;  %v1476_v49 = vor.u32 %v1547_v46, %v1473_v47  ;;  %v1539_v50 = vld [vmem:[%s2459_s0] sm:$0xff]  ;;  %v1540_v52 = vld [vmem:[%s2459_s0 + $0x8] sm:$0xff]  ;;  %v1545_v55 = vld [vmem:[%s2459_s0 + $0x30] sm:$0xff] }
  0x42   : > { %525 = vmatpush.bf16.msra.mxu1 %v1516_v19  ;;  %1573 = vmatpush.bf16.msra.mxu3 %v1516_v19  ;;  %v1543_v51 = vld [vmem:[%s2459_s0 + $0x20] sm:$0xff]  ;;  %v1544_v53 = vld [vmem:[%s2459_s0 + $0x28] sm:$0xff]  ;;  %v1542_v56 = vld [vmem:[%s2459_s0 + $0x18] sm:$0xff] }
  0x43   : > { %v1546_v57 = vld [vmem:[%s2459_s0 + $0x38] sm:$0xff]  ;;  %v340_v58 = vld [vmem:[%s2461_s2] sm:$0x3] }
  0x44   : > { %v2017_v59 = vperm.slane %v340_v58, 0  ;;  %v2019_v60 = vperm.slane %v340_v58, 1 }
  0x45   : > { %477 = vmatpush.bf16.msra.mxu0 %v1504_v24  ;;  %1566 = vmatpush.bf16.msra.mxu2 %v1504_v24 }
  0x46   : > { %526 = vmatpush.bf16.msra.mxu1 %v1508_v25  ;;  %1574 = vmatpush.bf16.msra.mxu3 %v1508_v25 }
  0x49   : > { %478 = vmatpush.bf16.msra.mxu0 %v1496_v30  ;;  %1567 = vmatpush.bf16.msra.mxu2 %v1496_v30 }
  0x4a   : > { %527 = vmatpush.bf16.msra.mxu1 %v1500_v31  ;;  %1575 = vmatpush.bf16.msra.mxu3 %v1500_v31 }
  0x4d   : > { %479 = vmatpush.bf16.msra.mxu0 %v1488_v36  ;;  %1568 = vmatpush.bf16.msra.mxu2 %v1488_v36 }
  0x4e   : > { %528 = vmatpush.bf16.msra.mxu1 %v1492_v37  ;;  %1576 = vmatpush.bf16.msra.mxu3 %v1492_v37 }
  0x51   : > { %480 = vmatpush.bf16.msra.mxu0 %v1480_v42  ;;  %1569 = vmatpush.bf16.msra.mxu2 %v1480_v42 }
  0x52   : > { %529 = vmatpush.bf16.msra.mxu1 %v1484_v43  ;;  %1577 = vmatpush.bf16.msra.mxu3 %v1484_v43 }
  0x55   : > { %481 = vmatpush.bf16.msra.mxu0 %v1472_v48  ;;  %1570 = vmatpush.bf16.msra.mxu2 %v1472_v48 }
  0x56   : > { %530 = vmatpush.bf16.msra.mxu1 %v1476_v49  ;;  %1578 = vmatpush.bf16.msra.mxu3 %v1476_v49 }
  0x58   : > { %482 = vmatmul.bf16.vlgmr.msra.gmra.mxu0 %v1539_v50  ;;  %502 = vmatmul.bf16.vlgmr.msra.gmra.mxu2 %v1543_v51 }
  0x59   : > { %531 = vmatmul.bf16.vlgmr.msra.gmra.mxu1 %v1539_v50  ;;  %551 = vmatmul.bf16.vlgmr.msra.gmra.mxu3 %v1543_v51 }
  0x68   : > { %487 = vmatmul.bf16.gmra.mxu0 %v1540_v52  ;;  %507 = vmatmul.bf16.gmra.mxu2 %v1544_v53 }
  0x69   : > { %536 = vmatmul.bf16.gmra.mxu1 %v1540_v52  ;;  %556 = vmatmul.bf16.gmra.mxu3 %v1544_v53 }
  0x78   : > { %492 = vmatmul.bf16.gmra.mxu0 %v1541_v54  ;;  %512 = vmatmul.bf16.gmra.mxu2 %v1545_v55 }
  0x79   : > { %541 = vmatmul.bf16.gmra.mxu1 %v1541_v54  ;;  %561 = vmatmul.bf16.gmra.mxu3 %v1545_v55 }
  0x88   : > { %497 = vmatmul.bf16.gmra.mxu0 %v1542_v56  ;;  %517 = vmatmul.bf16.gmra.mxu2 %v1546_v57 }
  0x89   : > { %546 = vmatmul.bf16.gmra.mxu1 %v1542_v56  ;;  %566 = vmatmul.bf16.gmra.mxu3 %v1546_v57 }
  0xd5   : > { %v483_v61 = vpop.f32.mrf.mxu0 }
  0xd6   : > { %v2022_v62 = vadd.f32 %v483_v61, %v2017_v59  ;;  %v532_v63 = vpop.f32.mrf.mxu1 }
  0xd7   : > { %v2025_v0 = vadd.f32 %v532_v63, %v2019_v60 }
  0xd8   : > { %575 = vst [vmem:[#allocation2 + $0xb0] sm:$0xff] %v2022_v62 }
  0xd9   : > { %576 = vst [vmem:[#allocation2] sm:$0xff] %v2025_v0  ;;  %v623_v1 = vmax.f32 %v2022_v62, %v2025_v0 }
  0xdb   : > { %624 = vmax.xlane.f32.xlu0 %v623_v1  ;;  %v503_v2 = vpop.f32.mrf.mxu2 }
  0xdc   : > { %v2032_v3 = vadd.f32 %v503_v2, %v2017_v59  ;;  %v552_v4 = vpop.f32.mrf.mxu3 }
  0xdd   : > { %v2035_v5 = vadd.f32 %v552_v4, %v2019_v60  ;;  %v485_v6 = vpop.f32.mrf.mxu0 }
  0xde   : > { %591 = vst [vmem:[#allocation2 + $0x38] sm:$0xff] %v2032_v3  ;;  %v2039_v7 = vadd.f32 %v485_v6, %v2017_v59  ;;  %v534_v8 = vpop.f32.mrf.mxu1 }
  0xdf   : > { %592 = vst [vmem:[#allocation2 + $0x58] sm:$0xff] %v2035_v5  ;;  %v2043_v9 = vadd.f32 %v534_v8, %v2019_v60  ;;  %v647_v10 = vmax.f32 %v2032_v3, %v2035_v5 }
  0xe0   : > { %577 = vst [vmem:[#allocation2 + $0xd8] sm:$0xff] %v2039_v7 }
  0xe1   : > { %578 = vst [vmem:[#allocation2 + $0x18] sm:$0xff] %v2043_v9  ;;  %648 = vmax.xlane.f32.xlu2 %v647_v10  ;;  %v626_v11 = vmax.f32 %v2039_v7, %v2043_v9 }
  0xe3   : > { %627 = vmax.xlane.f32.xlu0 %v626_v11  ;;  %v505_v12 = vpop.f32.mrf.mxu2 }
  0xe4   : > { %v2052_v13 = vadd.f32 %v505_v12, %v2017_v59  ;;  %v554_v14 = vpop.f32.mrf.mxu3 }
  0xe5   : > { %v2055_v15 = vadd.f32 %v554_v14, %v2019_v60  ;;  %v488_v16 = vpop.f32.mrf.mxu0 }
  0xe6   : > { %593 = vst [vmem:[#allocation2 + $0x40] sm:$0xff] %v2052_v13  ;;  %v2059_v17 = vadd.f32 %v488_v16, %v2017_v59  ;;  %v537_v18 = vpop.f32.mrf.mxu1 }
  0xe7   : > { %594 = vst [vmem:[#allocation2 + $0xc8] sm:$0xff] %v2055_v15  ;;  %v2063_v19 = vadd.f32 %v537_v18, %v2019_v60  ;;  %v650_v21 = vmax.f32 %v2052_v13, %v2055_v15 }
  0xe8   : > { %579 = vst [vmem:[#allocation2 + $0x50] sm:$0xff] %v2059_v17 }
  0xe9   : > { %580 = vst [vmem:[#allocation2 + $0x68] sm:$0xff] %v2063_v19  ;;  %v629_v20 = vmax.f32 %v2059_v17, %v2063_v19 }
  0xeb   : > { %630 = vmax.xlane.f32.xlu1 %v629_v20  ;;  %651 = vmax.xlane.f32.xlu0 %v650_v21  ;;  %v508_v22 = vpop.f32.mrf.mxu2 }
  0xec   : > { %v2072_v23 = vadd.f32 %v508_v22, %v2017_v59  ;;  %v557_v24 = vpop.f32.mrf.mxu3 }
  0xed   : > { %v2075_v25 = vadd.f32 %v557_v24, %v2019_v60  ;;  %v490_v26 = vpop.f32.mrf.mxu0 }
  0xee   : > { %595 = vst [vmem:[#allocation2 + $0xe0] sm:$0xff] %v2072_v23  ;;  %v2079_v27 = vadd.f32 %v490_v26, %v2017_v59  ;;  %v539_v28 = vpop.f32.mrf.mxu1 }
  0xef   : > { %596 = vst [vmem:[#allocation2 + $0x90] sm:$0xff] %v2075_v25  ;;  %v2083_v29 = vadd.f32 %v539_v28, %v2019_v60  ;;  %v653_v30 = vmax.f32 %v2072_v23, %v2075_v25  ;;  %v1813_v28 = vmov 0  }
  0xf0   : > { %581 = vst [vmem:[#allocation2 + $0x30] sm:$0xff] %v2079_v27  ;;  %1621 = vset.pattern.permute.xlu1 %v1813_v28  ;;  %1622 = vset.pattern.permute.xlu2 %v1813_v28 }
  0xf1   : > { %582 = vst [vmem:[#allocation2 + $0x48] sm:$0xff] %v2083_v29  ;;  %v632_v40 = vmax.f32 %v2079_v27, %v2083_v29  ;;  %1623 = vset.pattern.permute.xlu0 %v1813_v28 }
  0xf3   : > { %654 = vmax.xlane.f32.xlu1 %v653_v30  ;;  %v510_v31 = vpop.f32.mrf.mxu2  ;;  %v2181_v30 = vld [vmem:[#allocation3] sm:$0xff] }
  0xf4   : > { %v2090_v32 = vadd.f32 %v510_v31, %v2017_v59  ;;  %v559_v33 = vpop.f32.mrf.mxu3 }
  0xf5   : > { %v2093_v34 = vadd.f32 %v559_v33, %v2019_v60  ;;  %v493_v35 = vpop.f32.mrf.mxu0  ;;  %v2191_v33 = vld [vmem:[#allocation3 + $0x40] sm:$0xff] }
  0xf6   : > { %597 = vst [vmem:[#allocation2 + $0x70] sm:$0xff] %v2090_v32  ;;  %v2097_v36 = vadd.f32 %v493_v35, %v2017_v59  ;;  %v542_v37 = vpop.f32.mrf.mxu1 }
  0xf7   : > { %598 = vst [vmem:[#allocation2 + $0xc0] sm:$0xff] %v2093_v34  ;;  %v2101_v38 = vadd.f32 %v542_v37, %v2019_v60  ;;  %v656_v39 = vmax.f32 %v2090_v32, %v2093_v34  ;;  %v2193_v37 = vld [vmem:[#allocation3 + $0x8] sm:$0xff] }
  0xf8   : > { %583 = vst [vmem:[#allocation2 + $0x80] sm:$0xff] %v2097_v36 }
  0xf9   : > { %584 = vst [vmem:[#allocation2 + $0x88] sm:$0xff] %v2101_v38  ;;  %657 = vmax.xlane.f32.xlu2 %v656_v39  ;;  %v635_v46 = vmax.f32 %v2097_v36, %v2101_v38 }
  0xfb   : > { %633 = vmax.xlane.f32.xlu1 %v632_v40  ;;  %v513_v41 = vpop.f32.mrf.mxu2 }
  0xfc   : > { %v2110_v42 = vadd.f32 %v513_v41, %v2017_v59  ;;  %v562_v43 = vpop.f32.mrf.mxu3 }
  0xfd   : > { %v2113_v44 = vadd.f32 %v562_v43, %v2019_v60  ;;  %v495_v45 = vpop.f32.mrf.mxu0 }
  0xfe   : > { %599 = vst [vmem:[#allocation2 + $0xa8] sm:$0xff] %v2110_v42  ;;  %v2119_v47 = vadd.f32 %v495_v45, %v2017_v59  ;;  %v544_v48 = vpop.f32.mrf.mxu1 }
  0xff   : > { %600 = vst [vmem:[#allocation2 + $0xd0] sm:$0xff] %v2113_v44  ;;  %v2123_v49 = vadd.f32 %v544_v48, %v2019_v60  ;;  %v659_v50 = vmax.f32 %v2110_v42, %v2113_v44  ;;  %v2213_v48 = vld [vmem:[#allocation3 + $0x48] sm:$0xff] }
 0x100   : > { %585 = vst [vmem:[#allocation2 + $0xe8] sm:$0xff] %v2119_v47 }
 0x101   : > { %586 = vst [vmem:[#allocation2 + $0xb8] sm:$0xff] %v2123_v49  ;;  %636 = vmax.xlane.f32.xlu2 %v635_v46  ;;  %660 = vmax.xlane.f32.xlu0 %v659_v50  ;;  %v638_v61 = vmax.f32 %v2119_v47, %v2123_v49  ;;  %v2211_v46 = vld [vmem:[#allocation3 + $0x10] sm:$0xff] }
 0x103   : > { %v515_v51 = vpop.f32.mrf.mxu2 }
 0x104   : > { %v2130_v52 = vadd.f32 %v515_v51, %v2017_v59  ;;  %v564_v53 = vpop.f32.mrf.mxu3 }
 0x105   : > { %v2133_v54 = vadd.f32 %v564_v53, %v2019_v60  ;;  %v498_v55 = vpop.f32.mrf.mxu0 }
 0x106   : > { %601 = vst [vmem:[#allocation2 + $0x10] sm:$0xff] %v2130_v52  ;;  %v2137_v56 = vadd.f32 %v498_v55, %v2017_v59  ;;  %v547_v57 = vpop.f32.mrf.mxu1 }
 0x107   : > { %602 = vst [vmem:[#allocation2 + $0x28] sm:$0xff] %v2133_v54  ;;  %v2141_v58 = vadd.f32 %v547_v57, %v2019_v60  ;;  %v662_v63 = vmax.f32 %v2130_v52, %v2133_v54 }
 0x108   : > { %587 = vst [vmem:[#allocation2 + $0x60] sm:$0xff] %v2137_v56 }
 0x109   : > { %588 = vst [vmem:[#allocation2 + $0xf0] sm:$0xff] %v2141_v58  ;;  %639 = vmax.xlane.f32.xlu2 %v638_v61  ;;  %663 = vmax.xlane.f32.xlu1 %v662_v63  ;;  %v641_v1 = vmax.f32 %v2137_v56, %v2141_v58  ;;  %v2230_v63 = vld [vmem:[#allocation3 + $0x50] sm:$0xff] }
 0x10b   : > { %642 = vmax.xlane.f32.xlu0 %v641_v1  ;;  %v518_v2 = vpop.f32.mrf.mxu2 }
 0x10c   : > { %v2152_v4 = vadd.f32 %v518_v2, %v2017_v59  ;;  %v567_v6 = vpop.f32.mrf.mxu3 }
 0x10d   : > { %v2155_v8 = vadd.f32 %v567_v6, %v2019_v60  ;;  %v500_v10 = vpop.f32.mrf.mxu0  ;;  %v2312_v6 = vld [vmem:[#allocation3 + $0x38] sm:$0xff] }
 0x10e   : > { %603 = vst [vmem:[#allocation2 + $0xa0] sm:$0xff] %v2152_v4  ;;  %v2159_v11 = vadd.f32 %v500_v10, %v2017_v59  ;;  %v549_v12 = vpop.f32.mrf.mxu1  ;;  %v2241_v10 = vld [vmem:[#allocation3 + $0x58] sm:$0xff] }
 0x10f   : > { %604 = vst [vmem:[#allocation2 + $0xf8] sm:$0xff] %v2155_v8  ;;  %v2163_v14 = vadd.f32 %v549_v12, %v2019_v60  ;;  %v665_v16 = vmax.f32 %v2152_v4, %v2155_v8 }
 0x110   : > { %589 = vst [vmem:[#allocation2 + $0x8] sm:$0xff] %v2159_v11 }
 0x111   : > { %590 = vst [vmem:[#allocation2 + $0x78] sm:$0xff] %v2163_v14  ;;  %666 = vmax.xlane.f32.xlu2 %v665_v16  ;;  %v644_v18 = vmax.f32 %v2159_v11, %v2163_v14  ;;  %v2243_v16 = vld [vmem:[#allocation3 + $0x18] sm:$0xff] }
 0x112   : > { %2486 = vst [vmem:[#allocation17_spill] sm:$0xff] %v2312_v6 }
 0x113   : > { %645 = vmax.xlane.f32.xlu1 %v644_v18  ;;  %v520_v20 = vpop.f32.mrf.mxu2 }
 0x114   : > { %v2172_v21 = vadd.f32 %v520_v20, %v2017_v59  ;;  %v569_v22 = vpop.f32.mrf.mxu3 }
 0x115   : > { %v2175_v24 = vadd.f32 %v569_v22, %v2019_v60 }
 0x116   : > { %605 = vst [vmem:[#allocation2 + $0x20] sm:$0xff] %v2172_v21 }
 0x117   : > { %606 = vst [vmem:[#allocation2 + $0x98] sm:$0xff] %v2175_v24  ;;  %v668_v26 = vmax.f32 %v2172_v21, %v2175_v24 }
 0x119   : > { %669 = vmax.xlane.f32.xlu0 %v668_v26 }
 0x14e   : > { %v625_v59 = vpop.xlane.xlu0 %624 }
 0x14f   : > { %v2184_v31 = vmax.f32 %v2181_v30, %v625_v59  ;;  %v2261_v59 = vld [vmem:[#allocation3 + $0x20] sm:$0xff] }
 0x151   : > { %1024 = vst.msk [vmem:[#allocation3] sm:$0xff] %vm1007_vm1, %v2184_v31  ;;  %769 = vperm.xlu1 %1621, %v2184_v31  }
 0x154   : > { %v649_v35 = vpop.xlane.xlu2 %648 }
 0x155   : > { %v2196_v39 = vmax.f32 %v2191_v33, %v649_v35  ;;  %v2263_v35 = vld [vmem:[#allocation3 + $0x60] sm:$0xff] }
 0x156   : > { %v628_v40 = vpop.xlane.xlu0 %627  ;;  %2477 = vst [vmem:[#allocation8_spill] sm:$0xff] %v2263_v35 }
 0x157   : > { %1032 = vst.msk [vmem:[#allocation3 + $0x40] sm:$0xff] %vm1007_vm1, %v2196_v39  ;;  %v2203_v43 = vmax.f32 %v2193_v37, %v628_v40 }
 0x159   : > { %1025 = vst.msk [vmem:[#allocation3 + $0x8] sm:$0xff] %vm1007_vm1, %v2203_v43  ;;  %809 = vperm.xlu1 %1621, %v2196_v39   ;;  %774 = vperm.xlu2 %1622, %v2203_v43  }
 0x15e   : > { %v631_v50 = vpop.xlane.xlu1 %630  ;;  %v652_v51 = vpop.xlane.xlu0 %651 }
 0x15f   : > { %v2216_v53 = vmax.f32 %v2211_v46, %v631_v50  ;;  %v2219_v55 = vmax.f32 %v2213_v48, %v652_v51 }
 0x161   : > { %1026 = vst.msk [vmem:[#allocation3 + $0x10] sm:$0xff] %vm1007_vm1, %v2216_v53  ;;  %814 = vperm.xlu0 %1623, %v2219_v55  }
 0x162   : > { %1033 = vst.msk [vmem:[#allocation3 + $0x48] sm:$0xff] %vm1007_vm1, %v2219_v55 }
 0x166   : > { %v655_v1 = vpop.xlane.xlu1 %654 }
 0x167   : > { %v2233_v2 = vmax.f32 %v2230_v63, %v655_v1 }
 0x169   : > { %1034 = vst.msk [vmem:[#allocation3 + $0x50] sm:$0xff] %vm1007_vm1, %v2233_v2  ;;  %819 = vperm.xlu2 %1622, %v2233_v2   ;;  %779 = vperm.xlu0 %1623, %v2216_v53  }
 0x16c   : > { %v658_v12 = vpop.xlane.xlu2 %657 }
 0x16d   : > { %v2246_v18 = vmax.f32 %v2241_v10, %v658_v12  ;;  %v2285_v12 = vld [vmem:[#allocation3 + $0x30] sm:$0xff] }
 0x16e   : > { %v634_v20 = vpop.xlane.xlu1 %633  ;;  %2481 = vst [vmem:[#allocation12_spill] sm:$0xff] %v2285_v12 }
 0x16f   : > { %1035 = vst.msk [vmem:[#allocation3 + $0x58] sm:$0xff] %vm1007_vm1, %v2246_v18  ;;  %v2253_v26 = vmax.f32 %v2243_v16, %v634_v20  ;;  %824 = vperm.xlu1 %1621, %v2246_v18  }
 0x171   : > { %1027 = vst.msk [vmem:[#allocation3 + $0x18] sm:$0xff] %vm1007_vm1, %v2253_v26  ;;  %784 = vperm.xlu2 %1622, %v2253_v26  }
 0x174   : > { %v637_v40 = vpop.xlane.xlu2 %636  ;;  %v661_v50 = vpop.xlane.xlu0 %660 }
 0x175   : > { %v2266_v51 = vmax.f32 %v2261_v59, %v637_v40  ;;  %v2269_v1 = vmax.f32 %v2263_v35, %v661_v50  ;;  %v2281_v40 = vld [vmem:[#allocation3 + $0x28] sm:$0xff] }
 0x176   : > { %2479 = vst [vmem:[#allocation10_spill] sm:$0xff] %v2281_v40  ;;  %v2283_v50 = vld [vmem:[#allocation3 + $0x68] sm:$0xff] }
 0x177   : > { %2478 = vst [vmem:[#allocation9_spill] sm:$0xff] %v2269_v1  ;;  %789 = vperm.xlu1 %1621, %v2266_v51   ;;  %829 = vperm.xlu0 %1623, %v2269_v1  }
 0x178   : > { %1028 = vst.msk [vmem:[#allocation3 + $0x20] sm:$0xff] %vm1007_vm1, %v2266_v51 }
 0x179   : > { %1036 = vst.msk [vmem:[#allocation3 + $0x60] sm:$0xff] %vm1007_vm1, %v2269_v1 }
 0x17a   : > { %2480 = vst [vmem:[#allocation11_spill] sm:$0xff] %v2283_v50 }
 0x17c   : > { %v640_v22 = vpop.xlane.xlu2 %639  ;;  %v664_v57 = vpop.xlane.xlu1 %663 }
 0x17d   : > { %v2288_v61 = vmax.f32 %v2281_v40, %v640_v22  ;;  %v2291_v20 = vmax.f32 %v2283_v50, %v664_v57  ;;  %v2310_v22 = vld [vmem:[#allocation3 + $0x70] sm:$0xff] }
 0x17e   : > { %v643_v28 = vpop.xlane.xlu0 %642  ;;  %2485 = vst [vmem:[#allocation16_spill] sm:$0xff] %v2310_v22 }
 0x17f   : > { %2482 = vst [vmem:[#allocation13_spill] sm:$0xff] %v2288_v61  ;;  %v2300_v60 = vmax.f32 %v2285_v12, %v643_v28  ;;  %794 = vperm.xlu2 %1622, %v2288_v61  }
 0x180   : > { %2483 = vst [vmem:[#allocation14_spill] sm:$0xff] %v2291_v20 }
 0x181   : > { %1029 = vst.msk [vmem:[#allocation3 + $0x28] sm:$0xff] %vm1007_vm1, %v2288_v61  ;;  %799 = vperm.xlu1 %1621, %v2300_v60  }
 0x182   : > { %2484 = vst [vmem:[#allocation15_spill] sm:$0xff] %v2300_v60 }
 0x183   : > { %1037 = vst.msk [vmem:[#allocation3 + $0x68] sm:$0xff] %vm1007_vm1, %v2291_v20 }
 0x184   : > { %1030 = vst.msk [vmem:[#allocation3 + $0x30] sm:$0xff] %vm1007_vm1, %v2300_v60  ;;  %v667_v41 = vpop.xlane.xlu2 %666 }
 0x185   : > { %v2315_v28 = vmax.f32 %v2310_v22, %v667_v41  ;;  %v2330_v41 = vld [vmem:[#allocation3 + $0x78] sm:$0xff] }
 0x186   : > { %v646_v45 = vpop.xlane.xlu1 %645  ;;  %2489 = vst [vmem:[#allocation20_spill] sm:$0xff] %v2330_v41 }
 0x187   : > { %2487 = vst [vmem:[#allocation18_spill] sm:$0xff] %v2315_v28  ;;  %v2322_v57 = vmax.f32 %v2312_v6, %v646_v45  ;;  %834 = vperm.xlu2 %1622, %v2291_v20  }
 0x188   : > { %1038 = vst.msk [vmem:[#allocation3 + $0x70] sm:$0xff] %vm1007_vm1, %v2315_v28 }
 0x189   : > { %2488 = vst [vmem:[#allocation19_spill] sm:$0xff] %v2322_v57  ;;  %839 = vperm.xlu1 %1621, %v2315_v28  }
 0x18a   : > { %1031 = vst.msk [vmem:[#allocation3 + $0x38] sm:$0xff] %vm1007_vm1, %v2322_v57 }
 0x18c   : > { %v670_v12 = vpop.xlane.xlu0 %669 }
 0x18d   : > { %v2333_v50 = vmax.f32 %v2330_v41, %v670_v12 }
 0x18f   : > { %2490 = vst [vmem:[#allocation21_spill] sm:$0xff] %v2333_v50  ;;  %804 = vperm.xlu2 %1622, %v2322_v57   ;;  %844 = vperm.xlu0 %1623, %v2333_v50  }
 0x190   : > { %1039 = vst.msk [vmem:[#allocation3 + $0x78] sm:$0xff] %vm1007_vm1, %v2333_v50 }
 0x1b3   : > { %v775_v60 = vpop.permute.xlu2 %774 }
 0x1b4   : > { %v849_v22 = vsub.f32 %v2039_v7, %v775_v60  ;;  %v850_v28 = vsub.f32 %v2043_v9, %v775_v60 }
 0x1b6   : > { %v883_v20 = vmul.f32 1.442695, %v849_v22  ;;  %v885_v6 = vmul.f32 1.442695, %v850_v28 }
 0x1b8   : > { %1624 = vpow2.f32 %v883_v20 }
 0x1b9   : > { %1626 = vpow2.f32 %v885_v6 }
 0x1be   : > { %v1625_v12 = vpop.eup %1624 }
 0x1bf   : > { %v1627_v1 = vpop.eup %1626 }
 0x1c0   : > { %v946_v35 = vadd.f32 %v1627_v1, %v1625_v12 }
 0x1c2   : > { %947 = vadd.xlane.f32.xlu1 %v946_v35 }
 0x1c3   : > { %v770_v45 = vpop.permute.xlu1 %769  ;;  %v820_v41 = vpop.permute.xlu2 %819 }
 0x1c4   : > { %v847_v61 = vsub.f32 %v2022_v62, %v770_v45  ;;  %v848_v57 = vsub.f32 %v2025_v0, %v770_v45  ;;  %v867_v50 = vsub.f32 %v2072_v23, %v820_v41  ;;  %v868_v7 = vsub.f32 %v2075_v25, %v820_v41 }
 0x1c6   : > { %v879_v40 = vmul.f32 1.442695, %v847_v61  ;;  %v881_v9 = vmul.f32 1.442695, %v848_v57  ;;  %v919_v60 = vmul.f32 1.442695, %v867_v50 }
 0x1c7   : > { %v921_v22 = vmul.f32 1.442695, %v868_v7 }
 0x1c8   : > { %1628 = vpow2.f32 %v879_v40 }
 0x1c9   : > { %1630 = vpow2.f32 %v881_v9 }
 0x1ca   : > { %1632 = vpow2.f32 %v919_v60 }
 0x1cb   : > { %1634 = vpow2.f32 %v921_v22  ;;  %v810_v6 = vpop.permute.xlu1 %809  ;;  %v785_v35 = vpop.permute.xlu2 %784 }
 0x1cc   : > { %v863_v1 = vsub.f32 %v2032_v3, %v810_v6  ;;  %v864_v62 = vsub.f32 %v2035_v5, %v810_v6  ;;  %v853_v23 = vsub.f32 %v2079_v27, %v785_v35  ;;  %v854_v61 = vsub.f32 %v2083_v29, %v785_v35 }
 0x1ce   : > { %v1629_v20 = vpop.eup %1628  ;;  %v911_v0 = vmul.f32 1.442695, %v863_v1  ;;  %v913_v28 = vmul.f32 1.442695, %v864_v62  ;;  %v891_v41 = vmul.f32 1.442695, %v853_v23 }
 0x1cf   : > { %v1631_v25 = vpop.eup %1630  ;;  %v893_v12 = vmul.f32 1.442695, %v854_v61 }
 0x1d0   : > { %v1633_v50 = vpop.eup %1632  ;;  %1636 = vpow2.f32 %v911_v0  ;;  %v943_v40 = vadd.f32 %v1631_v25, %v1629_v20 }
 0x1d1   : > { %v1635_v57 = vpop.eup %1634  ;;  %1638 = vpow2.f32 %v913_v28 }
 0x1d2   : > { %944 = vadd.xlane.f32.xlu2 %v943_v40  ;;  %v973_v45 = vadd.f32 %v1635_v57, %v1633_v50  ;;  %1640 = vpow2.f32 %v891_v41 }
 0x1d3   : > { %v815_v3 = vpop.permute.xlu0 %814  ;;  %1642 = vpow2.f32 %v893_v12 }
 0x1d4   : > { %974 = vadd.xlane.f32.xlu1 %v973_v45  ;;  %v865_v5 = vsub.f32 %v2052_v13, %v815_v3  ;;  %v866_v7 = vsub.f32 %v2055_v15, %v815_v3 }
 0x1d6   : > { %v1637_v9 = vpop.eup %1636  ;;  %v915_v27 = vmul.f32 1.442695, %v865_v5  ;;  %v917_v60 = vmul.f32 1.442695, %v866_v7 }
 0x1d7   : > { %v1639_v29 = vpop.eup %1638 }
 0x1d8   : > { %1644 = vpow2.f32 %v915_v27  ;;  %v967_v22 = vadd.f32 %v1639_v29, %v1637_v9  ;;  %v1641_v1 = vpop.eup %1640 }
 0x1d9   : > { %1646 = vpow2.f32 %v917_v60  ;;  %v795_v6 = vpop.permute.xlu2 %794  ;;  %v1643_v13 = vpop.eup %1642 }
 0x1da   : > { %968 = vadd.xlane.f32.xlu2 %v967_v22  ;;  %v952_v25 = vadd.f32 %v1643_v13, %v1641_v1  ;;  %v858_v12 = vsub.f32 %v2123_v49, %v795_v6 }
 0x1db   : > { %v780_v35 = vpop.permute.xlu0 %779 }
 0x1dc   : > { %v851_v62 = vsub.f32 %v2059_v17, %v780_v35  ;;  %v852_v20 = vsub.f32 %v2063_v19, %v780_v35  ;;  %v857_v17 = vsub.f32 %v2119_v47, %v795_v6  ;;  %v901_v27 = vmul.f32 1.442695, %v858_v12 }
 0x1de   : > { %v1645_v0 = vpop.eup %1644  ;;  %v887_v15 = vmul.f32 1.442695, %v851_v62  ;;  %v889_v28 = vmul.f32 1.442695, %v852_v20  ;;  %v899_v7 = vmul.f32 1.442695, %v857_v17 }
 0x1df   : > { %v1647_v23 = vpop.eup %1646 }
 0x1e0   : > { %1648 = vpow2.f32 %v887_v15  ;;  %v970_v61 = vadd.f32 %v1647_v23, %v1645_v0 }
 0x1e1   : > { %1650 = vpow2.f32 %v889_v28  ;;  %v825_v50 = vpop.permute.xlu1 %824  ;;  %v2355_v40 = vpop.permute.xlu2 %834 }
 0x1e2   : > { %v869_v57 = vsub.f32 %v2090_v32, %v825_v50  ;;  %v870_v41 = vsub.f32 %v2093_v34, %v825_v50  ;;  %953 = vadd.xlane.f32.xlu2 %v952_v25  ;;  %971 = vadd.xlane.f32.xlu0 %v970_v61 }
 0x1e4   : > { %v923_v19 = vmul.f32 1.442695, %v869_v57  ;;  %v925_v45 = vmul.f32 1.442695, %v870_v41  ;;  %v874_v57 = vsub.f32 %v2133_v54, %v2355_v40 }
 0x1e6   : > { %v1649_v3 = vpop.eup %1648  ;;  %1652 = vpow2.f32 %v923_v19 }
 0x1e7   : > { %v1651_v5 = vpop.eup %1650  ;;  %1654 = vpow2.f32 %v925_v45 }
 0x1e8   : > { %v949_v9 = vadd.f32 %v1651_v5, %v1649_v3  ;;  %1656 = vpow2.f32 %v899_v7  ;;  %v933_v5 = vmul.f32 1.442695, %v874_v57 }
 0x1e9   : > { %v790_v60 = vpop.permute.xlu1 %789  ;;  %v805_v29 = vpop.permute.xlu2 %804  ;;  %1658 = vpow2.f32 %v901_v27 }
 0x1ea   : > { %v855_v32 = vsub.f32 %v2097_v36, %v790_v60  ;;  %v856_v34 = vsub.f32 %v2101_v38, %v790_v60  ;;  %v830_v22 = vpop.permute.xlu0 %829  ;;  %950 = vadd.xlane.f32.xlu0 %v949_v9  ;;  %v861_v62 = vsub.f32 %v2159_v11, %v805_v29  ;;  %v862_v13 = vsub.f32 %v2163_v14, %v805_v29 }
 0x1eb   : > { %v871_v47 = vsub.f32 %v2110_v42, %v830_v22  ;;  %v872_v35 = vsub.f32 %v2113_v44, %v830_v22  ;;  %v873_v11 = vsub.f32 %v2130_v52, %v2355_v40 }
 0x1ec   : > { %v1653_v49 = vpop.eup %1652  ;;  %v895_v6 = vmul.f32 1.442695, %v855_v32  ;;  %v897_v1 = vmul.f32 1.442695, %v856_v34  ;;  %v907_v15 = vmul.f32 1.442695, %v861_v62 }
 0x1ed   : > { %v1655_v20 = vpop.eup %1654  ;;  %v927_v36 = vmul.f32 1.442695, %v871_v47  ;;  %v929_v38 = vmul.f32 1.442695, %v872_v35  ;;  %v909_v42 = vmul.f32 1.442695, %v862_v13 }
 0x1ee   : > { %1660 = vpow2.f32 %v895_v6  ;;  %v976_v0 = vadd.f32 %v1655_v20, %v1653_v49  ;;  %v1657_v28 = vpop.eup %1656  ;;  %v931_v3 = vmul.f32 1.442695, %v873_v11  ;;  %v2492_v11 = vsub.f32 %v2181_v30, %v2184_v31 }
 0x1ef   : > { %1662 = vpow2.f32 %v897_v1  ;;  %v1659_v44 = vpop.eup %1658 }
 0x1f0   : > { %977 = vadd.xlane.f32.xlu2 %v976_v0  ;;  %1664 = vpow2.f32 %v927_v36  ;;  %v958_v19 = vadd.f32 %v1659_v44, %v1657_v28  ;;  %v688_v28 = vld [vmem:[#allocation4 + $0x8] sm:$0xff] }
 0x1f1   : > { %1666 = vpow2.f32 %v929_v38 }
 0x1f2   : > { %1668 = vpow2.f32 %v907_v15 }
 0x1f3   : > { %v800_v23 = vpop.permute.xlu1 %799  ;;  %1670 = vpow2.f32 %v909_v42 }
 0x1f4   : > { %v1661_v25 = vpop.eup %1660  ;;  %v859_v14 = vsub.f32 %v2137_v56, %v800_v23  ;;  %v860_v61 = vsub.f32 %v2141_v58, %v800_v23 }
 0x1f5   : > { %v1663_v50 = vpop.eup %1662 }
 0x1f6   : > { %v903_v41 = vmul.f32 1.442695, %v859_v14  ;;  %v905_v17 = vmul.f32 1.442695, %v860_v61  ;;  %v955_v45 = vadd.f32 %v1663_v50, %v1661_v25  ;;  %v1665_v12 = vpop.eup %1664  ;;  %v719_v14 = vmul.f32 1.442695, %v2492_v11 }
 0x1f7   : > { %v1667_v52 = vpop.eup %1666  ;;  %v2493_v61 = vsub.f32 %v2230_v63, %v2233_v2 }
 0x1f8   : > { %1672 = vpow2.f32 %v903_v41  ;;  %959 = vadd.xlane.f32.xlu2 %v958_v19  ;;  %956 = vadd.xlane.f32.xlu1 %v955_v45  ;;  %v1669_v56 = vpop.eup %1668  ;;  %v979_v7 = vadd.f32 %v1667_v52, %v1665_v12  ;;  %v687_v41 = vld [vmem:[#allocation4] sm:$0xff]  ;;  %v697_v19 = vld [vmem:[#allocation4 + $0x50] sm:$0xff]  ;;  %v2496_v52 = vsub.f32 %v2213_v48, %v2219_v55  ;;  %v690_v55 = vld [vmem:[#allocation4 + $0x18] sm:$0xff] }
 0x1f9   : > { %1674 = vpow2.f32 %v905_v17  ;;  %v1671_v58 = vpop.eup %1670  ;;  %v739_v50 = vmul.f32 1.442695, %v2493_v61  ;;  %v691_v61 = vld [vmem:[#allocation4 + $0x20] sm:$0xff] }
 0x1fa   : > { %1676 = vpow2.f32 %v931_v3  ;;  %980 = vadd.xlane.f32.xlu0 %v979_v7  ;;  %v964_v32 = vadd.f32 %v1671_v58, %v1669_v56  ;;  %v2495_v3 = vsub.f32 %v2243_v16, %v2253_v26  ;;  %v695_v56 = vld [vmem:[#allocation4 + $0x40] sm:$0xff]  ;;  %v2497_v16 = vsub.f32 %v2211_v46, %v2216_v53  ;;  %v689_v53 = vld [vmem:[#allocation4 + $0x10] sm:$0xff] }
 0x1fb   : > { %v840_v9 = vpop.permute.xlu1 %839  ;;  %1678 = vpow2.f32 %v933_v5  ;;  %v737_v5 = vmul.f32 1.442695, %v2496_v52 }
 0x1fc   : > { %v875_v54 = vsub.f32 %v2152_v4, %v840_v9  ;;  %v876_v40 = vsub.f32 %v2155_v8, %v840_v9  ;;  %v725_v63 = vmul.f32 1.442695, %v2495_v3  ;;  %v723_v26 = vmul.f32 1.442695, %v2497_v16 }
 0x1fe   : > { %v1673_v27 = vpop.eup %1672  ;;  %v935_v60 = vmul.f32 1.442695, %v875_v54  ;;  %v937_v29 = vmul.f32 1.442695, %v876_v40  ;;  %v696_v40 = vld [vmem:[#allocation4 + $0x48] sm:$0xff] }
 0x1ff   : > { %v1675_v34 = vpop.eup %1674 }
 0x200   : > { %1680 = vpow2.f32 %v935_v60  ;;  %965 = vadd.xlane.f32.xlu1 %v964_v32  ;;  %v961_v22 = vadd.f32 %v1675_v34, %v1673_v27  ;;  %v1677_v35 = vpop.eup %1676  ;;  %v2498_v60 = vsub.f32 %v2241_v10, %v2246_v18 }
 0x201   : > { %1682 = vpow2.f32 %v937_v29  ;;  %v845_v47 = vpop.permute.xlu0 %844  ;;  %v1679_v1 = vpop.eup %1678 }
 0x202   : > { %v877_v49 = vsub.f32 %v2172_v21, %v845_v47  ;;  %v878_v6 = vsub.f32 %v2175_v24, %v845_v47  ;;  %962 = vadd.xlane.f32.xlu0 %v961_v22  ;;  %v982_v20 = vadd.f32 %v1679_v1, %v1677_v35  ;;  %v2491_v21 = vsub.f32 %v2193_v37, %v2203_v43  ;;  %v2500_v1 = vld [vmem:[#allocation10_spill] sm:$0xff] }
 0x203   : > { %v2494_v37 = vsub.f32 %v2191_v33, %v2196_v39  ;;  %v741_v29 = vmul.f32 1.442695, %v2498_v60 }
 0x204   : > { %v939_v4 = vmul.f32 1.442695, %v877_v49  ;;  %v941_v8 = vmul.f32 1.442695, %v878_v6  ;;  %v721_v24 = vmul.f32 1.442695, %v2491_v21  ;;  %v2499_v49 = vsub.f32 %v2261_v59, %v2266_v51 }
 0x205   : > { %v735_v43 = vmul.f32 1.442695, %v2494_v37  ;;  %v2510_v37 = vld [vmem:[#allocation15_spill] sm:$0xff] }
 0x206   : > { %v1681_v62 = vpop.eup %1680  ;;  %1684 = vpow2.f32 %v939_v4  ;;  %v727_v6 = vmul.f32 1.442695, %v2499_v49  ;;  %v2501_v4 = vld [vmem:[#allocation13_spill] sm:$0xff] }
 0x207   : > { %v1683_v13 = vpop.eup %1682  ;;  %1686 = vpow2.f32 %v941_v8  ;;  %v2502_v10 = vsub.f32 %v2500_v1, %v2501_v4  ;;  %v701_v1 = vld [vmem:[#allocation4 + $0x70] sm:$0xff] }
 0x208   : > { %983 = vadd.xlane.f32.xlu1 %v982_v20  ;;  %v985_v36 = vadd.f32 %v1683_v13, %v1681_v62  ;;  %1688 = vpow2.f32 %v721_v24 }
 0x209   : > { %1690 = vpow2.f32 %v719_v14  ;;  %v729_v18 = vmul.f32 1.442695, %v2502_v10  ;;  %v692_v14 = vld [vmem:[#allocation4 + $0x28] sm:$0xff] }
 0x20a   : > { %986 = vadd.xlane.f32.xlu2 %v985_v36  ;;  %1692 = vpow2.f32 %v739_v50  ;;  %v698_v36 = vld [vmem:[#allocation4 + $0x58] sm:$0xff]  ;;  %v2509_v50 = vld [vmem:[#allocation12_spill] sm:$0xff] }
 0x20b   : > { %1694 = vpow2.f32 %v735_v43  ;;  %v2511_v43 = vsub.f32 %v2509_v50, %v2510_v37 }
 0x20c   : > { %v1685_v0 = vpop.eup %1684  ;;  %1696 = vpow2.f32 %v725_v63  ;;  %v2512_v63 = vld [vmem:[#allocation11_spill] sm:$0xff] }
 0x20d   : > { %v1687_v38 = vpop.eup %1686  ;;  %1698 = vpow2.f32 %v737_v5 }
 0x20e   : > { %v988_v15 = vadd.f32 %v1687_v38, %v1685_v0  ;;  %v1689_v42 = vpop.eup %1688  ;;  %1700 = vpow2.f32 %v723_v26  ;;  %v2503_v0 = vld [vmem:[#allocation8_spill] sm:$0xff]  ;;  %v2504_v38 = vld [vmem:[#allocation9_spill] sm:$0xff]  ;;  %v694_v26 = vld [vmem:[#allocation4 + $0x38] sm:$0xff] }
 0x20f   : > { %v752_v44 = vmul.f32 %v1689_v42, %v688_v28  ;;  %v1691_v57 = vpop.eup %1690  ;;  %1702 = vpow2.f32 %v741_v29  ;;  %v2506_v42 = vld [vmem:[#allocation17_spill] sm:$0xff]  ;;  %v2507_v28 = vld [vmem:[#allocation19_spill] sm:$0xff]  ;;  %v2518_v29 = vld [vmem:[#allocation20_spill] sm:$0xff] }
 0x210   : > { %989 = vadd.xlane.f32.xlu0 %v988_v15  ;;  %v1693_v17 = vpop.eup %1692  ;;  %v751_v45 = vmul.f32 %v1691_v57, %v687_v41  ;;  %1704 = vpow2.f32 %v727_v6  ;;  %v2505_v15 = vsub.f32 %v2503_v0, %v2504_v38  ;;  %v731_v57 = vmul.f32 1.442695, %v2511_v43 }
 0x211   : > { %v761_v12 = vmul.f32 %v1693_v17, %v697_v19  ;;  %v1695_v39 = vpop.eup %1694  ;;  %1706 = vpow2.f32 %v729_v18 }
 0x212   : > { %v759_v7 = vmul.f32 %v1695_v39, %v695_v56  ;;  %v1697_v48 = vpop.eup %1696  ;;  %v743_v21 = vmul.f32 1.442695, %v2505_v15  ;;  %v2515_v56 = vld [vmem:[#allocation16_spill] sm:$0xff] }
 0x213   : > { %v1699_v54 = vpop.eup %1698  ;;  %v754_v27 = vmul.f32 %v1697_v48, %v690_v55 }
 0x214   : > { %v760_v34 = vmul.f32 %v1699_v54, %v696_v40  ;;  %v1701_v46 = vpop.eup %1700  ;;  %1708 = vpow2.f32 %v743_v21 }
 0x215   : > { %v753_v8 = vmul.f32 %v1701_v46, %v689_v53  ;;  %v1703_v20 = vpop.eup %1702  ;;  %v700_v53 = vld [vmem:[#allocation4 + $0x68] sm:$0xff] }
 0x216   : > { %v762_v24 = vmul.f32 %v1703_v20, %v698_v36  ;;  %v702_v36 = vld [vmem:[#allocation4 + $0x78] sm:$0xff] }
 0x235   : > { %v948_v23 = vpop.xlane.xlu1 %947 }
 0x236   : > { %v992_v25 = vadd.f32 %v948_v23, %v752_v44  ;;  %v2508_v44 = vsub.f32 %v2506_v42, %v2507_v28 }
 0x238   : > { %1009 = vst.msk [vmem:[#allocation4 + $0x8] sm:$0xff] %vm1007_vm1, %v992_v25  ;;  %v733_v23 = vmul.f32 1.442695, %v2508_v44  ;;  %v1705_v25 = vpop.eup %1704 }
 0x239   : > { %v1707_v11 = vpop.eup %1706  ;;  %v755_v17 = vmul.f32 %v1705_v25, %v691_v61 }
 0x23a   : > { %1710 = vpow2.f32 %v733_v23  ;;  %v756_v41 = vmul.f32 %v1707_v11, %v692_v14  ;;  %v1709_v19 = vpop.eup %1708 }
 0x23b   : > { %1712 = vpow2.f32 %v731_v57 }
 0x240   : > { %v1711_v39 = vpop.eup %1710 }
 0x241   : > { %v758_v55 = vmul.f32 %v1711_v39, %v694_v26  ;;  %v1713_v54 = vpop.eup %1712 }
 0x245   : > { %v945_v30 = vpop.xlane.xlu2 %944 }
 0x246   : > { %v991_v31 = vadd.f32 %v945_v30, %v751_v45 }
 0x247   : > { %v975_v2 = vpop.xlane.xlu1 %974 }
 0x248   : > { %1008 = vst.msk [vmem:[#allocation4] sm:$0xff] %vm1007_vm1, %v991_v31  ;;  %v1001_v33 = vadd.f32 %v975_v2, %v761_v12  ;;  %v699_v31 = vld [vmem:[#allocation4 + $0x60] sm:$0xff]  ;;  %v2513_v2 = vld [vmem:[#allocation14_spill] sm:$0xff] }
 0x249   : > { %v2514_v52 = vsub.f32 %v2512_v63, %v2513_v2 }
 0x24a   : > { %1018 = vst.msk [vmem:[#allocation4 + $0x50] sm:$0xff] %vm1007_vm1, %v1001_v33  ;;  %v763_v33 = vmul.f32 %v1709_v19, %v699_v31 }
 0x24b   : > { %v745_v5 = vmul.f32 1.442695, %v2514_v52 }
 0x24d   : > { %v969_v58 = vpop.xlane.xlu2 %968  ;;  %1714 = vpow2.f32 %v745_v5 }
 0x24e   : > { %v999_v9 = vadd.f32 %v969_v58, %v759_v7  ;;  %v2516_v7 = vld [vmem:[#allocation18_spill] sm:$0xff] }
 0x24f   : > { %v2517_v58 = vsub.f32 %v2515_v56, %v2516_v7 }
 0x250   : > { %1016 = vst.msk [vmem:[#allocation4 + $0x40] sm:$0xff] %vm1007_vm1, %v999_v9 }
 0x251   : > { %v747_v9 = vmul.f32 1.442695, %v2517_v58 }
 0x253   : > { %1716 = vpow2.f32 %v747_v9 }
 0x255   : > { %v954_v32 = vpop.xlane.xlu2 %953  ;;  %v972_v47 = vpop.xlane.xlu0 %971 }
 0x256   : > { %v994_v22 = vadd.f32 %v954_v32, %v754_v27  ;;  %v1000_v35 = vadd.f32 %v972_v47, %v760_v34  ;;  %v693_v27 = vld [vmem:[#allocation4 + $0x30] sm:$0xff]  ;;  %v2519_v32 = vld [vmem:[#allocation21_spill] sm:$0xff] }
 0x257   : > { %v2520_v34 = vsub.f32 %v2518_v29, %v2519_v32  ;;  %v757_v47 = vmul.f32 %v1713_v54, %v693_v27 }
 0x258   : > { %1011 = vst.msk [vmem:[#allocation4 + $0x18] sm:$0xff] %vm1007_vm1, %v994_v22 }
 0x259   : > { %1017 = vst.msk [vmem:[#allocation4 + $0x48] sm:$0xff] %vm1007_vm1, %v1000_v35  ;;  %v749_v22 = vmul.f32 1.442695, %v2520_v34  ;;  %v1715_v35 = vpop.eup %1714 }
 0x25a   : > { %v1717_v6 = vpop.eup %1716  ;;  %v764_v4 = vmul.f32 %v1715_v35, %v700_v53 }
 0x25b   : > { %1718 = vpow2.f32 %v749_v22 }
 0x25d   : > { %v951_v62 = vpop.xlane.xlu0 %950 }
 0x25e   : > { %v993_v13 = vadd.f32 %v951_v62, %v753_v8  ;;  %v765_v8 = vmul.f32 %v1717_v6, %v701_v1 }
 0x260   : > { %1010 = vst.msk [vmem:[#allocation4 + $0x10] sm:$0xff] %vm1007_vm1, %v993_v13 }
 0x261   : > { %v1719_v13 = vpop.eup %1718 }
 0x262   : > { %v766_v0 = vmul.f32 %v1719_v13, %v702_v36 }
 0x263   : > { %v978_v59 = vpop.xlane.xlu2 %977 }
 0x264   : > { %v1002_v51 = vadd.f32 %v978_v59, %v762_v24 }
 0x266   : > { %1019 = vst.msk [vmem:[#allocation4 + $0x58] sm:$0xff] %vm1007_vm1, %v1002_v51 }
 0x26b   : > { %v960_v45 = vpop.xlane.xlu2 %959  ;;  %v957_v30 = vpop.xlane.xlu1 %956 }
 0x26c   : > { %v996_v12 = vadd.f32 %v960_v45, %v756_v41  ;;  %v995_v3 = vadd.f32 %v957_v30, %v755_v17 }
 0x26d   : > { %v981_v16 = vpop.xlane.xlu0 %980 }
 0x26e   : > { %1013 = vst.msk [vmem:[#allocation4 + $0x28] sm:$0xff] %vm1007_vm1, %v996_v12  ;;  %v1003_v48 = vadd.f32 %v981_v16, %v763_v33 }
 0x26f   : > { %1012 = vst.msk [vmem:[#allocation4 + $0x20] sm:$0xff] %vm1007_vm1, %v995_v3 }
 0x270   : > { %1020 = vst.msk [vmem:[#allocation4 + $0x60] sm:$0xff] %vm1007_vm1, %v1003_v48 }
 0x273   : > { %v966_v40 = vpop.xlane.xlu1 %965 }
 0x274   : > { %v998_v60 = vadd.f32 %v966_v40, %v758_v55 }
 0x275   : > { %v963_v46 = vpop.xlane.xlu0 %962 }
 0x276   : > { %1015 = vst.msk [vmem:[#allocation4 + $0x38] sm:$0xff] %vm1007_vm1, %v998_v60  ;;  %v997_v49 = vadd.f32 %v963_v46, %v757_v47 }
 0x278   : > { %1014 = vst.msk [vmem:[#allocation4 + $0x30] sm:$0xff] %vm1007_vm1, %v997_v49 }
 0x27b   : > { %v984_v10 = vpop.xlane.xlu1 %983 }
 0x27c   : > { %v1004_v18 = vadd.f32 %v984_v10, %v764_v4 }
 0x27d   : > { %v987_v62 = vpop.xlane.xlu2 %986 }
 0x27e   : > { %1021 = vst.msk [vmem:[#allocation4 + $0x68] sm:$0xff] %vm1007_vm1, %v1004_v18  ;;  %v1005_v20 = vadd.f32 %v987_v62, %v765_v8 }
 0x280   : > { %1022 = vst.msk [vmem:[#allocation4 + $0x70] sm:$0xff] %vm1007_vm1, %v1005_v20 }
 0x283   : > { %v990_v38 = vpop.xlane.xlu0 %989 }
 0x284   : > { %v1006_v15 = vadd.f32 %v990_v38, %v766_v0 }
 0x286   : > { %1023 = vst.msk [vmem:[#allocation4 + $0x78] sm:$0xff] %vm1007_vm1, %v1006_v15 }
 0x287 PF: > { %p1533_p6 = scmp.ne.s32.totalorder %s1801_s12, 1 }
 0x289   : > { %1043 = sbr.rel (%p1533_p6) target bundleno = 827 (0x33b), region = 44 }
 0x28e   : > { %v1099_v21 = vld [vmem:[#allocation4 + $0x20] sm:$0xff]  ;;  %v1814_v24 = vmov 0   ;;  %v1097_v59 = vld [vmem:[#allocation4 + $0x10] sm:$0xff]  ;;  %v1100_v42 = vld [vmem:[#allocation4 + $0x28] sm:$0xff] }
 0x28f   : > { %1722 = vset.pattern.permute.xlu2 %v1814_v24  ;;  %1721 = vset.pattern.permute.xlu1 %v1814_v24  ;;  %1723 = vlog2.f32 %v1099_v21  ;;  %v1095_v51 = vld [vmem:[#allocation4] sm:$0xff]  ;;  %v1098_v28 = vld [vmem:[#allocation4 + $0x18] sm:$0xff]  ;;  %v1096_v44 = vld [vmem:[#allocation4 + $0x8] sm:$0xff] }
 0x290   : > { %1720 = vset.pattern.permute.xlu0 %v1814_v24  ;;  %1725 = vlog2.f32 %v1097_v59  ;;  %v1083_v25 = vld [vmem:[#allocation3 + $0x20] sm:$0xff]  ;;  %v1081_v61 = vld [vmem:[#allocation3 + $0x10] sm:$0xff]  ;;  %v1102_v41 = vld [vmem:[#allocation4 + $0x38] sm:$0xff] }
 0x291   : > { %1727 = vlog2.f32 %v1095_v51  ;;  %v1103_v50 = vld [vmem:[#allocation4 + $0x40] sm:$0xff]  ;;  %v1101_v30 = vld [vmem:[#allocation4 + $0x30] sm:$0xff]  ;;  %v1084_v52 = vld [vmem:[#allocation3 + $0x28] sm:$0xff] }
 0x292   : > { %1729 = vlog2.f32 %v1100_v42  ;;  %v1079_v57 = vld [vmem:[#allocation3] sm:$0xff]  ;;  %v1082_v33 = vld [vmem:[#allocation3 + $0x18] sm:$0xff]  ;;  %v1080_v56 = vld [vmem:[#allocation3 + $0x8] sm:$0xff] }
 0x293   : > { %1731 = vlog2.f32 %v1098_v28  ;;  %v1106_v58 = vld [vmem:[#allocation4 + $0x58] sm:$0xff]  ;;  %v1105_v26 = vld [vmem:[#allocation4 + $0x50] sm:$0xff]  ;;  %v1104_v54 = vld [vmem:[#allocation4 + $0x48] sm:$0xff] }
 0x294   : > { %1733 = vlog2.f32 %v1096_v44  ;;  %v1087_v60 = vld [vmem:[#allocation3 + $0x40] sm:$0xff]  ;;  %v1086_v32 = vld [vmem:[#allocation3 + $0x38] sm:$0xff]  ;;  %v1085_v22 = vld [vmem:[#allocation3 + $0x30] sm:$0xff] }
 0x295   : > { %v1724_v23 = vpop.eup %1723  ;;  %1735 = vlog2.f32 %v1103_v50  ;;  %v1109_v35 = vld [vmem:[#allocation4 + $0x70] sm:$0xff]  ;;  %v1108_v49 = vld [vmem:[#allocation4 + $0x68] sm:$0xff]  ;;  %v1107_v4 = vld [vmem:[#allocation4 + $0x60] sm:$0xff] }
 0x296   : > { %v1726_v11 = vpop.eup %1725  ;;  %v1120_v14 = vmul.f32 0.6931472, %v1724_v23  ;;  %1737 = vlog2.f32 %v1102_v41  ;;  %v1090_v8 = vld [vmem:[#allocation3 + $0x58] sm:$0xff]  ;;  %v1089_v20 = vld [vmem:[#allocation3 + $0x50] sm:$0xff]  ;;  %v1088_v36 = vld [vmem:[#allocation3 + $0x48] sm:$0xff] }
 0x297   : > { %v1728_v37 = vpop.eup %1727  ;;  %v1116_v43 = vmul.f32 0.6931472, %v1726_v11  ;;  %1739 = vlog2.f32 %v1101_v30  ;;  %v1110_v59 = vld [vmem:[#allocation4 + $0x78] sm:$0xff]  ;;  %v1093_v28 = vld [vmem:[#allocation3 + $0x70] sm:$0xff]  ;;  %v1092_v23 = vld [vmem:[#allocation3 + $0x68] sm:$0xff] }
 0x298   : > { %v1730_v17 = vpop.eup %1729  ;;  %v1147_v19 = vadd.f32 %v1120_v14, %v1083_v25  ;;  %v1112_v45 = vmul.f32 0.6931472, %v1728_v37  ;;  %1741 = vlog2.f32 %v1106_v58  ;;  %v1091_v11 = vld [vmem:[#allocation3 + $0x60] sm:$0xff]  ;;  %v1069_v58 = vld [vmem:[#allocation2 + $0x70] sm:$0xff] }
 0x299   : > { %v1732_v31 = vpop.eup %1731  ;;  %v1145_v12 = vadd.f32 %v1116_v43, %v1081_v61  ;;  %v1122_v2 = vmul.f32 0.6931472, %v1730_v17  ;;  %1743 = vlog2.f32 %v1105_v26  ;;  %v1055_v17 = vld [vmem:[#allocation2 + $0x80] sm:$0xff]  ;;  %v1052_v26 = vld [vmem:[#allocation2 + $0x68] sm:$0xff] }
 0x29a   : > { %v1734_v3 = vpop.eup %1733  ;;  %1181 = vperm.xlu2 %1722, %v1147_v19   ;;  %v1143_v63 = vadd.f32 %v1112_v45, %v1079_v57  ;;  %v1118_v5 = vmul.f32 0.6931472, %v1732_v31  ;;  %1745 = vlog2.f32 %v1104_v54  ;;  %v1094_v57 = vld [vmem:[#allocation3 + $0x78] sm:$0xff]  ;;  %v1056_v19 = vld [vmem:[#allocation2 + $0x88] sm:$0xff] }
 0x29b   : > { %1171 = vperm.xlu1 %1721, %v1145_v12   ;;  %v1114_v39 = vmul.f32 0.6931472, %v1734_v3  ;;  %v1148_v7 = vadd.f32 %v1122_v2, %v1084_v52  ;;  %v1736_v9 = vpop.eup %1735  ;;  %1747 = vlog2.f32 %v1109_v35  ;;  %v1057_v12 = vld [vmem:[#allocation2 + $0xe8] sm:$0xff]  ;;  %v1058_v3 = vld [vmem:[#allocation2 + $0xb8] sm:$0xff]  ;;  %v1075_v35 = vld [vmem:[#allocation2 + $0xa0] sm:$0xff] }
 0x29c   : > { %1161 = vperm.xlu0 %1720, %v1143_v63   ;;  %v1146_v16 = vadd.f32 %v1118_v5, %v1082_v33  ;;  %v1738_v48 = vpop.eup %1737  ;;  %v1128_v27 = vmul.f32 0.6931472, %v1736_v9  ;;  %1749 = vlog2.f32 %v1108_v49  ;;  %v1063_v5 = vld [vmem:[#allocation2 + $0x38] sm:$0xff]  ;;  %v1070_v9 = vld [vmem:[#allocation2 + $0xc0] sm:$0xff]  ;;  %v1054_v49 = vld [vmem:[#allocation2 + $0x48] sm:$0xff] }
 0x29d   : > { %v1144_v55 = vadd.f32 %v1114_v39, %v1080_v56  ;;  %v1740_v40 = vpop.eup %1739  ;;  %v1126_v29 = vmul.f32 0.6931472, %v1738_v48  ;;  %1751 = vlog2.f32 %v1107_v4  ;;  %v1064_v33 = vld [vmem:[#allocation2 + $0x58] sm:$0xff] }
 0x29e   : > { %v1124_v34 = vmul.f32 0.6931472, %v1740_v40  ;;  %v1151_v47 = vadd.f32 %v1128_v27, %v1087_v60  ;;  %v1742_v46 = vpop.eup %1741  ;;  %1753 = vlog2.f32 %v1110_v59  ;;  %v1048_v60 = vld [vmem:[#allocation2] sm:$0xff] }
 0x29f   : > { %v1150_v53 = vadd.f32 %v1126_v29, %v1086_v32  ;;  %v1744_v6 = vpop.eup %1743  ;;  %v1134_v18 = vmul.f32 0.6931472, %v1742_v46  ;;  %v1076_v46 = vld [vmem:[#allocation2 + $0xf8] sm:$0xff] }
 0x2a0   : > { %v1149_v1 = vadd.f32 %v1124_v34, %v1085_v22  ;;  %v1746_v10 = vpop.eup %1745  ;;  %v1132_v62 = vmul.f32 0.6931472, %v1744_v6 }
 0x2a1   : > { %v1130_v13 = vmul.f32 0.6931472, %v1746_v10  ;;  %v1154_v0 = vadd.f32 %v1134_v18, %v1090_v8  ;;  %v1748_v38 = vpop.eup %1747  ;;  %v1050_v8 = vld [vmem:[#allocation2 + $0x18] sm:$0xff] }
 0x2a2   : > { %1186 = vperm.xlu2 %1722, %v1148_v7   ;;  %v1153_v15 = vadd.f32 %v1132_v62, %v1089_v20  ;;  %v1750_v21 = vpop.eup %1749  ;;  %v1140_v42 = vmul.f32 0.6931472, %v1748_v38  ;;  %v1061_v38 = vld [vmem:[#allocation2 + $0x8] sm:$0xff] }
 0x2a3   : > { %1176 = vperm.xlu1 %1721, %v1146_v16   ;;  %v1152_v24 = vadd.f32 %v1130_v13, %v1088_v36  ;;  %v1752_v51 = vpop.eup %1751  ;;  %v1138_v44 = vmul.f32 0.6931472, %v1750_v21  ;;  %v1051_v16 = vld [vmem:[#allocation2 + $0x50] sm:$0xff]  ;;  %v1059_v21 = vld [vmem:[#allocation2 + $0x60] sm:$0xff] }
 0x2a4   : > { %1166 = vperm.xlu0 %1720, %v1144_v55   ;;  %v1136_v25 = vmul.f32 0.6931472, %v1752_v51  ;;  %v1157_v14 = vadd.f32 %v1140_v42, %v1093_v28  ;;  %v1754_v37 = vpop.eup %1753  ;;  %v1047_v55 = vld [vmem:[#allocation2 + $0xb0] sm:$0xff] }
 0x2a5   : > { %v1156_v61 = vadd.f32 %v1138_v44, %v1092_v23  ;;  %v1142_v43 = vmul.f32 0.6931472, %v1754_v37 }
 0x2a6   : > { %v1155_v50 = vadd.f32 %v1136_v25, %v1091_v11  ;;  %v1067_v25 = vld [vmem:[#allocation2 + $0xe0] sm:$0xff]  ;;  %v1068_v11 = vld [vmem:[#allocation2 + $0x90] sm:$0xff] }
 0x2a7   : > { %v1158_v41 = vadd.f32 %v1142_v43, %v1094_v57 }
 0x2aa   : > { %1201 = vperm.xlu2 %1722, %v1151_v47  }
 0x2ab   : > { %1196 = vperm.xlu1 %1721, %v1150_v53   ;;  %v1053_v53 = vld [vmem:[#allocation2 + $0x30] sm:$0xff] }
 0x2ac   : > { %1191 = vperm.xlu0 %1720, %v1149_v1   ;;  %v1049_v1 = vld [vmem:[#allocation2 + $0xd8] sm:$0xff] }
 0x2b2   : > { %1216 = vperm.xlu2 %1722, %v1154_v0  }
 0x2b3   : > { %1211 = vperm.xlu1 %1721, %v1153_v15   ;;  %v1062_v15 = vld [vmem:[#allocation2 + $0x78] sm:$0xff] }
 0x2b4   : > { %1206 = vperm.xlu0 %1720, %v1152_v24   ;;  %v1060_v24 = vld [vmem:[#allocation2 + $0xf0] sm:$0xff] }
 0x2ba   : > { %1231 = vperm.xlu2 %1722, %v1157_v14   ;;  %v1065_v14 = vld [vmem:[#allocation2 + $0x40] sm:$0xff] }
 0x2bb   : > { %1226 = vperm.xlu1 %1721, %v1156_v61   ;;  %v1066_v61 = vld [vmem:[#allocation2 + $0xc8] sm:$0xff] }
 0x2bc   : > { %1221 = vperm.xlu0 %1720, %v1155_v50  }
 0x2c4   : > { %1236 = vperm.xlu0 %1720, %v1158_v41  }
 0x2f4   : > { %v1182_v45 = vpop.permute.xlu2 %1181 }
 0x2f5   : > { %v1247_v30 = vsub.f32 %v1055_v17, %v1182_v45  ;;  %v1248_v31 = vsub.f32 %v1056_v19, %v1182_v45  ;;  %v1073_v19 = vld [vmem:[#allocation2 + $0x10] sm:$0xff]  ;;  %v1074_v45 = vld [vmem:[#allocation2 + $0x28] sm:$0xff] }
 0x2f7   : > { %1279 = vst [vmem:[#allocation5 + $0x40] sm:$0xff] %v1247_v30  ;;  %v1071_v30 = vld [vmem:[#allocation2 + $0xa8] sm:$0xff] }
 0x2f8   : > { %1280 = vst [vmem:[#allocation5 + $0x48] sm:$0xff] %v1248_v31  ;;  %v1072_v31 = vld [vmem:[#allocation2 + $0xd0] sm:$0xff] }
 0x2fc   : > { %v1187_v63 = vpop.permute.xlu2 %1186 }
 0x2fd   : > { %v1249_v2 = vsub.f32 %v1057_v12, %v1187_v63  ;;  %v1250_v52 = vsub.f32 %v1058_v3, %v1187_v63 }
 0x2ff   : > { %1281 = vst [vmem:[#allocation5 + $0x50] sm:$0xff] %v1249_v2 }
 0x300   : > { %1282 = vst [vmem:[#allocation5 + $0x58] sm:$0xff] %v1250_v52 }
 0x304   : > { %v1202_v39 = vpop.permute.xlu2 %1201 }
 0x305   : > { %v1255_v56 = vsub.f32 %v1063_v5, %v1202_v39  ;;  %v1256_v7 = vsub.f32 %v1064_v33, %v1202_v39  ;;  %v1077_v33 = vld [vmem:[#allocation2 + $0x20] sm:$0xff]  ;;  %v1078_v39 = vld [vmem:[#allocation2 + $0x98] sm:$0xff] }
 0x307   : > { %1287 = vst [vmem:[#allocation5 + $0x80] sm:$0xff] %v1255_v56 }
 0x308   : > { %1288 = vst [vmem:[#allocation5 + $0x88] sm:$0xff] %v1256_v7 }
 0x30c   : > { %v1217_v48 = vpop.permute.xlu2 %1216 }
 0x30d   : > { %v1261_v54 = vsub.f32 %v1069_v58, %v1217_v48  ;;  %v1262_v40 = vsub.f32 %v1070_v9, %v1217_v48  ;;  %v1172_v27 = vpop.permute.xlu1 %1171 }
 0x30e   : > { %v1243_v29 = vsub.f32 %v1051_v16, %v1172_v27  ;;  %v1244_v32 = vsub.f32 %v1052_v26, %v1172_v27  ;;  %v1162_v34 = vpop.permute.xlu0 %1161 }
 0x30f   : > { %1293 = vst [vmem:[#allocation5 + $0xb0] sm:$0xff] %v1261_v54  ;;  %v1239_v22 = vsub.f32 %v1047_v55, %v1162_v34  ;;  %v1240_v47 = vsub.f32 %v1048_v60, %v1162_v34 }
 0x310   : > { %1294 = vst [vmem:[#allocation5 + $0xb8] sm:$0xff] %v1262_v40 }
 0x311   : > { %1275 = vst [vmem:[#allocation5 + $0x20] sm:$0xff] %v1243_v29 }
 0x312   : > { %1276 = vst [vmem:[#allocation5 + $0x28] sm:$0xff] %v1244_v32 }
 0x313   : > { %1271 = vst [vmem:[#allocation5] sm:$0xff] %v1239_v22 }
 0x314   : > { %1272 = vst [vmem:[#allocation5 + $0x8] sm:$0xff] %v1240_v47  ;;  %v1232_v6 = vpop.permute.xlu2 %1231 }
 0x315   : > { %v1267_v4 = vsub.f32 %v1075_v35, %v1232_v6  ;;  %v1268_v10 = vsub.f32 %v1076_v46, %v1232_v6  ;;  %v1177_v18 = vpop.permute.xlu1 %1176 }
 0x316   : > { %v1245_v62 = vsub.f32 %v1053_v53, %v1177_v18  ;;  %v1246_v20 = vsub.f32 %v1054_v49, %v1177_v18  ;;  %v1167_v13 = vpop.permute.xlu0 %1166 }
 0x317   : > { %1299 = vst [vmem:[#allocation5 + $0xe0] sm:$0xff] %v1267_v4  ;;  %v1241_v36 = vsub.f32 %v1049_v1, %v1167_v13  ;;  %v1242_v0 = vsub.f32 %v1050_v8, %v1167_v13 }
 0x318   : > { %1300 = vst [vmem:[#allocation5 + $0xe8] sm:$0xff] %v1268_v10 }
 0x319   : > { %1277 = vst [vmem:[#allocation5 + $0x30] sm:$0xff] %v1245_v62 }
 0x31a   : > { %1278 = vst [vmem:[#allocation5 + $0x38] sm:$0xff] %v1246_v20 }
 0x31b   : > { %1273 = vst [vmem:[#allocation5 + $0x10] sm:$0xff] %v1241_v36 }
 0x31c   : > { %1274 = vst [vmem:[#allocation5 + $0x18] sm:$0xff] %v1242_v0 }
 0x31d   : > { %v1197_v59 = vpop.permute.xlu1 %1196 }
 0x31e   : > { %v1253_v51 = vsub.f32 %v1061_v38, %v1197_v59  ;;  %v1254_v42 = vsub.f32 %v1062_v15, %v1197_v59  ;;  %v1192_v28 = vpop.permute.xlu0 %1191 }
 0x31f   : > { %v1251_v44 = vsub.f32 %v1059_v21, %v1192_v28  ;;  %v1252_v23 = vsub.f32 %v1060_v24, %v1192_v28 }
 0x320   : > { %1285 = vst [vmem:[#allocation5 + $0x70] sm:$0xff] %v1253_v51 }
 0x321   : > { %1286 = vst [vmem:[#allocation5 + $0x78] sm:$0xff] %v1254_v42 }
 0x322   : > { %1283 = vst [vmem:[#allocation5 + $0x60] sm:$0xff] %v1251_v44 }
 0x323   : > { %1284 = vst [vmem:[#allocation5 + $0x68] sm:$0xff] %v1252_v23 }
 0x325   : > { %v1212_v50 = vpop.permute.xlu1 %1211 }
 0x326   : > { %v1259_v37 = vsub.f32 %v1067_v25, %v1212_v50  ;;  %v1260_v43 = vsub.f32 %v1068_v11, %v1212_v50  ;;  %v1207_v57 = vpop.permute.xlu0 %1206 }
 0x327   : > { %v1257_v41 = vsub.f32 %v1065_v14, %v1207_v57  ;;  %v1258_v17 = vsub.f32 %v1066_v61, %v1207_v57 }
 0x328   : > { %1291 = vst [vmem:[#allocation5 + $0xa0] sm:$0xff] %v1259_v37 }
 0x329   : > { %1292 = vst [vmem:[#allocation5 + $0xa8] sm:$0xff] %v1260_v43 }
 0x32a   : > { %1289 = vst [vmem:[#allocation5 + $0x90] sm:$0xff] %v1257_v41 }
 0x32b   : > { %1290 = vst [vmem:[#allocation5 + $0x98] sm:$0xff] %v1258_v17 }
 0x32d   : > { %v1227_v12 = vpop.permute.xlu1 %1226 }
 0x32e   : > { %v1265_v3 = vsub.f32 %v1073_v19, %v1227_v12  ;;  %v1266_v63 = vsub.f32 %v1074_v45, %v1227_v12  ;;  %v1222_v2 = vpop.permute.xlu0 %1221 }
 0x32f   : > { %v1263_v52 = vsub.f32 %v1071_v30, %v1222_v2  ;;  %v1264_v5 = vsub.f32 %v1072_v31, %v1222_v2 }
 0x330   : > { %1297 = vst [vmem:[#allocation5 + $0xd0] sm:$0xff] %v1265_v3 }
 0x331   : > { %1298 = vst [vmem:[#allocation5 + $0xd8] sm:$0xff] %v1266_v63 }
 0x332   : > { %1295 = vst [vmem:[#allocation5 + $0xc0] sm:$0xff] %v1263_v52 }
 0x333   : > { %1296 = vst [vmem:[#allocation5 + $0xc8] sm:$0xff] %v1264_v5 }
 0x336   : > { %v1237_v56 = vpop.permute.xlu0 %1236 }
 0x337   : > { %v1269_v7 = vsub.f32 %v1077_v33, %v1237_v56  ;;  %v1270_v58 = vsub.f32 %v1078_v39, %v1237_v56 }
 0x339   : > { %1301 = vst [vmem:[#allocation5 + $0xf0] sm:$0xff] %v1269_v7 }
 0x33a   : > { %1302 = vst [vmem:[#allocation5 + $0xf8] sm:$0xff] %v1270_v58 }
 0x33b PF: > { %p1587_p7 = scmp.eq.s32.totalorder %s1427_s15, 1  ;;  %s1322_s11 = sshll.u32 %s2462_s3, 4  ;;  %s1323_s11 = int_to_ptr.hbm [resolvable:$true] %s1322_s11 }
 0x33c   : > { %s1815_s18 = smov [#allocation5]   ;;  %s1816_s20 = smov 256  }
 0x33d   : > { %s1320_s19 = sshll.u32 %s1815_s18, 4  ;;  %s1817_s21 = smov 16   ;;  %s1321_s19 = int_to_ptr.vmem [resolvable:$true] %s1320_s19 }
 0x33e   : > { %1580 = dma.vmem_to_hbm [thread:$0]  (%p1587_p7), %s1321_s19, 4096, %s1323_s11, [#allocation6], %s1816_s20, %s1816_s20, %s1817_s21  }
 0x33f PF: > { %p1588_p8 = scmp.ge.s32.totalorder %s1809_s14, 2  ;;  %p1589_p9 = scmp.eq.s32.totalorder %s1428_s16, 1 }
 0x341   : > { %p1584_p10 = pnand %p1589_p9, %p1588_p8 }
 0x343   : > { %p1585_p11 = pneg %p1584_p10 }
 0x345   : > { %1796 = dma.done.wait (%p1585_p11), [#allocation6], 4096  }
 0x346   : > { %1798 = vsyncadd (%p1585_p11), [#allocation6], 4294963200  ;;  %s16_s14 = sadd.s32 1, %s1809_s14   ;;  %s2521_s12 = smov %s1805_s13 }
 0x347   : > { %p13_p12 = scmp.ge.s32.totalorder %s16_s14, 4   ;;  %s2522_s13 = smov %s2524_s17 }
 0x349   :  { %15 = sbr.rel (!%p13_p12) target bundleno = 3 (0x3), region = 87 }
 0x34e   :  { %1344 = vsyncpa [#allocation6], 1 }
 0x34f   :  { %1346 = vsyncpa [#allocation6 + $0x1], 1 }

// kernel: lstm_lm2_forward.2
= control target key start
LH: loop header
LB: loop body
LE: loop exit
PB: predicated region body
PF: predicated region fallthrough
CT: control target
= control target key end

     0   :  { %17 = vsyncpa [#allocation7], 0  ;;  %s13766_s0 = inlined_call_operand.vmem [shape: bf16[16,8,128], index: 0, kind: input, shape index: {}]   ;;  %s13767_s1 = inlined_call_operand.vmem [shape: bf16[128,512], index: 1, kind: input, shape index: {}]   ;;  %s13768_s2 = inlined_call_operand.vmem [shape: bf16[128,512], index: 2, kind: input, shape index: {}]   ;;  %s13769_s3 = inlined_call_operand.vmem [shape: f32[1,512], index: 3, kind: input, shape index: {}]   ;;  %s13770_s4 = inlined_call_operand.vmem [shape: bf16[128,512], index: 4, kind: input, shape index: {}]   ;;  %s13771_s5 = inlined_call_operand.vmem [shape: bf16[128,512], index: 5, kind: input, shape index: {}]   ;;  %s13772_s6 = inlined_call_operand.vmem [shape: f32[1,512], index: 6, kind: input, shape index: {}]   ;;  %s13773_s7 = inlined_call_operand.vmem [shape: f32[2,8,128], index: 7, kind: input, shape index: {}]   ;;  %s13774_s8 = inlined_call_operand.vmem [shape: f32[2,8,128], index: 8, kind: input, shape index: {}]   ;;  %s13775_s9 = inlined_call_operand.vmem [shape: bf16[16,8,128], index: 9, kind: output, shape index: {0}]   ;;  %s13776_s10 = inlined_call_operand.hbm [shape: f32[2,8,128], index: 10, kind: output, shape index: {1}]   ;;  %s13777_s11 = inlined_call_operand.hbm [shape: f32[2,8,128], index: 11, kind: output, shape index: {2}]  }
   0x1   :  { %18 = vsyncpa [#allocation9], 0  ;;  %s9784_s17 = smov 0  }
   0x2 LB: > { %s9790_s18 = sadd.s32 4294967295, %s9718_s17   ;;  %p6380_p0 = scmp.ge.s32.totalorder %s9718_s17, 1  ;;  %s9718_s17 = sphi %s9784_s17, %s24_s17  }
   0x3   : > { %p335_p1 = scmp.lt.s32.totalorder %s9718_s17, 3 }
   0x5   : > { %p336_p2 = pnand %p6380_p0, %p335_p1 }
   0x6   : > { %s6381_s19 = sshll.u32 (!%p336_p2), %s9790_s18, 3  ;;  %p6385_p4 = scmp.ne.s32.totalorder (!%p336_p2), %s9790_s18, 0 }
   0x7   : > { %339 = sbr.rel (%p336_p2) target bundleno = 2915 (0xb63), region = 56  ;;  %p376_p3 = scmp.lt.s32.totalorder (!%p336_p2), %s6381_s19, 15 }
   0xc   : > { %s13789_s19 = smov (!%p376_p3, %s6381_s19), 15  ;;  %390 = sbr.rel (%p6385_p4) target bundleno = 22 (0x16), region = 60 }
   0xd   : > { %s6382_s20 = sshll.u32 %s13789_s19, 2 }
   0xe   : > { %s9798_s23 = scalar_lea.vmem %s13766_s0, %s6382_s20  ;;  %s9803_s26 = scalar_lea.vmem %s13775_s9, %s6382_s20 }
  0x11   : > { %v391_v0 = vld [vmem:[%s13773_s7] sm:$0xff]  ;;  %v392_v1 = vld [vmem:[%s13773_s7 + $0x8] sm:$0xff] }
  0x12   : > { %v395_v2 = vld [vmem:[%s13774_s8] sm:$0xff]  ;;  %393 = vst [vmem:[#allocation2] sm:$0xff] %v391_v0  ;;  %v396_v3 = vld [vmem:[%s13774_s8 + $0x8] sm:$0xff] }
  0x13   : > { %394 = vst [vmem:[#allocation2 + $0x8] sm:$0xff] %v392_v1 }
  0x14   : > { %397 = vst [vmem:[#allocation3 + $0x8] sm:$0xff] %v395_v2 }
  0x15   : > { %398 = vst [vmem:[#allocation3] sm:$0xff] %v396_v3 }
  0x16 PF: > { %v6516_v4 = vld [vmem:[%s13767_s1 + $0xe0] sm:$0xf]  ;;  %v8818_v5 = vld [vmem:[%s13767_s1 + $0xec] sm:$0xf0]  ;;  %v8816_v6 = vld [vmem:[%s13767_s1 + $0xe4] sm:$0xf] }
  0x17   : > { %v6517_v7 = vor.u32 %v8818_v5, %v6516_v4  ;;  %v6518_v8 = vld [vmem:[%s13767_s1 + $0xf0] sm:$0xf0]  ;;  %v6524_v9 = vld [vmem:[%s13767_s1 + $0xe8] sm:$0xf]  ;;  %v8819_v10 = vld [vmem:[%s13767_s1 + $0xf4] sm:$0xf0] }
  0x18   : > { %v6521_v11 = vor.u32 %v8816_v6, %v6518_v8  ;;  %v6525_v12 = vor.u32 %v8819_v10, %v6524_v9  ;;  %v8817_v13 = vld [vmem:[%s13767_s1 + $0xec] sm:$0xf]  ;;  %v6526_v14 = vld [vmem:[%s13767_s1 + $0xf8] sm:$0xf0]  ;;  %v6500_v15 = vld [vmem:[%s13767_s1 + $0xc0] sm:$0xf] }
  0x19   : > { %633 = vmatpush.bf16.msra.mxu0 %v6517_v7  ;;  %v6529_v16 = vor.u32 %v8817_v13, %v6526_v14  ;;  %v8814_v17 = vld [vmem:[%s13767_s1 + $0xcc] sm:$0xf0]  ;;  %v8812_v18 = vld [vmem:[%s13767_s1 + $0xc4] sm:$0xf]  ;;  %v6502_v19 = vld [vmem:[%s13767_s1 + $0xd0] sm:$0xf0] }
  0x1a   : > { %662 = vmatpush.bf16.msra.mxu1 %v6521_v11  ;;  %691 = vmatpush.bf16.msra.mxu2 %v6525_v12  ;;  %v6501_v20 = vor.u32 %v8814_v17, %v6500_v15  ;;  %v6505_v21 = vor.u32 %v8812_v18, %v6502_v19  ;;  %v6508_v22 = vld [vmem:[%s13767_s1 + $0xc8] sm:$0xf]  ;;  %v8815_v23 = vld [vmem:[%s13767_s1 + $0xd4] sm:$0xf0]  ;;  %v8813_v24 = vld [vmem:[%s13767_s1 + $0xcc] sm:$0xf] }
  0x1b   : > { %720 = vmatpush.bf16.msra.mxu3 %v6529_v16  ;;  %v6509_v25 = vor.u32 %v8815_v23, %v6508_v22  ;;  %v6510_v26 = vld [vmem:[%s13767_s1 + $0xd8] sm:$0xf0]  ;;  %v6484_v27 = vld [vmem:[%s13767_s1 + $0xa0] sm:$0xf]  ;;  %v8810_v28 = vld [vmem:[%s13767_s1 + $0xac] sm:$0xf0] }
  0x1c   : > { %v6513_v29 = vor.u32 %v8813_v24, %v6510_v26  ;;  %v8808_v30 = vld [vmem:[%s13767_s1 + $0xa4] sm:$0xf]  ;;  %v6486_v31 = vld [vmem:[%s13767_s1 + $0xb0] sm:$0xf0]  ;;  %v6492_v32 = vld [vmem:[%s13767_s1 + $0xa8] sm:$0xf]  ;;  %v6485_v33 = vor.u32 %v8810_v28, %v6484_v27 }
  0x1d   : > { %634 = vmatpush.bf16.msra.mxu0 %v6501_v20  ;;  %v8811_v34 = vld [vmem:[%s13767_s1 + $0xb4] sm:$0xf0]  ;;  %v8809_v35 = vld [vmem:[%s13767_s1 + $0xac] sm:$0xf]  ;;  %v6494_v36 = vld [vmem:[%s13767_s1 + $0xb8] sm:$0xf0]  ;;  %v6489_v37 = vor.u32 %v8808_v30, %v6486_v31 }
  0x1e   : > { %663 = vmatpush.bf16.msra.mxu1 %v6505_v21  ;;  %692 = vmatpush.bf16.msra.mxu2 %v6509_v25  ;;  %v6493_v38 = vor.u32 %v8811_v34, %v6492_v32  ;;  %v6468_v39 = vld [vmem:[%s13767_s1 + $0x80] sm:$0xf]  ;;  %v8806_v40 = vld [vmem:[%s13767_s1 + $0x8c] sm:$0xf0]  ;;  %v8804_v41 = vld [vmem:[%s13767_s1 + $0x84] sm:$0xf]  ;;  %v6497_v42 = vor.u32 %v8809_v35, %v6494_v36 }
  0x1f   : > { %721 = vmatpush.bf16.msra.mxu3 %v6513_v29  ;;  %v6470_v43 = vld [vmem:[%s13767_s1 + $0x90] sm:$0xf0]  ;;  %v6476_v44 = vld [vmem:[%s13767_s1 + $0x88] sm:$0xf]  ;;  %v8807_v45 = vld [vmem:[%s13767_s1 + $0x94] sm:$0xf0]  ;;  %v6469_v48 = vor.u32 %v8806_v40, %v6468_v39 }
  0x20   : > { %v8805_v46 = vld [vmem:[%s13767_s1 + $0x8c] sm:$0xf]  ;;  %v6478_v47 = vld [vmem:[%s13767_s1 + $0x98] sm:$0xf0]  ;;  %v6473_v49 = vor.u32 %v8804_v41, %v6470_v43  ;;  %v6477_v50 = vor.u32 %v8807_v45, %v6476_v44  ;;  %v6452_v51 = vld [vmem:[%s13767_s1 + $0x60] sm:$0xf] }
  0x21   : > { %635 = vmatpush.bf16.msra.mxu0 %v6485_v33  ;;  %v8802_v52 = vld [vmem:[%s13767_s1 + $0x6c] sm:$0xf0]  ;;  %v8800_v53 = vld [vmem:[%s13767_s1 + $0x64] sm:$0xf]  ;;  %v6481_v54 = vor.u32 %v8805_v46, %v6478_v47  ;;  %v6454_v55 = vld [vmem:[%s13767_s1 + $0x70] sm:$0xf0] }
  0x22   : > { %664 = vmatpush.bf16.msra.mxu1 %v6489_v37  ;;  %693 = vmatpush.bf16.msra.mxu2 %v6493_v38  ;;  %v6460_v56 = vld [vmem:[%s13767_s1 + $0x68] sm:$0xf]  ;;  %v8803_v57 = vld [vmem:[%s13767_s1 + $0x74] sm:$0xf0]  ;;  %v8801_v58 = vld [vmem:[%s13767_s1 + $0x6c] sm:$0xf]  ;;  %v6453_v60 = vor.u32 %v8802_v52, %v6452_v51  ;;  %v6457_v61 = vor.u32 %v8800_v53, %v6454_v55 }
  0x23   : > { %722 = vmatpush.bf16.msra.mxu3 %v6497_v42  ;;  %v6462_v59 = vld [vmem:[%s13767_s1 + $0x78] sm:$0xf0]  ;;  %v6461_v62 = vor.u32 %v8803_v57, %v6460_v56  ;;  %v6436_v63 = vld [vmem:[%s13767_s1 + $0x40] sm:$0xf]  ;;  %v8798_v0 = vld [vmem:[%s13767_s1 + $0x4c] sm:$0xf0] }
  0x24   : > { %v8796_v1 = vld [vmem:[%s13767_s1 + $0x44] sm:$0xf]  ;;  %v6465_v2 = vor.u32 %v8801_v58, %v6462_v59  ;;  %v6438_v3 = vld [vmem:[%s13767_s1 + $0x50] sm:$0xf0]  ;;  %v6444_v4 = vld [vmem:[%s13767_s1 + $0x48] sm:$0xf]  ;;  %v6437_v8 = vor.u32 %v8798_v0, %v6436_v63 }
  0x25   : > { %636 = vmatpush.bf16.msra.mxu0 %v6469_v48  ;;  %v8799_v5 = vld [vmem:[%s13767_s1 + $0x54] sm:$0xf0]  ;;  %v8797_v6 = vld [vmem:[%s13767_s1 + $0x4c] sm:$0xf]  ;;  %v6446_v7 = vld [vmem:[%s13767_s1 + $0x58] sm:$0xf0]  ;;  %v6441_v9 = vor.u32 %v8796_v1, %v6438_v3 }
  0x26   : > { %665 = vmatpush.bf16.msra.mxu1 %v6473_v49  ;;  %694 = vmatpush.bf16.msra.mxu2 %v6477_v50  ;;  %v6445_v10 = vor.u32 %v8799_v5, %v6444_v4  ;;  %v6420_v11 = vld [vmem:[%s13767_s1 + $0x20] sm:$0xf]  ;;  %v8794_v12 = vld [vmem:[%s13767_s1 + $0x2c] sm:$0xf0]  ;;  %v8792_v13 = vld [vmem:[%s13767_s1 + $0x24] sm:$0xf]  ;;  %v6449_v14 = vor.u32 %v8797_v6, %v6446_v7 }
  0x27   : > { %723 = vmatpush.bf16.msra.mxu3 %v6481_v54  ;;  %v6422_v15 = vld [vmem:[%s13767_s1 + $0x30] sm:$0xf0]  ;;  %v6428_v16 = vld [vmem:[%s13767_s1 + $0x28] sm:$0xf]  ;;  %v8795_v17 = vld [vmem:[%s13767_s1 + $0x34] sm:$0xf0]  ;;  %v6421_v20 = vor.u32 %v8794_v12, %v6420_v11 }
  0x28   : > { %v8793_v18 = vld [vmem:[%s13767_s1 + $0x2c] sm:$0xf]  ;;  %v6430_v19 = vld [vmem:[%s13767_s1 + $0x38] sm:$0xf0]  ;;  %v6404_v21 = vld [vmem:[%s13767_s1] sm:$0xf]  ;;  %v6425_v22 = vor.u32 %v8792_v13, %v6422_v15  ;;  %v6429_v23 = vor.u32 %v8795_v17, %v6428_v16 }
  0x29   : > { %637 = vmatpush.bf16.msra.mxu0 %v6453_v60  ;;  %v8790_v24 = vld [vmem:[%s13767_s1 + $0xc] sm:$0xf0]  ;;  %v8788_v25 = vld [vmem:[%s13767_s1 + $0x4] sm:$0xf]  ;;  %v6406_v26 = vld [vmem:[%s13767_s1 + $0x10] sm:$0xf0]  ;;  %v6433_v27 = vor.u32 %v8793_v18, %v6430_v19 }
  0x2a   : > { %666 = vmatpush.bf16.msra.mxu1 %v6457_v61  ;;  %695 = vmatpush.bf16.msra.mxu2 %v6461_v62  ;;  %v6412_v28 = vld [vmem:[%s13767_s1 + $0x8] sm:$0xf]  ;;  %v8791_v29 = vld [vmem:[%s13767_s1 + $0x14] sm:$0xf0]  ;;  %v8789_v30 = vld [vmem:[%s13767_s1 + $0xc] sm:$0xf]  ;;  %v6405_v34 = vor.u32 %v8790_v24, %v6404_v21  ;;  %v6409_v37 = vor.u32 %v8788_v25, %v6406_v26 }
  0x2b   : > { %724 = vmatpush.bf16.msra.mxu3 %v6465_v2  ;;  %v6414_v31 = vld [vmem:[%s13767_s1 + $0x18] sm:$0xf0]  ;;  %v6644_v32 = vld [vmem:[%s13768_s2 + $0xe0] sm:$0xf]  ;;  %v8850_v33 = vld [vmem:[%s13768_s2 + $0xec] sm:$0xf0]  ;;  %v6413_v38 = vor.u32 %v8791_v29, %v6412_v28 }
  0x2c   : > { %v8848_v35 = vld [vmem:[%s13768_s2 + $0xe4] sm:$0xf]  ;;  %v6646_v36 = vld [vmem:[%s13768_s2 + $0xf0] sm:$0xf0]  ;;  %v6417_v40 = vor.u32 %v8789_v30, %v6414_v31  ;;  %v6645_v41 = vor.u32 %v8850_v33, %v6644_v32  ;;  %v8849_v42 = vld [vmem:[%s13768_s2 + $0xec] sm:$0xf] }
  0x2d   : > { %638 = vmatpush.bf16.msra.mxu0 %v6437_v8  ;;  %v8784_v39 = vld [vmem:[%s9798_s23] sm:$0xff]  ;;  %v6652_v43 = vld [vmem:[%s13768_s2 + $0xe8] sm:$0xf]  ;;  %v8851_v44 = vld [vmem:[%s13768_s2 + $0xf4] sm:$0xf0]  ;;  %v6649_v45 = vor.u32 %v8848_v35, %v6646_v36  ;;  %p8777_p5 = scmp.ne.s32.totalorder %s9790_s18, 1 }
  0x2e   : > { %667 = vmatpush.bf16.msra.mxu1 %v6441_v9  ;;  %696 = vmatpush.bf16.msra.mxu2 %v6445_v10  ;;  %v6654_v46 = vld [vmem:[%s13768_s2 + $0xf8] sm:$0xf0]  ;;  %v6628_v47 = vld [vmem:[%s13768_s2 + $0xc0] sm:$0xf]  ;;  %v8846_v48 = vld [vmem:[%s13768_s2 + $0xcc] sm:$0xf0]  ;;  %v6653_v51 = vor.u32 %v8851_v44, %v6652_v43 }
  0x2f   : > { %725 = vmatpush.bf16.msra.mxu3 %v6449_v14  ;;  %v8844_v49 = vld [vmem:[%s13768_s2 + $0xc4] sm:$0xf]  ;;  %v6630_v50 = vld [vmem:[%s13768_s2 + $0xd0] sm:$0xf0]  ;;  %v6657_v52 = vor.u32 %v8849_v42, %v6654_v46  ;;  %v6629_v53 = vor.u32 %v8846_v48, %v6628_v47  ;;  %v8845_v54 = vld [vmem:[%s13768_s2 + $0xcc] sm:$0xf] }
  0x30   : > { %v6636_v55 = vld [vmem:[%s13768_s2 + $0xc8] sm:$0xf]  ;;  %v8847_v56 = vld [vmem:[%s13768_s2 + $0xd4] sm:$0xf0]  ;;  %v6633_v57 = vor.u32 %v8844_v49, %v6630_v50  ;;  %v6638_v58 = vld [vmem:[%s13768_s2 + $0xd8] sm:$0xf0] }
  0x31   : > { %639 = vmatpush.bf16.msra.mxu0 %v6421_v20  ;;  %v6612_v59 = vld [vmem:[%s13768_s2 + $0xa0] sm:$0xf]  ;;  %v8842_v60 = vld [vmem:[%s13768_s2 + $0xac] sm:$0xf0]  ;;  %v8840_v61 = vld [vmem:[%s13768_s2 + $0xa4] sm:$0xf]  ;;  %v6637_v63 = vor.u32 %v8847_v56, %v6636_v55  ;;  %v6641_v0 = vor.u32 %v8845_v54, %v6638_v58 }
  0x32   : > { %668 = vmatpush.bf16.msra.mxu1 %v6425_v22  ;;  %697 = vmatpush.bf16.msra.mxu2 %v6429_v23  ;;  %v6614_v62 = vld [vmem:[%s13768_s2 + $0xb0] sm:$0xf0]  ;;  %v6613_v1 = vor.u32 %v8842_v60, %v6612_v59  ;;  %v8841_v2 = vld [vmem:[%s13768_s2 + $0xac] sm:$0xf]  ;;  %v6620_v3 = vld [vmem:[%s13768_s2 + $0xa8] sm:$0xf] }
  0x33   : > { %726 = vmatpush.bf16.msra.mxu3 %v6433_v27  ;;  %v8843_v4 = vld [vmem:[%s13768_s2 + $0xb4] sm:$0xf0]  ;;  %v6617_v5 = vor.u32 %v8840_v61, %v6614_v62  ;;  %v6622_v6 = vld [vmem:[%s13768_s2 + $0xb8] sm:$0xf0]  ;;  %v6596_v7 = vld [vmem:[%s13768_s2 + $0x80] sm:$0xf] }
  0x34   : > { %v8838_v8 = vld [vmem:[%s13768_s2 + $0x8c] sm:$0xf0]  ;;  %v8836_v9 = vld [vmem:[%s13768_s2 + $0x84] sm:$0xf]  ;;  %v6598_v10 = vld [vmem:[%s13768_s2 + $0x90] sm:$0xf0]  ;;  %v6621_v11 = vor.u32 %v8843_v4, %v6620_v3  ;;  %v6625_v12 = vor.u32 %v8841_v2, %v6622_v6 }
  0x35   : > { %640 = vmatpush.bf16.msra.mxu0 %v6405_v34  ;;  %v6597_v13 = vor.u32 %v8838_v8, %v6596_v7  ;;  %v8837_v14 = vld [vmem:[%s13768_s2 + $0x8c] sm:$0xf]  ;;  %v6604_v15 = vld [vmem:[%s13768_s2 + $0x88] sm:$0xf]  ;;  %v8839_v16 = vld [vmem:[%s13768_s2 + $0x94] sm:$0xf0]  ;;  %v6601_v17 = vor.u32 %v8836_v9, %v6598_v10 }
  0x36   : > { %669 = vmatpush.bf16.msra.mxu1 %v6409_v37  ;;  %698 = vmatpush.bf16.msra.mxu2 %v6413_v38  ;;  %v6606_v18 = vld [vmem:[%s13768_s2 + $0x98] sm:$0xf0]  ;;  %v6580_v19 = vld [vmem:[%s13768_s2 + $0x60] sm:$0xf]  ;;  %v8834_v20 = vld [vmem:[%s13768_s2 + $0x6c] sm:$0xf0]  ;;  %v6605_v24 = vor.u32 %v8839_v16, %v6604_v15 }
  0x37   : > { %727 = vmatpush.bf16.msra.mxu3 %v6417_v40  ;;  %v8832_v21 = vld [vmem:[%s13768_s2 + $0x64] sm:$0xf]  ;;  %v6582_v22 = vld [vmem:[%s13768_s2 + $0x70] sm:$0xf0]  ;;  %v8785_v23 = vld [vmem:[%s9798_s23 + $0x8] sm:$0xff]  ;;  %v6609_v25 = vor.u32 %v8837_v14, %v6606_v18  ;;  %v6581_v26 = vor.u32 %v8834_v20, %v6580_v19 }
  0x38   : > { %641 = vmatmul.bf16.vlgmr.msra.gmra.mxu0 %v8784_v39  ;;  %v8833_v27 = vld [vmem:[%s13768_s2 + $0x6c] sm:$0xf]  ;;  %v6588_v28 = vld [vmem:[%s13768_s2 + $0x68] sm:$0xf]  ;;  %v8835_v29 = vld [vmem:[%s13768_s2 + $0x74] sm:$0xf0]  ;;  %v6585_v30 = vor.u32 %v8832_v21, %v6582_v22 }
  0x39   : > { %980 = vmatpush.bf16.msrb.mxu0 %v6645_v41  ;;  %670 = vmatmul.bf16.vlgmr.msra.gmra.mxu1 %v8784_v39  ;;  %v6590_v31 = vld [vmem:[%s13768_s2 + $0x78] sm:$0xf0]  ;;  %v6564_v32 = vld [vmem:[%s13768_s2 + $0x40] sm:$0xf]  ;;  %v8830_v33 = vld [vmem:[%s13768_s2 + $0x4c] sm:$0xf0]  ;;  %v6589_v36 = vor.u32 %v8835_v29, %v6588_v28 }
  0x3a   : > { %993 = vmatpush.bf16.msrb.mxu1 %v6649_v45  ;;  %699 = vmatmul.bf16.vlgmr.msra.gmra.mxu2 %v8784_v39  ;;  %v8828_v34 = vld [vmem:[%s13768_s2 + $0x44] sm:$0xf]  ;;  %v6566_v35 = vld [vmem:[%s13768_s2 + $0x50] sm:$0xf0]  ;;  %v6593_v37 = vor.u32 %v8833_v27, %v6590_v31  ;;  %v6565_v38 = vor.u32 %v8830_v33, %v6564_v32  ;;  %v8829_v40 = vld [vmem:[%s13768_s2 + $0x4c] sm:$0xf] }
  0x3b   : > { %728 = vmatmul.bf16.vlgmr.msra.gmra.mxu3 %v8784_v39  ;;  %1006 = vmatpush.bf16.msrb.mxu2 %v6653_v51  ;;  %v6569_v39 = vor.u32 %v8828_v34, %v6566_v35  ;;  %v6574_v41 = vld [vmem:[%s13768_s2 + $0x58] sm:$0xf0]  ;;  %v6548_v42 = vld [vmem:[%s13768_s2 + $0x20] sm:$0xf]  ;;  %v8826_v43 = vld [vmem:[%s13768_s2 + $0x2c] sm:$0xf0] }
  0x3c   : > { %1019 = vmatpush.bf16.msrb.mxu3 %v6657_v52  ;;  %v8824_v44 = vld [vmem:[%s13768_s2 + $0x24] sm:$0xf]  ;;  %v6577_v45 = vor.u32 %v8829_v40, %v6574_v41  ;;  %v6549_v46 = vor.u32 %v8826_v43, %v6548_v42  ;;  %v6550_v47 = vld [vmem:[%s13768_s2 + $0x30] sm:$0xf0]  ;;  %v6572_v48 = vld [vmem:[%s13768_s2 + $0x48] sm:$0xf] }
  0x3d   : > { %981 = vmatpush.bf16.msrb.mxu0 %v6629_v53  ;;  %v8831_v49 = vld [vmem:[%s13768_s2 + $0x54] sm:$0xf0]  ;;  %v6553_v50 = vor.u32 %v8824_v44, %v6550_v47  ;;  %v8825_v52 = vld [vmem:[%s13768_s2 + $0x2c] sm:$0xf]  ;;  %v6558_v53 = vld [vmem:[%s13768_s2 + $0x38] sm:$0xf0] }
  0x3e   : > { %994 = vmatpush.bf16.msrb.mxu1 %v6633_v57  ;;  %v6573_v51 = vor.u32 %v8831_v49, %v6572_v48  ;;  %v6532_v54 = vld [vmem:[%s13768_s2] sm:$0xf]  ;;  %v8822_v55 = vld [vmem:[%s13768_s2 + $0xc] sm:$0xf0]  ;;  %v8820_v56 = vld [vmem:[%s13768_s2 + $0x4] sm:$0xf]  ;;  %v6561_v60 = vor.u32 %v8825_v52, %v6558_v53 }
  0x3f   : > { %1007 = vmatpush.bf16.msrb.mxu2 %v6637_v63  ;;  %v6534_v57 = vld [vmem:[%s13768_s2 + $0x10] sm:$0xf0]  ;;  %v6556_v58 = vld [vmem:[%s13768_s2 + $0x28] sm:$0xf]  ;;  %v8827_v59 = vld [vmem:[%s13768_s2 + $0x34] sm:$0xf0]  ;;  %v6533_v61 = vor.u32 %v8822_v55, %v6532_v54 }
  0x40   : > { %1020 = vmatpush.bf16.msrb.mxu3 %v6641_v0  ;;  %v6557_v62 = vor.u32 %v8827_v59, %v6556_v58  ;;  %v6540_v63 = vld [vmem:[%s13768_s2 + $0x8] sm:$0xf]  ;;  %v8823_v0 = vld [vmem:[%s13768_s2 + $0x14] sm:$0xf0]  ;;  %v8821_v2 = vld [vmem:[%s13768_s2 + $0xc] sm:$0xf] }
  0x41   : > { %982 = vmatpush.bf16.msrb.mxu0 %v6613_v1  ;;  %v6537_v1 = vor.u32 %v8820_v56, %v6534_v57  ;;  %v6542_v3 = vld [vmem:[%s13768_s2 + $0x18] sm:$0xf0]  ;;  %v6541_v4 = vor.u32 %v8823_v0, %v6540_v63  ;;  %v8786_v6 = vld [vmem:[%s9798_s23 + $0x10] sm:$0xff]  ;;  %v781_v8 = vld [vmem:[#allocation2] sm:$0xff] }
  0x42   : > { %995 = vmatpush.bf16.msrb.mxu1 %v6617_v5  ;;  %v6545_v5 = vor.u32 %v8821_v2, %v6542_v3  ;;  %v8787_v7 = vld [vmem:[%s9798_s23 + $0x18] sm:$0xff]  ;;  %v787_v9 = vpack.c.bf16 %v781_v8, %v781_v8  ;;  %v439_v16 = vld [vmem:[%s13769_s3] sm:$0xf]  ;;  %v8882_v47 = vld [vmem:[%s13768_s2 + $0xec] sm:$0xf0] }
  0x43   : > { %1008 = vmatpush.bf16.msrb.mxu2 %v6621_v11  ;;  %v10225_v19 = vperm.slane %v439_v16, 1  ;;  %v8880_v48 = vld [vmem:[%s13768_s2 + $0xe4] sm:$0xf]  ;;  %v6777_v52 = vld [vmem:[%s13768_s2 + $0xf0] sm:$0xf0] }
  0x44   : > { %1021 = vmatpush.bf16.msrb.mxu3 %v6625_v12  ;;  %v6783_v53 = vld [vmem:[%s13768_s2 + $0xe8] sm:$0xf]  ;;  %v8883_v54 = vld [vmem:[%s13768_s2 + $0xf4] sm:$0xf0]  ;;  %v6780_v57 = vor.u32 %v8880_v48, %v6777_v52  ;;  %v8881_v59 = vld [vmem:[%s13768_s2 + $0xec] sm:$0xf] }
  0x45   : > { %983 = vmatpush.bf16.msrb.mxu0 %v6597_v13  ;;  %v6784_v58 = vor.u32 %v8883_v54, %v6783_v53  ;;  %v6759_v63 = vld [vmem:[%s13768_s2 + $0xc0] sm:$0xf]  ;;  %v8878_v0 = vld [vmem:[%s13768_s2 + $0xcc] sm:$0xf0]  ;;  %v6761_v3 = vld [vmem:[%s13768_s2 + $0xd0] sm:$0xf0] }
  0x46   : > { %996 = vmatpush.bf16.msrb.mxu1 %v6601_v17  ;;  %v10221_v17 = vperm.slane %v439_v16, 0  ;;  %v6760_v2 = vor.u32 %v8878_v0, %v6759_v63  ;;  %v8877_v8 = vld [vmem:[%s13768_s2 + $0xcc] sm:$0xf]  ;;  %v8875_v48 = vld [vmem:[%s13768_s2 + $0xb4] sm:$0xf0] }
  0x47   : > { %1009 = vmatpush.bf16.msrb.mxu2 %v6605_v24  ;;  %v8873_v54 = vld [vmem:[%s13768_s2 + $0xac] sm:$0xf]  ;;  %v6729_v63 = vld [vmem:[%s13768_s2 + $0x90] sm:$0xf0]  ;;  %v6735_v0 = vld [vmem:[%s13768_s2 + $0x88] sm:$0xf] }
  0x48   : > { %1022 = vmatpush.bf16.msrb.mxu3 %v6609_v25  ;;  %646 = vmatmul.bf16.gmra.mxu0 %v8785_v23  ;;  %v10235_v25 = vperm.slane %v439_v16, 2 }
  0x49   : > { %984 = vmatpush.bf16.msrb.mxu0 %v6581_v26  ;;  %675 = vmatmul.bf16.gmra.mxu1 %v8785_v23  ;;  %v10237_v26 = vperm.slane %v439_v16, 3 }
  0x4a   : > { %997 = vmatpush.bf16.msrb.mxu1 %v6585_v30  ;;  %704 = vmatmul.bf16.gmra.mxu2 %v8785_v23 }
  0x4b   : > { %733 = vmatmul.bf16.gmra.mxu3 %v8785_v23  ;;  %1010 = vmatpush.bf16.msrb.mxu2 %v6589_v36 }
  0x4c   : > { %1023 = vmatpush.bf16.msrb.mxu3 %v6593_v37 }
  0x4d   : > { %985 = vmatpush.bf16.msrb.mxu0 %v6565_v38 }
  0x4e   : > { %998 = vmatpush.bf16.msrb.mxu1 %v6569_v39 }
  0x4f   : > { %1011 = vmatpush.bf16.msrb.mxu2 %v6573_v51 }
  0x50   : > { %1024 = vmatpush.bf16.msrb.mxu3 %v6577_v45 }
  0x51   : > { %986 = vmatpush.bf16.msrb.mxu0 %v6549_v46  ;;  %v6775_v46 = vld [vmem:[%s13768_s2 + $0xe0] sm:$0xf] }
  0x52   : > { %999 = vmatpush.bf16.msrb.mxu1 %v6553_v50  ;;  %v6776_v51 = vor.u32 %v8882_v47, %v6775_v46  ;;  %v6745_v46 = vld [vmem:[%s13768_s2 + $0xb0] sm:$0xf0]  ;;  %v6751_v47 = vld [vmem:[%s13768_s2 + $0xa8] sm:$0xf] }
  0x53   : > { %1012 = vmatpush.bf16.msrb.mxu2 %v6557_v62  ;;  %v6752_v53 = vor.u32 %v8875_v48, %v6751_v47 }
  0x54   : > { %1025 = vmatpush.bf16.msrb.mxu3 %v6561_v60  ;;  %v6785_v60 = vld [vmem:[%s13768_s2 + $0xf8] sm:$0xf0] }
  0x55   : > { %987 = vmatpush.bf16.msrb.mxu0 %v6533_v61  ;;  %v6788_v62 = vor.u32 %v8881_v59, %v6785_v60  ;;  %v8870_v59 = vld [vmem:[%s13768_s2 + $0x8c] sm:$0xf0]  ;;  %v8868_v60 = vld [vmem:[%s13768_s2 + $0x84] sm:$0xf] }
  0x56   : > { %1000 = vmatpush.bf16.msrb.mxu1 %v6537_v1  ;;  %v8876_v1 = vld [vmem:[%s13768_s2 + $0xc4] sm:$0xf] }
  0x57   : > { %1013 = vmatpush.bf16.msrb.mxu2 %v6541_v4  ;;  %v6767_v4 = vld [vmem:[%s13768_s2 + $0xc8] sm:$0xf] }
  0x58   : > { %1026 = vmatpush.bf16.msrb.mxu3 %v6545_v5  ;;  %651 = vmatmul.bf16.gmra.mxu0 %v8786_v6  ;;  %v8879_v5 = vld [vmem:[%s13768_s2 + $0xd4] sm:$0xf0] }
  0x59   : > { %680 = vmatmul.bf16.gmra.mxu1 %v8786_v6  ;;  %1297 = vmatpush.bf16.msra.mxu0 %v6776_v51 }
  0x5a   : > { %709 = vmatmul.bf16.gmra.mxu2 %v8786_v6  ;;  %1310 = vmatpush.bf16.msra.mxu1 %v6780_v57 }
  0x5b   : > { %738 = vmatmul.bf16.gmra.mxu3 %v8786_v6  ;;  %1323 = vmatpush.bf16.msra.mxu2 %v6784_v58  ;;  %v6764_v6 = vor.u32 %v8876_v1, %v6761_v3  ;;  %v6727_v58 = vld [vmem:[%s13768_s2 + $0x80] sm:$0xf]  ;;  %v8871_v1 = vld [vmem:[%s13768_s2 + $0x94] sm:$0xf0] }
  0x5c   : > { %1336 = vmatpush.bf16.msra.mxu3 %v6788_v62  ;;  %v6728_v62 = vor.u32 %v8870_v59, %v6727_v58  ;;  %v6736_v3 = vor.u32 %v8871_v1, %v6735_v0  ;;  %v6695_v59 = vld [vmem:[%s13768_s2 + $0x40] sm:$0xf]  ;;  %v8860_v0 = vld [vmem:[%s13768_s2 + $0x44] sm:$0xf]  ;;  %v6697_v1 = vld [vmem:[%s13768_s2 + $0x50] sm:$0xf0] }
  0x5d   : > { %1298 = vmatpush.bf16.msra.mxu0 %v6760_v2  ;;  %v6732_v2 = vor.u32 %v8868_v60, %v6729_v63  ;;  %v8862_v60 = vld [vmem:[%s13768_s2 + $0x4c] sm:$0xf0] }
  0x5e   : > { %1311 = vmatpush.bf16.msra.mxu1 %v6764_v6  ;;  %v6696_v63 = vor.u32 %v8862_v60, %v6695_v59  ;;  %v6663_v59 = vld [vmem:[%s13768_s2] sm:$0xf]  ;;  %v8854_v60 = vld [vmem:[%s13768_s2 + $0xc] sm:$0xf0] }
  0x68   : > { %656 = vmatmul.bf16.gmra.mxu0 %v8787_v7 }
  0x69   : > { %685 = vmatmul.bf16.gmra.mxu1 %v8787_v7 }
  0x6a   : > { %714 = vmatmul.bf16.gmra.mxu2 %v8787_v7 }
  0x6b   : > { %743 = vmatmul.bf16.gmra.mxu3 %v8787_v7  ;;  %v6768_v7 = vor.u32 %v8879_v5, %v6767_v4  ;;  %v8869_v4 = vld [vmem:[%s13768_s2 + $0x8c] sm:$0xf]  ;;  %v6737_v5 = vld [vmem:[%s13768_s2 + $0x98] sm:$0xf0] }
  0x6c   : > { %v6740_v6 = vor.u32 %v8869_v4, %v6737_v5  ;;  %v8863_v4 = vld [vmem:[%s13768_s2 + $0x54] sm:$0xf0]  ;;  %v8861_v5 = vld [vmem:[%s13768_s2 + $0x4c] sm:$0xf] }
  0x6d   : > { %1324 = vmatpush.bf16.msra.mxu2 %v6768_v7 }
  0x71   : > { %1325 = vmatpush.bf16.msra.mxu2 %v6752_v53  ;;  %v8865_v53 = vld [vmem:[%s13768_s2 + $0x6c] sm:$0xf] }
  0x75   : > { %1326 = vmatpush.bf16.msra.mxu2 %v6736_v3  ;;  %v6703_v3 = vld [vmem:[%s13768_s2 + $0x48] sm:$0xf] }
  0x78   : > { %988 = vmatmul.bf16.vlgmr.msrb.gmra.mxu0 %v787_v9 }
  0x79   : > { %1001 = vmatmul.bf16.vlgmr.msrb.gmra.mxu1 %v787_v9 }
  0x7a   : > { %1014 = vmatmul.bf16.vlgmr.msrb.gmra.mxu2 %v787_v9 }
  0x7b   : > { %1027 = vmatmul.bf16.vlgmr.msrb.gmra.mxu3 %v787_v9  ;;  %v6769_v9 = vld [vmem:[%s13768_s2 + $0xd8] sm:$0xf0] }
  0x7c   : > { %v6772_v16 = vor.u32 %v8877_v8, %v6769_v9  ;;  %v6711_v9 = vld [vmem:[%s13768_s2 + $0x60] sm:$0xf] }
  0x7e   : > { %1337 = vmatpush.bf16.msra.mxu3 %v6772_v16  ;;  %v8866_v16 = vld [vmem:[%s13768_s2 + $0x6c] sm:$0xf0] }
  0xb5   : > { %v10206_v10 = vpop.f32.mrf.mxu0 }
  0xb6   : > { %v10208_v11 = vpop.f32.mrf.mxu1  ;;  %v643_v7 = vadd.f32 %v10206_v10, %v10221_v17 }
  0xbd   : > { %v10210_v12 = vpop.f32.mrf.mxu2  ;;  %v10214_v14 = vpop.f32.mrf.mxu0 }
  0xbe   : > { %v10212_v13 = vpop.f32.mrf.mxu3  ;;  %v10216_v15 = vpop.f32.mrf.mxu1 }
  0xc5   : > { %v10223_v18 = vpop.f32.mrf.mxu2  ;;  %v647_v21 = vpop.f32.mrf.mxu0 }
  0xc6   : > { %v10227_v20 = vpop.f32.mrf.mxu3  ;;  %v10230_v22 = vadd.f32 %v647_v21, %v10221_v17  ;;  %v676_v23 = vpop.f32.mrf.mxu1 }
  0xc7   : > { %v10233_v24 = vadd.f32 %v676_v23, %v10225_v19  ;;  %v6743_v23 = vld [vmem:[%s13768_s2 + $0xa0] sm:$0xf] }
  0xcd   : > { %v705_v27 = vpop.f32.mrf.mxu2  ;;  %v10242_v30 = vpop.f32.mrf.mxu0 }
  0xce   : > { %v10240_v28 = vadd.f32 %v705_v27, %v10235_v25  ;;  %v734_v29 = vpop.f32.mrf.mxu3  ;;  %v10247_v32 = vpop.f32.mrf.mxu1  ;;  %v8874_v27 = vld [vmem:[%s13768_s2 + $0xac] sm:$0xf0] }
  0xcf   : > { %v10245_v31 = vadd.f32 %v734_v29, %v10237_v26  ;;  %v8872_v29 = vld [vmem:[%s13768_s2 + $0xa4] sm:$0xf] }
  0xd0   : > { %v6748_v52 = vor.u32 %v8872_v29, %v6745_v46  ;;  %v6712_v29 = vor.u32 %v8866_v16, %v6711_v9  ;;  %v8867_v46 = vld [vmem:[%s13768_s2 + $0x74] sm:$0xf0]  ;;  %v6679_v9 = vld [vmem:[%s13768_s2 + $0x20] sm:$0xf]  ;;  %v8858_v16 = vld [vmem:[%s13768_s2 + $0x2c] sm:$0xf0] }
  0xd2   : > { %1312 = vmatpush.bf16.msra.mxu1 %v6748_v52 }
  0xd5   : > { %v10249_v33 = vpop.f32.mrf.mxu2  ;;  %v652_v35 = vpop.f32.mrf.mxu0 }
  0xd6   : > { %v10251_v34 = vpop.f32.mrf.mxu3  ;;  %v10254_v36 = vadd.f32 %v652_v35, %v10221_v17  ;;  %v681_v37 = vpop.f32.mrf.mxu1  ;;  %1313 = vmatpush.bf16.msra.mxu1 %v6732_v2  ;;  %v6700_v2 = vor.u32 %v8860_v0, %v6697_v1  ;;  %v6665_v0 = vld [vmem:[%s13768_s2 + $0x10] sm:$0xf0]  ;;  %v6671_v1 = vld [vmem:[%s13768_s2 + $0x8] sm:$0xf] }
  0xd7   : > { %v10257_v38 = vadd.f32 %v681_v37, %v10225_v19 }
  0xdd   : > { %v710_v39 = vpop.f32.mrf.mxu2  ;;  %v10262_v42 = vpop.f32.mrf.mxu0 }
  0xde   : > { %v10260_v40 = vadd.f32 %v710_v39, %v10235_v25  ;;  %v739_v41 = vpop.f32.mrf.mxu3  ;;  %v10267_v44 = vpop.f32.mrf.mxu1 }
  0xdf   : > { %v10265_v43 = vadd.f32 %v739_v41, %v10237_v26  ;;  %v6744_v41 = vor.u32 %v8874_v27, %v6743_v23  ;;  %v672_v23 = vadd.f32 %v10208_v11, %v10225_v19 }
  0xe1   : > { %1299 = vmatpush.bf16.msra.mxu0 %v6744_v41  ;;  %v6719_v41 = vld [vmem:[%s13768_s2 + $0x68] sm:$0xf] }
  0xe2   : > { %v6720_v52 = vor.u32 %v8867_v46, %v6719_v41  ;;  %v6681_v41 = vld [vmem:[%s13768_s2 + $0x30] sm:$0xf0]  ;;  %v6687_v46 = vld [vmem:[%s13768_s2 + $0x28] sm:$0xf] }
  0xe4   : > { %1327 = vmatpush.bf16.msra.mxu2 %v6720_v52  ;;  %v8857_v52 = vld [vmem:[%s13768_s2 + $0x2c] sm:$0xf] }
  0xe5   : > { %v10269_v45 = vpop.f32.mrf.mxu2  ;;  %v657_v50 = vpop.f32.mrf.mxu0  ;;  %1300 = vmatpush.bf16.msra.mxu0 %v6728_v62 }
  0xe6   : > { %v10280_v49 = vpop.f32.mrf.mxu3  ;;  %v10292_v55 = vadd.f32 %v657_v50, %v10221_v17  ;;  %v686_v56 = vpop.f32.mrf.mxu1 }
  0xe7   : > { %v10301_v61 = vadd.f32 %v686_v56, %v10225_v19  ;;  %v6753_v56 = vld [vmem:[%s13768_s2 + $0xb8] sm:$0xf0] }
  0xe8   : > { %v6756_v57 = vor.u32 %v8873_v54, %v6753_v56  ;;  %v6721_v54 = vld [vmem:[%s13768_s2 + $0x78] sm:$0xf0] }
  0xe9   : > { %1301 = vmatpush.bf16.msra.mxu0 %v6712_v29  ;;  %v6680_v29 = vor.u32 %v8858_v16, %v6679_v9 }
  0xea   : > { %1338 = vmatpush.bf16.msra.mxu3 %v6756_v57  ;;  %v6724_v57 = vor.u32 %v8865_v53, %v6721_v54  ;;  %v6689_v53 = vld [vmem:[%s13768_s2 + $0x38] sm:$0xf0] }
  0xed   : > { %v715_v21 = vpop.f32.mrf.mxu2  ;;  %v10339_v39 = vpop.f32.mrf.mxu0  ;;  %1302 = vmatpush.bf16.msra.mxu0 %v6696_v63  ;;  %v6664_v63 = vor.u32 %v8854_v60, %v6663_v59 }
  0xee   : > { %v10337_v35 = vadd.f32 %v715_v21, %v10235_v25  ;;  %v744_v37 = vpop.f32.mrf.mxu3  ;;  %v10353_v51 = vpop.f32.mrf.mxu1  ;;  %v8864_v21 = vld [vmem:[%s13768_s2 + $0x64] sm:$0xf]  ;;  %1339 = vmatpush.bf16.msra.mxu3 %v6740_v6  ;;  %v6704_v6 = vor.u32 %v8863_v4, %v6703_v3 }
  0xef   : > { %v10351_v50 = vadd.f32 %v744_v37, %v10237_v26  ;;  %v6713_v37 = vld [vmem:[%s13768_s2 + $0x70] sm:$0xf0] }
  0xf0   : > { %v6716_v11 = vor.u32 %v8864_v21, %v6713_v37  ;;  %v730_v21 = vadd.f32 %v10212_v13, %v10237_v26  ;;  %v8856_v37 = vld [vmem:[%s13768_s2 + $0x24] sm:$0xf]  ;;  %1328 = vmatpush.bf16.msra.mxu2 %v6704_v6  ;;  %v8853_v6 = vld [vmem:[%s13768_s2 + $0xc] sm:$0xf] }
  0xf1   : > { %v6684_v13 = vor.u32 %v8856_v37, %v6681_v41  ;;  %1303 = vmatpush.bf16.msra.mxu0 %v6680_v29 }
  0xf2   : > { %1314 = vmatpush.bf16.msra.mxu1 %v6716_v11  ;;  %1340 = vmatpush.bf16.msra.mxu3 %v6724_v57  ;;  %v8859_v11 = vld [vmem:[%s13768_s2 + $0x34] sm:$0xf0] }
  0xf3   : > { %v6688_v57 = vor.u32 %v8859_v11, %v6687_v46  ;;  %v701_v46 = vadd.f32 %v10210_v12, %v10235_v25 }
  0xf5   : > { %v10387_v8 = vpop.f32.mrf.mxu2  ;;  %v989_v27 = vpop.f32.mrf.mxu0  ;;  %1329 = vmatpush.bf16.msra.mxu2 %v6688_v57  ;;  %1304 = vmatpush.bf16.msra.mxu0 %v6664_v63 }
  0xf6   : > { %v10400_v10 = vpop.f32.mrf.mxu3  ;;  %v1032_v47 = vadd.f32 %v989_v27, %v643_v7  ;;  %v1002_v48 = vpop.f32.mrf.mxu1  ;;  %v6705_v7 = vld [vmem:[%s13768_s2 + $0x58] sm:$0xf0]  ;;  %1315 = vmatpush.bf16.msra.mxu1 %v6700_v2  ;;  %v8855_v2 = vld [vmem:[%s13768_s2 + $0x14] sm:$0xf0] }
  0xf7   : > { %v1033_v56 = vadd.f32 %v1002_v48, %v672_v23  ;;  %v6708_v27 = vor.u32 %v8861_v5, %v6705_v7  ;;  %v6673_v7 = vld [vmem:[%s13768_s2 + $0x18] sm:$0xf0] }
  0xf8   : > { %v6658_v58 = vmul.f32 -1.442695, %v1032_v47  ;;  %v6676_v29 = vor.u32 %v8853_v6, %v6673_v7 }
  0xf9   : > { %v6659_v62 = vmul.f32 -1.442695, %v1033_v56  ;;  %1341 = vmatpush.bf16.msra.mxu3 %v6708_v27 }
  0xfa   : > { %9392 = vpow2.f32 %v6658_v58  ;;  %v6692_v58 = vor.u32 %v8857_v52, %v6689_v53  ;;  %1316 = vmatpush.bf16.msra.mxu1 %v6684_v13 }
  0xfb   : > { %9394 = vpow2.f32 %v6659_v62  ;;  %v8852_v62 = vld [vmem:[%s13768_s2 + $0x4] sm:$0xf] }
  0xfc   : > { %v6668_v5 = vor.u32 %v8852_v62, %v6665_v0 }
  0xfd   : > { %v1015_v23 = vpop.f32.mrf.mxu2  ;;  %v991_v48 = vpop.f32.mrf.mxu0  ;;  %1342 = vmatpush.bf16.msra.mxu3 %v6692_v58 }
  0xfe   : > { %v1028_v47 = vpop.f32.mrf.mxu3  ;;  %v1004_v56 = vpop.f32.mrf.mxu1  ;;  %1317 = vmatpush.bf16.msra.mxu1 %v6668_v5  ;;  %v1034_v13 = vadd.f32 %v1015_v23, %v701_v46 }
  0xff   : > { %v1035_v54 = vadd.f32 %v1028_v47, %v730_v21  ;;  %v6672_v21 = vor.u32 %v8855_v2, %v6671_v1 }
 0x100   : > { %v9393_v3 = vpop.eup %9392 }
 0x101   : > { %v6660_v4 = vmul.f32 -1.442695, %v1035_v54  ;;  %v9395_v9 = vpop.eup %9394  ;;  %v1039_v16 = vadd.f32 1.0, %v9393_v3  ;;  %1330 = vmatpush.bf16.msra.mxu2 %v6672_v21  ;;  %1343 = vmatpush.bf16.msra.mxu3 %v6676_v29 }
 0x102   : > { %v1058_v27 = vadd.f32 1.0, %v9395_v9 }
 0x103   : > { %9396 = vpow2.f32 %v6660_v4  ;;  %v1051_v58 = vand.u32 2147483648, %v1039_v16  ;;  %v1049_v62 = vand.u32 2147483647, %v1039_v16  ;;  %vm1045_vm2 = vweird.f32 %v1039_v16  ;;  %v782_v4 = vld [vmem:[#allocation3 + $0x8] sm:$0xff] }
 0x104   : > { %9398 = vrcp.f32 %v1039_v16  ;;  %v1070_v59 = vand.u32 2147483648, %v1058_v27  ;;  %v1068_v0 = vand.u32 2147483647, %v1058_v27  ;;  %vm1064_vm3 = vweird.f32 %v1058_v27 }
 0x105   : > { %9400 = vrcp.f32 %v1058_v27  ;;  %v1017_v37 = vpop.f32.mrf.mxu2  ;;  %v1052_v23 = vor.u32 1.1754944e-38, %v1051_v58  ;;  %vm1050_vm6 = vcmp.eq.f32.partialorder %v1049_v62, 8.507059e+37 }
 0x106   : > { %v1030_v41 = vpop.f32.mrf.mxu3  ;;  %v1071_v3 = vor.u32 1.1754944e-38, %v1070_v59  ;;  %vm1069_vm7 = vcmp.eq.f32.partialorder %v1068_v0, 8.507059e+37  ;;  %v6906_v59 = vld [vmem:[%s13768_s2 + $0xe0] sm:$0xf]  ;;  %v6914_v0 = vld [vmem:[%s13768_s2 + $0xe8] sm:$0xf] }
 0x109   : > { %v9397_v47 = vpop.eup %9396 }
 0x10a   : > { %v9399_v48 = vpop.eup %9398  ;;  %v1078_v11 = vadd.f32 1.0, %v9397_v47 }
 0x10b   : > { %v9401_v52 = vpop.eup %9400  ;;  %v1041_v53 = vmul.f32 %v9399_v48, %v1039_v16  ;;  %vm1046_vm0 = vweird.f32 %v9399_v48 }
 0x10c   : > { %v1060_v54 = vmul.f32 %v9401_v52, %v1058_v27  ;;  %9402 = vrcp.f32 %v1078_v11  ;;  %vm1065_vm1 = vweird.f32 %v9401_v52  ;;  %vm1047_vm4 = vmor %vm1045_vm2, %vm1046_vm0  ;;  %vm1084_vm9 = vweird.f32 %v1078_v11 }
 0x10d   : > { %v1042_v56 = vsub.f32 1.0, %v1041_v53  ;;  %9404 = vtanh.f32 %v1034_v13  ;;  %vm1066_vm5 = vmor %vm1064_vm3, %vm1065_vm1  ;;  %v1090_v13 = vand.u32 2147483648, %v1078_v11 }
 0x10e   : > { %v1061_v57 = vsub.f32 1.0, %v1060_v54 }
 0x10f   : > { %v1043_v60 = vmul.f32 %v9399_v48, %v1042_v56  ;;  %v1091_v54 = vor.u32 1.1754944e-38, %v1090_v13 }
 0x110   : > { %v1062_v63 = vmul.f32 %v9401_v52, %v1061_v57 }
 0x111   : > { %v1044_v12 = vadd.f32 %v9399_v48, %v1043_v60  ;;  %v8912_v60 = vld [vmem:[%s13768_s2 + $0xe4] sm:$0xf] }
 0x112   : > { %v9403_v1 = vpop.eup %9402  ;;  %v1063_v2 = vadd.f32 %v9401_v52, %v1062_v63  ;;  %v6908_v63 = vld [vmem:[%s13768_s2 + $0xf0] sm:$0xf0] }
 0x113   : > { %v1048_v5 = vsel %vm1047_vm4, %v9399_v48, %v1044_v12  ;;  %v1080_v6 = vmul.f32 %v9403_v1, %v1078_v11  ;;  %v9405_v7 = vpop.eup %9404  ;;  %vm1085_vm8 = vweird.f32 %v9403_v1  ;;  %v1088_v48 = vand.u32 2147483647, %v1078_v11  ;;  %v8914_v11 = vld [vmem:[%s13768_s2 + $0xec] sm:$0xf0]  ;;  %v8915_v12 = vld [vmem:[%s13768_s2 + $0xf4] sm:$0xf0] }
 0x114   : > { %v1053_v9 = vsel %vm1050_vm6, %v1052_v23, %v1048_v5  ;;  %v1067_v21 = vsel %vm1066_vm5, %v9401_v52, %v1063_v2  ;;  %vm1086_vm10 = vmor %vm1084_vm9, %vm1085_vm8  ;;  %v6907_v62 = vor.u32 %v8914_v11, %v6906_v59  ;;  %v6915_v23 = vor.u32 %v8915_v12, %v6914_v0  ;;  %v8913_v2 = vld [vmem:[%s13768_s2 + $0xec] sm:$0xf]  ;;  %v6890_v5 = vld [vmem:[%s13768_s2 + $0xc0] sm:$0xf] }
 0x115   : > { %v1072_v29 = vsel %vm1069_vm7, %v1071_v3, %v1067_v21  ;;  %v1095_v37 = vmul.f32 %v9405_v7, %v1053_v9  ;;  %v1081_v41 = vsub.f32 1.0, %v1080_v6  ;;  %vm1089_vm11 = vcmp.eq.f32.partialorder %v1088_v48, 8.507059e+37  ;;  %v6916_v3 = vld [vmem:[%s13768_s2 + $0xf8] sm:$0xf0]  ;;  %v8910_v6 = vld [vmem:[%s13768_s2 + $0xcc] sm:$0xf0] }
 0x116   : > { %v1094_v46 = vmul.f32 %v1072_v29, %v782_v4  ;;  %1614 = vmatpush.bf16.msrb.mxu0 %v6907_v62  ;;  %v6919_v4 = vor.u32 %v8913_v2, %v6916_v3  ;;  %1640 = vmatpush.bf16.msrb.mxu2 %v6915_v23  ;;  %v8908_v7 = vld [vmem:[%s13768_s2 + $0xc4] sm:$0xf]  ;;  %v6891_v9 = vor.u32 %v8910_v6, %v6890_v5  ;;  %v6892_v21 = vld [vmem:[%s13768_s2 + $0xd0] sm:$0xf0]  ;;  %v6898_v29 = vld [vmem:[%s13768_s2 + $0xc8] sm:$0xf] }
 0x117   : > { %v1082_v16 = vmul.f32 %v9403_v1, %v1081_v41  ;;  %v6895_v41 = vor.u32 %v8908_v7, %v6892_v21  ;;  %v6874_v48 = vld [vmem:[%s13768_s2 + $0xa0] sm:$0xf]  ;;  %v6884_v62 = vld [vmem:[%s13768_s2 + $0xb8] sm:$0xf0]  ;;  %v8902_v12 = vld [vmem:[%s13768_s2 + $0x8c] sm:$0xf0] }
 0x118   : > { %v10493_v47 = vadd.f32 %v1095_v37, %v1094_v46  ;;  %1653 = vmatpush.bf16.msrb.mxu3 %v6919_v4  ;;  %v8911_v37 = vld [vmem:[%s13768_s2 + $0xd4] sm:$0xf0]  ;;  %v6858_v0 = vld [vmem:[%s13768_s2 + $0x80] sm:$0xf]  ;;  %v6860_v2 = vld [vmem:[%s13768_s2 + $0x90] sm:$0xf0] }
 0x119   : > { %v1083_v27 = vadd.f32 %v9403_v1, %v1082_v16  ;;  %v6899_v46 = vor.u32 %v8911_v37, %v6898_v29  ;;  %v8909_v16 = vld [vmem:[%s13768_s2 + $0xcc] sm:$0xf]  ;;  %v6859_v23 = vor.u32 %v8902_v12, %v6858_v0  ;;  %v6866_v3 = vld [vmem:[%s13768_s2 + $0x88] sm:$0xf]  ;;  %v8903_v4 = vld [vmem:[%s13768_s2 + $0x94] sm:$0xf0] }
 0x11a   : > { %9406 = vtanh.f32 %v10493_v47  ;;  %1615 = vmatpush.bf16.msrb.mxu0 %v6891_v9  ;;  %v6867_v6 = vor.u32 %v8903_v4, %v6866_v3  ;;  %v8901_v7 = vld [vmem:[%s13768_s2 + $0x8c] sm:$0xf]  ;;  %v6868_v9 = vld [vmem:[%s13768_s2 + $0x98] sm:$0xf0]  ;;  %v6842_v29 = vld [vmem:[%s13768_s2 + $0x60] sm:$0xf] }
 0x11b   : > { %v1087_v53 = vsel %vm1086_vm10, %v9403_v1, %v1083_v27  ;;  %v6911_v1 = vor.u32 %v8912_v60, %v6908_v63  ;;  %v6900_v27 = vld [vmem:[%s13768_s2 + $0xd8] sm:$0xf0]  ;;  %1641 = vmatpush.bf16.msrb.mxu2 %v6899_v46  ;;  %v8905_v60 = vld [vmem:[%s13768_s2 + $0xac] sm:$0xf]  ;;  %v6871_v21 = vor.u32 %v8901_v7, %v6868_v9  ;;  %v8898_v37 = vld [vmem:[%s13768_s2 + $0x6c] sm:$0xf0]  ;;  %v645_v46 = vadd.f32 %v10214_v14, %v10221_v17 }
 0x11c   : > { %v1092_v56 = vsel %vm1089_vm11, %v1091_v54, %v1087_v53  ;;  %v6903_v13 = vor.u32 %v8909_v16, %v6900_v27  ;;  %v8906_v53 = vld [vmem:[%s13768_s2 + $0xac] sm:$0xf0]  ;;  %v8904_v54 = vld [vmem:[%s13768_s2 + $0xa4] sm:$0xf]  ;;  %v6887_v63 = vor.u32 %v8905_v60, %v6884_v62  ;;  %v674_v16 = vadd.f32 %v10216_v15, %v10225_v19  ;;  %v8897_v15 = vld [vmem:[%s13768_s2 + $0x6c] sm:$0xf] }
 0x11d   : > { %1627 = vmatpush.bf16.msrb.mxu1 %v6911_v1  ;;  %v8900_v1 = vld [vmem:[%s13768_s2 + $0x84] sm:$0xf]  ;;  %v6843_v27 = vor.u32 %v8898_v37, %v6842_v29  ;;  %v6826_v60 = vld [vmem:[%s13768_s2 + $0x40] sm:$0xf]  ;;  %v8894_v62 = vld [vmem:[%s13768_s2 + $0x4c] sm:$0xf0]  ;;  %v732_v29 = vadd.f32 %v10227_v20, %v10237_v26 }
 0x11e   : > { %1654 = vmatpush.bf16.msrb.mxu3 %v6903_v13  ;;  %v6863_v5 = vor.u32 %v8900_v1, %v6860_v2  ;;  %v6844_v13 = vld [vmem:[%s13768_s2 + $0x70] sm:$0xf0]  ;;  %v6827_v1 = vor.u32 %v8894_v62, %v6826_v60  ;;  %v6834_v3 = vld [vmem:[%s13768_s2 + $0x48] sm:$0xf]  ;;  %v8895_v4 = vld [vmem:[%s13768_s2 + $0x54] sm:$0xf0] }
 0x11f   : > { %v6836_v7 = vld [vmem:[%s13768_s2 + $0x58] sm:$0xf0]  ;;  %v6810_v9 = vld [vmem:[%s13768_s2 + $0x20] sm:$0xf]  ;;  %v8884_v60 = vld [vmem:[%s13768_s2 + $0x4] sm:$0xf] }
 0x120   : > { %v9407_v52 = vpop.eup %9406 }
 0x121   : > { %v1098_v57 = vmul.f32 %v9407_v52, %v1092_v56  ;;  %1628 = vmatpush.bf16.msrb.mxu1 %v6895_v41  ;;  %v6875_v52 = vor.u32 %v8906_v53, %v6874_v48  ;;  %v6876_v56 = vld [vmem:[%s13768_s2 + $0xb0] sm:$0xf0]  ;;  %v8896_v41 = vld [vmem:[%s13768_s2 + $0x64] sm:$0xf]  ;;  %v6850_v48 = vld [vmem:[%s13768_s2 + $0x68] sm:$0xf] }
 0x122   : > { %v6879_v59 = vor.u32 %v8904_v54, %v6876_v56  ;;  %1655 = vmatpush.bf16.msrb.mxu3 %v6887_v63  ;;  %v8899_v53 = vld [vmem:[%s13768_s2 + $0x74] sm:$0xf0]  ;;  %v6847_v14 = vor.u32 %v8896_v41, %v6844_v13  ;;  %v8892_v63 = vld [vmem:[%s13768_s2 + $0x44] sm:$0xf] }
 0x123   : > { %v1099_v58 = vpack.c.bf16 %v1098_v57, %v1098_v57  ;;  %v6882_v57 = vld [vmem:[%s13768_s2 + $0xa8] sm:$0xf]  ;;  %1616 = vmatpush.bf16.msrb.mxu0 %v6875_v52  ;;  %v6851_v56 = vor.u32 %v8899_v53, %v6850_v48  ;;  %v8891_v53 = vld [vmem:[%s13768_s2 + $0x34] sm:$0xf0] }
 0x125   : > { %1100 = vst [vmem:[#allocation5] sm:$0xf] %v1099_v58  ;;  %1305 = vmatmul.bf16.vlgmr.msra.gmra.mxu0 %v1099_v58  ;;  %1318 = vmatmul.bf16.vlgmr.msra.gmra.mxu1 %v1099_v58 }
 0x126   : > { %1331 = vmatmul.bf16.vlgmr.msra.gmra.mxu2 %v1099_v58  ;;  %1344 = vmatmul.bf16.vlgmr.msra.gmra.mxu3 %v1099_v58  ;;  %v8907_v58 = vld [vmem:[%s13768_s2 + $0xb4] sm:$0xf0] }
 0x127   : > { %v6883_v11 = vor.u32 %v8907_v58, %v6882_v57  ;;  %1629 = vmatpush.bf16.msrb.mxu1 %v6879_v59  ;;  %1617 = vmatpush.bf16.msrb.mxu0 %v6859_v23  ;;  %v6852_v57 = vld [vmem:[%s13768_s2 + $0x78] sm:$0xf0]  ;;  %v6828_v23 = vld [vmem:[%s13768_s2 + $0x50] sm:$0xf0] }
 0x128   : > { %1656 = vmatpush.bf16.msrb.mxu3 %v6871_v21  ;;  %v6831_v2 = vor.u32 %v8892_v63, %v6828_v23  ;;  %v8890_v21 = vld [vmem:[%s13768_s2 + $0x2c] sm:$0xf0]  ;;  %v6796_v63 = vld [vmem:[%s13768_s2 + $0x10] sm:$0xf0] }
 0x129   : > { %1642 = vmatpush.bf16.msrb.mxu2 %v6883_v11  ;;  %v6855_v11 = vor.u32 %v8897_v15, %v6852_v57  ;;  %v6811_v41 = vor.u32 %v8890_v21, %v6810_v9  ;;  %v6799_v23 = vor.u32 %v8884_v60, %v6796_v63 }
 0x12b   : > { %1630 = vmatpush.bf16.msrb.mxu1 %v6863_v5  ;;  %1618 = vmatpush.bf16.msrb.mxu0 %v6843_v27  ;;  %v8893_v5 = vld [vmem:[%s13768_s2 + $0x4c] sm:$0xf]  ;;  %v6818_v27 = vld [vmem:[%s13768_s2 + $0x28] sm:$0xf] }
 0x12c   : > { %1657 = vmatpush.bf16.msrb.mxu3 %v6855_v11  ;;  %v6839_v37 = vor.u32 %v8893_v5, %v6836_v7  ;;  %v6819_v57 = vor.u32 %v8891_v53, %v6818_v27  ;;  %v8886_v11 = vld [vmem:[%s13768_s2 + $0xc] sm:$0xf0] }
 0x12d   : > { %1643 = vmatpush.bf16.msrb.mxu2 %v6867_v6  ;;  %v6835_v6 = vor.u32 %v8895_v4, %v6834_v3  ;;  %v6804_v3 = vld [vmem:[%s13768_s2 + $0x18] sm:$0xf0] }
 0x12f   : > { %1631 = vmatpush.bf16.msrb.mxu1 %v6847_v14  ;;  %1619 = vmatpush.bf16.msrb.mxu0 %v6827_v1 }
 0x130   : > { %1658 = vmatpush.bf16.msrb.mxu3 %v6839_v37 }
 0x131   : > { %1644 = vmatpush.bf16.msrb.mxu2 %v6851_v56 }
 0x133   : > { %1632 = vmatpush.bf16.msrb.mxu1 %v6831_v2  ;;  %1620 = vmatpush.bf16.msrb.mxu0 %v6811_v41  ;;  %v8885_v2 = vld [vmem:[%s13768_s2 + $0xc] sm:$0xf] }
 0x134   : > { %v6807_v9 = vor.u32 %v8885_v2, %v6804_v3 }
 0x135   : > { %1645 = vmatpush.bf16.msrb.mxu2 %v6835_v6 }
 0x139   : > { %1646 = vmatpush.bf16.msrb.mxu2 %v6819_v57 }
 0x1a2   : > { %v1306_v54 = vpop.f32.mrf.mxu0  ;;  %v1319_v52 = vpop.f32.mrf.mxu1 }
 0x1a3   : > { %v1349_v58 = vadd.f32 %v1306_v54, %v645_v46  ;;  %v1350_v59 = vadd.f32 %v1319_v52, %v674_v16  ;;  %v8888_v46 = vld [vmem:[%s13768_s2 + $0x24] sm:$0xf]  ;;  %v6812_v16 = vld [vmem:[%s13768_s2 + $0x30] sm:$0xf0]  ;;  %v8889_v54 = vld [vmem:[%s13768_s2 + $0x2c] sm:$0xf] }
 0x1a4   : > { %v6815_v20 = vor.u32 %v8888_v46, %v6812_v16  ;;  %v6820_v52 = vld [vmem:[%s13768_s2 + $0x38] sm:$0xf0]  ;;  %v703_v46 = vadd.f32 %v10223_v18, %v10235_v25 }
 0x1a5   : > { %v6789_v0 = vmul.f32 -1.442695, %v1349_v58  ;;  %v6790_v12 = vmul.f32 -1.442695, %v1350_v59  ;;  %v6823_v58 = vor.u32 %v8889_v54, %v6820_v52  ;;  %v6794_v59 = vld [vmem:[%s13768_s2] sm:$0xf] }
 0x1a6   : > { %v6795_v62 = vor.u32 %v8886_v11, %v6794_v59  ;;  %1633 = vmatpush.bf16.msrb.mxu1 %v6815_v20 }
 0x1a7   : > { %9408 = vpow2.f32 %v6789_v0  ;;  %v6802_v0 = vld [vmem:[%s13768_s2 + $0x8] sm:$0xf]  ;;  %1659 = vmatpush.bf16.msrb.mxu3 %v6823_v58 }
 0x1a8   : > { %9410 = vpow2.f32 %v6790_v12  ;;  %v8887_v12 = vld [vmem:[%s13768_s2 + $0x14] sm:$0xf0]  ;;  %1621 = vmatpush.bf16.msrb.mxu0 %v6795_v62 }
 0x1a9   : > { %v1332_v13 = vpop.f32.mrf.mxu2  ;;  %v1345_v48 = vpop.f32.mrf.mxu3  ;;  %v6803_v5 = vor.u32 %v8887_v12, %v6802_v0 }
 0x1aa   : > { %v1352_v14 = vadd.f32 %v1345_v48, %v732_v29  ;;  %v1308_v56 = vpop.f32.mrf.mxu0  ;;  %v1321_v15 = vpop.f32.mrf.mxu1  ;;  %1634 = vmatpush.bf16.msrb.mxu1 %v6799_v23  ;;  %v1351_v48 = vadd.f32 %v1332_v13, %v703_v46 }
 0x1ab   : > { %1647 = vmatpush.bf16.msrb.mxu2 %v6803_v5  ;;  %1660 = vmatpush.bf16.msrb.mxu3 %v6807_v9 }
 0x1ac   : > { %v6791_v1 = vmul.f32 -1.442695, %v1352_v14 }
 0x1ad   : > { %v9409_v4 = vpop.eup %9408 }
 0x1ae   : > { %v9411_v6 = vpop.eup %9410  ;;  %v1356_v7 = vadd.f32 1.0, %v9409_v4  ;;  %9412 = vpow2.f32 %v6791_v1 }
 0x1af   : > { %v1375_v21 = vadd.f32 1.0, %v9411_v6 }
 0x1b0   : > { %9414 = vrcp.f32 %v1356_v7  ;;  %v1368_v56 = vand.u32 2147483648, %v1356_v7  ;;  %v1366_v58 = vand.u32 2147483647, %v1356_v7  ;;  %vm1362_vm14 = vweird.f32 %v1356_v7 }
 0x1b1   : > { %9416 = vrcp.f32 %v1375_v21  ;;  %v1334_v29 = vpop.f32.mrf.mxu2  ;;  %v1347_v37 = vpop.f32.mrf.mxu3  ;;  %v1387_v15 = vand.u32 2147483648, %v1375_v21  ;;  %v1385_v11 = vand.u32 2147483647, %v1375_v21  ;;  %vm1381_vm15 = vweird.f32 %v1375_v21 }
 0x1b2   : > { %v1369_v13 = vor.u32 1.1754944e-38, %v1368_v56  ;;  %vm1367_vm2 = vcmp.eq.f32.partialorder %v1366_v58, 8.507059e+37  ;;  %v7045_v56 = vld [vmem:[%s13768_s2 + $0xe8] sm:$0xf] }
 0x1b3   : > { %v1388_v0 = vor.u32 1.1754944e-38, %v1387_v15  ;;  %vm1386_vm3 = vcmp.eq.f32.partialorder %v1385_v11, 8.507059e+37  ;;  %v8947_v15 = vld [vmem:[%s13768_s2 + $0xf4] sm:$0xf0]  ;;  %v7047_v11 = vld [vmem:[%s13768_s2 + $0xf8] sm:$0xf0] }
 0x1b4   : > { %v9413_v41 = vpop.eup %9412  ;;  %v7046_v58 = vor.u32 %v8947_v15, %v7045_v56  ;;  %v6991_v56 = vld [vmem:[%s13768_s2 + $0x90] sm:$0xf0]  ;;  %v6997_v15 = vld [vmem:[%s13768_s2 + $0x88] sm:$0xf] }
 0x1b5   : > { %v1395_v16 = vadd.f32 1.0, %v9413_v41 }
 0x1b6   : > { %v9415_v27 = vpop.eup %9414  ;;  %1957 = vmatpush.bf16.msra.mxu2 %v7046_v58 }
 0x1b7   : > { %v9417_v20 = vpop.eup %9416  ;;  %v1358_v53 = vmul.f32 %v9415_v27, %v1356_v7  ;;  %9418 = vrcp.f32 %v1395_v16  ;;  %vm1363_vm12 = vweird.f32 %v9415_v27  ;;  %v1407_v29 = vand.u32 2147483648, %v1395_v16 }
 0x1b8   : > { %v1377_v54 = vmul.f32 %v9417_v20, %v1375_v21  ;;  %9420 = vtanh.f32 %v1351_v48  ;;  %vm1382_vm13 = vweird.f32 %v9417_v20  ;;  %vm1364_vm0 = vmor %vm1362_vm14, %vm1363_vm12  ;;  %vm1401_vm5 = vweird.f32 %v1395_v16 }
 0x1b9   : > { %v1359_v52 = vsub.f32 1.0, %v1358_v53  ;;  %vm1383_vm1 = vmor %vm1381_vm15, %vm1382_vm13  ;;  %v1405_v37 = vand.u32 2147483647, %v1395_v16  ;;  %v1408_v46 = vor.u32 1.1754944e-38, %v1407_v29 }
 0x1ba   : > { %v1378_v14 = vsub.f32 1.0, %v1377_v54  ;;  %v8944_v54 = vld [vmem:[%s13768_s2 + $0xe4] sm:$0xf] }
 0x1bb   : > { %v1360_v57 = vmul.f32 %v9415_v27, %v1359_v52  ;;  %vm1406_vm7 = vcmp.eq.f32.partialorder %v1405_v37, 8.507059e+37  ;;  %v7007_v37 = vld [vmem:[%s13768_s2 + $0xb0] sm:$0xf0] }
 0x1bc   : > { %v1379_v59 = vmul.f32 %v9417_v20, %v1378_v14  ;;  %v7039_v14 = vld [vmem:[%s13768_s2 + $0xf0] sm:$0xf0] }
 0x1bd   : > { %v9419_v60 = vpop.eup %9418  ;;  %v1361_v18 = vadd.f32 %v9415_v27, %v1360_v57  ;;  %v7042_v57 = vor.u32 %v8944_v54, %v7039_v14  ;;  %v8934_v54 = vld [vmem:[%s13768_s2 + $0x8c] sm:$0xf0] }
 0x1be   : > { %v1380_v62 = vadd.f32 %v9417_v20, %v1379_v59  ;;  %v1397_v63 = vmul.f32 %v9419_v60, %v1395_v16  ;;  %v9421_v1 = vpop.eup %9420  ;;  %vm1402_vm4 = vweird.f32 %v9419_v60  ;;  %v8946_v16 = vld [vmem:[%s13768_s2 + $0xec] sm:$0xf0]  ;;  %v8945_v59 = vld [vmem:[%s13768_s2 + $0xec] sm:$0xf] }
 0x1bf   : > { %v1365_v12 = vsel %vm1364_vm0, %v9415_v27, %v1361_v18  ;;  %vm1403_vm6 = vmor %vm1401_vm5, %vm1402_vm4  ;;  %1944 = vmatpush.bf16.msra.mxu1 %v7042_v57  ;;  %v7021_v18 = vld [vmem:[%s13768_s2 + $0xc0] sm:$0xf]  ;;  %v8935_v57 = vld [vmem:[%s13768_s2 + $0x94] sm:$0xf0] }
 0x1c0   : > { %v1370_v23 = vsel %vm1367_vm2, %v1369_v13, %v1365_v12  ;;  %v1384_v2 = vsel %vm1383_vm1, %v9417_v20, %v1380_v62  ;;  %v1398_v3 = vsub.f32 1.0, %v1397_v63  ;;  %v8942_v13 = vld [vmem:[%s13768_s2 + $0xcc] sm:$0xf0]  ;;  %v8940_v62 = vld [vmem:[%s13768_s2 + $0xc4] sm:$0xf] }
 0x1c1   : > { %v1389_v4 = vsel %vm1386_vm3, %v1388_v0, %v1384_v2  ;;  %v1412_v5 = vmul.f32 %v9421_v1, %v1370_v23  ;;  %v7022_v63 = vor.u32 %v8942_v13, %v7021_v18  ;;  %v7023_v0 = vld [vmem:[%s13768_s2 + $0xd0] sm:$0xf0]  ;;  %v7029_v12 = vld [vmem:[%s13768_s2 + $0xc8] sm:$0xf]  ;;  %v8943_v1 = vld [vmem:[%s13768_s2 + $0xd4] sm:$0xf0] }
 0x1c2   : > { %v1411_v6 = vmul.f32 %v1389_v4, %v10493_v47  ;;  %v1399_v9 = vmul.f32 %v9419_v60, %v1398_v3  ;;  %v7037_v47 = vld [vmem:[%s13768_s2 + $0xe0] sm:$0xf]  ;;  %v7026_v23 = vor.u32 %v8940_v62, %v7023_v0  ;;  %v7030_v2 = vor.u32 %v8943_v1, %v7029_v12  ;;  %v8941_v3 = vld [vmem:[%s13768_s2 + $0xcc] sm:$0xf]  ;;  %v7031_v4 = vld [vmem:[%s13768_s2 + $0xd8] sm:$0xf0] }
 0x1c3   : > { %v7038_v52 = vor.u32 %v8946_v16, %v7037_v47  ;;  %v6989_v16 = vld [vmem:[%s13768_s2 + $0x80] sm:$0xf]  ;;  %v8930_v62 = vld [vmem:[%s13768_s2 + $0x6c] sm:$0xf0]  ;;  %v6975_v12 = vld [vmem:[%s13768_s2 + $0x70] sm:$0xf0] }
 0x1c4   : > { %v10697_v7 = vadd.f32 %v1412_v5, %v1411_v6  ;;  %v1400_v21 = vadd.f32 %v9419_v60, %v1399_v9  ;;  %v7034_v5 = vor.u32 %v8941_v3, %v7031_v4  ;;  %1945 = vmatpush.bf16.msra.mxu1 %v7026_v23  ;;  %1958 = vmatpush.bf16.msra.mxu2 %v7030_v2  ;;  %v7005_v6 = vld [vmem:[%s13768_s2 + $0xa0] sm:$0xf]  ;;  %v8938_v9 = vld [vmem:[%s13768_s2 + $0xac] sm:$0xf0]  ;;  %v6981_v1 = vld [vmem:[%s13768_s2 + $0x68] sm:$0xf] }
 0x1c5   : > { %1931 = vmatpush.bf16.msra.mxu0 %v7038_v52  ;;  %v7006_v29 = vor.u32 %v8938_v9, %v7005_v6  ;;  %v8932_v52 = vld [vmem:[%s13768_s2 + $0x84] sm:$0xf]  ;;  %v6990_v14 = vor.u32 %v8934_v54, %v6989_v16  ;;  %v6973_v13 = vld [vmem:[%s13768_s2 + $0x60] sm:$0xf]  ;;  %v8931_v23 = vld [vmem:[%s13768_s2 + $0x74] sm:$0xf0] }
 0x1c6   : > { %9422 = vtanh.f32 %v10697_v7  ;;  %v1404_v41 = vsel %vm1403_vm6, %v9419_v60, %v1400_v21  ;;  %v7050_v60 = vor.u32 %v8945_v59, %v7047_v11  ;;  %v8936_v21 = vld [vmem:[%s13768_s2 + $0xa4] sm:$0xf]  ;;  %v6994_v58 = vor.u32 %v8932_v52, %v6991_v56  ;;  %v8933_v11 = vld [vmem:[%s13768_s2 + $0x8c] sm:$0xf]  ;;  %v6983_v9 = vld [vmem:[%s13768_s2 + $0x78] sm:$0xf0] }
 0x1c7   : > { %v1409_v48 = vsel %vm1406_vm7, %v1408_v46, %v1404_v41  ;;  %v7013_v41 = vld [vmem:[%s13768_s2 + $0xa8] sm:$0xf]  ;;  %v8939_v46 = vld [vmem:[%s13768_s2 + $0xb4] sm:$0xf0]  ;;  %v6998_v59 = vor.u32 %v8935_v57, %v6997_v15  ;;  %v6974_v0 = vor.u32 %v8930_v62, %v6973_v13  ;;  %v8929_v6 = vld [vmem:[%s13768_s2 + $0x6c] sm:$0xf] }
 0x1c8   : > { %1970 = vmatpush.bf16.msra.mxu3 %v7050_v60  ;;  %v6999_v60 = vld [vmem:[%s13768_s2 + $0x98] sm:$0xf0]  ;;  %v8927_v16 = vld [vmem:[%s13768_s2 + $0x54] sm:$0xf0]  ;;  %v8925_v54 = vld [vmem:[%s13768_s2 + $0x4c] sm:$0xf] }
 0x1c9   : > { %1932 = vmatpush.bf16.msra.mxu0 %v7022_v63  ;;  %v7002_v18 = vor.u32 %v8933_v11, %v6999_v60  ;;  %v8928_v63 = vld [vmem:[%s13768_s2 + $0x64] sm:$0xf]  ;;  %v6941_v56 = vld [vmem:[%s13768_s2 + $0x20] sm:$0xf]  ;;  %v8922_v15 = vld [vmem:[%s13768_s2 + $0x2c] sm:$0xf0] }
 0x1ca   : > { %v6978_v4 = vor.u32 %v8928_v63, %v6975_v12  ;;  %v6943_v11 = vld [vmem:[%s13768_s2 + $0x30] sm:$0xf0]  ;;  %v6949_v60 = vld [vmem:[%s13768_s2 + $0x28] sm:$0xf]  ;;  %v8923_v63 = vld [vmem:[%s13768_s2 + $0x34] sm:$0xf0] }
 0x1cb   : > { %v6951_v12 = vld [vmem:[%s13768_s2 + $0x38] sm:$0xf0] }
 0x1cc   : > { %v9423_v27 = vpop.eup %9422  ;;  %1971 = vmatpush.bf16.msra.mxu3 %v7034_v5  ;;  %v6982_v5 = vor.u32 %v8931_v23, %v6981_v1 }
 0x1cd   : > { %v1415_v20 = vmul.f32 %v9423_v27, %v1409_v48  ;;  %v7010_v27 = vor.u32 %v8936_v21, %v7007_v37  ;;  %v7014_v48 = vor.u32 %v8939_v46, %v7013_v41  ;;  %1933 = vmatpush.bf16.msra.mxu0 %v7006_v29  ;;  %v6986_v37 = vor.u32 %v8929_v6, %v6983_v9  ;;  %v6957_v41 = vld [vmem:[%s13768_s2 + $0x40] sm:$0xf]  ;;  %v8926_v46 = vld [vmem:[%s13768_s2 + $0x4c] sm:$0xf0]  ;;  %v8916_v9 = vld [vmem:[%s13768_s2 + $0x4] sm:$0xf] }
 0x1ce   : > { %v8918_v6 = vld [vmem:[%s13768_s2 + $0xc] sm:$0xf0] }
 0x1cf   : > { %v1416_v53 = vpack.c.bf16 %v1415_v20, %v1415_v20  ;;  %v8937_v20 = vld [vmem:[%s13768_s2 + $0xac] sm:$0xf]  ;;  %1946 = vmatpush.bf16.msra.mxu1 %v7010_v27  ;;  %1959 = vmatpush.bf16.msra.mxu2 %v7014_v48  ;;  %v8924_v27 = vld [vmem:[%s13768_s2 + $0x44] sm:$0xf] }
 0x1d1   : > { %1417 = vst [vmem:[#allocation5 + $0x4] sm:$0xf] %v1416_v53  ;;  %1622 = vmatmul.bf16.vlgmr.msrb.gmra.mxu0 %v1416_v53  ;;  %1635 = vmatmul.bf16.vlgmr.msrb.gmra.mxu1 %v1416_v53 }
 0x1d2   : > { %1648 = vmatmul.bf16.vlgmr.msrb.gmra.mxu2 %v1416_v53  ;;  %1661 = vmatmul.bf16.vlgmr.msrb.gmra.mxu3 %v1416_v53  ;;  %v7015_v53 = vld [vmem:[%s13768_s2 + $0xb8] sm:$0xf0] }
 0x1d3   : > { %v7018_v47 = vor.u32 %v8937_v20, %v7015_v53  ;;  %1934 = vmatpush.bf16.msra.mxu0 %v6990_v14  ;;  %1947 = vmatpush.bf16.msra.mxu1 %v6994_v58  ;;  %v6959_v20 = vld [vmem:[%s13768_s2 + $0x50] sm:$0xf0]  ;;  %v6967_v14 = vld [vmem:[%s13768_s2 + $0x58] sm:$0xf0]  ;;  %v6942_v58 = vor.u32 %v8922_v15, %v6941_v56 }
 0x1d4   : > { %1960 = vmatpush.bf16.msra.mxu2 %v6998_v59  ;;  %v6962_v53 = vor.u32 %v8924_v27, %v6959_v20  ;;  %v6970_v57 = vor.u32 %v8925_v54, %v6967_v14  ;;  %v8920_v59 = vld [vmem:[%s13768_s2 + $0x24] sm:$0xf]  ;;  %v8917_v27 = vld [vmem:[%s13768_s2 + $0xc] sm:$0xf] }
 0x1d5   : > { %1972 = vmatpush.bf16.msra.mxu3 %v7018_v47  ;;  %v6965_v47 = vld [vmem:[%s13768_s2 + $0x48] sm:$0xf]  ;;  %v6946_v62 = vor.u32 %v8920_v59, %v6943_v11 }
 0x1d6   : > { %v6966_v52 = vor.u32 %v8927_v16, %v6965_v47 }
 0x1d7   : > { %1935 = vmatpush.bf16.msra.mxu0 %v6974_v0  ;;  %1948 = vmatpush.bf16.msra.mxu1 %v6978_v4  ;;  %v8921_v0 = vld [vmem:[%s13768_s2 + $0x2c] sm:$0xf] }
 0x1d8   : > { %1961 = vmatpush.bf16.msra.mxu2 %v6982_v5  ;;  %v6954_v4 = vor.u32 %v8921_v0, %v6951_v12  ;;  %v6925_v5 = vld [vmem:[%s13768_s2] sm:$0xf] }
 0x1d9   : > { %1973 = vmatpush.bf16.msra.mxu3 %v7002_v18 }
 0x1db   : > { %1949 = vmatpush.bf16.msra.mxu1 %v6962_v53 }
 0x1dc   : > { %1962 = vmatpush.bf16.msra.mxu2 %v6966_v52 }
 0x1dd   : > { %1974 = vmatpush.bf16.msra.mxu3 %v6986_v37  ;;  %v8919_v37 = vld [vmem:[%s13768_s2 + $0x14] sm:$0xf0] }
 0x1df   : > { %1950 = vmatpush.bf16.msra.mxu1 %v6946_v62 }
 0x1e1   : > { %1975 = vmatpush.bf16.msra.mxu3 %v6970_v57 }
 0x1e5   : > { %1976 = vmatpush.bf16.msra.mxu3 %v6954_v4 }
 0x24e   : > { %v1623_v2 = vpop.f32.mrf.mxu0  ;;  %v1636_v3 = vpop.f32.mrf.mxu1 }
 0x24f   : > { %v1666_v21 = vadd.f32 %v1623_v2, %v10230_v22  ;;  %v1667_v29 = vadd.f32 %v1636_v3, %v10233_v24  ;;  %v6958_v24 = vor.u32 %v8926_v46, %v6957_v41  ;;  %v6950_v3 = vor.u32 %v8923_v63, %v6949_v60 }
 0x251   : > { %v6920_v48 = vmul.f32 -1.442695, %v1666_v21  ;;  %v6921_v22 = vmul.f32 -1.442695, %v1667_v29  ;;  %1936 = vmatpush.bf16.msra.mxu0 %v6958_v24  ;;  %v6926_v21 = vor.u32 %v8918_v6, %v6925_v5  ;;  %v6933_v29 = vld [vmem:[%s13768_s2 + $0x8] sm:$0xf]  ;;  %1963 = vmatpush.bf16.msra.mxu2 %v6950_v3 }
 0x252   : > { %v6934_v24 = vor.u32 %v8919_v37, %v6933_v29 }
 0x253   : > { %9424 = vpow2.f32 %v6920_v48  ;;  %v6935_v48 = vld [vmem:[%s13768_s2 + $0x18] sm:$0xf0] }
 0x254   : > { %9426 = vpow2.f32 %v6921_v22  ;;  %v6938_v47 = vor.u32 %v8917_v27, %v6935_v48 }
 0x255   : > { %v1649_v18 = vpop.f32.mrf.mxu2  ;;  %v1662_v13 = vpop.f32.mrf.mxu3  ;;  %1937 = vmatpush.bf16.msra.mxu0 %v6942_v58  ;;  %1964 = vmatpush.bf16.msra.mxu2 %v6934_v24 }
 0x256   : > { %v1669_v1 = vadd.f32 %v1662_v13, %v10245_v31  ;;  %v1625_v23 = vpop.f32.mrf.mxu0  ;;  %v1638_v2 = vpop.f32.mrf.mxu1  ;;  %v6927_v31 = vld [vmem:[%s13768_s2 + $0x10] sm:$0xf0]  ;;  %1977 = vmatpush.bf16.msra.mxu3 %v6938_v47  ;;  %v1668_v57 = vadd.f32 %v1649_v18, %v10240_v28 }
 0x257   : > { %v6930_v46 = vor.u32 %v8916_v9, %v6927_v31 }
 0x258   : > { %v6922_v41 = vmul.f32 -1.442695, %v1669_v1 }
 0x259   : > { %v9425_v22 = vpop.eup %9424  ;;  %1938 = vmatpush.bf16.msra.mxu0 %v6926_v21  ;;  %1951 = vmatpush.bf16.msra.mxu1 %v6930_v46 }
 0x25a   : > { %v9427_v20 = vpop.eup %9426  ;;  %v1673_v53 = vadd.f32 1.0, %v9425_v22  ;;  %9428 = vpow2.f32 %v6922_v41 }
 0x25b   : > { %v1692_v16 = vadd.f32 1.0, %v9427_v20 }
 0x25c   : > { %9430 = vrcp.f32 %v1673_v53  ;;  %v1685_v62 = vand.u32 2147483648, %v1673_v53  ;;  %v1683_v12 = vand.u32 2147483647, %v1673_v53  ;;  %vm1679_vm10 = vweird.f32 %v1673_v53 }
 0x25d   : > { %9432 = vrcp.f32 %v1692_v16  ;;  %v1651_v54 = vpop.f32.mrf.mxu2  ;;  %v1664_v52 = vpop.f32.mrf.mxu3  ;;  %v1704_v63 = vand.u32 2147483648, %v1692_v16  ;;  %v1702_v23 = vand.u32 2147483647, %v1692_v16  ;;  %vm1698_vm11 = vweird.f32 %v1692_v16 }
 0x25e   : > { %v1686_v28 = vor.u32 1.1754944e-38, %v1685_v62  ;;  %vm1684_vm14 = vcmp.eq.f32.partialorder %v1683_v12, 8.507059e+37  ;;  %v8977_v62 = vld [vmem:[%s13768_s2 + $0xec] sm:$0xf]  ;;  %v7152_v12 = vld [vmem:[%s13768_s2 + $0xc0] sm:$0xf] }
 0x25f   : > { %v1705_v5 = vor.u32 1.1754944e-38, %v1704_v63  ;;  %vm1703_vm15 = vcmp.eq.f32.partialorder %v1702_v23, 8.507059e+37  ;;  %v7178_v63 = vld [vmem:[%s13768_s2 + $0xf8] sm:$0xf0]  ;;  %v8972_v23 = vld [vmem:[%s13768_s2 + $0xc4] sm:$0xf] }
 0x260   : > { %v9429_v14 = vpop.eup %9428 }
 0x261   : > { %v1712_v56 = vadd.f32 1.0, %v9429_v14 }
 0x262   : > { %v9431_v15 = vpop.eup %9430 }
 0x263   : > { %v9433_v58 = vpop.eup %9432  ;;  %v1675_v59 = vmul.f32 %v9431_v15, %v1673_v53  ;;  %9434 = vrcp.f32 %v1712_v56  ;;  %vm1680_vm8 = vweird.f32 %v9431_v15  ;;  %v1724_v24 = vand.u32 2147483648, %v1712_v56 }
 0x264   : > { %v1694_v11 = vmul.f32 %v9433_v58, %v1692_v16  ;;  %9436 = vtanh.f32 %v1668_v57  ;;  %vm1699_vm9 = vweird.f32 %v9433_v58  ;;  %vm1681_vm12 = vmor %vm1679_vm10, %vm1680_vm8  ;;  %vm1718_vm1 = vweird.f32 %v1712_v56 }
 0x265   : > { %v1676_v60 = vsub.f32 1.0, %v1675_v59  ;;  %vm1700_vm13 = vmor %vm1698_vm11, %vm1699_vm9  ;;  %v1722_v20 = vand.u32 2147483647, %v1712_v56  ;;  %v1725_v47 = vor.u32 1.1754944e-38, %v1724_v24  ;;  %v7176_v59 = vld [vmem:[%s13768_s2 + $0xe8] sm:$0xf] }
 0x266   : > { %v1695_v13 = vsub.f32 1.0, %v1694_v11  ;;  %v8979_v11 = vld [vmem:[%s13768_s2 + $0xf4] sm:$0xf0] }
 0x267   : > { %v1677_v0 = vmul.f32 %v9431_v15, %v1676_v60  ;;  %vm1723_vm3 = vcmp.eq.f32.partialorder %v1722_v20, 8.507059e+37 }
 0x268   : > { %v1696_v1 = vmul.f32 %v9433_v58, %v1695_v13  ;;  %v7177_v13 = vor.u32 %v8979_v11, %v7176_v59  ;;  %v8965_v11 = vld [vmem:[%s13768_s2 + $0x8c] sm:$0xf] }
 0x269   : > { %v9435_v2 = vpop.eup %9434  ;;  %v1678_v3 = vadd.f32 %v9431_v15, %v1677_v0  ;;  %v7181_v0 = vor.u32 %v8977_v62, %v7178_v63  ;;  %v7104_v62 = vld [vmem:[%s13768_s2 + $0x60] sm:$0xf]  ;;  %v8962_v63 = vld [vmem:[%s13768_s2 + $0x6c] sm:$0xf0] }
 0x26a   : > { %v1697_v18 = vadd.f32 %v9433_v58, %v1696_v1  ;;  %v1714_v4 = vmul.f32 %v9435_v2, %v1712_v56  ;;  %v9437_v9 = vpop.eup %9436  ;;  %vm1719_vm0 = vweird.f32 %v9435_v2  ;;  %v8978_v56 = vld [vmem:[%s13768_s2 + $0xec] sm:$0xf0]  ;;  %2274 = vmatpush.bf16.msrb.mxu2 %v7177_v13 }
 0x26b   : > { %v1682_v6 = vsel %vm1681_vm12, %v9431_v15, %v1678_v3  ;;  %vm1720_vm2 = vmor %vm1718_vm1, %vm1719_vm0  ;;  %v8976_v15 = vld [vmem:[%s13768_s2 + $0xe4] sm:$0xf]  ;;  %v8974_v1 = vld [vmem:[%s13768_s2 + $0xcc] sm:$0xf0]  ;;  %2287 = vmatpush.bf16.msrb.mxu3 %v7181_v0 }
 0x26c   : > { %v1687_v21 = vsel %vm1684_vm14, %v1686_v28, %v1682_v6  ;;  %v1701_v31 = vsel %vm1700_vm13, %v9433_v58, %v1697_v18  ;;  %v1715_v29 = vsub.f32 1.0, %v1714_v4  ;;  %v7170_v58 = vld [vmem:[%s13768_s2 + $0xf0] sm:$0xf0]  ;;  %v7160_v28 = vld [vmem:[%s13768_s2 + $0xc8] sm:$0xf] }
 0x26d   : > { %v1706_v37 = vsel %vm1703_vm15, %v1705_v5, %v1701_v31  ;;  %v1729_v41 = vmul.f32 %v9437_v9, %v1687_v21  ;;  %v7173_v60 = vor.u32 %v8976_v15, %v7170_v58  ;;  %v7154_v3 = vld [vmem:[%s13768_s2 + $0xd0] sm:$0xf0]  ;;  %v8975_v18 = vld [vmem:[%s13768_s2 + $0xd4] sm:$0xf0]  ;;  %v8973_v6 = vld [vmem:[%s13768_s2 + $0xcc] sm:$0xf] }
 0x26e   : > { %v1728_v46 = vmul.f32 %v1706_v37, %v10697_v7  ;;  %v1716_v27 = vmul.f32 %v9435_v2, %v1715_v29  ;;  %v7168_v7 = vld [vmem:[%s13768_s2 + $0xe0] sm:$0xf]  ;;  %v7157_v4 = vor.u32 %v8972_v23, %v7154_v3  ;;  %v7161_v5 = vor.u32 %v8975_v18, %v7160_v28  ;;  %v7162_v9 = vld [vmem:[%s13768_s2 + $0xd8] sm:$0xf0]  ;;  %v8970_v29 = vld [vmem:[%s13768_s2 + $0xac] sm:$0xf0] }
 0x26f   : > { %v7169_v57 = vor.u32 %v8978_v56, %v7168_v7  ;;  %2261 = vmatpush.bf16.msrb.mxu1 %v7173_v60  ;;  %v7165_v21 = vor.u32 %v8973_v6, %v7162_v9  ;;  %v7136_v31 = vld [vmem:[%s13768_s2 + $0xa0] sm:$0xf]  ;;  %v8968_v37 = vld [vmem:[%s13768_s2 + $0xa4] sm:$0xf]  ;;  %v7122_v56 = vld [vmem:[%s13768_s2 + $0x90] sm:$0xf0]  ;;  %v7105_v23 = vor.u32 %v8962_v63, %v7104_v62 }
 0x270   : > { %v10897_v48 = vadd.f32 %v1729_v41, %v1728_v46  ;;  %v1717_v22 = vadd.f32 %v9435_v2, %v1716_v27  ;;  %2275 = vmatpush.bf16.msrb.mxu2 %v7161_v5  ;;  %v7137_v41 = vor.u32 %v8970_v29, %v7136_v31  ;;  %v7138_v46 = vld [vmem:[%s13768_s2 + $0xb0] sm:$0xf0]  ;;  %v7144_v27 = vld [vmem:[%s13768_s2 + $0xa8] sm:$0xf]  ;;  %v7130_v60 = vld [vmem:[%s13768_s2 + $0x98] sm:$0xf0] }
 0x271   : > { %2248 = vmatpush.bf16.msrb.mxu0 %v7169_v57  ;;  %2288 = vmatpush.bf16.msrb.mxu3 %v7165_v21  ;;  %v7141_v24 = vor.u32 %v8968_v37, %v7138_v46  ;;  %v7128_v15 = vld [vmem:[%s13768_s2 + $0x88] sm:$0xf]  ;;  %v8967_v57 = vld [vmem:[%s13768_s2 + $0x94] sm:$0xf0]  ;;  %v7133_v13 = vor.u32 %v8965_v11, %v7130_v60  ;;  %v8960_v0 = vld [vmem:[%s13768_s2 + $0x64] sm:$0xf] }
 0x272   : > { %9438 = vtanh.f32 %v10897_v48  ;;  %v1721_v53 = vsel %vm1720_vm2, %v9435_v2, %v1717_v22  ;;  %v7153_v2 = vor.u32 %v8974_v1, %v7152_v12  ;;  %v8971_v22 = vld [vmem:[%s13768_s2 + $0xb4] sm:$0xf0]  ;;  %v7129_v59 = vor.u32 %v8967_v57, %v7128_v15  ;;  %v7112_v3 = vld [vmem:[%s13768_s2 + $0x68] sm:$0xf]  ;;  %v7114_v6 = vld [vmem:[%s13768_s2 + $0x78] sm:$0xf0] }
 0x273   : > { %v1726_v54 = vsel %vm1723_vm3, %v1725_v47, %v1721_v53  ;;  %2262 = vmatpush.bf16.msrb.mxu1 %v7157_v4  ;;  %v7145_v20 = vor.u32 %v8971_v22, %v7144_v27  ;;  %v8969_v53 = vld [vmem:[%s13768_s2 + $0xac] sm:$0xf]  ;;  %v7146_v47 = vld [vmem:[%s13768_s2 + $0xb8] sm:$0xf0]  ;;  %v650_v12 = vadd.f32 %v10242_v30, %v10221_v17  ;;  %v679_v1 = vadd.f32 %v10247_v32, %v10225_v19  ;;  %v8963_v28 = vld [vmem:[%s13768_s2 + $0x74] sm:$0xf0] }
 0x274   : > { %v7113_v5 = vor.u32 %v8963_v28, %v7112_v3  ;;  %v8961_v32 = vld [vmem:[%s13768_s2 + $0x6c] sm:$0xf]  ;;  %v7088_v29 = vld [vmem:[%s13768_s2 + $0x40] sm:$0xf]  ;;  %v8958_v37 = vld [vmem:[%s13768_s2 + $0x4c] sm:$0xf0] }
 0x275   : > { %2249 = vmatpush.bf16.msrb.mxu0 %v7153_v2  ;;  %2276 = vmatpush.bf16.msrb.mxu2 %v7145_v20  ;;  %v7106_v2 = vld [vmem:[%s13768_s2 + $0x70] sm:$0xf0]  ;;  %v7117_v31 = vor.u32 %v8961_v32, %v7114_v6  ;;  %v7089_v22 = vor.u32 %v8958_v37, %v7088_v29  ;;  %v7080_v11 = vld [vmem:[%s13768_s2 + $0x28] sm:$0xf]  ;;  %v8955_v62 = vld [vmem:[%s13768_s2 + $0x34] sm:$0xf0] }
 0x276   : > { %v7109_v30 = vor.u32 %v8960_v0, %v7106_v2  ;;  %v8953_v63 = vld [vmem:[%s13768_s2 + $0x2c] sm:$0xf]  ;;  %v7082_v0 = vld [vmem:[%s13768_s2 + $0x38] sm:$0xf0]  ;;  %v7081_v2 = vor.u32 %v8955_v62, %v7080_v11  ;;  %v7056_v28 = vld [vmem:[%s13768_s2] sm:$0xf] }
 0x277   : > { %2263 = vmatpush.bf16.msrb.mxu1 %v7141_v24  ;;  %v7090_v24 = vld [vmem:[%s13768_s2 + $0x50] sm:$0xf0]  ;;  %v7085_v3 = vor.u32 %v8953_v63, %v7082_v0  ;;  %v7064_v32 = vld [vmem:[%s13768_s2 + $0x8] sm:$0xf]  ;;  %v8951_v6 = vld [vmem:[%s13768_s2 + $0x14] sm:$0xf0] }
 0x278   : > { %v9439_v16 = vpop.eup %9438  ;;  %v7066_v29 = vld [vmem:[%s13768_s2 + $0x18] sm:$0xf0] }
 0x279   : > { %v1732_v52 = vmul.f32 %v9439_v16, %v1726_v54  ;;  %2250 = vmatpush.bf16.msrb.mxu0 %v7137_v41  ;;  %v7149_v16 = vor.u32 %v8969_v53, %v7146_v47  ;;  %v7120_v54 = vld [vmem:[%s13768_s2 + $0x80] sm:$0xf]  ;;  %2277 = vmatpush.bf16.msrb.mxu2 %v7129_v59  ;;  %v8956_v41 = vld [vmem:[%s13768_s2 + $0x44] sm:$0xf]  ;;  %v7096_v53 = vld [vmem:[%s13768_s2 + $0x48] sm:$0xf] }
 0x27a   : > { %v7093_v20 = vor.u32 %v8956_v41, %v7090_v24  ;;  %v8959_v47 = vld [vmem:[%s13768_s2 + $0x54] sm:$0xf0]  ;;  %v7074_v59 = vld [vmem:[%s13768_s2 + $0x30] sm:$0xf0]  ;;  %v7065_v41 = vor.u32 %v8951_v6, %v7064_v32 }
 0x27b   : > { %v1733_v14 = vpack.c.bf16 %v1732_v52, %v1732_v52  ;;  %v8966_v52 = vld [vmem:[%s13768_s2 + $0x8c] sm:$0xf0]  ;;  %2289 = vmatpush.bf16.msrb.mxu3 %v7149_v16  ;;  %v8957_v16 = vld [vmem:[%s13768_s2 + $0x4c] sm:$0xf] }
 0x27c   : > { %v7121_v7 = vor.u32 %v8966_v52, %v7120_v54  ;;  %v7097_v54 = vor.u32 %v8959_v47, %v7096_v53  ;;  %v7098_v52 = vld [vmem:[%s13768_s2 + $0x58] sm:$0xf0] }
 0x27d   : > { %1734 = vst [vmem:[#allocation5 + $0x8] sm:$0xf] %v1733_v14  ;;  %1939 = vmatmul.bf16.vlgmr.msra.gmra.mxu0 %v1733_v14  ;;  %1952 = vmatmul.bf16.vlgmr.msra.gmra.mxu1 %v1733_v14  ;;  %v7101_v15 = vor.u32 %v8957_v16, %v7098_v52  ;;  %v708_v16 = vadd.f32 %v10249_v33, %v10235_v25 }
 0x27e   : > { %1965 = vmatmul.bf16.vlgmr.msra.gmra.mxu2 %v1733_v14  ;;  %1978 = vmatmul.bf16.vlgmr.msra.gmra.mxu3 %v1733_v14  ;;  %v8964_v14 = vld [vmem:[%s13768_s2 + $0x84] sm:$0xf] }
 0x27f   : > { %v7125_v58 = vor.u32 %v8964_v14, %v7122_v56  ;;  %2251 = vmatpush.bf16.msrb.mxu0 %v7121_v7  ;;  %2290 = vmatpush.bf16.msrb.mxu3 %v7133_v13  ;;  %v7072_v14 = vld [vmem:[%s13768_s2 + $0x20] sm:$0xf]  ;;  %v8954_v7 = vld [vmem:[%s13768_s2 + $0x2c] sm:$0xf0]  ;;  %v737_v56 = vadd.f32 %v10251_v34, %v10237_v26 }
 0x280   : > { %2278 = vmatpush.bf16.msrb.mxu2 %v7113_v5  ;;  %v7073_v57 = vor.u32 %v8954_v7, %v7072_v14  ;;  %v7058_v5 = vld [vmem:[%s13768_s2 + $0x10] sm:$0xf0] }
 0x281   : > { %2264 = vmatpush.bf16.msrb.mxu1 %v7125_v58  ;;  %v8952_v58 = vld [vmem:[%s13768_s2 + $0x24] sm:$0xf] }
 0x282   : > { %v7077_v34 = vor.u32 %v8952_v58, %v7074_v59 }
 0x283   : > { %2252 = vmatpush.bf16.msrb.mxu0 %v7105_v23  ;;  %2291 = vmatpush.bf16.msrb.mxu3 %v7117_v31  ;;  %v8949_v31 = vld [vmem:[%s13768_s2 + $0xc] sm:$0xf] }
 0x284   : > { %2279 = vmatpush.bf16.msrb.mxu2 %v7097_v54 }
 0x285   : > { %2265 = vmatpush.bf16.msrb.mxu1 %v7109_v30 }
 0x287   : > { %2253 = vmatpush.bf16.msrb.mxu0 %v7089_v22  ;;  %2292 = vmatpush.bf16.msrb.mxu3 %v7101_v15  ;;  %v7069_v22 = vor.u32 %v8949_v31, %v7066_v29 }
 0x288   : > { %2280 = vmatpush.bf16.msrb.mxu2 %v7081_v2 }
 0x289   : > { %2266 = vmatpush.bf16.msrb.mxu1 %v7093_v20 }
 0x28b   : > { %2254 = vmatpush.bf16.msrb.mxu0 %v7073_v57  ;;  %2293 = vmatpush.bf16.msrb.mxu3 %v7085_v3 }
 0x28c   : > { %2281 = vmatpush.bf16.msrb.mxu2 %v7065_v41 }
 0x28d   : > { %2267 = vmatpush.bf16.msrb.mxu1 %v7077_v34 }
 0x28f   : > { %2294 = vmatpush.bf16.msrb.mxu3 %v7069_v22 }
 0x2fa   : > { %v1940_v18 = vpop.f32.mrf.mxu0  ;;  %v1953_v4 = vpop.f32.mrf.mxu1 }
 0x2fb   : > { %v1983_v9 = vadd.f32 %v1940_v18, %v650_v12  ;;  %v1984_v21 = vadd.f32 %v1953_v4, %v679_v1  ;;  %v8950_v18 = vld [vmem:[%s13768_s2 + $0xc] sm:$0xf0]  ;;  %v8948_v4 = vld [vmem:[%s13768_s2 + $0x4] sm:$0xf] }
 0x2fc   : > { %v7057_v30 = vor.u32 %v8950_v18, %v7056_v28 }
 0x2fd   : > { %v7051_v46 = vmul.f32 -1.442695, %v1983_v9  ;;  %v7052_v27 = vmul.f32 -1.442695, %v1984_v21  ;;  %v7061_v21 = vor.u32 %v8948_v4, %v7058_v5 }
 0x2fe   : > { %2255 = vmatpush.bf16.msrb.mxu0 %v7057_v30 }
 0x2ff   : > { %9440 = vpow2.f32 %v7051_v46  ;;  %2268 = vmatpush.bf16.msrb.mxu1 %v7061_v21 }
 0x300   : > { %9442 = vpow2.f32 %v7052_v27 }
 0x301   : > { %v1966_v60 = vpop.f32.mrf.mxu2  ;;  %v1979_v13 = vpop.f32.mrf.mxu3 }
 0x302   : > { %v1986_v12 = vadd.f32 %v1979_v13, %v737_v56  ;;  %v1942_v1 = vpop.f32.mrf.mxu0  ;;  %v1955_v23 = vpop.f32.mrf.mxu1  ;;  %v1985_v14 = vadd.f32 %v1966_v60, %v708_v16  ;;  %v7301_v16 = vld [vmem:[%s13768_s2 + $0xf0] sm:$0xf0] }
 0x304   : > { %v7053_v9 = vmul.f32 -1.442695, %v1986_v12 }
 0x305   : > { %v9441_v37 = vpop.eup %9440 }
 0x306   : > { %v9443_v46 = vpop.eup %9442  ;;  %v1990_v27 = vadd.f32 1.0, %v9441_v37  ;;  %9444 = vpow2.f32 %v7053_v9 }
 0x307   : > { %v2009_v24 = vadd.f32 1.0, %v9443_v46 }
 0x308   : > { %9446 = vrcp.f32 %v1990_v27  ;;  %v2002_v59 = vand.u32 2147483648, %v1990_v27  ;;  %v2000_v34 = vand.u32 2147483647, %v1990_v27  ;;  %vm1996_vm6 = vweird.f32 %v1990_v27 }
 0x309   : > { %9448 = vrcp.f32 %v2009_v24  ;;  %v1968_v20 = vpop.f32.mrf.mxu2  ;;  %v1981_v53 = vpop.f32.mrf.mxu3  ;;  %v2021_v11 = vand.u32 2147483648, %v2009_v24  ;;  %v2019_v63 = vand.u32 2147483647, %v2009_v24  ;;  %vm2015_vm7 = vweird.f32 %v2009_v24 }
 0x30a   : > { %v2003_v60 = vor.u32 1.1754944e-38, %v2002_v59  ;;  %vm2001_vm10 = vcmp.eq.f32.partialorder %v2000_v34, 8.507059e+37  ;;  %v9010_v20 = vld [vmem:[%s13768_s2 + $0xec] sm:$0xf0]  ;;  %v9008_v53 = vld [vmem:[%s13768_s2 + $0xe4] sm:$0xf] }
 0x30b   : > { %v2022_v23 = vor.u32 1.1754944e-38, %v2021_v11  ;;  %vm2020_vm11 = vcmp.eq.f32.partialorder %v2019_v63, 8.507059e+37  ;;  %v9006_v59 = vld [vmem:[%s13768_s2 + $0xcc] sm:$0xf0]  ;;  %v9004_v11 = vld [vmem:[%s13768_s2 + $0xc4] sm:$0xf] }
 0x30c   : > { %v9445_v47 = vpop.eup %9444  ;;  %v7285_v34 = vld [vmem:[%s13768_s2 + $0xd0] sm:$0xf0]  ;;  %v9007_v63 = vld [vmem:[%s13768_s2 + $0xd4] sm:$0xf0] }
 0x30d   : > { %v2029_v54 = vadd.f32 1.0, %v9445_v47 }
 0x30e   : > { %v9447_v52 = vpop.eup %9446 }
 0x30f   : > { %v9449_v7 = vpop.eup %9448  ;;  %v1992_v56 = vmul.f32 %v9447_v52, %v1990_v27  ;;  %9450 = vrcp.f32 %v2029_v54  ;;  %vm1997_vm4 = vweird.f32 %v9447_v52  ;;  %v2041_v31 = vand.u32 2147483648, %v2029_v54 }
 0x310   : > { %v2011_v15 = vmul.f32 %v9449_v7, %v2009_v24  ;;  %9452 = vtanh.f32 %v1985_v14  ;;  %vm2016_vm5 = vweird.f32 %v9449_v7  ;;  %vm1998_vm8 = vmor %vm1996_vm6, %vm1997_vm4  ;;  %vm2035_vm13 = vweird.f32 %v2029_v54 }
 0x311   : > { %v1993_v57 = vsub.f32 1.0, %v1992_v56  ;;  %vm2017_vm9 = vmor %vm2015_vm7, %vm2016_vm5  ;;  %v2039_v29 = vand.u32 2147483647, %v2029_v54  ;;  %v2042_v41 = vor.u32 1.1754944e-38, %v2041_v31  ;;  %v7304_v14 = vor.u32 %v9008_v53, %v7301_v16  ;;  %v9009_v56 = vld [vmem:[%s13768_s2 + $0xec] sm:$0xf] }
 0x312   : > { %v2012_v58 = vsub.f32 1.0, %v2011_v15  ;;  %v7309_v15 = vld [vmem:[%s13768_s2 + $0xf8] sm:$0xf0]  ;;  %v8997_v53 = vld [vmem:[%s13768_s2 + $0x8c] sm:$0xf] }
 0x313   : > { %v1994_v13 = vmul.f32 %v9447_v52, %v1993_v57  ;;  %vm2040_vm15 = vcmp.eq.f32.partialorder %v2039_v29, 8.507059e+37  ;;  %v7312_v57 = vor.u32 %v9009_v56, %v7309_v15  ;;  %2578 = vmatpush.bf16.msra.mxu1 %v7304_v14  ;;  %v7251_v29 = vld [vmem:[%s13768_s2 + $0x80] sm:$0xf]  ;;  %v8992_v14 = vld [vmem:[%s13768_s2 + $0x64] sm:$0xf] }
 0x314   : > { %v2013_v62 = vmul.f32 %v9449_v7, %v2012_v58  ;;  %v7283_v58 = vld [vmem:[%s13768_s2 + $0xc0] sm:$0xf]  ;;  %v7237_v56 = vld [vmem:[%s13768_s2 + $0x70] sm:$0xf0]  ;;  %v7243_v15 = vld [vmem:[%s13768_s2 + $0x68] sm:$0xf] }
 0x315   : > { %v9451_v0 = vpop.eup %9450  ;;  %v1995_v33 = vadd.f32 %v9447_v52, %v1994_v13  ;;  %2604 = vmatpush.bf16.msra.mxu3 %v7312_v57  ;;  %v7284_v13 = vor.u32 %v9006_v59, %v7283_v58  ;;  %v8995_v57 = vld [vmem:[%s13768_s2 + $0x74] sm:$0xf0] }
 0x316   : > { %v2014_v12 = vadd.f32 %v9449_v7, %v2013_v62  ;;  %v2031_v1 = vmul.f32 %v9451_v0, %v2029_v54  ;;  %v9453_v3 = vpop.eup %9452  ;;  %vm2036_vm12 = vweird.f32 %v9451_v0  ;;  %v7307_v54 = vld [vmem:[%s13768_s2 + $0xe8] sm:$0xf] }
 0x317   : > { %v1999_v2 = vsel %vm1998_vm8, %v9447_v52, %v1995_v33  ;;  %vm2037_vm14 = vmor %vm2035_vm13, %vm2036_vm12  ;;  %v9011_v52 = vld [vmem:[%s13768_s2 + $0xf4] sm:$0xf0]  ;;  %v7291_v62 = vld [vmem:[%s13768_s2 + $0xc8] sm:$0xf] }
 0x318   : > { %v2004_v28 = vsel %vm2001_vm10, %v2003_v60, %v1999_v2  ;;  %v2018_v18 = vsel %vm2017_vm9, %v9449_v7, %v2014_v12  ;;  %v2032_v4 = vsub.f32 1.0, %v2031_v1  ;;  %v7308_v7 = vor.u32 %v9011_v52, %v7307_v54  ;;  %v9005_v60 = vld [vmem:[%s13768_s2 + $0xcc] sm:$0xf]  ;;  %v7293_v12 = vld [vmem:[%s13768_s2 + $0xd8] sm:$0xf0] }
 0x319   : > { %v2023_v30 = vsel %vm2020_vm11, %v2022_v23, %v2018_v18  ;;  %v2046_v5 = vmul.f32 %v9453_v3, %v2004_v28  ;;  %v7292_v33 = vor.u32 %v9007_v63, %v7291_v62  ;;  %v7296_v1 = vor.u32 %v9005_v60, %v7293_v12  ;;  %v7267_v23 = vld [vmem:[%s13768_s2 + $0xa0] sm:$0xf]  ;;  %v9002_v2 = vld [vmem:[%s13768_s2 + $0xac] sm:$0xf0]  ;;  %v9000_v3 = vld [vmem:[%s13768_s2 + $0xa4] sm:$0xf] }
 0x31a   : > { %v2045_v32 = vmul.f32 %v2023_v30, %v10897_v48  ;;  %v2033_v6 = vmul.f32 %v9451_v0, %v2032_v4  ;;  %v7299_v48 = vld [vmem:[%s13768_s2 + $0xe0] sm:$0xf]  ;;  %2591 = vmatpush.bf16.msra.mxu2 %v7308_v7  ;;  %v7268_v28 = vor.u32 %v9002_v2, %v7267_v23  ;;  %v7269_v18 = vld [vmem:[%s13768_s2 + $0xb0] sm:$0xf0]  ;;  %v7275_v4 = vld [vmem:[%s13768_s2 + $0xa8] sm:$0xf] }
 0x31b   : > { %v7300_v47 = vor.u32 %v9010_v20, %v7299_v48  ;;  %2605 = vmatpush.bf16.msra.mxu3 %v7296_v1  ;;  %v9003_v30 = vld [vmem:[%s13768_s2 + $0xb4] sm:$0xf0]  ;;  %v7235_v54 = vld [vmem:[%s13768_s2 + $0x60] sm:$0xf]  ;;  %v8994_v52 = vld [vmem:[%s13768_s2 + $0x6c] sm:$0xf0] }
 0x31c   : > { %v11101_v9 = vadd.f32 %v2046_v5, %v2045_v32  ;;  %v2034_v21 = vadd.f32 %v9451_v0, %v2033_v6  ;;  %v7272_v5 = vor.u32 %v9000_v3, %v7269_v18  ;;  %v7276_v32 = vor.u32 %v9003_v30, %v7275_v4  ;;  %v9001_v6 = vld [vmem:[%s13768_s2 + $0xac] sm:$0xf]  ;;  %v7245_v62 = vld [vmem:[%s13768_s2 + $0x78] sm:$0xf0]  ;;  %v7219_v60 = vld [vmem:[%s13768_s2 + $0x40] sm:$0xf] }
 0x31d   : > { %2565 = vmatpush.bf16.msra.mxu0 %v7300_v47  ;;  %v7261_v47 = vld [vmem:[%s13768_s2 + $0x98] sm:$0xf0]  ;;  %v7236_v7 = vor.u32 %v8994_v52, %v7235_v54  ;;  %v8990_v12 = vld [vmem:[%s13768_s2 + $0x4c] sm:$0xf0]  ;;  %v8988_v1 = vld [vmem:[%s13768_s2 + $0x44] sm:$0xf] }
 0x31e   : > { %9454 = vtanh.f32 %v11101_v9  ;;  %v2038_v37 = vsel %vm2037_vm14, %v9451_v0, %v2034_v21  ;;  %v7288_v0 = vor.u32 %v9004_v11, %v7285_v34  ;;  %2592 = vmatpush.bf16.msra.mxu2 %v7292_v33  ;;  %v7277_v21 = vld [vmem:[%s13768_s2 + $0xb8] sm:$0xf0]  ;;  %v7264_v16 = vor.u32 %v8997_v53, %v7261_v47  ;;  %v8993_v34 = vld [vmem:[%s13768_s2 + $0x6c] sm:$0xf]  ;;  %v7221_v2 = vld [vmem:[%s13768_s2 + $0x50] sm:$0xf0] }
 0x31f   : > { %v2043_v27 = vsel %vm2040_vm15, %v2042_v41, %v2038_v37  ;;  %v7280_v31 = vor.u32 %v9001_v6, %v7277_v21  ;;  %v8998_v37 = vld [vmem:[%s13768_s2 + $0x8c] sm:$0xf0]  ;;  %v8996_v41 = vld [vmem:[%s13768_s2 + $0x84] sm:$0xf]  ;;  %v7240_v11 = vor.u32 %v8992_v14, %v7237_v56  ;;  %v7248_v33 = vor.u32 %v8993_v34, %v7245_v62  ;;  %v8991_v18 = vld [vmem:[%s13768_s2 + $0x54] sm:$0xf0] }
 0x320   : > { %2579 = vmatpush.bf16.msra.mxu1 %v7288_v0  ;;  %v7224_v3 = vor.u32 %v8988_v1, %v7221_v2  ;;  %v8989_v4 = vld [vmem:[%s13768_s2 + $0x4c] sm:$0xf]  ;;  %v8986_v6 = vld [vmem:[%s13768_s2 + $0x2c] sm:$0xf0]  ;;  %v7187_v14 = vld [vmem:[%s13768_s2] sm:$0xf] }
 0x321   : > { %2566 = vmatpush.bf16.msra.mxu0 %v7284_v13  ;;  %2606 = vmatpush.bf16.msra.mxu3 %v7280_v31  ;;  %v7244_v13 = vor.u32 %v8995_v57, %v7243_v15  ;;  %v8980_v56 = vld [vmem:[%s13768_s2 + $0x4] sm:$0xf]  ;;  %v7195_v57 = vld [vmem:[%s13768_s2 + $0x8] sm:$0xf]  ;;  %v7197_v34 = vld [vmem:[%s13768_s2 + $0x18] sm:$0xf0] }
 0x322   : > { %2593 = vmatpush.bf16.msra.mxu2 %v7276_v32  ;;  %v7203_v32 = vld [vmem:[%s13768_s2 + $0x20] sm:$0xf] }
 0x323   : > { %v7204_v31 = vor.u32 %v8986_v6, %v7203_v32 }
 0x324   : > { %v9455_v46 = vpop.eup %9454  ;;  %2580 = vmatpush.bf16.msra.mxu1 %v7272_v5  ;;  %v7229_v5 = vld [vmem:[%s13768_s2 + $0x58] sm:$0xf0] }
 0x325   : > { %v2049_v22 = vmul.f32 %v9455_v46, %v2043_v27  ;;  %2567 = vmatpush.bf16.msra.mxu0 %v7268_v28  ;;  %v7252_v46 = vor.u32 %v8998_v37, %v7251_v29  ;;  %v7253_v27 = vld [vmem:[%s13768_s2 + $0x90] sm:$0xf0]  ;;  %2607 = vmatpush.bf16.msra.mxu3 %v7264_v16  ;;  %v7227_v28 = vld [vmem:[%s13768_s2 + $0x48] sm:$0xf]  ;;  %v7232_v21 = vor.u32 %v8989_v4, %v7229_v5  ;;  %v8984_v29 = vld [vmem:[%s13768_s2 + $0x24] sm:$0xf] }
 0x326   : > { %v7256_v48 = vor.u32 %v8996_v41, %v7253_v27  ;;  %v7228_v30 = vor.u32 %v8991_v18, %v7227_v28  ;;  %v7205_v37 = vld [vmem:[%s13768_s2 + $0x30] sm:$0xf0]  ;;  %v7211_v41 = vld [vmem:[%s13768_s2 + $0x28] sm:$0xf] }
 0x327   : > { %v2050_v24 = vpack.c.bf16 %v2049_v22, %v2049_v22  ;;  %v7259_v22 = vld [vmem:[%s13768_s2 + $0x88] sm:$0xf] }
 0x328   : > { %2581 = vmatpush.bf16.msra.mxu1 %v7256_v48  ;;  %v8985_v48 = vld [vmem:[%s13768_s2 + $0x2c] sm:$0xf] }
 0x329   : > { %2051 = vst [vmem:[#allocation5 + $0xc] sm:$0xf] %v2050_v24  ;;  %2256 = vmatmul.bf16.vlgmr.msrb.gmra.mxu0 %v2050_v24  ;;  %2269 = vmatmul.bf16.vlgmr.msrb.gmra.mxu1 %v2050_v24 }
 0x32a   : > { %2282 = vmatmul.bf16.vlgmr.msrb.gmra.mxu2 %v2050_v24  ;;  %2295 = vmatmul.bf16.vlgmr.msrb.gmra.mxu3 %v2050_v24  ;;  %v8999_v24 = vld [vmem:[%s13768_s2 + $0x94] sm:$0xf0] }
 0x32b   : > { %v7260_v20 = vor.u32 %v8999_v24, %v7259_v22  ;;  %2568 = vmatpush.bf16.msra.mxu0 %v7252_v46  ;;  %2608 = vmatpush.bf16.msra.mxu3 %v7248_v33  ;;  %v7208_v22 = vor.u32 %v8984_v29, %v7205_v37  ;;  %v8987_v24 = vld [vmem:[%s13768_s2 + $0x34] sm:$0xf0] }
 0x32c   : > { %2582 = vmatpush.bf16.msra.mxu1 %v7240_v11  ;;  %v7212_v54 = vor.u32 %v8987_v24, %v7211_v41 }
 0x32d   : > { %2594 = vmatpush.bf16.msra.mxu2 %v7260_v20  ;;  %v7213_v20 = vld [vmem:[%s13768_s2 + $0x38] sm:$0xf0] }
 0x32e   : > { %v7216_v52 = vor.u32 %v8985_v48, %v7213_v20 }
 0x32f   : > { %2569 = vmatpush.bf16.msra.mxu0 %v7236_v7  ;;  %2609 = vmatpush.bf16.msra.mxu3 %v7232_v21  ;;  %v8982_v7 = vld [vmem:[%s13768_s2 + $0xc] sm:$0xf0] }
 0x330   : > { %2583 = vmatpush.bf16.msra.mxu1 %v7224_v3  ;;  %v7188_v15 = vor.u32 %v8982_v7, %v7187_v14 }
 0x331   : > { %2595 = vmatpush.bf16.msra.mxu2 %v7244_v13  ;;  %v8981_v13 = vld [vmem:[%s13768_s2 + $0xc] sm:$0xf] }
 0x333   : > { %2610 = vmatpush.bf16.msra.mxu3 %v7216_v52 }
 0x334   : > { %2584 = vmatpush.bf16.msra.mxu1 %v7208_v22 }
 0x335   : > { %2596 = vmatpush.bf16.msra.mxu2 %v7228_v30 }
 0x339   : > { %2597 = vmatpush.bf16.msra.mxu2 %v7212_v54 }
 0x3a6   : > { %v2257_v58 = vpop.f32.mrf.mxu0  ;;  %v2270_v59 = vpop.f32.mrf.mxu1 }
 0x3a7   : > { %v2300_v63 = vadd.f32 %v2257_v58, %v10254_v36  ;;  %v2301_v0 = vadd.f32 %v2270_v59, %v10257_v38  ;;  %v7220_v38 = vor.u32 %v8990_v12, %v7219_v60  ;;  %v8983_v58 = vld [vmem:[%s13768_s2 + $0x14] sm:$0xf0]  ;;  %v7200_v60 = vor.u32 %v8981_v13, %v7197_v34 }
 0x3a9   : > { %v7182_v23 = vmul.f32 -1.442695, %v2300_v63  ;;  %v7183_v36 = vmul.f32 -1.442695, %v2301_v0  ;;  %2570 = vmatpush.bf16.msra.mxu0 %v7220_v38  ;;  %v7196_v63 = vor.u32 %v8983_v58, %v7195_v57  ;;  %2611 = vmatpush.bf16.msra.mxu3 %v7200_v60  ;;  %v7432_v60 = vld [vmem:[%s13768_s2 + $0xf0] sm:$0xf0] }
 0x3ab   : > { %9456 = vpow2.f32 %v7182_v23  ;;  %2598 = vmatpush.bf16.msra.mxu2 %v7196_v63  ;;  %v9042_v63 = vld [vmem:[%s13768_s2 + $0xec] sm:$0xf0] }
 0x3ac   : > { %9458 = vpow2.f32 %v7183_v36 }
 0x3ad   : > { %v2283_v46 = vpop.f32.mrf.mxu2  ;;  %v2296_v27 = vpop.f32.mrf.mxu3  ;;  %2571 = vmatpush.bf16.msra.mxu0 %v7204_v31 }
 0x3ae   : > { %v2303_v53 = vadd.f32 %v2296_v27, %v10265_v43  ;;  %v2259_v47 = vpop.f32.mrf.mxu0  ;;  %v2272_v16 = vpop.f32.mrf.mxu1  ;;  %v7189_v43 = vld [vmem:[%s13768_s2 + $0x10] sm:$0xf0]  ;;  %v2302_v3 = vadd.f32 %v2283_v46, %v10260_v40 }
 0x3af   : > { %v7192_v11 = vor.u32 %v8980_v56, %v7189_v43 }
 0x3b0   : > { %v7184_v59 = vmul.f32 -1.442695, %v2303_v53 }
 0x3b1   : > { %v9457_v62 = vpop.eup %9456  ;;  %2572 = vmatpush.bf16.msra.mxu0 %v7188_v15  ;;  %2585 = vmatpush.bf16.msra.mxu1 %v7192_v11 }
 0x3b2   : > { %v9459_v0 = vpop.eup %9458  ;;  %v2307_v33 = vadd.f32 1.0, %v9457_v62  ;;  %9460 = vpow2.f32 %v7184_v59 }
 0x3b3   : > { %v2326_v12 = vadd.f32 1.0, %v9459_v0  ;;  %v9040_v0 = vld [vmem:[%s13768_s2 + $0xe4] sm:$0xf] }
 0x3b4   : > { %9462 = vrcp.f32 %v2307_v33  ;;  %v2319_v32 = vand.u32 2147483648, %v2307_v33  ;;  %v2317_v31 = vand.u32 2147483647, %v2307_v33  ;;  %vm2313_vm2 = vweird.f32 %v2307_v33 }
 0x3b5   : > { %9464 = vrcp.f32 %v2326_v12  ;;  %v2285_v1 = vpop.f32.mrf.mxu2  ;;  %v2298_v23 = vpop.f32.mrf.mxu3  ;;  %v2338_v6 = vand.u32 2147483648, %v2326_v12  ;;  %v2336_v37 = vand.u32 2147483647, %v2326_v12  ;;  %vm2332_vm3 = vweird.f32 %v2326_v12 }
 0x3b6   : > { %v2320_v40 = vor.u32 1.1754944e-38, %v2319_v32  ;;  %vm2318_vm6 = vcmp.eq.f32.partialorder %v2317_v31, 8.507059e+37  ;;  %v9043_v1 = vld [vmem:[%s13768_s2 + $0xf4] sm:$0xf0]  ;;  %v7435_v23 = vor.u32 %v9040_v0, %v7432_v60  ;;  %v7422_v32 = vld [vmem:[%s13768_s2 + $0xc8] sm:$0xf]  ;;  %v655_v60 = vadd.f32 %v10262_v42, %v10221_v17 }
 0x3b7   : > { %v2339_v24 = vor.u32 1.1754944e-38, %v2338_v6  ;;  %vm2337_vm7 = vcmp.eq.f32.partialorder %v2336_v37, 8.507059e+37  ;;  %v9039_v6 = vld [vmem:[%s13768_s2 + $0xd4] sm:$0xf0]  ;;  %v7424_v37 = vld [vmem:[%s13768_s2 + $0xd8] sm:$0xf0] }
 0x3b8   : > { %v9461_v36 = vpop.eup %9460  ;;  %2895 = vmatpush.bf16.msrb.mxu1 %v7435_v23  ;;  %v7423_v31 = vor.u32 %v9039_v6, %v7422_v32  ;;  %v9026_v0 = vld [vmem:[%s13768_s2 + $0x6c] sm:$0xf0]  ;;  %v7368_v23 = vld [vmem:[%s13768_s2 + $0x70] sm:$0xf0]  ;;  %v7350_v32 = vld [vmem:[%s13768_s2 + $0x40] sm:$0xf] }
 0x3b9   : > { %v2346_v38 = vadd.f32 1.0, %v9461_v36  ;;  %v9022_v6 = vld [vmem:[%s13768_s2 + $0x4c] sm:$0xf0] }
 0x3ba   : > { %v9463_v2 = vpop.eup %9462 }
 0x3bb   : > { %v9465_v28 = vpop.eup %9464  ;;  %v2309_v18 = vmul.f32 %v9463_v2, %v2307_v33  ;;  %9466 = vrcp.f32 %v2346_v38  ;;  %vm2314_vm0 = vweird.f32 %v9463_v2  ;;  %v2358_v43 = vand.u32 2147483648, %v2346_v38 }
 0x3bc   : > { %v2328_v4 = vmul.f32 %v9465_v28, %v2326_v12  ;;  %9468 = vtanh.f32 %v2302_v3  ;;  %vm2333_vm1 = vweird.f32 %v9465_v28  ;;  %vm2315_vm4 = vmor %vm2313_vm2, %vm2314_vm0  ;;  %vm2352_vm9 = vweird.f32 %v2346_v38  ;;  %v7438_v12 = vld [vmem:[%s13768_s2 + $0xe8] sm:$0xf] }
 0x3bd   : > { %v2310_v30 = vsub.f32 1.0, %v2309_v18  ;;  %vm2334_vm5 = vmor %vm2332_vm3, %vm2333_vm1  ;;  %v2356_v57 = vand.u32 2147483647, %v2346_v38  ;;  %v2359_v59 = vor.u32 1.1754944e-38, %v2358_v43  ;;  %v7439_v36 = vor.u32 %v9043_v1, %v7438_v12  ;;  %v9038_v18 = vld [vmem:[%s13768_s2 + $0xcc] sm:$0xf0] }
 0x3be   : > { %v2329_v5 = vsub.f32 1.0, %v2328_v4  ;;  %v9036_v4 = vld [vmem:[%s13768_s2 + $0xc4] sm:$0xf]  ;;  %v684_v12 = vadd.f32 %v10267_v44, %v10225_v19  ;;  %v9025_v44 = vld [vmem:[%s13768_s2 + $0x6c] sm:$0xf] }
 0x3bf   : > { %v2311_v21 = vmul.f32 %v9463_v2, %v2310_v30  ;;  %vm2357_vm11 = vcmp.eq.f32.partialorder %v2356_v57, 8.507059e+37  ;;  %2908 = vmatpush.bf16.msrb.mxu2 %v7439_v36  ;;  %v7384_v57 = vld [vmem:[%s13768_s2 + $0x90] sm:$0xf0]  ;;  %v7374_v36 = vld [vmem:[%s13768_s2 + $0x68] sm:$0xf] }
 0x3c0   : > { %v2330_v29 = vmul.f32 %v9465_v28, %v2329_v5  ;;  %v7416_v5 = vld [vmem:[%s13768_s2 + $0xd0] sm:$0xf0] }
 0x3c1   : > { %v9467_v41 = vpop.eup %9466  ;;  %v2312_v27 = vadd.f32 %v9463_v2, %v2311_v21  ;;  %v7419_v21 = vor.u32 %v9036_v4, %v7416_v5 }
 0x3c2   : > { %v2331_v46 = vadd.f32 %v9465_v28, %v2330_v29  ;;  %v2348_v22 = vmul.f32 %v9467_v41, %v2346_v38  ;;  %v9469_v20 = vpop.eup %9468  ;;  %vm2353_vm8 = vweird.f32 %v9467_v41  ;;  %v9041_v38 = vld [vmem:[%s13768_s2 + $0xec] sm:$0xf] }
 0x3c3   : > { %v2316_v48 = vsel %vm2315_vm4, %v9463_v2, %v2312_v27  ;;  %vm2354_vm10 = vmor %vm2352_vm9, %vm2353_vm8  ;;  %v7440_v2 = vld [vmem:[%s13768_s2 + $0xf8] sm:$0xf0]  ;;  %v9037_v29 = vld [vmem:[%s13768_s2 + $0xcc] sm:$0xf]  ;;  %2896 = vmatpush.bf16.msrb.mxu1 %v7419_v21  ;;  %2909 = vmatpush.bf16.msrb.mxu2 %v7423_v31 }
 0x3c4   : > { %v2321_v53 = vsel %vm2318_vm6, %v2320_v40, %v2316_v48  ;;  %v2335_v47 = vsel %vm2334_vm5, %v9465_v28, %v2331_v46  ;;  %v2349_v16 = vsub.f32 1.0, %v2348_v22  ;;  %v7443_v3 = vor.u32 %v9041_v38, %v7440_v2  ;;  %v7414_v28 = vld [vmem:[%s13768_s2 + $0xc0] sm:$0xf]  ;;  %v9034_v40 = vld [vmem:[%s13768_s2 + $0xac] sm:$0xf0] }
 0x3c5   : > { %v2340_v54 = vsel %vm2337_vm7, %v2339_v24, %v2335_v47  ;;  %v2363_v52 = vmul.f32 %v9469_v20, %v2321_v53  ;;  %v7415_v30 = vor.u32 %v9038_v18, %v7414_v28  ;;  %v7398_v27 = vld [vmem:[%s13768_s2 + $0xa0] sm:$0xf]  ;;  %v9032_v46 = vld [vmem:[%s13768_s2 + $0xa4] sm:$0xf]  ;;  %v7400_v24 = vld [vmem:[%s13768_s2 + $0xb0] sm:$0xf0] }
 0x3c6   : > { %v2362_v14 = vmul.f32 %v2340_v54, %v11101_v9  ;;  %v2350_v7 = vmul.f32 %v9467_v41, %v2349_v16  ;;  %v7430_v9 = vld [vmem:[%s13768_s2 + $0xe0] sm:$0xf]  ;;  %2921 = vmatpush.bf16.msrb.mxu3 %v7443_v3  ;;  %v7399_v22 = vor.u32 %v9034_v40, %v7398_v27  ;;  %v7406_v48 = vld [vmem:[%s13768_s2 + $0xa8] sm:$0xf]  ;;  %v9035_v20 = vld [vmem:[%s13768_s2 + $0xb4] sm:$0xf0]  ;;  %v7403_v53 = vor.u32 %v9032_v46, %v7400_v24 }
 0x3c7   : > { %v7431_v33 = vor.u32 %v9042_v63, %v7430_v9  ;;  %v7407_v47 = vor.u32 %v9035_v20, %v7406_v48  ;;  %v9033_v16 = vld [vmem:[%s13768_s2 + $0xac] sm:$0xf]  ;;  %v7408_v54 = vld [vmem:[%s13768_s2 + $0xb8] sm:$0xf0]  ;;  %v7366_v63 = vld [vmem:[%s13768_s2 + $0x60] sm:$0xf] }
 0x3c8   : > { %v11301_v56 = vadd.f32 %v2363_v52, %v2362_v14  ;;  %v2351_v15 = vadd.f32 %v9467_v41, %v2350_v7  ;;  %v7411_v52 = vor.u32 %v9033_v16, %v7408_v54  ;;  %2897 = vmatpush.bf16.msrb.mxu1 %v7403_v53  ;;  %v7382_v14 = vld [vmem:[%s13768_s2 + $0x80] sm:$0xf]  ;;  %v9030_v7 = vld [vmem:[%s13768_s2 + $0x8c] sm:$0xf0]  ;;  %v7367_v1 = vor.u32 %v9026_v0, %v7366_v63  ;;  %v9027_v38 = vld [vmem:[%s13768_s2 + $0x74] sm:$0xf0] }
 0x3c9   : > { %2882 = vmatpush.bf16.msrb.mxu0 %v7431_v33  ;;  %2910 = vmatpush.bf16.msrb.mxu2 %v7407_v47  ;;  %v7383_v43 = vor.u32 %v9030_v7, %v7382_v14  ;;  %v9024_v33 = vld [vmem:[%s13768_s2 + $0x64] sm:$0xf]  ;;  %v7375_v28 = vor.u32 %v9027_v38, %v7374_v36  ;;  %v7376_v18 = vld [vmem:[%s13768_s2 + $0x78] sm:$0xf0]  ;;  %v7358_v40 = vld [vmem:[%s13768_s2 + $0x48] sm:$0xf]  ;;  %v742_v47 = vadd.f32 %v10280_v49, %v10237_v26 }
 0x3ca   : > { %9470 = vtanh.f32 %v11301_v56  ;;  %v2355_v58 = vsel %vm2354_vm10, %v9467_v41, %v2351_v15  ;;  %v7427_v41 = vor.u32 %v9037_v29, %v7424_v37  ;;  %v9028_v15 = vld [vmem:[%s13768_s2 + $0x84] sm:$0xf]  ;;  %v7371_v42 = vor.u32 %v9024_v33, %v7368_v23  ;;  %v9023_v46 = vld [vmem:[%s13768_s2 + $0x54] sm:$0xf0]  ;;  %v7360_v48 = vld [vmem:[%s13768_s2 + $0x58] sm:$0xf0] }
 0x3cb   : > { %v2360_v13 = vsel %vm2357_vm11, %v2359_v59, %v2355_v58  ;;  %v7390_v58 = vld [vmem:[%s13768_s2 + $0x88] sm:$0xf]  ;;  %v9031_v59 = vld [vmem:[%s13768_s2 + $0x94] sm:$0xf0]  ;;  %v7379_v5 = vor.u32 %v9025_v44, %v7376_v18  ;;  %v9020_v21 = vld [vmem:[%s13768_s2 + $0x44] sm:$0xf]  ;;  %v7351_v37 = vor.u32 %v9022_v6, %v7350_v32  ;;  %v7359_v24 = vor.u32 %v9023_v46, %v7358_v40 }
 0x3cc   : > { %2922 = vmatpush.bf16.msrb.mxu3 %v7427_v41  ;;  %v7352_v41 = vld [vmem:[%s13768_s2 + $0x50] sm:$0xf0]  ;;  %v7334_v20 = vld [vmem:[%s13768_s2 + $0x20] sm:$0xf]  ;;  %v9018_v53 = vld [vmem:[%s13768_s2 + $0x2c] sm:$0xf0] }
 0x3cd   : > { %2883 = vmatpush.bf16.msrb.mxu0 %v7415_v30  ;;  %v7355_v27 = vor.u32 %v9020_v21, %v7352_v41  ;;  %v7335_v54 = vor.u32 %v9018_v53, %v7334_v20  ;;  %v7336_v14 = vld [vmem:[%s13768_s2 + $0x30] sm:$0xf0]  ;;  %v7342_v7 = vld [vmem:[%s13768_s2 + $0x28] sm:$0xf]  ;;  %v7318_v63 = vld [vmem:[%s13768_s2] sm:$0xf]  ;;  %v713_v21 = vadd.f32 %v10269_v45, %v10235_v25 }
 0x3ce   : > { %v9014_v0 = vld [vmem:[%s13768_s2 + $0xc] sm:$0xf0]  ;;  %v9012_v33 = vld [vmem:[%s13768_s2 + $0x4] sm:$0xf]  ;;  %v9015_v23 = vld [vmem:[%s13768_s2 + $0x14] sm:$0xf0] }
 0x3d0   : > { %v9471_v11 = vpop.eup %9470  ;;  %2923 = vmatpush.bf16.msrb.mxu3 %v7411_v52  ;;  %v9016_v52 = vld [vmem:[%s13768_s2 + $0x24] sm:$0xf] }
 0x3d1   : > { %v2366_v34 = vmul.f32 %v9471_v11, %v2360_v13  ;;  %2884 = vmatpush.bf16.msrb.mxu0 %v7399_v22  ;;  %v7387_v11 = vor.u32 %v9028_v15, %v7384_v57  ;;  %v7391_v13 = vor.u32 %v9031_v59, %v7390_v58  ;;  %v9021_v22 = vld [vmem:[%s13768_s2 + $0x4c] sm:$0xf]  ;;  %v7339_v49 = vor.u32 %v9016_v52, %v7336_v14  ;;  %v9019_v57 = vld [vmem:[%s13768_s2 + $0x34] sm:$0xf0]  ;;  %v7344_v59 = vld [vmem:[%s13768_s2 + $0x38] sm:$0xf0] }
 0x3d2   : > { %v7363_v16 = vor.u32 %v9021_v22, %v7360_v48  ;;  %v9017_v58 = vld [vmem:[%s13768_s2 + $0x2c] sm:$0xf] }
 0x3d3   : > { %v2367_v62 = vpack.c.bf16 %v2366_v34, %v2366_v34  ;;  %v9029_v34 = vld [vmem:[%s13768_s2 + $0x8c] sm:$0xf]  ;;  %2898 = vmatpush.bf16.msrb.mxu1 %v7387_v11  ;;  %2911 = vmatpush.bf16.msrb.mxu2 %v7391_v13 }
 0x3d5   : > { %2368 = vst [vmem:[#allocation5 + $0x10] sm:$0xf] %v2367_v62  ;;  %2573 = vmatmul.bf16.vlgmr.msra.gmra.mxu0 %v2367_v62  ;;  %2586 = vmatmul.bf16.vlgmr.msra.gmra.mxu1 %v2367_v62 }
 0x3d6   : > { %2599 = vmatmul.bf16.vlgmr.msra.gmra.mxu2 %v2367_v62  ;;  %2612 = vmatmul.bf16.vlgmr.msra.gmra.mxu3 %v2367_v62  ;;  %v7392_v62 = vld [vmem:[%s13768_s2 + $0x98] sm:$0xf0] }
 0x3d7   : > { %2885 = vmatpush.bf16.msrb.mxu0 %v7383_v43  ;;  %v7395_v9 = vor.u32 %v9029_v34, %v7392_v62  ;;  %2899 = vmatpush.bf16.msrb.mxu1 %v7371_v42  ;;  %v7343_v62 = vor.u32 %v9019_v57, %v7342_v7 }
 0x3d8   : > { %2912 = vmatpush.bf16.msrb.mxu2 %v7375_v28 }
 0x3d9   : > { %2924 = vmatpush.bf16.msrb.mxu3 %v7395_v9  ;;  %v7347_v9 = vor.u32 %v9017_v58, %v7344_v59 }
 0x3db   : > { %2886 = vmatpush.bf16.msrb.mxu0 %v7367_v1  ;;  %2900 = vmatpush.bf16.msrb.mxu1 %v7355_v27  ;;  %v7326_v1 = vld [vmem:[%s13768_s2 + $0x8] sm:$0xf] }
 0x3dc   : > { %2913 = vmatpush.bf16.msrb.mxu2 %v7359_v24  ;;  %v7327_v28 = vor.u32 %v9015_v23, %v7326_v1 }
 0x3dd   : > { %2925 = vmatpush.bf16.msrb.mxu3 %v7379_v5 }
 0x3df   : > { %2887 = vmatpush.bf16.msrb.mxu0 %v7351_v37  ;;  %2901 = vmatpush.bf16.msrb.mxu1 %v7339_v49 }
 0x3e0   : > { %2914 = vmatpush.bf16.msrb.mxu2 %v7343_v62 }
 0x3e1   : > { %2926 = vmatpush.bf16.msrb.mxu3 %v7363_v16 }
 0x3e3   : > { %2888 = vmatpush.bf16.msrb.mxu0 %v7335_v54 }
 0x3e4   : > { %2915 = vmatpush.bf16.msrb.mxu2 %v7327_v28  ;;  %v7563_v28 = vld [vmem:[%s13768_s2 + $0xf0] sm:$0xf0] }
 0x3e5   : > { %2927 = vmatpush.bf16.msrb.mxu3 %v7347_v9 }
 0x452   : > { %v2574_v2 = vpop.f32.mrf.mxu0  ;;  %v2587_v3 = vpop.f32.mrf.mxu1 }
 0x453   : > { %v2617_v4 = vadd.f32 %v2574_v2, %v655_v60  ;;  %v2618_v30 = vadd.f32 %v2587_v3, %v684_v12  ;;  %v7319_v60 = vor.u32 %v9014_v0, %v7318_v63  ;;  %v7320_v12 = vld [vmem:[%s13768_s2 + $0x10] sm:$0xf0]  ;;  %v9013_v2 = vld [vmem:[%s13768_s2 + $0xc] sm:$0xf]  ;;  %v7328_v3 = vld [vmem:[%s13768_s2 + $0x18] sm:$0xf0] }
 0x454   : > { %v7323_v38 = vor.u32 %v9012_v33, %v7320_v12 }
 0x455   : > { %v7313_v31 = vmul.f32 -1.442695, %v2617_v4  ;;  %v7314_v29 = vmul.f32 -1.442695, %v2618_v30  ;;  %v7331_v4 = vor.u32 %v9013_v2, %v7328_v3  ;;  %2889 = vmatpush.bf16.msrb.mxu0 %v7319_v60  ;;  %v9074_v2 = vld [vmem:[%s13768_s2 + $0xec] sm:$0xf0] }
 0x456   : > { %2902 = vmatpush.bf16.msrb.mxu1 %v7323_v38  ;;  %v9072_v3 = vld [vmem:[%s13768_s2 + $0xe4] sm:$0xf] }
 0x457   : > { %9472 = vpow2.f32 %v7313_v31  ;;  %2928 = vmatpush.bf16.msrb.mxu3 %v7331_v4  ;;  %v7566_v4 = vor.u32 %v9072_v3, %v7563_v28  ;;  %v7505_v3 = vld [vmem:[%s13768_s2 + $0x68] sm:$0xf] }
 0x458   : > { %9474 = vpow2.f32 %v7314_v29 }
 0x459   : > { %v2600_v15 = vpop.f32.mrf.mxu2  ;;  %v2613_v43 = vpop.f32.mrf.mxu3 }
 0x45a   : > { %v2620_v11 = vadd.f32 %v2613_v43, %v742_v47  ;;  %v2576_v13 = vpop.f32.mrf.mxu0  ;;  %v2589_v34 = vpop.f32.mrf.mxu1  ;;  %v2619_v37 = vadd.f32 %v2600_v15, %v713_v21  ;;  %3212 = vmatpush.bf16.msra.mxu1 %v7566_v4  ;;  %v7545_v21 = vld [vmem:[%s13768_s2 + $0xc0] sm:$0xf]  ;;  %v7507_v4 = vld [vmem:[%s13768_s2 + $0x78] sm:$0xf0] }
 0x45c   : > { %v7315_v36 = vmul.f32 -1.442695, %v2620_v11 }
 0x45d   : > { %v9473_v42 = vpop.eup %9472 }
 0x45e   : > { %v9475_v44 = vpop.eup %9474  ;;  %v2624_v18 = vadd.f32 1.0, %v9473_v42  ;;  %9476 = vpow2.f32 %v7315_v36 }
 0x45f   : > { %v2643_v30 = vadd.f32 1.0, %v9475_v44  ;;  %v7569_v44 = vld [vmem:[%s13768_s2 + $0xe8] sm:$0xf] }
 0x460   : > { %9478 = vrcp.f32 %v2624_v18  ;;  %v2636_v24 = vand.u32 2147483648, %v2624_v18  ;;  %v2634_v53 = vand.u32 2147483647, %v2624_v18  ;;  %vm2630_vm14 = vweird.f32 %v2624_v18 }
 0x461   : > { %9480 = vrcp.f32 %v2643_v30  ;;  %v2602_v5 = vpop.f32.mrf.mxu2  ;;  %v2615_v32 = vpop.f32.mrf.mxu3  ;;  %v2655_v48 = vand.u32 2147483648, %v2643_v30  ;;  %v2653_v16 = vand.u32 2147483647, %v2643_v30  ;;  %vm2649_vm15 = vweird.f32 %v2643_v30 }
 0x462   : > { %v2637_v52 = vor.u32 1.1754944e-38, %v2636_v24  ;;  %vm2635_vm2 = vcmp.eq.f32.partialorder %v2634_v53, 8.507059e+37  ;;  %v9073_v5 = vld [vmem:[%s13768_s2 + $0xec] sm:$0xf]  ;;  %v7571_v32 = vld [vmem:[%s13768_s2 + $0xf8] sm:$0xf0] }
 0x463   : > { %v2656_v15 = vor.u32 1.1754944e-38, %v2655_v48  ;;  %vm2654_vm3 = vcmp.eq.f32.partialorder %v2653_v16, 8.507059e+37  ;;  %v9069_v24 = vld [vmem:[%s13768_s2 + $0xcc] sm:$0xf]  ;;  %v7555_v48 = vld [vmem:[%s13768_s2 + $0xd8] sm:$0xf0] }
 0x464   : > { %v9477_v6 = vpop.eup %9476  ;;  %v7529_v53 = vld [vmem:[%s13768_s2 + $0xa0] sm:$0xf]  ;;  %v9064_v16 = vld [vmem:[%s13768_s2 + $0xa4] sm:$0xf] }
 0x465   : > { %v2663_v31 = vadd.f32 1.0, %v9477_v6  ;;  %v7574_v6 = vor.u32 %v9073_v5, %v7571_v32  ;;  %v7481_v5 = vld [vmem:[%s13768_s2 + $0x40] sm:$0xf]  ;;  %v9054_v32 = vld [vmem:[%s13768_s2 + $0x4c] sm:$0xf0] }
 0x466   : > { %v9479_v29 = vpop.eup %9478 }
 0x467   : > { %v9481_v41 = vpop.eup %9480  ;;  %v2626_v27 = vmul.f32 %v9479_v29, %v2624_v18  ;;  %9482 = vrcp.f32 %v2663_v31  ;;  %vm2631_vm12 = vweird.f32 %v9479_v29  ;;  %v2675_v0 = vand.u32 2147483648, %v2663_v31  ;;  %v9075_v18 = vld [vmem:[%s13768_s2 + $0xf4] sm:$0xf0]  ;;  %3238 = vmatpush.bf16.msra.mxu3 %v7574_v6  ;;  %v9052_v6 = vld [vmem:[%s13768_s2 + $0x44] sm:$0xf] }
 0x468   : > { %v2645_v40 = vmul.f32 %v9481_v41, %v2643_v30  ;;  %9484 = vtanh.f32 %v2619_v37  ;;  %vm2650_vm13 = vweird.f32 %v9481_v41  ;;  %vm2632_vm0 = vmor %vm2630_vm14, %vm2631_vm12  ;;  %vm2669_vm5 = vweird.f32 %v2663_v31 }
 0x469   : > { %v2627_v46 = vsub.f32 1.0, %v2626_v27  ;;  %vm2651_vm1 = vmor %vm2649_vm15, %vm2650_vm13  ;;  %v2673_v33 = vand.u32 2147483647, %v2663_v31  ;;  %v2676_v12 = vor.u32 1.1754944e-38, %v2675_v0  ;;  %v7570_v30 = vor.u32 %v9075_v18, %v7569_v44  ;;  %v7553_v27 = vld [vmem:[%s13768_s2 + $0xc8] sm:$0xf] }
 0x46a   : > { %v2646_v22 = vsub.f32 1.0, %v2645_v40  ;;  %v9071_v40 = vld [vmem:[%s13768_s2 + $0xd4] sm:$0xf0]  ;;  %v9057_v18 = vld [vmem:[%s13768_s2 + $0x6c] sm:$0xf] }
 0x46b   : > { %v2628_v20 = vmul.f32 %v9479_v29, %v2627_v46  ;;  %vm2674_vm7 = vcmp.eq.f32.partialorder %v2673_v33, 8.507059e+37  ;;  %3225 = vmatpush.bf16.msra.mxu2 %v7570_v30  ;;  %v7510_v30 = vor.u32 %v9057_v18, %v7507_v4  ;;  %v7692_v4 = vld [vmem:[%s13770_s4 + $0xc0] sm:$0xf] }
 0x46c   : > { %v2647_v47 = vmul.f32 %v9481_v41, %v2646_v22  ;;  %v7554_v22 = vor.u32 %v9071_v40, %v7553_v27  ;;  %v9053_v40 = vld [vmem:[%s13768_s2 + $0x4c] sm:$0xf] }
 0x46d   : > { %v9483_v54 = vpop.eup %9482  ;;  %v2629_v45 = vadd.f32 %v9479_v29, %v2628_v20  ;;  %v7558_v20 = vor.u32 %v9069_v24, %v7555_v48  ;;  %v7465_v24 = vld [vmem:[%s13768_s2 + $0x20] sm:$0xf]  ;;  %v9050_v48 = vld [vmem:[%s13768_s2 + $0x2c] sm:$0xf0] }
 0x46e   : > { %v2648_v14 = vadd.f32 %v9481_v41, %v2647_v47  ;;  %v2665_v7 = vmul.f32 %v9483_v54, %v2663_v31  ;;  %v9485_v49 = vpop.eup %9484  ;;  %vm2670_vm4 = vweird.f32 %v9483_v54  ;;  %v9070_v31 = vld [vmem:[%s13768_s2 + $0xcc] sm:$0xf0] }
 0x46f   : > { %v2633_v43 = vsel %vm2632_vm0, %v9479_v29, %v2629_v45  ;;  %vm2671_vm6 = vmor %vm2669_vm5, %vm2670_vm4  ;;  %v9068_v29 = vld [vmem:[%s13768_s2 + $0xc4] sm:$0xf]  ;;  %v7546_v37 = vor.u32 %v9070_v31, %v7545_v21  ;;  %3226 = vmatpush.bf16.msra.mxu2 %v7554_v22  ;;  %v9066_v47 = vld [vmem:[%s13768_s2 + $0xac] sm:$0xf0]  ;;  %3239 = vmatpush.bf16.msra.mxu3 %v7558_v20  ;;  %v7482_v21 = vor.u32 %v9054_v32, %v7481_v5 }
 0x470   : > { %v2638_v57 = vsel %vm2635_vm2, %v2637_v52, %v2633_v43  ;;  %v2652_v58 = vsel %vm2651_vm1, %v9481_v41, %v2648_v14  ;;  %v2666_v59 = vsub.f32 1.0, %v2665_v7  ;;  %v7547_v41 = vld [vmem:[%s13768_s2 + $0xd0] sm:$0xf0]  ;;  %v7537_v52 = vld [vmem:[%s13768_s2 + $0xa8] sm:$0xf] }
 0x471   : > { %v2657_v11 = vsel %vm2654_vm3, %v2656_v15, %v2652_v58  ;;  %v2680_v13 = vmul.f32 %v9485_v49, %v2638_v57  ;;  %v7550_v46 = vor.u32 %v9068_v29, %v7547_v41  ;;  %v7531_v45 = vld [vmem:[%s13768_s2 + $0xb0] sm:$0xf0]  ;;  %v9067_v14 = vld [vmem:[%s13768_s2 + $0xb4] sm:$0xf0]  ;;  %v9065_v43 = vld [vmem:[%s13768_s2 + $0xac] sm:$0xf] }
 0x472   : > { %v2679_v34 = vmul.f32 %v2657_v11, %v11301_v56  ;;  %v2667_v62 = vmul.f32 %v9483_v54, %v2666_v59  ;;  %v7561_v56 = vld [vmem:[%s13768_s2 + $0xe0] sm:$0xf]  ;;  %v7534_v7 = vor.u32 %v9064_v16, %v7531_v45  ;;  %v7538_v15 = vor.u32 %v9067_v14, %v7537_v52  ;;  %v7539_v49 = vld [vmem:[%s13768_s2 + $0xb8] sm:$0xf0]  ;;  %v9062_v59 = vld [vmem:[%s13768_s2 + $0x8c] sm:$0xf0] }
 0x473   : > { %v7562_v42 = vor.u32 %v9074_v2, %v7561_v56  ;;  %3213 = vmatpush.bf16.msra.mxu1 %v7550_v46  ;;  %v7542_v57 = vor.u32 %v9065_v43, %v7539_v49  ;;  %v7513_v58 = vld [vmem:[%s13768_s2 + $0x80] sm:$0xf]  ;;  %v9060_v11 = vld [vmem:[%s13768_s2 + $0x84] sm:$0xf]  ;;  %v7499_v2 = vld [vmem:[%s13768_s2 + $0x70] sm:$0xf0] }
 0x474   : > { %v11505_v9 = vadd.f32 %v2680_v13, %v2679_v34  ;;  %v2668_v63 = vadd.f32 %v9483_v54, %v2667_v62  ;;  %3227 = vmatpush.bf16.msra.mxu2 %v7538_v15  ;;  %v7514_v13 = vor.u32 %v9062_v59, %v7513_v58  ;;  %v7515_v34 = vld [vmem:[%s13768_s2 + $0x90] sm:$0xf0]  ;;  %v7521_v62 = vld [vmem:[%s13768_s2 + $0x88] sm:$0xf]  ;;  %v7491_v46 = vld [vmem:[%s13768_s2 + $0x58] sm:$0xf0] }
 0x475   : > { %3199 = vmatpush.bf16.msra.mxu0 %v7562_v42  ;;  %3240 = vmatpush.bf16.msra.mxu3 %v7542_v57  ;;  %v7518_v0 = vor.u32 %v9060_v11, %v7515_v34  ;;  %v9059_v42 = vld [vmem:[%s13768_s2 + $0x74] sm:$0xf0]  ;;  %v7483_v31 = vld [vmem:[%s13768_s2 + $0x50] sm:$0xf0]  ;;  %v7489_v29 = vld [vmem:[%s13768_s2 + $0x48] sm:$0xf]  ;;  %v7494_v22 = vor.u32 %v9053_v40, %v7491_v46 }
 0x476   : > { %9486 = vtanh.f32 %v11505_v9  ;;  %v2672_v60 = vsel %vm2671_vm6, %v9483_v54, %v2668_v63  ;;  %v7530_v54 = vor.u32 %v9066_v47, %v7529_v53  ;;  %v9063_v63 = vld [vmem:[%s13768_s2 + $0x94] sm:$0xf0]  ;;  %v7506_v44 = vor.u32 %v9059_v42, %v7505_v3  ;;  %v9048_v20 = vld [vmem:[%s13768_s2 + $0x24] sm:$0xf]  ;;  %v7467_v47 = vld [vmem:[%s13768_s2 + $0x30] sm:$0xf0] }
 0x477   : > { %v2677_v23 = vsel %vm2674_vm7, %v2676_v12, %v2672_v60  ;;  %3214 = vmatpush.bf16.msra.mxu1 %v7534_v7  ;;  %v7522_v33 = vor.u32 %v9063_v63, %v7521_v62  ;;  %v9061_v60 = vld [vmem:[%s13768_s2 + $0x8c] sm:$0xf]  ;;  %v7523_v12 = vld [vmem:[%s13768_s2 + $0x98] sm:$0xf0]  ;;  %v7486_v41 = vor.u32 %v9052_v6, %v7483_v31  ;;  %v7466_v53 = vor.u32 %v9050_v48, %v7465_v24  ;;  %v7473_v16 = vld [vmem:[%s13768_s2 + $0x28] sm:$0xf] }
 0x478   : > { %v7470_v45 = vor.u32 %v9048_v20, %v7467_v47  ;;  %v9049_v14 = vld [vmem:[%s13768_s2 + $0x2c] sm:$0xf]  ;;  %v7475_v7 = vld [vmem:[%s13768_s2 + $0x38] sm:$0xf0]  ;;  %v7449_v43 = vld [vmem:[%s13768_s2] sm:$0xf] }
 0x479   : > { %3200 = vmatpush.bf16.msra.mxu0 %v7546_v37  ;;  %3228 = vmatpush.bf16.msra.mxu2 %v7522_v33  ;;  %v9055_v37 = vld [vmem:[%s13768_s2 + $0x54] sm:$0xf0]  ;;  %v7478_v15 = vor.u32 %v9049_v14, %v7475_v7  ;;  %v9046_v49 = vld [vmem:[%s13768_s2 + $0xc] sm:$0xf0]  ;;  %v9044_v57 = vld [vmem:[%s13768_s2 + $0x4] sm:$0xf] }
 0x47a   : > { %v7490_v27 = vor.u32 %v9055_v37, %v7489_v29  ;;  %v7450_v58 = vor.u32 %v9046_v49, %v7449_v43  ;;  %v7451_v59 = vld [vmem:[%s13768_s2 + $0x10] sm:$0xf0]  ;;  %v7457_v11 = vld [vmem:[%s13768_s2 + $0x8] sm:$0xf]  ;;  %v9045_v63 = vld [vmem:[%s13768_s2 + $0xc] sm:$0xf] }
 0x47b   : > { %3215 = vmatpush.bf16.msra.mxu1 %v7518_v0  ;;  %v7454_v34 = vor.u32 %v9044_v57, %v7451_v59  ;;  %v7459_v0 = vld [vmem:[%s13768_s2 + $0x18] sm:$0xf0]  ;;  %v7708_v33 = vld [vmem:[%s13770_s4 + $0xe0] sm:$0xf]  ;;  %v7716_v42 = vld [vmem:[%s13770_s4 + $0xe8] sm:$0xf] }
 0x47c   : > { %v9487_v1 = vpop.eup %9486  ;;  %v9104_v31 = vld [vmem:[%s13770_s4 + $0xc4] sm:$0xf]  ;;  %v7694_v29 = vld [vmem:[%s13770_s4 + $0xd0] sm:$0xf0]  ;;  %v7700_v37 = vld [vmem:[%s13770_s4 + $0xc8] sm:$0xf] }
 0x47d   : > { %v2683_v36 = vmul.f32 %v9487_v1, %v2677_v23  ;;  %3201 = vmatpush.bf16.msra.mxu0 %v7530_v54  ;;  %v7526_v1 = vor.u32 %v9061_v60, %v7523_v12  ;;  %v7497_v23 = vld [vmem:[%s13768_s2 + $0x60] sm:$0xf]  ;;  %3229 = vmatpush.bf16.msra.mxu2 %v7506_v44  ;;  %v9051_v54 = vld [vmem:[%s13768_s2 + $0x34] sm:$0xf0]  ;;  %v9109_v44 = vld [vmem:[%s13770_s4 + $0xec] sm:$0xf] }
 0x47e   : > { %v7474_v52 = vor.u32 %v9051_v54, %v7473_v16  ;;  %v9105_v46 = vld [vmem:[%s13770_s4 + $0xcc] sm:$0xf]  ;;  %v7676_v24 = vld [vmem:[%s13770_s4 + $0xa0] sm:$0xf]  ;;  %v9102_v20 = vld [vmem:[%s13770_s4 + $0xac] sm:$0xf0] }
 0x47f   : > { %v2684_v38 = vpack.c.bf16 %v2683_v36, %v2683_v36  ;;  %v9058_v36 = vld [vmem:[%s13768_s2 + $0x6c] sm:$0xf0]  ;;  %3241 = vmatpush.bf16.msra.mxu3 %v7526_v1  ;;  %v7462_v1 = vor.u32 %v9045_v63, %v7459_v0  ;;  %v7678_v47 = vld [vmem:[%s13770_s4 + $0xb0] sm:$0xf0]  ;;  %v9103_v14 = vld [vmem:[%s13770_s4 + $0xb4] sm:$0xf0] }
 0x480   : > { %v7498_v56 = vor.u32 %v9058_v36, %v7497_v23  ;;  %v9110_v23 = vld [vmem:[%s13770_s4 + $0xec] sm:$0xf0]  ;;  %v9108_v36 = vld [vmem:[%s13770_s4 + $0xe4] sm:$0xf]  ;;  %v9101_v7 = vld [vmem:[%s13770_s4 + $0xac] sm:$0xf] }
 0x481   : > { %2685 = vst [vmem:[#allocation5 + $0x14] sm:$0xf] %v2684_v38  ;;  %2890 = vmatmul.bf16.vlgmr.msrb.gmra.mxu0 %v2684_v38  ;;  %2903 = vmatmul.bf16.vlgmr.msrb.gmra.mxu1 %v2684_v38  ;;  %v7709_v3 = vor.u32 %v9110_v23, %v7708_v33  ;;  %v7686_v59 = vld [vmem:[%s13770_s4 + $0xb8] sm:$0xf0]  ;;  %v7668_v63 = vld [vmem:[%s13770_s4 + $0x88] sm:$0xf] }
 0x482   : > { %2916 = vmatmul.bf16.vlgmr.msrb.gmra.mxu2 %v2684_v38  ;;  %2929 = vmatmul.bf16.vlgmr.msrb.gmra.mxu3 %v2684_v38  ;;  %v9056_v38 = vld [vmem:[%s13768_s2 + $0x64] sm:$0xf]  ;;  %v9099_v33 = vld [vmem:[%s13770_s4 + $0x94] sm:$0xf0]  ;;  %v7670_v23 = vld [vmem:[%s13770_s4 + $0x98] sm:$0xf0] }
 0x483   : > { %3202 = vmatpush.bf16.msra.mxu0 %v7514_v13  ;;  %v7502_v28 = vor.u32 %v9056_v38, %v7499_v2  ;;  %3242 = vmatpush.bf16.msra.mxu3 %v7510_v30  ;;  %v9047_v13 = vld [vmem:[%s13768_s2 + $0x14] sm:$0xf0]  ;;  %v7710_v38 = vld [vmem:[%s13770_s4 + $0xf0] sm:$0xf0]  ;;  %v9106_v30 = vld [vmem:[%s13770_s4 + $0xcc] sm:$0xf0] }
 0x484   : > { %3230 = vmatpush.bf16.msra.mxu2 %v7490_v27  ;;  %v7458_v62 = vor.u32 %v9047_v13, %v7457_v11  ;;  %v7713_v18 = vor.u32 %v9108_v36, %v7710_v38  ;;  %v7697_v27 = vor.u32 %v9104_v31, %v7694_v29  ;;  %v7660_v11 = vld [vmem:[%s13770_s4 + $0x80] sm:$0xf]  ;;  %v9098_v13 = vld [vmem:[%s13770_s4 + $0x8c] sm:$0xf0] }
 0x485   : > { %3216 = vmatpush.bf16.msra.mxu1 %v7502_v28  ;;  %v9111_v28 = vld [vmem:[%s13770_s4 + $0xf4] sm:$0xf0] }
 0x487   : > { %3203 = vmatpush.bf16.msra.mxu0 %v7498_v56  ;;  %3243 = vmatpush.bf16.msra.mxu3 %v7494_v22  ;;  %v7702_v22 = vld [vmem:[%s13770_s4 + $0xd8] sm:$0xf0] }
 0x488   : > { %3231 = vmatpush.bf16.msra.mxu2 %v7474_v52  ;;  %v7705_v48 = vor.u32 %v9105_v46, %v7702_v22  ;;  %v7684_v52 = vld [vmem:[%s13770_s4 + $0xa8] sm:$0xf] }
 0x489   : > { %3217 = vmatpush.bf16.msra.mxu1 %v7486_v41  ;;  %v9107_v41 = vld [vmem:[%s13770_s4 + $0xd4] sm:$0xf0] }
 0x48a   : > { %v7701_v40 = vor.u32 %v9107_v41, %v7700_v37  ;;  %v9093_v41 = vld [vmem:[%s13770_s4 + $0x6c] sm:$0xf] }
 0x48b   : > { %3204 = vmatpush.bf16.msra.mxu0 %v7482_v21  ;;  %3244 = vmatpush.bf16.msra.mxu3 %v7478_v15  ;;  %v7693_v21 = vor.u32 %v9106_v30, %v7692_v4  ;;  %v9092_v4 = vld [vmem:[%s13770_s4 + $0x64] sm:$0xf]  ;;  %v7646_v30 = vld [vmem:[%s13770_s4 + $0x70] sm:$0xf0] }
 0x48c   : > { %3232 = vmatpush.bf16.msra.mxu2 %v7458_v62  ;;  %v7662_v62 = vld [vmem:[%s13770_s4 + $0x90] sm:$0xf0] }
 0x48d   : > { %3218 = vmatpush.bf16.msra.mxu1 %v7470_v45  ;;  %v7677_v45 = vor.u32 %v9102_v20, %v7676_v24  ;;  %v9088_v24 = vld [vmem:[%s13770_s4 + $0x44] sm:$0xf] }
 0x48f   : > { %3205 = vmatpush.bf16.msra.mxu0 %v7466_v53  ;;  %3245 = vmatpush.bf16.msra.mxu3 %v7462_v1  ;;  %v9100_v53 = vld [vmem:[%s13770_s4 + $0xa4] sm:$0xf]  ;;  %v7661_v1 = vor.u32 %v9098_v13, %v7660_v11 }
 0x490   : > { %v7681_v57 = vor.u32 %v9100_v53, %v7678_v47  ;;  %v7630_v53 = vld [vmem:[%s13770_s4 + $0x50] sm:$0xf0]  ;;  %v7636_v47 = vld [vmem:[%s13770_s4 + $0x48] sm:$0xf] }
 0x491   : > { %3219 = vmatpush.bf16.msra.mxu1 %v7454_v34  ;;  %v9096_v34 = vld [vmem:[%s13770_s4 + $0x84] sm:$0xf] }
 0x493   : > { %3206 = vmatpush.bf16.msra.mxu0 %v7450_v58  ;;  %v7685_v58 = vor.u32 %v9103_v14, %v7684_v52  ;;  %v9089_v52 = vld [vmem:[%s13770_s4 + $0x4c] sm:$0xf]  ;;  %v7638_v14 = vld [vmem:[%s13770_s4 + $0x58] sm:$0xf0] }
 0x494   : > { %v7641_v13 = vor.u32 %v9089_v52, %v7638_v14 }
 0x495   : > { %3583 = vmatpush.bf16.msrb.mxu1 %v7713_v18 }
 0x497   : > { %3554 = vmatpush.bf16.msrb.mxu0 %v7709_v3 }
 0x499   : > { %3584 = vmatpush.bf16.msrb.mxu1 %v7697_v27  ;;  %v7654_v27 = vld [vmem:[%s13770_s4 + $0x78] sm:$0xf0] }
 0x49a   : > { %v7657_v22 = vor.u32 %v9093_v41, %v7654_v27  ;;  %v9081_v41 = vld [vmem:[%s13770_s4 + $0xc] sm:$0xf]  ;;  %v7606_v27 = vld [vmem:[%s13770_s4 + $0x18] sm:$0xf0] }
 0x49b   : > { %3555 = vmatpush.bf16.msrb.mxu0 %v7693_v21  ;;  %v9095_v21 = vld [vmem:[%s13770_s4 + $0x74] sm:$0xf0] }
 0x49d   : > { %3585 = vmatpush.bf16.msrb.mxu1 %v7681_v57  ;;  %v9086_v57 = vld [vmem:[%s13770_s4 + $0x2c] sm:$0xf0] }
 0x49f   : > { %3556 = vmatpush.bf16.msrb.mxu0 %v7677_v45 }
 0x4a3   : > { %3557 = vmatpush.bf16.msrb.mxu0 %v7661_v1 }
 0x4fe   : > { %v2891_v60 = vpop.f32.mrf.mxu0  ;;  %v2904_v12 = vpop.f32.mrf.mxu1 }
 0x4ff   : > { %v2934_v56 = vadd.f32 %v2891_v60, %v10292_v55  ;;  %v2935_v2 = vadd.f32 %v2904_v12, %v10301_v61  ;;  %v7717_v55 = vor.u32 %v9111_v28, %v7716_v42  ;;  %v7718_v61 = vld [vmem:[%s13770_s4 + $0xf8] sm:$0xf0]  ;;  %v9097_v60 = vld [vmem:[%s13770_s4 + $0x8c] sm:$0xf]  ;;  %v7644_v28 = vld [vmem:[%s13770_s4 + $0x60] sm:$0xf] }
 0x500   : > { %v7721_v6 = vor.u32 %v9109_v44, %v7718_v61  ;;  %v7673_v42 = vor.u32 %v9097_v60, %v7670_v23  ;;  %v7620_v60 = vld [vmem:[%s13770_s4 + $0x28] sm:$0xf]  ;;  %v9087_v23 = vld [vmem:[%s13770_s4 + $0x34] sm:$0xf0] }
 0x501   : > { %v7444_v5 = vmul.f32 -1.442695, %v2934_v56  ;;  %v7445_v32 = vmul.f32 -1.442695, %v2935_v2  ;;  %3612 = vmatpush.bf16.msrb.mxu2 %v7717_v55  ;;  %v7665_v56 = vor.u32 %v9096_v34, %v7662_v62  ;;  %v7669_v2 = vor.u32 %v9099_v33, %v7668_v63  ;;  %v9094_v55 = vld [vmem:[%s13770_s4 + $0x6c] sm:$0xf0] }
 0x502   : > { %3641 = vmatpush.bf16.msrb.mxu3 %v7721_v6  ;;  %v7645_v61 = vor.u32 %v9094_v55, %v7644_v28  ;;  %v7652_v6 = vld [vmem:[%s13770_s4 + $0x68] sm:$0xf]  ;;  %v7614_v34 = vld [vmem:[%s13770_s4 + $0x30] sm:$0xf0]  ;;  %v9080_v55 = vld [vmem:[%s13770_s4 + $0x4] sm:$0xf] }
 0x503   : > { %9488 = vpow2.f32 %v7444_v5  ;;  %3586 = vmatpush.bf16.msrb.mxu1 %v7665_v56  ;;  %v7653_v37 = vor.u32 %v9095_v21, %v7652_v6  ;;  %v7622_v56 = vld [vmem:[%s13770_s4 + $0x38] sm:$0xf0]  ;;  %v9083_v6 = vld [vmem:[%s13770_s4 + $0x14] sm:$0xf0] }
 0x504   : > { %9490 = vpow2.f32 %v7445_v32  ;;  %v7649_v32 = vor.u32 %v9092_v4, %v7646_v30  ;;  %3558 = vmatpush.bf16.msrb.mxu0 %v7645_v61 }
 0x505   : > { %v2917_v16 = vpop.f32.mrf.mxu2  ;;  %v2930_v54 = vpop.f32.mrf.mxu3  ;;  %3613 = vmatpush.bf16.msrb.mxu2 %v7701_v40  ;;  %v7628_v40 = vld [vmem:[%s13770_s4 + $0x40] sm:$0xf] }
 0x506   : > { %v2937_v15 = vadd.f32 %v2930_v54, %v10351_v50  ;;  %v2893_v43 = vpop.f32.mrf.mxu0  ;;  %v2906_v49 = vpop.f32.mrf.mxu1  ;;  %3642 = vmatpush.bf16.msrb.mxu3 %v7705_v48  ;;  %v7689_v50 = vor.u32 %v9101_v7, %v7686_v59  ;;  %v2936_v29 = vadd.f32 %v2917_v16, %v10337_v35  ;;  %v9090_v35 = vld [vmem:[%s13770_s4 + $0x4c] sm:$0xf0]  ;;  %v9091_v16 = vld [vmem:[%s13770_s4 + $0x54] sm:$0xf0]  ;;  %v7612_v7 = vld [vmem:[%s13770_s4 + $0x20] sm:$0xf]  ;;  %v7633_v59 = vor.u32 %v9088_v24, %v7630_v53 }
 0x507   : > { %3587 = vmatpush.bf16.msrb.mxu1 %v7649_v32  ;;  %v7629_v20 = vor.u32 %v9090_v35, %v7628_v40  ;;  %v7637_v11 = vor.u32 %v9091_v16, %v7636_v47  ;;  %v7613_v33 = vor.u32 %v9086_v57, %v7612_v7  ;;  %v7604_v32 = vld [vmem:[%s13770_s4 + $0x8] sm:$0xf]  ;;  %v7609_v47 = vor.u32 %v9081_v41, %v7606_v27 }
 0x508   : > { %v7446_v0 = vmul.f32 -1.442695, %v2937_v15  ;;  %v7605_v35 = vor.u32 %v9083_v6, %v7604_v32  ;;  %v9138_v32 = vld [vmem:[%s13771_s5 + $0xcc] sm:$0xf0]  ;;  %v9136_v6 = vld [vmem:[%s13771_s5 + $0xc4] sm:$0xf] }
 0x509   : > { %v9489_v12 = vpop.eup %9488  ;;  %3614 = vmatpush.bf16.msrb.mxu2 %v7685_v58  ;;  %3559 = vmatpush.bf16.msrb.mxu0 %v7629_v20 }
 0x50a   : > { %v9491_v36 = vpop.eup %9490  ;;  %v11799_v38 = vadd.f32 1.0, %v9489_v12  ;;  %9492 = vpow2.f32 %v7446_v0  ;;  %3643 = vmatpush.bf16.msrb.mxu3 %v7689_v50  ;;  %v9084_v50 = vld [vmem:[%s13770_s4 + $0x24] sm:$0xf] }
 0x50b   : > { %v11801_v3 = vadd.f32 1.0, %v9491_v36  ;;  %3588 = vmatpush.bf16.msrb.mxu1 %v7633_v59  ;;  %v7617_v1 = vor.u32 %v9084_v50, %v7614_v34  ;;  %v9085_v36 = vld [vmem:[%s13770_s4 + $0x2c] sm:$0xf]  ;;  %v9076_v59 = vld [vmem:[#allocation5] sm:$0xff]  ;;  %v689_v50 = vadd.f32 %v10353_v51, %v10225_v19  ;;  %v9142_v19 = vld [vmem:[%s13771_s5 + $0xec] sm:$0xf0] }
 0x50c   : > { %9494 = vrcp.f32 %v11799_v38  ;;  %v2951_v5 = vand.u32 2147483647, %v11799_v38  ;;  %v2953_v49 = vand.u32 2147483648, %v11799_v38  ;;  %v7625_v28 = vor.u32 %v9085_v36, %v7622_v56 }
 0x50d   : > { %9496 = vrcp.f32 %v11801_v3  ;;  %v2919_v44 = vpop.f32.mrf.mxu2  ;;  %v2932_v18 = vpop.f32.mrf.mxu3  ;;  %3615 = vmatpush.bf16.msrb.mxu2 %v7669_v2  ;;  %v2972_v43 = vand.u32 2147483648, %v11801_v3  ;;  %v2970_v0 = vand.u32 2147483647, %v11801_v3  ;;  %vm2966_vm11 = vweird.f32 %v11801_v3  ;;  %3560 = vmatpush.bf16.msrb.mxu0 %v7613_v33 }
 0x50e   : > { %3644 = vmatpush.bf16.msrb.mxu3 %v7673_v42  ;;  %vm11880_vm8 = vcmp.eq.f32.partialorder %v2951_v5, 8.507059e+37  ;;  %v7621_v42 = vor.u32 %v9087_v23, %v7620_v60  ;;  %v7596_v44 = vld [vmem:[%s13770_s4] sm:$0xf]  ;;  %v9082_v18 = vld [vmem:[%s13770_s4 + $0xc] sm:$0xf0]  ;;  %vm2947_vm12 = vweird.f32 %v11799_v38 }
 0x50f   : > { %v7597_v30 = vor.u32 %v9082_v18, %v7596_v44  ;;  %v7598_v5 = vld [vmem:[%s13770_s4 + $0x10] sm:$0xf0]  ;;  %vm2971_vm15 = vcmp.eq.f32.partialorder %v2970_v0, 8.507059e+37  ;;  %3589 = vmatpush.bf16.msrb.mxu1 %v7617_v1  ;;  %v7844_v18 = vld [vmem:[%s13771_s5 + $0xe8] sm:$0xf] }
 0x510   : > { %v9493_v31 = vpop.eup %9492 }
 0x511   : > { %v11834_v46 = vadd.f32 1.0, %v9493_v31  ;;  %3616 = vmatpush.bf16.msrb.mxu2 %v7653_v37  ;;  %v2973_v31 = vor.u32 1.1754944e-38, %v2972_v43  ;;  %3561 = vmatpush.bf16.msrb.mxu0 %v7597_v30 }
 0x512   : > { %v11842_v48 = vpop.eup %9494  ;;  %3645 = vmatpush.bf16.msrb.mxu3 %v7657_v22  ;;  %v7601_v22 = vor.u32 %v9080_v55, %v7598_v5  ;;  %v9143_v55 = vld [vmem:[%s13771_s5 + $0xf4] sm:$0xf0]  ;;  %v7820_v5 = vld [vmem:[%s13771_s5 + $0xc0] sm:$0xf] }
 0x513   : > { %v11853_v54 = vpop.eup %9496  ;;  %v2943_v45 = vmul.f32 %v11842_v48, %v11799_v38  ;;  %9498 = vrcp.f32 %v11834_v46  ;;  %vm2948_vm9 = vweird.f32 %v11842_v48  ;;  %v2954_v38 = vor.u32 1.1754944e-38, %v2953_v49 }
 0x514   : > { %v2962_v15 = vmul.f32 %v11853_v54, %v11801_v3  ;;  %9500 = vtanh.f32 %v2936_v29  ;;  %vm2967_vm10 = vweird.f32 %v11853_v54  ;;  %vm2949_vm13 = vmor %vm2947_vm12, %vm2948_vm9  ;;  %3590 = vmatpush.bf16.msrb.mxu1 %v7601_v22  ;;  %vm2986_vm1 = vweird.f32 %v11834_v46  ;;  %v7828_v22 = vld [vmem:[%s13771_s5 + $0xc8] sm:$0xf] }
 0x515   : > { %v2944_v58 = vsub.f32 1.0, %v2943_v45  ;;  %3617 = vmatpush.bf16.msrb.mxu2 %v7637_v11  ;;  %vm2968_vm14 = vmor %vm2966_vm11, %vm2967_vm10  ;;  %v2990_v7 = vand.u32 2147483647, %v11834_v46  ;;  %v9077_v11 = vld [vmem:[#allocation5 + $0x8] sm:$0xff] }
 0x516   : > { %v2963_v62 = vsub.f32 1.0, %v2962_v15  ;;  %3646 = vmatpush.bf16.msrb.mxu3 %v7641_v13  ;;  %v660_v13 = vadd.f32 %v10339_v39, %v10221_v17  ;;  %v7836_v17 = vld [vmem:[%s13771_s5 + $0xe0] sm:$0xf]  ;;  %v9140_v39 = vld [vmem:[%s13771_s5 + $0xe4] sm:$0xf] }
 0x517   : > { %v2945_v12 = vmul.f32 %v11842_v48, %v2944_v58  ;;  %vm2991_vm3 = vcmp.eq.f32.partialorder %v2990_v7, 8.507059e+37  ;;  %v7806_v7 = vld [vmem:[%s13771_s5 + $0xb0] sm:$0xf0] }
 0x518   : > { %v2964_v2 = vmul.f32 %v11853_v54, %v2963_v62 }
 0x519   : > { %v9499_v61 = vpop.eup %9498  ;;  %v2946_v4 = vadd.f32 %v11842_v48, %v2945_v12  ;;  %3618 = vmatpush.bf16.msrb.mxu2 %v7621_v42  ;;  %v747_v12 = vadd.f32 %v10400_v10, %v10237_v26  ;;  %v7838_v26 = vld [vmem:[%s13771_s5 + $0xf0] sm:$0xf0]  ;;  %v9141_v10 = vld [vmem:[%s13771_s5 + $0xec] sm:$0xf]  ;;  %v7846_v42 = vld [vmem:[%s13771_s5 + $0xf8] sm:$0xf0] }
 0x51a   : > { %v9501_v21 = vpop.eup %9500  ;;  %v2965_v29 = vadd.f32 %v11853_v54, %v2964_v2  ;;  %v2982_v37 = vmul.f32 %v9499_v61, %v11834_v46  ;;  %3647 = vmatpush.bf16.msrb.mxu3 %v7625_v28  ;;  %vm2987_vm0 = vweird.f32 %v9499_v61  ;;  %v7837_v2 = vor.u32 %v9142_v19, %v7836_v17  ;;  %v7772_v17 = vld [vmem:[%s13771_s5 + $0x60] sm:$0xf]  ;;  %v9126_v19 = vld [vmem:[%s13771_s5 + $0x6c] sm:$0xf0] }
 0x51b   : > { %v2950_v40 = vsel %vm2949_vm13, %v11842_v48, %v2946_v4  ;;  %vm2988_vm2 = vmor %vm2986_vm1, %vm2987_vm0  ;;  %v7841_v28 = vor.u32 %v9140_v39, %v7838_v26  ;;  %v7849_v44 = vor.u32 %v9141_v10, %v7846_v42  ;;  %v7845_v4 = vor.u32 %v9143_v55, %v7844_v18  ;;  %v7774_v42 = vld [vmem:[%s13771_s5 + $0x70] sm:$0xf0] }
 0x51c   : > { %v2955_v24 = vsel %vm11880_vm8, %v2954_v38, %v2950_v40  ;;  %v2969_v20 = vsel %vm2968_vm14, %v11853_v54, %v2965_v29  ;;  %v2983_v53 = vsub.f32 1.0, %v2982_v37  ;;  %v2992_v54 = vand.u32 2147483648, %v11834_v46  ;;  %v9078_v46 = vld [vmem:[#allocation5 + $0x10] sm:$0xff]  ;;  %v9137_v37 = vld [vmem:[%s13771_s5 + $0xcc] sm:$0xf] }
 0x51d   : > { %v2974_v16 = vsel %vm2971_vm15, %v2973_v31, %v2969_v20  ;;  %v2997_v45 = vmul.f32 %v9501_v21, %v2955_v24  ;;  %3619 = vmatpush.bf16.msrb.mxu2 %v7605_v35  ;;  %v7821_v38 = vor.u32 %v9138_v32, %v7820_v5  ;;  %v7822_v29 = vld [vmem:[%s13771_s5 + $0xd0] sm:$0xf0]  ;;  %v7830_v40 = vld [vmem:[%s13771_s5 + $0xd8] sm:$0xf0]  ;;  %v9139_v35 = vld [vmem:[%s13771_s5 + $0xd4] sm:$0xf0] }
 0x51e   : > { %v2996_v3 = vmul.f32 %v2974_v16, %v11505_v9  ;;  %v2984_v52 = vmul.f32 %v9499_v61, %v2983_v53  ;;  %3648 = vmatpush.bf16.msrb.mxu3 %v7609_v47  ;;  %v2993_v43 = vor.u32 1.1754944e-38, %v2992_v54  ;;  %v7825_v27 = vor.u32 %v9136_v6, %v7822_v29  ;;  %v7804_v53 = vld [vmem:[%s13771_s5 + $0xa0] sm:$0xf]  ;;  %v7796_v32 = vld [vmem:[%s13771_s5 + $0x88] sm:$0xf] }
 0x51f   : > { %v718_v47 = vadd.f32 %v10387_v8, %v10235_v25  ;;  %v9133_v25 = vld [vmem:[%s13771_s5 + $0xac] sm:$0xf]  ;;  %v9131_v6 = vld [vmem:[%s13771_s5 + $0x94] sm:$0xf0] }
 0x520   : > { %v11941_v48 = vadd.f32 %v2997_v45, %v2996_v3  ;;  %v2985_v14 = vadd.f32 %v9499_v61, %v2984_v52  ;;  %v7833_v45 = vor.u32 %v9137_v37, %v7830_v40  ;;  %v9134_v3 = vld [vmem:[%s13771_s5 + $0xac] sm:$0xf0]  ;;  %v9132_v52 = vld [vmem:[%s13771_s5 + $0xa4] sm:$0xf]  ;;  %v7797_v37 = vor.u32 %v9131_v6, %v7796_v32 }
 0x521   : > { %v9120_v40 = vld [vmem:[%s13771_s5 + $0x44] sm:$0xf] }
 0x522   : > { %9502 = vtanh.f32 %v11941_v48  ;;  %v2989_v15 = vsel %vm2988_vm2, %v9499_v61, %v2985_v14  ;;  %v7829_v14 = vor.u32 %v9139_v35, %v7828_v22  ;;  %v7758_v22 = vld [vmem:[%s13771_s5 + $0x50] sm:$0xf0] }
 0x523   : > { %v2994_v49 = vsel %vm2991_vm3, %v2993_v43, %v2989_v15  ;;  %v7805_v43 = vor.u32 %v9134_v3, %v7804_v53  ;;  %v7766_v53 = vld [vmem:[%s13771_s5 + $0x58] sm:$0xf0] }
 0x528   : > { %v9503_v9 = vpop.eup %9502 }
 0x529   : > { %v3000_v57 = vmul.f32 %v9503_v9, %v2994_v49  ;;  %v7809_v9 = vor.u32 %v9132_v52, %v7806_v7  ;;  %v7814_v49 = vld [vmem:[%s13771_s5 + $0xb8] sm:$0xf0]  ;;  %v7740_v7 = vld [vmem:[%s13771_s5 + $0x20] sm:$0xf] }
 0x52b   : > { %v3001_v58 = vpack.c.bf16 %v3000_v57, %v3000_v57  ;;  %v7788_v57 = vld [vmem:[%s13771_s5 + $0x80] sm:$0xf] }
 0x52d   : > { %3002 = vst [vmem:[#allocation5 + $0x18] sm:$0xf] %v3001_v58  ;;  %3207 = vmatmul.bf16.vlgmr.msra.gmra.mxu0 %v3001_v58  ;;  %3220 = vmatmul.bf16.vlgmr.msra.gmra.mxu1 %v3001_v58 }
 0x52e   : > { %3233 = vmatmul.bf16.vlgmr.msra.gmra.mxu2 %v3001_v58  ;;  %3246 = vmatmul.bf16.vlgmr.msra.gmra.mxu3 %v3001_v58  ;;  %v9130_v58 = vld [vmem:[%s13771_s5 + $0x8c] sm:$0xf0] }
 0x52f   : > { %3903 = vmatpush.bf16.msra.mxu0 %v7837_v2  ;;  %3916 = vmatpush.bf16.msra.mxu1 %v7841_v28  ;;  %v9125_v28 = vld [vmem:[%s13771_s5 + $0x6c] sm:$0xf]  ;;  %v9119_v2 = vld [vmem:[%s13771_s5 + $0x34] sm:$0xf0] }
 0x530   : > { %3942 = vmatpush.bf16.msra.mxu3 %v7849_v44  ;;  %3929 = vmatpush.bf16.msra.mxu2 %v7845_v4  ;;  %v7773_v4 = vor.u32 %v9126_v19, %v7772_v17  ;;  %v7724_v17 = vld [vmem:[%s13771_s5] sm:$0xf]  ;;  %v9114_v19 = vld [vmem:[%s13771_s5 + $0xc] sm:$0xf0] }
 0x533   : > { %3904 = vmatpush.bf16.msra.mxu0 %v7821_v38  ;;  %3917 = vmatpush.bf16.msra.mxu1 %v7825_v27  ;;  %v9122_v27 = vld [vmem:[%s13771_s5 + $0x4c] sm:$0xf0] }
 0x534   : > { %3943 = vmatpush.bf16.msra.mxu3 %v7833_v45  ;;  %3930 = vmatpush.bf16.msra.mxu2 %v7829_v14 }
 0x537   : > { %3905 = vmatpush.bf16.msra.mxu0 %v7805_v43  ;;  %3918 = vmatpush.bf16.msra.mxu1 %v7809_v9  ;;  %v9118_v43 = vld [vmem:[%s13771_s5 + $0x2c] sm:$0xf0]  ;;  %v9116_v9 = vld [vmem:[%s13771_s5 + $0x24] sm:$0xf] }
 0x53d   : > { %3562 = vmatmul.bf16.vlgmr.msrb.gmra.mxu0 %v9076_v59  ;;  %3591 = vmatmul.bf16.vlgmr.msrb.gmra.mxu1 %v9076_v59 }
 0x53e   : > { %3620 = vmatmul.bf16.vlgmr.msrb.gmra.mxu2 %v9076_v59  ;;  %3649 = vmatmul.bf16.vlgmr.msrb.gmra.mxu3 %v9076_v59 }
 0x54d   : > { %3567 = vmatmul.bf16.gmra.mxu0 %v9077_v11  ;;  %3596 = vmatmul.bf16.gmra.mxu1 %v9077_v11 }
 0x54e   : > { %3625 = vmatmul.bf16.gmra.mxu2 %v9077_v11  ;;  %3654 = vmatmul.bf16.gmra.mxu3 %v9077_v11 }
 0x55d   : > { %3572 = vmatmul.bf16.gmra.mxu0 %v9078_v46  ;;  %3601 = vmatmul.bf16.gmra.mxu1 %v9078_v46 }
 0x55e   : > { %3630 = vmatmul.bf16.gmra.mxu2 %v9078_v46  ;;  %3659 = vmatmul.bf16.gmra.mxu3 %v9078_v46  ;;  %v7817_v46 = vor.u32 %v9133_v25, %v7814_v49  ;;  %v7742_v49 = vld [vmem:[%s13771_s5 + $0x30] sm:$0xf0] }
 0x560   : > { %3944 = vmatpush.bf16.msra.mxu3 %v7817_v46 }
 0x5aa   : > { %v3208_v34 = vpop.f32.mrf.mxu0  ;;  %v3221_v62 = vpop.f32.mrf.mxu1 }
 0x5ab   : > { %v3251_v63 = vadd.f32 %v3208_v34, %v660_v13  ;;  %v3252_v0 = vadd.f32 %v3221_v62, %v689_v50  ;;  %v9128_v13 = vld [vmem:[%s13771_s5 + $0x84] sm:$0xf]  ;;  %v7790_v50 = vld [vmem:[%s13771_s5 + $0x90] sm:$0xf0]  ;;  %v7789_v62 = vor.u32 %v9130_v58, %v7788_v57 }
 0x5ad   : > { %v7575_v33 = vmul.f32 -1.442695, %v3251_v63  ;;  %v7576_v60 = vmul.f32 -1.442695, %v3252_v0  ;;  %v7793_v63 = vor.u32 %v9128_v13, %v7790_v50  ;;  %v9129_v0 = vld [vmem:[%s13771_s5 + $0x8c] sm:$0xf]  ;;  %3906 = vmatpush.bf16.msra.mxu0 %v7789_v62 }
 0x5ae   : > { %v7764_v13 = vld [vmem:[%s13771_s5 + $0x48] sm:$0xf]  ;;  %v9123_v50 = vld [vmem:[%s13771_s5 + $0x54] sm:$0xf0] }
 0x5af   : > { %9504 = vpow2.f32 %v7575_v33  ;;  %v7798_v33 = vld [vmem:[%s13771_s5 + $0x98] sm:$0xf0]  ;;  %3919 = vmatpush.bf16.msra.mxu1 %v7793_v63  ;;  %v9117_v63 = vld [vmem:[%s13771_s5 + $0x2c] sm:$0xf] }
 0x5b0   : > { %9506 = vpow2.f32 %v7576_v60  ;;  %v7812_v60 = vld [vmem:[%s13771_s5 + $0xa8] sm:$0xf]  ;;  %v7801_v26 = vor.u32 %v9129_v0, %v7798_v33  ;;  %v7750_v0 = vld [vmem:[%s13771_s5 + $0x38] sm:$0xf0] }
 0x5b1   : > { %v3234_v1 = vpop.f32.mrf.mxu2  ;;  %v3247_v23 = vpop.f32.mrf.mxu3  ;;  %3907 = vmatpush.bf16.msra.mxu0 %v7773_v4  ;;  %v7732_v4 = vld [vmem:[%s13771_s5 + $0x8] sm:$0xf] }
 0x5b2   : > { %v3254_v51 = vadd.f32 %v3247_v23, %v747_v12  ;;  %v3210_v36 = vpop.f32.mrf.mxu0  ;;  %v3223_v56 = vpop.f32.mrf.mxu1  ;;  %v3253_v15 = vadd.f32 %v3234_v1, %v718_v47  ;;  %v9135_v23 = vld [vmem:[%s13771_s5 + $0xb4] sm:$0xf0]  ;;  %3945 = vmatpush.bf16.msra.mxu3 %v7801_v26  ;;  %v7780_v47 = vld [vmem:[%s13771_s5 + $0x68] sm:$0xf] }
 0x5b3   : > { %v9124_v36 = vld [vmem:[%s13771_s5 + $0x64] sm:$0xf]  ;;  %v7813_v10 = vor.u32 %v9135_v23, %v7812_v60  ;;  %v7765_v23 = vor.u32 %v9123_v50, %v7764_v13 }
 0x5b4   : > { %v7577_v61 = vmul.f32 -1.442695, %v3254_v51  ;;  %v7777_v38 = vor.u32 %v9124_v36, %v7774_v42  ;;  %v9112_v36 = vld [vmem:[%s13771_s5 + $0x4] sm:$0xf]  ;;  %v7734_v42 = vld [vmem:[%s13771_s5 + $0x18] sm:$0xf0] }
 0x5b5   : > { %v9505_v30 = vpop.eup %9504  ;;  %3931 = vmatpush.bf16.msra.mxu2 %v7813_v10  ;;  %v9113_v10 = vld [vmem:[%s13771_s5 + $0xc] sm:$0xf]  ;;  %v9172_v13 = vld [vmem:[%s13771_s5 + $0xe4] sm:$0xf] }
 0x5b6   : > { %v9507_v21 = vpop.eup %9506  ;;  %v11986_v31 = vadd.f32 1.0, %v9505_v30  ;;  %9508 = vpow2.f32 %v7577_v61  ;;  %v7782_v30 = vld [vmem:[%s13771_s5 + $0x78] sm:$0xf0]  ;;  %3920 = vmatpush.bf16.msra.mxu1 %v7777_v38 }
 0x5b7   : > { %v11994_v41 = vadd.f32 1.0, %v9507_v21  ;;  %v7756_v21 = vld [vmem:[%s13771_s5 + $0x40] sm:$0xf]  ;;  %v7785_v29 = vor.u32 %v9125_v28, %v7782_v30  ;;  %v9115_v30 = vld [vmem:[%s13771_s5 + $0x14] sm:$0xf0] }
 0x5b8   : > { %9510 = vrcp.f32 %v11986_v31  ;;  %v3268_v16 = vand.u32 2147483647, %v11986_v31  ;;  %v3270_v54 = vand.u32 2147483648, %v11986_v31  ;;  %vm3264_vm5 = vweird.f32 %v11986_v31 }
 0x5b9   : > { %9512 = vrcp.f32 %v11994_v41  ;;  %v3236_v24 = vpop.f32.mrf.mxu2  ;;  %v3249_v20 = vpop.f32.mrf.mxu3  ;;  %v3289_v59 = vand.u32 2147483648, %v11994_v41  ;;  %v3287_v51 = vand.u32 2147483647, %v11994_v41  ;;  %vm3283_vm9 = vweird.f32 %v11994_v41  ;;  %3932 = vmatpush.bf16.msra.mxu2 %v7797_v37  ;;  %3946 = vmatpush.bf16.msra.mxu3 %v7785_v29 }
 0x5ba   : > { %vm12077_vm6 = vcmp.eq.f32.partialorder %v3268_v16, 8.507059e+37  ;;  %v3271_v61 = vor.u32 1.1754944e-38, %v3270_v54  ;;  %v9121_v20 = vld [vmem:[%s13771_s5 + $0x4c] sm:$0xf]  ;;  %v7757_v14 = vor.u32 %v9122_v27, %v7756_v21  ;;  %v9127_v54 = vld [vmem:[%s13771_s5 + $0x74] sm:$0xf0] }
 0x5bb   : > { %v3290_v18 = vor.u32 1.1754944e-38, %v3289_v59  ;;  %vm12137_vm11 = vcmp.eq.f32.partialorder %v3287_v51, 8.507059e+37  ;;  %v7769_v46 = vor.u32 %v9121_v20, %v7766_v53  ;;  %v7753_v51 = vor.u32 %v9117_v63, %v7750_v0  ;;  %v3703_v27 = vld [vmem:[#allocation2 + $0x8] sm:$0xff]  ;;  %v7969_v63 = vld [vmem:[%s13771_s5 + $0xf0] sm:$0xf0] }
 0x5bc   : > { %v9509_v8 = vpop.eup %9508  ;;  %3908 = vmatpush.bf16.msra.mxu0 %v7757_v14  ;;  %v7975_v0 = vld [vmem:[%s13771_s5 + $0xe8] sm:$0xf] }
 0x5bd   : > { %v12036_v11 = vadd.f32 1.0, %v9509_v8  ;;  %v7761_v8 = vor.u32 %v9120_v40, %v7758_v22  ;;  %3947 = vmatpush.bf16.msra.mxu3 %v7769_v46  ;;  %v3710_v40 = vpack.c.bf16 %v3703_v27, %v3703_v27  ;;  %v12218_v22 = vpop.f32.mrf.mxu0  ;;  %v9174_v46 = vld [vmem:[%s13771_s5 + $0xec] sm:$0xf0] }
 0x5be   : > { %v12044_v34 = vpop.eup %9510 }
 0x5bf   : > { %v12055_v12 = vpop.eup %9512  ;;  %v3260_v1 = vmul.f32 %v12044_v34, %v11986_v31  ;;  %vm3265_vm4 = vweird.f32 %v12044_v34  ;;  %9514 = vrcp.f32 %v12036_v11  ;;  %3921 = vmatpush.bf16.msra.mxu1 %v7761_v8  ;;  %v3309_v28 = vand.u32 2147483648, %v12036_v11 }
 0x5c0   : > { %v3279_v39 = vmul.f32 %v12055_v12, %v11994_v41  ;;  %9516 = vtanh.f32 %v3253_v15  ;;  %vm12089_vm7 = vmor %vm3264_vm5, %vm3265_vm4  ;;  %vm3284_vm8 = vweird.f32 %v12055_v12  ;;  %v7781_v15 = vor.u32 %v9127_v54, %v7780_v47 }
 0x5c1   : > { %v3261_v56 = vsub.f32 1.0, %v3260_v1  ;;  %vm12132_vm10 = vmor %vm3283_vm9, %vm3284_vm8  ;;  %v7745_v1 = vor.u32 %v9116_v9, %v7742_v49  ;;  %vm3303_vm13 = vweird.f32 %v12036_v11  ;;  %3948 = vmatpush.bf16.msra.mxu3 %v7753_v51  ;;  %v3310_v6 = vor.u32 1.1754944e-38, %v3309_v28  ;;  %v12224_v20 = vpop.f32.mrf.mxu3  ;;  %v9170_v51 = vld [vmem:[%s13771_s5 + $0xcc] sm:$0xf0] }
 0x5c2   : > { %v3280_v44 = vsub.f32 1.0, %v3279_v39  ;;  %3933 = vmatpush.bf16.msra.mxu2 %v7781_v15 }
 0x5c3   : > { %v3262_v5 = vmul.f32 %v12044_v34, %v3261_v56  ;;  %v7726_v56 = vld [vmem:[%s13771_s5 + $0x10] sm:$0xf0]  ;;  %3922 = vmatpush.bf16.msra.mxu1 %v7745_v1  ;;  %v7972_v1 = vor.u32 %v9172_v13, %v7969_v63 }
 0x5c4   : > { %v3281_v31 = vmul.f32 %v12055_v12, %v3280_v44  ;;  %v7725_v44 = vor.u32 %v9114_v19, %v7724_v17  ;;  %v7729_v55 = vor.u32 %v9112_v36, %v7726_v56  ;;  %v9173_v17 = vld [vmem:[%s13771_s5 + $0xec] sm:$0xf]  ;;  %v7977_v19 = vld [vmem:[%s13771_s5 + $0xf8] sm:$0xf0]  ;;  %v9168_v36 = vld [vmem:[%s13771_s5 + $0xc4] sm:$0xf] }
 0x5c5   : > { %v12117_v35 = vpop.eup %9514  ;;  %v3263_v24 = vadd.f32 %v12044_v34, %v3262_v5  ;;  %v7737_v5 = vor.u32 %v9113_v10, %v7734_v42  ;;  %v12226_v53 = vpop.f32.mrf.mxu0  ;;  %v9171_v10 = vld [vmem:[%s13771_s5 + $0xd4] sm:$0xf0] }
 0x5c6   : > { %v9517_v16 = vpop.eup %9516  ;;  %v3282_v41 = vadd.f32 %v12055_v12, %v3281_v31  ;;  %v3299_v52 = vmul.f32 %v12117_v35, %v12036_v11  ;;  %vm3304_vm12 = vweird.f32 %v12117_v35  ;;  %3934 = vmatpush.bf16.msra.mxu2 %v7765_v23 }
 0x5c7   : > { %v3267_v25 = vsel %vm12089_vm7, %v12044_v34, %v3263_v24  ;;  %vm3305_vm14 = vmor %vm3303_vm13, %vm3304_vm12  ;;  %3923 = vmatpush.bf16.msra.mxu1 %v7729_v55  ;;  %3949 = vmatpush.bf16.msra.mxu3 %v7737_v5  ;;  %v12222_v24 = vpop.f32.mrf.mxu2  ;;  %v12321_v55 = vld [vmem:[%s13772_s6] sm:$0xf]  ;;  %v9164_v5 = vld [vmem:[%s13771_s5 + $0xa4] sm:$0xf] }
 0x5c8   : > { %v3272_v57 = vsel %vm12077_vm6, %v3271_v61, %v3267_v25  ;;  %v3286_v58 = vsel %vm12132_vm10, %v12055_v12, %v3282_v41  ;;  %v3300_v59 = vsub.f32 1.0, %v3299_v52  ;;  %v7741_v12 = vor.u32 %v9118_v43, %v7740_v7 }
 0x5c9   : > { %v3291_v34 = vsel %vm12137_vm11, %v3290_v18, %v3286_v58  ;;  %v3314_v62 = vmul.f32 %v9517_v16, %v3272_v57  ;;  %v3307_v18 = vand.u32 2147483647, %v12036_v11  ;;  %v7733_v11 = vor.u32 %v9115_v30, %v7732_v4  ;;  %v12232_v45 = vpop.f32.mrf.mxu3  ;;  %v7935_v4 = vld [vmem:[%s13771_s5 + $0xa0] sm:$0xf]  ;;  %v9166_v30 = vld [vmem:[%s13771_s5 + $0xac] sm:$0xf0] }
 0x5ca   : > { %v3313_v33 = vmul.f32 %v3291_v34, %v11941_v48  ;;  %v3301_v60 = vmul.f32 %v12117_v35, %v3300_v59  ;;  %v7748_v48 = vld [vmem:[%s13771_s5 + $0x28] sm:$0xf]  ;;  %3909 = vmatpush.bf16.msra.mxu0 %v7741_v12  ;;  %v7967_v59 = vld [vmem:[%s13771_s5 + $0xe0] sm:$0xf]  ;;  %v12359_v63 = vperm.slane %v12321_v55, 1 }
 0x5cb   : > { %v7749_v61 = vor.u32 %v9119_v2, %v7748_v48  ;;  %vm3308_vm15 = vcmp.eq.f32.partialorder %v3307_v18, 8.507059e+37  ;;  %v7980_v48 = vor.u32 %v9173_v17, %v7977_v19  ;;  %4233 = vmatpush.bf16.msrb.mxu1 %v7972_v1  ;;  %v7953_v2 = vld [vmem:[%s13771_s5 + $0xd0] sm:$0xf0]  ;;  %v7961_v18 = vld [vmem:[%s13771_s5 + $0xd8] sm:$0xf0] }
 0x5cc   : > { %v3315_v39 = vadd.f32 %v3314_v62, %v3313_v33  ;;  %v3302_v26 = vadd.f32 %v12117_v35, %v3301_v60  ;;  %v7968_v62 = vor.u32 %v9174_v46, %v7967_v59  ;;  %v9175_v33 = vld [vmem:[%s13771_s5 + $0xf4] sm:$0xf0]  ;;  %v7956_v42 = vor.u32 %v9168_v36, %v7953_v2  ;;  %v9165_v59 = vld [vmem:[%s13771_s5 + $0xac] sm:$0xf]  ;;  %v7945_v46 = vld [vmem:[%s13771_s5 + $0xb8] sm:$0xf0] }
 0x5cd   : > { %3935 = vmatpush.bf16.msra.mxu2 %v7749_v61  ;;  %v12234_v41 = vpop.f32.mrf.mxu0  ;;  %v7976_v23 = vor.u32 %v9175_v33, %v7975_v0  ;;  %4259 = vmatpush.bf16.msrb.mxu3 %v7980_v48  ;;  %v7948_v13 = vor.u32 %v9165_v59, %v7945_v46  ;;  %v7919_v0 = vld [vmem:[%s13771_s5 + $0x80] sm:$0xf]  ;;  %v9162_v33 = vld [vmem:[%s13771_s5 + $0x8c] sm:$0xf0]  ;;  %v7921_v17 = vld [vmem:[%s13771_s5 + $0x90] sm:$0xf0] }
 0x5ce   : > { %9518 = vtanh.f32 %v3315_v39  ;;  %6251 = vst [vmem:[#allocation3 + $0x8] sm:$0xff] %v3315_v39  ;;  %v3306_v32 = vsel %vm3305_vm14, %v12117_v35, %v3302_v26  ;;  %3910 = vmatpush.bf16.msra.mxu0 %v7725_v44  ;;  %v12220_v35 = vpop.f32.mrf.mxu1  ;;  %v7951_v39 = vld [vmem:[%s13771_s5 + $0xc0] sm:$0xf]  ;;  %v7959_v26 = vld [vmem:[%s13771_s5 + $0xc8] sm:$0xf]  ;;  %v7920_v1 = vor.u32 %v9162_v33, %v7919_v0 }
 0x5cf   : > { %v3311_v31 = vsel %vm3308_vm15, %v3310_v6, %v3306_v32  ;;  %v12230_v16 = vpop.f32.mrf.mxu2  ;;  %v7952_v56 = vor.u32 %v9170_v51, %v7951_v39  ;;  %v7960_v28 = vor.u32 %v9171_v10, %v7959_v26  ;;  %v9169_v44 = vld [vmem:[%s13771_s5 + $0xcc] sm:$0xf]  ;;  %4234 = vmatpush.bf16.msrb.mxu1 %v7956_v42  ;;  %v7927_v19 = vld [vmem:[%s13771_s5 + $0x88] sm:$0xf]  ;;  %v9163_v39 = vld [vmem:[%s13771_s5 + $0x94] sm:$0xf0] }
 0x5d0   : > { %v7964_v61 = vor.u32 %v9169_v44, %v7961_v18  ;;  %v9161_v51 = vld [vmem:[%s13771_s5 + $0x8c] sm:$0xf]  ;;  %v7929_v36 = vld [vmem:[%s13771_s5 + $0x98] sm:$0xf0]  ;;  %v7903_v26 = vld [vmem:[%s13771_s5 + $0x60] sm:$0xf]  ;;  %v3593_v44 = vadd.f32 %v12220_v35, %v12359_v63 }
 0x5d1   : > { %3936 = vmatpush.bf16.msra.mxu2 %v7733_v11  ;;  %v12240_v14 = vpop.f32.mrf.mxu3  ;;  %v7936_v11 = vor.u32 %v9166_v30, %v7935_v4  ;;  %v7932_v2 = vor.u32 %v9161_v51, %v7929_v36  ;;  %v9158_v10 = vld [vmem:[%s13771_s5 + $0x6c] sm:$0xf0]  ;;  %v9156_v42 = vld [vmem:[%s13771_s5 + $0x64] sm:$0xf]  ;;  %v7905_v30 = vld [vmem:[%s13771_s5 + $0x70] sm:$0xf0] }
 0x5d2   : > { %4220 = vmatpush.bf16.msrb.mxu0 %v7968_v62  ;;  %4260 = vmatpush.bf16.msrb.mxu3 %v7964_v61  ;;  %v12356_v62 = vperm.slane %v12321_v55, 0  ;;  %v7904_v4 = vor.u32 %v9158_v10, %v7903_v26  ;;  %v7887_v0 = vld [vmem:[%s13771_s5 + $0x40] sm:$0xf]  ;;  %v9154_v33 = vld [vmem:[%s13771_s5 + $0x4c] sm:$0xf0] }
 0x5d3   : > { %v7895_v51 = vld [vmem:[%s13771_s5 + $0x48] sm:$0xf]  ;;  %v9155_v36 = vld [vmem:[%s13771_s5 + $0x54] sm:$0xf0]  ;;  %v7897_v26 = vld [vmem:[%s13771_s5 + $0x58] sm:$0xf0] }
 0x5d4   : > { %v9519_v21 = vpop.eup %9518  ;;  %v7871_v10 = vld [vmem:[%s13771_s5 + $0x20] sm:$0xf] }
 0x5d5   : > { %v3317_v38 = vmul.f32 %v9519_v21, %v3311_v31  ;;  %v12242_v54 = vpop.f32.mrf.mxu0  ;;  %4246 = vmatpush.bf16.msrb.mxu2 %v7976_v23  ;;  %v7937_v21 = vld [vmem:[%s13771_s5 + $0xb0] sm:$0xf0]  ;;  %v7943_v31 = vld [vmem:[%s13771_s5 + $0xa8] sm:$0xf]  ;;  %v9160_v23 = vld [vmem:[%s13771_s5 + $0x84] sm:$0xf] }
 0x5d6   : > { %v12228_v47 = vpop.f32.mrf.mxu1  ;;  %4221 = vmatpush.bf16.msrb.mxu0 %v7952_v56  ;;  %v7940_v27 = vor.u32 %v9164_v5, %v7937_v21  ;;  %4261 = vmatpush.bf16.msrb.mxu3 %v7948_v13  ;;  %v7924_v48 = vor.u32 %v9160_v23, %v7921_v17  ;;  %v7928_v56 = vor.u32 %v9163_v39, %v7927_v19  ;;  %v7911_v5 = vld [vmem:[%s13771_s5 + $0x68] sm:$0xf] }
 0x5d7   : > { %v3318_v29 = vpack.c.bf16 %v3317_v38, %v3317_v38  ;;  %6250 = vst [vmem:[#allocation2] sm:$0xff] %v3317_v38  ;;  %v12238_v52 = vpop.f32.mrf.mxu2  ;;  %v9167_v38 = vld [vmem:[%s13771_s5 + $0xb4] sm:$0xf0]  ;;  %v7908_v21 = vor.u32 %v9156_v42, %v7905_v30  ;;  %v7888_v19 = vor.u32 %v9154_v33, %v7887_v0  ;;  %v9150_v42 = vld [vmem:[%s13771_s5 + $0x2c] sm:$0xf0] }
 0x5d8   : > { %4235 = vmatpush.bf16.msrb.mxu1 %v7940_v27  ;;  %v7913_v27 = vld [vmem:[%s13771_s5 + $0x78] sm:$0xf0]  ;;  %v9148_v30 = vld [vmem:[%s13771_s5 + $0x24] sm:$0xf]  ;;  %v7855_v33 = vld [vmem:[%s13771_s5] sm:$0xf] }
 0x5d9   : > { %3319 = vst [vmem:[#allocation5 + $0x1c] sm:$0xf] %v3318_v29  ;;  %v12248_v8 = vpop.f32.mrf.mxu3  ;;  %4247 = vmatpush.bf16.msrb.mxu2 %v7960_v28  ;;  %v3564_v28 = vadd.f32 %v12218_v22, %v12356_v62  ;;  %v9159_v22 = vld [vmem:[%s13771_s5 + $0x74] sm:$0xf0] }
 0x5da   : > { %4222 = vmatpush.bf16.msrb.mxu0 %v7936_v11  ;;  %4262 = vmatpush.bf16.msrb.mxu3 %v7932_v2  ;;  %v7896_v2 = vor.u32 %v9155_v36, %v7895_v51 }
 0x5dc   : > { %4236 = vmatpush.bf16.msrb.mxu1 %v7924_v48  ;;  %v7889_v48 = vld [vmem:[%s13771_s5 + $0x50] sm:$0xf0] }
 0x5dd   : > { %v12250_v15 = vpop.f32.mrf.mxu0 }
 0x5de   : > { %v12236_v3 = vpop.f32.mrf.mxu1  ;;  %4223 = vmatpush.bf16.msrb.mxu0 %v7920_v1  ;;  %v9152_v1 = vld [vmem:[%s13771_s5 + $0x44] sm:$0xf] }
 0x5df   : > { %v12246_v25 = vpop.f32.mrf.mxu2  ;;  %v7892_v39 = vor.u32 %v9152_v1, %v7889_v48  ;;  %v9146_v1 = vld [vmem:[%s13771_s5 + $0xc] sm:$0xf0]  ;;  %v7863_v48 = vld [vmem:[%s13771_s5 + $0x8] sm:$0xf] }
 0x5e0   : > { %v9079_v37 = vld [vmem:[#allocation5 + $0x18] sm:$0xff]  ;;  %4237 = vmatpush.bf16.msrb.mxu1 %v7908_v21 }
 0x5e1   : > { %3577 = vmatmul.bf16.gmra.mxu0 %v9079_v37  ;;  %3606 = vmatmul.bf16.gmra.mxu1 %v9079_v37  ;;  %v12256_v49 = vpop.f32.mrf.mxu3  ;;  %v9151_v21 = vld [vmem:[%s13771_s5 + $0x34] sm:$0xf0] }
 0x5e2   : > { %3635 = vmatmul.bf16.gmra.mxu2 %v9079_v37  ;;  %3664 = vmatmul.bf16.gmra.mxu3 %v9079_v37 }
 0x5e3   : > { %4224 = vmatpush.bf16.msrb.mxu0 %v7904_v4  ;;  %v7872_v4 = vor.u32 %v9150_v42, %v7871_v10 }
 0x5e4   : > { %4238 = vmatpush.bf16.msrb.mxu1 %v7892_v39  ;;  %v9147_v39 = vld [vmem:[%s13771_s5 + $0x14] sm:$0xf0] }
 0x5e5   : > { %v12258_v57 = vpop.f32.mrf.mxu0  ;;  %v7864_v10 = vor.u32 %v9147_v39, %v7863_v48 }
 0x5e6   : > { %v12244_v7 = vpop.f32.mrf.mxu1 }
 0x5e7   : > { %v12254_v9 = vpop.f32.mrf.mxu2  ;;  %4225 = vmatpush.bf16.msrb.mxu0 %v7888_v19  ;;  %v7857_v19 = vld [vmem:[%s13771_s5 + $0x10] sm:$0xf0] }
 0x5e9   : > { %v12273_v34 = vpop.f32.mrf.mxu3 }
 0x5eb   : > { %4226 = vmatpush.bf16.msrb.mxu0 %v7872_v4 }
 0x5ee   : > { %v12252_v43 = vpop.f32.mrf.mxu1 }
 0x5ef   : > { %v12271_v50 = vpop.f32.mrf.mxu2 }
 0x5f1   : > { %3911 = vmatmul.bf16.vlgmr.msra.gmra.mxu0 %v3710_v40  ;;  %3924 = vmatmul.bf16.vlgmr.msra.gmra.mxu1 %v3710_v40 }
 0x5f2   : > { %3937 = vmatmul.bf16.vlgmr.msra.gmra.mxu2 %v3710_v40  ;;  %3950 = vmatmul.bf16.vlgmr.msra.gmra.mxu3 %v3710_v40  ;;  %v7944_v40 = vor.u32 %v9167_v38, %v7943_v31  ;;  %v7912_v31 = vor.u32 %v9159_v22, %v7911_v5  ;;  %v9157_v38 = vld [vmem:[%s13771_s5 + $0x6c] sm:$0xf]  ;;  %v7873_v5 = vld [vmem:[%s13771_s5 + $0x30] sm:$0xf0]  ;;  %v7879_v22 = vld [vmem:[%s13771_s5 + $0x28] sm:$0xf] }
 0x5f3   : > { %v7916_v13 = vor.u32 %v9157_v38, %v7913_v27  ;;  %v7881_v38 = vld [vmem:[%s13771_s5 + $0x38] sm:$0xf0] }
 0x5f4   : > { %4248 = vmatpush.bf16.msrb.mxu2 %v7944_v40  ;;  %v12418_v40 = vperm.slane %v12321_v55, 3 }
 0x5f5   : > { %4263 = vmatpush.bf16.msrb.mxu3 %v7916_v13  ;;  %v7880_v13 = vor.u32 %v9151_v21, %v7879_v22 }
 0x5f6   : > { %v12260_v58 = vpop.f32.mrf.mxu1 }
 0x5f8   : > { %4249 = vmatpush.bf16.msrb.mxu2 %v7928_v56  ;;  %v9153_v56 = vld [vmem:[%s13771_s5 + $0x4c] sm:$0xf] }
 0x5fc   : > { %4250 = vmatpush.bf16.msrb.mxu2 %v7912_v31  ;;  %v9149_v31 = vld [vmem:[%s13771_s5 + $0x2c] sm:$0xf] }
 0x5fd   : > { %v7884_v0 = vor.u32 %v9149_v31, %v7881_v38 }
 0x600   : > { %4251 = vmatpush.bf16.msrb.mxu2 %v7896_v2  ;;  %v7865_v2 = vld [vmem:[%s13771_s5 + $0x18] sm:$0xf0] }
 0x604   : > { %4252 = vmatpush.bf16.msrb.mxu2 %v7880_v13 }
 0x608   : > { %4253 = vmatpush.bf16.msrb.mxu2 %v7864_v10 }
 0x65e   : > { %v12284_v60 = vpop.f32.mrf.mxu0  ;;  %v12286_v12 = vpop.f32.mrf.mxu1 }
 0x665   : > { %v12332_v32 = vpop.f32.mrf.mxu2  ;;  %v12334_v6 = vpop.f32.mrf.mxu3 }
 0x666   : > { %v12345_v29 = vpop.f32.mrf.mxu0  ;;  %v12347_v37 = vpop.f32.mrf.mxu1 }
 0x66d   : > { %v12398_v18 = vpop.f32.mrf.mxu2  ;;  %v12400_v61 = vpop.f32.mrf.mxu3 }
 0x66e   : > { %v3912_v35 = vpop.f32.mrf.mxu0  ;;  %v3925_v11 = vpop.f32.mrf.mxu1 }
 0x66f   : > { %v3955_v59 = vadd.f32 %v3912_v35, %v3564_v28  ;;  %v3956_v46 = vadd.f32 %v3925_v11, %v3593_v44  ;;  %v3651_v28 = vadd.f32 %v12224_v20, %v12418_v40  ;;  %v7900_v44 = vor.u32 %v9153_v56, %v7897_v26  ;;  %v9145_v56 = vld [vmem:[%s13771_s5 + $0xc] sm:$0xf] }
 0x670   : > { %v7876_v20 = vor.u32 %v9148_v30, %v7873_v5  ;;  %v12495_v30 = vperm.slane %v12321_v55, 2 }
 0x671   : > { %v7850_v23 = vmul.f32 -1.442695, %v3955_v59  ;;  %v7851_v17 = vmul.f32 -1.442695, %v3956_v46  ;;  %4264 = vmatpush.bf16.msrb.mxu3 %v7900_v44  ;;  %v7868_v44 = vor.u32 %v9145_v56, %v7865_v2  ;;  %v3705_v56 = vld [vmem:[#allocation3] sm:$0xff] }
 0x672   : > { %4239 = vmatpush.bf16.msrb.mxu1 %v7876_v20  ;;  %v3622_v20 = vadd.f32 %v12222_v24, %v12495_v30 }
 0x673   : > { %9520 = vpow2.f32 %v7850_v23  ;;  %v9144_v23 = vld [vmem:[%s13771_s5 + $0x4] sm:$0xf] }
 0x674   : > { %9522 = vpow2.f32 %v7851_v17  ;;  %v7856_v17 = vor.u32 %v9146_v1, %v7855_v33  ;;  %v7860_v36 = vor.u32 %v9144_v23, %v7857_v19 }
 0x675   : > { %v3938_v35 = vpop.f32.mrf.mxu2  ;;  %v3951_v11 = vpop.f32.mrf.mxu3  ;;  %4265 = vmatpush.bf16.msrb.mxu3 %v7884_v0 }
 0x676   : > { %v3958_v27 = vadd.f32 %v3951_v11, %v3651_v28  ;;  %v3914_v59 = vpop.f32.mrf.mxu0  ;;  %v3927_v46 = vpop.f32.mrf.mxu1  ;;  %4227 = vmatpush.bf16.msrb.mxu0 %v7856_v17  ;;  %4240 = vmatpush.bf16.msrb.mxu1 %v7860_v36  ;;  %v3957_v38 = vadd.f32 %v3938_v35, %v3622_v20 }
 0x678   : > { %v7852_v51 = vmul.f32 -1.442695, %v3958_v27 }
 0x679   : > { %v9521_v26 = vpop.eup %9520  ;;  %4266 = vmatpush.bf16.msrb.mxu3 %v7868_v44 }
 0x67a   : > { %v9523_v42 = vpop.eup %9522  ;;  %v3962_v28 = vadd.f32 1.0, %v9521_v26  ;;  %9524 = vpow2.f32 %v7852_v51 }
 0x67b   : > { %v3981_v4 = vadd.f32 1.0, %v9523_v42 }
 0x67c   : > { %9526 = vrcp.f32 %v3962_v28  ;;  %v3974_v0 = vand.u32 2147483648, %v3962_v28  ;;  %v3972_v23 = vand.u32 2147483647, %v3962_v28  ;;  %vm3968_vm2 = vweird.f32 %v3962_v28 }
 0x67d   : > { %9528 = vrcp.f32 %v3981_v4  ;;  %v3953_v5 = vpop.f32.mrf.mxu3  ;;  %v3940_v22 = vpop.f32.mrf.mxu2  ;;  %v3993_v33 = vand.u32 2147483648, %v3981_v4  ;;  %v3991_v19 = vand.u32 2147483647, %v3981_v4  ;;  %vm3987_vm3 = vweird.f32 %v3981_v4 }
 0x67e   : > { %v3975_v35 = vor.u32 1.1754944e-38, %v3974_v0  ;;  %vm3973_vm6 = vcmp.eq.f32.partialorder %v3972_v23, 8.507059e+37 }
 0x67f   : > { %v3994_v36 = vor.u32 1.1754944e-38, %v3993_v33  ;;  %vm3992_vm7 = vcmp.eq.f32.partialorder %v3991_v19, 8.507059e+37  ;;  %v8099_v33 = vld [vmem:[%s13771_s5 + $0xe0] sm:$0xf]  ;;  %v8107_v19 = vld [vmem:[%s13771_s5 + $0xe8] sm:$0xf] }
 0x680   : > { %v9525_v11 = vpop.eup %9524 }
 0x681   : > { %v4001_v21 = vadd.f32 1.0, %v9525_v11 }
 0x682   : > { %v9527_v31 = vpop.eup %9526 }
 0x683   : > { %v9529_v27 = vpop.eup %9528  ;;  %v3964_v59 = vmul.f32 %v9527_v31, %v3962_v28  ;;  %9530 = vrcp.f32 %v4001_v21  ;;  %vm3969_vm0 = vweird.f32 %v9527_v31  ;;  %vm4007_vm9 = vweird.f32 %v4001_v21 }
 0x684   : > { %v3983_v46 = vmul.f32 %v9529_v27, %v3981_v4  ;;  %9532 = vtanh.f32 %v3957_v38  ;;  %vm3988_vm1 = vweird.f32 %v9529_v27  ;;  %vm3970_vm4 = vmor %vm3968_vm2, %vm3969_vm0  ;;  %v4013_v38 = vand.u32 2147483648, %v4001_v21 }
 0x685   : > { %v3965_v55 = vsub.f32 1.0, %v3964_v59  ;;  %vm3989_vm5 = vmor %vm3987_vm3, %vm3988_vm1 }
 0x686   : > { %v3984_v13 = vsub.f32 1.0, %v3983_v46  ;;  %v4014_v46 = vor.u32 1.1754944e-38, %v4013_v38 }
 0x687   : > { %v3966_v1 = vmul.f32 %v9527_v31, %v3965_v55 }
 0x688   : > { %v3985_v17 = vmul.f32 %v9529_v27, %v3984_v13 }
 0x689   : > { %v9531_v48 = vpop.eup %9530  ;;  %v3967_v24 = vadd.f32 %v9527_v31, %v3966_v1  ;;  %v9204_v1 = vld [vmem:[%s13771_s5 + $0xe4] sm:$0xf] }
 0x68a   : > { %v3986_v39 = vadd.f32 %v9529_v27, %v3985_v17  ;;  %v4003_v51 = vmul.f32 %v9531_v48, %v4001_v21  ;;  %v9533_v26 = vpop.eup %9532  ;;  %vm4008_vm8 = vweird.f32 %v9531_v48  ;;  %v8101_v17 = vld [vmem:[%s13771_s5 + $0xf0] sm:$0xf0] }
 0x68b   : > { %v3971_v2 = vsel %vm3970_vm4, %v9527_v31, %v3967_v24  ;;  %v4011_v31 = vand.u32 2147483647, %v4001_v21  ;;  %vm4009_vm10 = vmor %vm4007_vm9, %vm4008_vm8  ;;  %v9206_v21 = vld [vmem:[%s13771_s5 + $0xec] sm:$0xf0]  ;;  %v8104_v24 = vor.u32 %v9204_v1, %v8101_v17  ;;  %v9197_v1 = vld [vmem:[%s13771_s5 + $0xac] sm:$0xf] }
 0x68c   : > { %v3976_v10 = vsel %vm3973_vm6, %v3975_v35, %v3971_v2  ;;  %v3990_v42 = vsel %vm3989_vm5, %v9529_v27, %v3986_v39  ;;  %v4004_v44 = vsub.f32 1.0, %v4003_v51  ;;  %v8100_v23 = vor.u32 %v9206_v21, %v8099_v33  ;;  %v9205_v39 = vld [vmem:[%s13771_s5 + $0xec] sm:$0xf]  ;;  %v8109_v51 = vld [vmem:[%s13771_s5 + $0xf8] sm:$0xf0] }
 0x68d   : > { %v3995_v5 = vsel %vm3992_vm7, %v3994_v36, %v3990_v42  ;;  %v4018_v22 = vmul.f32 %v9533_v26, %v3976_v10  ;;  %vm4012_vm11 = vcmp.eq.f32.partialorder %v4011_v31, 8.507059e+37  ;;  %v8112_v36 = vor.u32 %v9205_v39, %v8109_v51  ;;  %4551 = vmatpush.bf16.msra.mxu1 %v8104_v24  ;;  %v9202_v2 = vld [vmem:[%s13771_s5 + $0xcc] sm:$0xf0]  ;;  %v9200_v26 = vld [vmem:[%s13771_s5 + $0xc4] sm:$0xf] }
 0x68e   : > { %v4017_v11 = vmul.f32 %v3995_v5, %v3705_v56  ;;  %v4005_v20 = vmul.f32 %v9531_v48, %v4004_v44  ;;  %4538 = vmatpush.bf16.msra.mxu0 %v8100_v23  ;;  %v8083_v56 = vld [vmem:[%s13771_s5 + $0xc0] sm:$0xf]  ;;  %v8085_v42 = vld [vmem:[%s13771_s5 + $0xd0] sm:$0xf0]  ;;  %v8091_v44 = vld [vmem:[%s13771_s5 + $0xc8] sm:$0xf] }
 0x68f   : > { %4577 = vmatpush.bf16.msra.mxu3 %v8112_v36  ;;  %v8084_v10 = vor.u32 %v9202_v2, %v8083_v56  ;;  %v9203_v5 = vld [vmem:[%s13771_s5 + $0xd4] sm:$0xf0]  ;;  %v8067_v31 = vld [vmem:[%s13771_s5 + $0xa0] sm:$0xf]  ;;  %v8077_v23 = vld [vmem:[%s13771_s5 + $0xb8] sm:$0xf0] }
 0x690   : > { %v12499_v28 = vadd.f32 %v4018_v22, %v4017_v11  ;;  %v4006_v4 = vadd.f32 %v9531_v48, %v4005_v20  ;;  %v8088_v22 = vor.u32 %v9200_v26, %v8085_v42  ;;  %v8092_v11 = vor.u32 %v9203_v5, %v8091_v44  ;;  %v9201_v20 = vld [vmem:[%s13771_s5 + $0xcc] sm:$0xf]  ;;  %v9192_v24 = vld [vmem:[%s13771_s5 + $0x84] sm:$0xf]  ;;  %v8053_v39 = vld [vmem:[%s13771_s5 + $0x90] sm:$0xf0] }
 0x691   : > { %v8080_v17 = vor.u32 %v9197_v1, %v8077_v23  ;;  %v8059_v51 = vld [vmem:[%s13771_s5 + $0x88] sm:$0xf]  ;;  %v9195_v36 = vld [vmem:[%s13771_s5 + $0x94] sm:$0xf0]  ;;  %v8056_v56 = vor.u32 %v9192_v24, %v8053_v39  ;;  %v9193_v26 = vld [vmem:[%s13771_s5 + $0x8c] sm:$0xf] }
 0x692   : > { %9534 = vtanh.f32 %v12499_v28  ;;  %v4010_v59 = vsel %vm4009_vm10, %v9531_v48, %v4006_v4  ;;  %v9207_v48 = vld [vmem:[%s13771_s5 + $0xf4] sm:$0xf0]  ;;  %v8093_v4 = vld [vmem:[%s13771_s5 + $0xd8] sm:$0xf0]  ;;  %4539 = vmatpush.bf16.msra.mxu0 %v8084_v10  ;;  %4552 = vmatpush.bf16.msra.mxu1 %v8088_v22  ;;  %v8060_v2 = vor.u32 %v9195_v36, %v8059_v51  ;;  %v8035_v44 = vld [vmem:[%s13771_s5 + $0x60] sm:$0xf] }
 0x693   : > { %v4015_v55 = vsel %vm4012_vm11, %v4014_v46, %v4010_v59  ;;  %v8108_v35 = vor.u32 %v9207_v48, %v8107_v19  ;;  %v8096_v38 = vor.u32 %v9201_v20, %v8093_v4  ;;  %v9198_v59 = vld [vmem:[%s13771_s5 + $0xac] sm:$0xf0]  ;;  %v9196_v46 = vld [vmem:[%s13771_s5 + $0xa4] sm:$0xf]  ;;  %v8051_v19 = vld [vmem:[%s13771_s5 + $0x80] sm:$0xf]  ;;  %v3595_v20 = vadd.f32 %v12228_v47, %v12359_v63 }
 0x694   : > { %v9194_v48 = vld [vmem:[%s13771_s5 + $0x8c] sm:$0xf0]  ;;  %v8061_v10 = vld [vmem:[%s13771_s5 + $0x98] sm:$0xf0]  ;;  %v9188_v22 = vld [vmem:[%s13771_s5 + $0x64] sm:$0xf] }
 0x695   : > { %4564 = vmatpush.bf16.msra.mxu2 %v8108_v35  ;;  %4578 = vmatpush.bf16.msra.mxu3 %v8096_v38  ;;  %v8052_v35 = vor.u32 %v9194_v48, %v8051_v19  ;;  %v8064_v42 = vor.u32 %v9193_v26, %v8061_v10  ;;  %v9190_v5 = vld [vmem:[%s13771_s5 + $0x6c] sm:$0xf0]  ;;  %v8037_v38 = vld [vmem:[%s13771_s5 + $0x70] sm:$0xf0]  ;;  %v9189_v47 = vld [vmem:[%s13771_s5 + $0x6c] sm:$0xf] }
 0x696   : > { %v8036_v4 = vor.u32 %v9190_v5, %v8035_v44  ;;  %v8019_v1 = vld [vmem:[%s13771_s5 + $0x40] sm:$0xf]  ;;  %v9186_v23 = vld [vmem:[%s13771_s5 + $0x4c] sm:$0xf0]  ;;  %v8027_v51 = vld [vmem:[%s13771_s5 + $0x48] sm:$0xf]  ;;  %v3653_v44 = vadd.f32 %v12232_v45, %v12418_v40 }
 0x697   : > { %v8020_v24 = vor.u32 %v9186_v23, %v8019_v1  ;;  %v9187_v36 = vld [vmem:[%s13771_s5 + $0x54] sm:$0xf0]  ;;  %v8029_v26 = vld [vmem:[%s13771_s5 + $0x58] sm:$0xf0]  ;;  %v8003_v10 = vld [vmem:[%s13771_s5 + $0x20] sm:$0xf] }
 0x698   : > { %v9535_v27 = vpop.eup %9534  ;;  %v9176_v1 = vld [vmem:[%s13771_s5 + $0x4] sm:$0xf] }
 0x699   : > { %v4021_v13 = vmul.f32 %v9535_v27, %v4015_v55  ;;  %4565 = vmatpush.bf16.msra.mxu2 %v8092_v11  ;;  %v8068_v27 = vor.u32 %v9198_v59, %v8067_v31  ;;  %v8069_v55 = vld [vmem:[%s13771_s5 + $0xb0] sm:$0xf0]  ;;  %4579 = vmatpush.bf16.msra.mxu3 %v8080_v17  ;;  %v3566_v11 = vadd.f32 %v12226_v53, %v12356_v62  ;;  %v8043_v31 = vld [vmem:[%s13771_s5 + $0x68] sm:$0xf]  ;;  %v9191_v59 = vld [vmem:[%s13771_s5 + $0x74] sm:$0xf0] }
 0x69a   : > { %v8072_v33 = vor.u32 %v9196_v46, %v8069_v55  ;;  %v8040_v53 = vor.u32 %v9188_v22, %v8037_v38  ;;  %v8044_v55 = vor.u32 %v9191_v59, %v8043_v31  ;;  %v9184_v17 = vld [vmem:[%s13771_s5 + $0x44] sm:$0xf]  ;;  %v9183_v59 = vld [vmem:[%s13771_s5 + $0x34] sm:$0xf0] }
 0x69b   : > { %v4022_v0 = vpack.c.bf16 %v4021_v13, %v4021_v13  ;;  %v8075_v13 = vld [vmem:[%s13771_s5 + $0xa8] sm:$0xf]  ;;  %4540 = vmatpush.bf16.msra.mxu0 %v8068_v27 }
 0x69c   : > { %4553 = vmatpush.bf16.msra.mxu1 %v8072_v33 }
 0x69d   : > { %4023 = vst [vmem:[%s9803_s26] sm:$0xf] %v4022_v0  ;;  %4228 = vmatmul.bf16.vlgmr.msrb.gmra.mxu0 %v4022_v0  ;;  %4241 = vmatmul.bf16.vlgmr.msrb.gmra.mxu1 %v4022_v0 }
 0x69e   : > { %4254 = vmatmul.bf16.vlgmr.msrb.gmra.mxu2 %v4022_v0  ;;  %4267 = vmatmul.bf16.vlgmr.msrb.gmra.mxu3 %v4022_v0  ;;  %v9199_v0 = vld [vmem:[%s13771_s5 + $0xb4] sm:$0xf0] }
 0x69f   : > { %v8076_v21 = vor.u32 %v9199_v0, %v8075_v13  ;;  %4541 = vmatpush.bf16.msra.mxu0 %v8052_v35  ;;  %4580 = vmatpush.bf16.msra.mxu3 %v8064_v42  ;;  %v8045_v13 = vld [vmem:[%s13771_s5 + $0x78] sm:$0xf0]  ;;  %v8021_v35 = vld [vmem:[%s13771_s5 + $0x50] sm:$0xf0]  ;;  %v9182_v42 = vld [vmem:[%s13771_s5 + $0x2c] sm:$0xf0] }
 0x6a0   : > { %4554 = vmatpush.bf16.msra.mxu1 %v8056_v56  ;;  %v8024_v39 = vor.u32 %v9184_v17, %v8021_v35  ;;  %v9185_v56 = vld [vmem:[%s13771_s5 + $0x4c] sm:$0xf]  ;;  %v8004_v22 = vor.u32 %v9182_v42, %v8003_v10  ;;  %v7989_v17 = vld [vmem:[%s13771_s5 + $0x10] sm:$0xf0] }
 0x6a1   : > { %4566 = vmatpush.bf16.msra.mxu2 %v8076_v21  ;;  %v8048_v21 = vor.u32 %v9189_v47, %v8045_v13  ;;  %v8032_v5 = vor.u32 %v9185_v56, %v8029_v26  ;;  %v7992_v35 = vor.u32 %v9176_v1, %v7989_v17 }
 0x6a3   : > { %4542 = vmatpush.bf16.msra.mxu0 %v8036_v4  ;;  %4581 = vmatpush.bf16.msra.mxu3 %v8048_v21  ;;  %v8011_v4 = vld [vmem:[%s13771_s5 + $0x28] sm:$0xf]  ;;  %v9178_v21 = vld [vmem:[%s13771_s5 + $0xc] sm:$0xf0] }
 0x6a4   : > { %4555 = vmatpush.bf16.msra.mxu1 %v8040_v53  ;;  %v8012_v13 = vor.u32 %v9183_v59, %v8011_v4 }
 0x6a5   : > { %4567 = vmatpush.bf16.msra.mxu2 %v8060_v2  ;;  %v8028_v2 = vor.u32 %v9187_v36, %v8027_v51  ;;  %v7997_v51 = vld [vmem:[%s13771_s5 + $0x18] sm:$0xf0] }
 0x6a7   : > { %4543 = vmatpush.bf16.msra.mxu0 %v8020_v24  ;;  %4582 = vmatpush.bf16.msra.mxu3 %v8032_v5 }
 0x6a8   : > { %4556 = vmatpush.bf16.msra.mxu1 %v8024_v39  ;;  %v9177_v39 = vld [vmem:[%s13771_s5 + $0xc] sm:$0xf] }
 0x6a9   : > { %4568 = vmatpush.bf16.msra.mxu2 %v8044_v55  ;;  %v8000_v10 = vor.u32 %v9177_v39, %v7997_v51 }
 0x6ab   : > { %4544 = vmatpush.bf16.msra.mxu0 %v8004_v22 }
 0x6ad   : > { %4569 = vmatpush.bf16.msra.mxu2 %v8028_v2 }
 0x6b1   : > { %4570 = vmatpush.bf16.msra.mxu2 %v8012_v13 }
 0x71a   : > { %v4229_v46 = vpop.f32.mrf.mxu0  ;;  %v4242_v27 = vpop.f32.mrf.mxu1 }
 0x71b   : > { %v4272_v0 = vadd.f32 %v4229_v46, %v3566_v11  ;;  %v4273_v33 = vadd.f32 %v4242_v27, %v3595_v20  ;;  %v9180_v11 = vld [vmem:[%s13771_s5 + $0x24] sm:$0xf]  ;;  %v8005_v20 = vld [vmem:[%s13771_s5 + $0x30] sm:$0xf0]  ;;  %v9181_v46 = vld [vmem:[%s13771_s5 + $0x2c] sm:$0xf] }
 0x71c   : > { %v8008_v45 = vor.u32 %v9180_v11, %v8005_v20  ;;  %v8013_v27 = vld [vmem:[%s13771_s5 + $0x38] sm:$0xf0]  ;;  %v3624_v11 = vadd.f32 %v12230_v16, %v12495_v30 }
 0x71d   : > { %v7981_v19 = vmul.f32 -1.442695, %v4272_v0  ;;  %v7982_v48 = vmul.f32 -1.442695, %v4273_v33  ;;  %v8016_v0 = vor.u32 %v9181_v46, %v8013_v27  ;;  %v7987_v33 = vld [vmem:[%s13771_s5] sm:$0xf] }
 0x71e   : > { %v7988_v23 = vor.u32 %v9178_v21, %v7987_v33  ;;  %4557 = vmatpush.bf16.msra.mxu1 %v8008_v45 }
 0x71f   : > { %9536 = vpow2.f32 %v7981_v19  ;;  %v7995_v19 = vld [vmem:[%s13771_s5 + $0x8] sm:$0xf]  ;;  %4583 = vmatpush.bf16.msra.mxu3 %v8016_v0 }
 0x720   : > { %9538 = vpow2.f32 %v7982_v48  ;;  %v9179_v48 = vld [vmem:[%s13771_s5 + $0x14] sm:$0xf0]  ;;  %4545 = vmatpush.bf16.msra.mxu0 %v7988_v23 }
 0x721   : > { %v4255_v38 = vpop.f32.mrf.mxu2  ;;  %v4268_v31 = vpop.f32.mrf.mxu3  ;;  %v7996_v56 = vor.u32 %v9179_v48, %v7995_v19 }
 0x722   : > { %v4275_v53 = vadd.f32 %v4268_v31, %v3653_v44  ;;  %v4231_v55 = vpop.f32.mrf.mxu0  ;;  %v4244_v47 = vpop.f32.mrf.mxu1  ;;  %4558 = vmatpush.bf16.msra.mxu1 %v7992_v35  ;;  %v4274_v31 = vadd.f32 %v4255_v38, %v3624_v11 }
 0x723   : > { %4571 = vmatpush.bf16.msra.mxu2 %v7996_v56  ;;  %4584 = vmatpush.bf16.msra.mxu3 %v8000_v10 }
 0x724   : > { %v7983_v24 = vmul.f32 -1.442695, %v4275_v53 }
 0x725   : > { %v9537_v36 = vpop.eup %9536 }
 0x726   : > { %v9539_v2 = vpop.eup %9538  ;;  %v4279_v26 = vadd.f32 1.0, %v9537_v36  ;;  %9540 = vpow2.f32 %v7983_v24 }
 0x727   : > { %v4298_v42 = vadd.f32 1.0, %v9539_v2 }
 0x728   : > { %9542 = vrcp.f32 %v4279_v26  ;;  %v4291_v55 = vand.u32 2147483648, %v4279_v26  ;;  %v4289_v0 = vand.u32 2147483647, %v4279_v26  ;;  %vm4285_vm14 = vweird.f32 %v4279_v26 }
 0x729   : > { %9544 = vrcp.f32 %v4298_v42  ;;  %v4257_v44 = vpop.f32.mrf.mxu2  ;;  %v4270_v5 = vpop.f32.mrf.mxu3  ;;  %v4310_v47 = vand.u32 2147483648, %v4298_v42  ;;  %v4308_v21 = vand.u32 2147483647, %v4298_v42  ;;  %vm4304_vm15 = vweird.f32 %v4298_v42 }
 0x72a   : > { %v4292_v38 = vor.u32 1.1754944e-38, %v4291_v55  ;;  %vm4290_vm2 = vcmp.eq.f32.partialorder %v4289_v0, 8.507059e+37  ;;  %v8239_v55 = vld [vmem:[%s13771_s5 + $0xe8] sm:$0xf] }
 0x72b   : > { %v4311_v19 = vor.u32 1.1754944e-38, %v4310_v47  ;;  %vm4309_vm3 = vcmp.eq.f32.partialorder %v4308_v21, 8.507059e+37  ;;  %v9239_v47 = vld [vmem:[%s13771_s5 + $0xf4] sm:$0xf0]  ;;  %v8241_v21 = vld [vmem:[%s13771_s5 + $0xf8] sm:$0xf0] }
 0x72c   : > { %v9541_v22 = vpop.eup %9540  ;;  %v8240_v0 = vor.u32 %v9239_v47, %v8239_v55  ;;  %v8185_v55 = vld [vmem:[%s13771_s5 + $0x90] sm:$0xf0]  ;;  %v8191_v47 = vld [vmem:[%s13771_s5 + $0x88] sm:$0xf] }
 0x72d   : > { %v4318_v20 = vadd.f32 1.0, %v9541_v22 }
 0x72e   : > { %v9543_v4 = vpop.eup %9542  ;;  %4882 = vmatpush.bf16.msrb.mxu2 %v8240_v0 }
 0x72f   : > { %v9545_v45 = vpop.eup %9544  ;;  %v4281_v59 = vmul.f32 %v9543_v4, %v4279_v26  ;;  %9546 = vrcp.f32 %v4318_v20  ;;  %vm4286_vm12 = vweird.f32 %v9543_v4  ;;  %v4330_v44 = vand.u32 2147483648, %v4318_v20 }
 0x730   : > { %v4300_v46 = vmul.f32 %v9545_v45, %v4298_v42  ;;  %9548 = vtanh.f32 %v4274_v31  ;;  %vm4305_vm13 = vweird.f32 %v9545_v45  ;;  %vm4287_vm0 = vmor %vm4285_vm14, %vm4286_vm12  ;;  %vm4324_vm5 = vweird.f32 %v4318_v20 }
 0x731   : > { %v4282_v27 = vsub.f32 1.0, %v4281_v59  ;;  %vm4306_vm1 = vmor %vm4304_vm15, %vm4305_vm13  ;;  %v4328_v5 = vand.u32 2147483647, %v4318_v20  ;;  %v4331_v11 = vor.u32 1.1754944e-38, %v4330_v44 }
 0x732   : > { %v4301_v53 = vsub.f32 1.0, %v4300_v46  ;;  %v9236_v46 = vld [vmem:[%s13771_s5 + $0xe4] sm:$0xf] }
 0x733   : > { %v4283_v13 = vmul.f32 %v9543_v4, %v4282_v27  ;;  %vm4329_vm7 = vcmp.eq.f32.partialorder %v4328_v5, 8.507059e+37  ;;  %v8201_v5 = vld [vmem:[%s13771_s5 + $0xb0] sm:$0xf0] }
 0x734   : > { %v4302_v33 = vmul.f32 %v9545_v45, %v4301_v53  ;;  %v8233_v53 = vld [vmem:[%s13771_s5 + $0xf0] sm:$0xf0] }
 0x735   : > { %v9547_v1 = vpop.eup %9546  ;;  %v4284_v16 = vadd.f32 %v9543_v4, %v4283_v13  ;;  %v8236_v13 = vor.u32 %v9236_v46, %v8233_v53  ;;  %v9226_v46 = vld [vmem:[%s13771_s5 + $0x8c] sm:$0xf0] }
 0x736   : > { %v4303_v23 = vadd.f32 %v9545_v45, %v4302_v33  ;;  %v4320_v17 = vmul.f32 %v9547_v1, %v4318_v20  ;;  %v9549_v24 = vpop.eup %9548  ;;  %vm4325_vm4 = vweird.f32 %v9547_v1  ;;  %v9238_v20 = vld [vmem:[%s13771_s5 + $0xec] sm:$0xf0]  ;;  %v9237_v33 = vld [vmem:[%s13771_s5 + $0xec] sm:$0xf] }
 0x737   : > { %v4288_v48 = vsel %vm4287_vm0, %v9543_v4, %v4284_v16  ;;  %vm4326_vm6 = vmor %vm4324_vm5, %vm4325_vm4  ;;  %4869 = vmatpush.bf16.msrb.mxu1 %v8236_v13  ;;  %v8215_v16 = vld [vmem:[%s13771_s5 + $0xc0] sm:$0xf]  ;;  %v9227_v13 = vld [vmem:[%s13771_s5 + $0x94] sm:$0xf0] }
 0x738   : > { %v4293_v35 = vsel %vm4290_vm2, %v4292_v38, %v4288_v48  ;;  %v4307_v39 = vsel %vm4306_vm1, %v9545_v45, %v4303_v23  ;;  %v4321_v51 = vsub.f32 1.0, %v4320_v17  ;;  %v9234_v38 = vld [vmem:[%s13771_s5 + $0xcc] sm:$0xf0]  ;;  %v9232_v23 = vld [vmem:[%s13771_s5 + $0xc4] sm:$0xf] }
 0x739   : > { %v4312_v36 = vsel %vm4309_vm3, %v4311_v19, %v4307_v39  ;;  %v4335_v56 = vmul.f32 %v9549_v24, %v4293_v35  ;;  %v8216_v17 = vor.u32 %v9234_v38, %v8215_v16  ;;  %v8217_v19 = vld [vmem:[%s13771_s5 + $0xd0] sm:$0xf0]  ;;  %v8223_v48 = vld [vmem:[%s13771_s5 + $0xc8] sm:$0xf]  ;;  %v9235_v24 = vld [vmem:[%s13771_s5 + $0xd4] sm:$0xf0] }
 0x73a   : > { %v4334_v2 = vmul.f32 %v4312_v36, %v12499_v28  ;;  %v4322_v10 = vmul.f32 %v9547_v1, %v4321_v51  ;;  %v8231_v28 = vld [vmem:[%s13771_s5 + $0xe0] sm:$0xf]  ;;  %v8220_v35 = vor.u32 %v9232_v23, %v8217_v19  ;;  %v8224_v39 = vor.u32 %v9235_v24, %v8223_v48  ;;  %v9233_v51 = vld [vmem:[%s13771_s5 + $0xcc] sm:$0xf]  ;;  %v8225_v36 = vld [vmem:[%s13771_s5 + $0xd8] sm:$0xf0] }
 0x73b   : > { %v8232_v27 = vor.u32 %v9238_v20, %v8231_v28  ;;  %v8183_v20 = vld [vmem:[%s13771_s5 + $0x80] sm:$0xf]  ;;  %v9222_v23 = vld [vmem:[%s13771_s5 + $0x6c] sm:$0xf0]  ;;  %v3569_v19 = vadd.f32 %v12234_v41, %v12356_v62  ;;  %v3598_v48 = vadd.f32 %v12236_v3, %v12359_v63  ;;  %v9221_v3 = vld [vmem:[%s13771_s5 + $0x6c] sm:$0xf] }
 0x73c   : > { %v12704_v26 = vadd.f32 %v4335_v56, %v4334_v2  ;;  %v4323_v42 = vadd.f32 %v9547_v1, %v4322_v10  ;;  %v8228_v56 = vor.u32 %v9233_v51, %v8225_v36  ;;  %4870 = vmatpush.bf16.msrb.mxu1 %v8220_v35  ;;  %4883 = vmatpush.bf16.msrb.mxu2 %v8224_v39  ;;  %v8199_v2 = vld [vmem:[%s13771_s5 + $0xa0] sm:$0xf]  ;;  %v9230_v10 = vld [vmem:[%s13771_s5 + $0xac] sm:$0xf0]  ;;  %v8169_v35 = vld [vmem:[%s13771_s5 + $0x70] sm:$0xf0] }
 0x73d   : > { %4856 = vmatpush.bf16.msrb.mxu0 %v8232_v27  ;;  %v8200_v44 = vor.u32 %v9230_v10, %v8199_v2  ;;  %v9224_v27 = vld [vmem:[%s13771_s5 + $0x84] sm:$0xf]  ;;  %v8184_v53 = vor.u32 %v9226_v46, %v8183_v20  ;;  %v8167_v38 = vld [vmem:[%s13771_s5 + $0x60] sm:$0xf]  ;;  %v8175_v39 = vld [vmem:[%s13771_s5 + $0x68] sm:$0xf] }
 0x73e   : > { %9550 = vtanh.f32 %v12704_v26  ;;  %v4327_v22 = vsel %vm4326_vm6, %v9547_v1, %v4323_v42  ;;  %v8244_v1 = vor.u32 %v9237_v33, %v8241_v21  ;;  %v9228_v42 = vld [vmem:[%s13771_s5 + $0xa4] sm:$0xf]  ;;  %v8188_v0 = vor.u32 %v9224_v27, %v8185_v55  ;;  %v9225_v21 = vld [vmem:[%s13771_s5 + $0x8c] sm:$0xf]  ;;  %v9223_v51 = vld [vmem:[%s13771_s5 + $0x74] sm:$0xf0] }
 0x73f   : > { %v4332_v31 = vsel %vm4329_vm7, %v4331_v11, %v4327_v22  ;;  %v8207_v22 = vld [vmem:[%s13771_s5 + $0xa8] sm:$0xf]  ;;  %v9231_v11 = vld [vmem:[%s13771_s5 + $0xb4] sm:$0xf0]  ;;  %v8192_v33 = vor.u32 %v9227_v13, %v8191_v47  ;;  %v8168_v24 = vor.u32 %v9222_v23, %v8167_v38  ;;  %v8176_v2 = vor.u32 %v9223_v51, %v8175_v39  ;;  %v8177_v10 = vld [vmem:[%s13771_s5 + $0x78] sm:$0xf0] }
 0x740   : > { %4895 = vmatpush.bf16.msrb.mxu3 %v8244_v1  ;;  %v8193_v1 = vld [vmem:[%s13771_s5 + $0x98] sm:$0xf0]  ;;  %v8159_v46 = vld [vmem:[%s13771_s5 + $0x48] sm:$0xf]  ;;  %v9219_v27 = vld [vmem:[%s13771_s5 + $0x54] sm:$0xf0] }
 0x741   : > { %4857 = vmatpush.bf16.msrb.mxu0 %v8216_v17  ;;  %v8196_v16 = vor.u32 %v9225_v21, %v8193_v1  ;;  %v9220_v17 = vld [vmem:[%s13771_s5 + $0x64] sm:$0xf]  ;;  %v8160_v55 = vor.u32 %v9219_v27, %v8159_v46  ;;  %v8161_v47 = vld [vmem:[%s13771_s5 + $0x58] sm:$0xf0]  ;;  %v8135_v13 = vld [vmem:[%s13771_s5 + $0x20] sm:$0xf] }
 0x742   : > { %v8172_v41 = vor.u32 %v9220_v17, %v8169_v35  ;;  %v8137_v38 = vld [vmem:[%s13771_s5 + $0x30] sm:$0xf0]  ;;  %v8143_v23 = vld [vmem:[%s13771_s5 + $0x28] sm:$0xf]  ;;  %v8145_v35 = vld [vmem:[%s13771_s5 + $0x38] sm:$0xf0] }
 0x744   : > { %v9551_v4 = vpop.eup %9550  ;;  %4896 = vmatpush.bf16.msrb.mxu3 %v8228_v56 }
 0x745   : > { %v4338_v45 = vmul.f32 %v9551_v4, %v4332_v31  ;;  %v8204_v4 = vor.u32 %v9228_v42, %v8201_v5  ;;  %v8208_v31 = vor.u32 %v9231_v11, %v8207_v22  ;;  %4858 = vmatpush.bf16.msrb.mxu0 %v8200_v44  ;;  %v8180_v5 = vor.u32 %v9221_v3, %v8177_v10  ;;  %v8151_v22 = vld [vmem:[%s13771_s5 + $0x40] sm:$0xf]  ;;  %v9218_v11 = vld [vmem:[%s13771_s5 + $0x4c] sm:$0xf0]  ;;  %v9208_v10 = vld [vmem:[%s13771_s5 + $0x4] sm:$0xf] }
 0x746   : > { %v9210_v3 = vld [vmem:[%s13771_s5 + $0xc] sm:$0xf0] }
 0x747   : > { %v4339_v59 = vpack.c.bf16 %v4338_v45, %v4338_v45  ;;  %v9229_v45 = vld [vmem:[%s13771_s5 + $0xac] sm:$0xf]  ;;  %4871 = vmatpush.bf16.msrb.mxu1 %v8204_v4  ;;  %4884 = vmatpush.bf16.msrb.mxu2 %v8208_v31  ;;  %v9216_v4 = vld [vmem:[%s13771_s5 + $0x44] sm:$0xf] }
 0x749   : > { %7984 = vst [vmem:[%s9803_s26 + $0x4] sm:$0xf] %v4339_v59  ;;  %4546 = vmatmul.bf16.vlgmr.msra.gmra.mxu0 %v4339_v59  ;;  %4559 = vmatmul.bf16.vlgmr.msra.gmra.mxu1 %v4339_v59 }
 0x74a   : > { %4572 = vmatmul.bf16.vlgmr.msra.gmra.mxu2 %v4339_v59  ;;  %4585 = vmatmul.bf16.vlgmr.msra.gmra.mxu3 %v4339_v59  ;;  %v8209_v59 = vld [vmem:[%s13771_s5 + $0xb8] sm:$0xf0] }
 0x74b   : > { %v8212_v28 = vor.u32 %v9229_v45, %v8209_v59  ;;  %4859 = vmatpush.bf16.msrb.mxu0 %v8184_v53  ;;  %4872 = vmatpush.bf16.msrb.mxu1 %v8188_v0  ;;  %v8152_v59 = vor.u32 %v9218_v11, %v8151_v22  ;;  %v9217_v53 = vld [vmem:[%s13771_s5 + $0x4c] sm:$0xf]  ;;  %v9214_v0 = vld [vmem:[%s13771_s5 + $0x2c] sm:$0xf0]  ;;  %v9211_v22 = vld [vmem:[%s13771_s5 + $0x14] sm:$0xf0] }
 0x74c   : > { %4885 = vmatpush.bf16.msrb.mxu2 %v8192_v33  ;;  %v3656_v33 = vadd.f32 %v12240_v14, %v12418_v40  ;;  %v8164_v21 = vor.u32 %v9217_v53, %v8161_v47  ;;  %v8136_v1 = vor.u32 %v9214_v0, %v8135_v13  ;;  %v3627_v0 = vadd.f32 %v12238_v52, %v12495_v30 }
 0x74d   : > { %4897 = vmatpush.bf16.msrb.mxu3 %v8212_v28  ;;  %v8153_v28 = vld [vmem:[%s13771_s5 + $0x50] sm:$0xf0] }
 0x74e   : > { %v8156_v20 = vor.u32 %v9216_v4, %v8153_v28 }
 0x74f   : > { %4860 = vmatpush.bf16.msrb.mxu0 %v8168_v24  ;;  %4873 = vmatpush.bf16.msrb.mxu1 %v8172_v41  ;;  %v9213_v24 = vld [vmem:[%s13771_s5 + $0x2c] sm:$0xf] }
 0x750   : > { %4886 = vmatpush.bf16.msrb.mxu2 %v8176_v2  ;;  %v8148_v41 = vor.u32 %v9213_v24, %v8145_v35  ;;  %v8119_v2 = vld [vmem:[%s13771_s5] sm:$0xf] }
 0x751   : > { %4898 = vmatpush.bf16.msrb.mxu3 %v8196_v16  ;;  %v9212_v16 = vld [vmem:[%s13771_s5 + $0x24] sm:$0xf] }
 0x752   : > { %v8140_v14 = vor.u32 %v9212_v16, %v8137_v38 }
 0x753   : > { %4861 = vmatpush.bf16.msrb.mxu0 %v8152_v59  ;;  %4874 = vmatpush.bf16.msrb.mxu1 %v8156_v20 }
 0x754   : > { %4887 = vmatpush.bf16.msrb.mxu2 %v8160_v55 }
 0x755   : > { %4899 = vmatpush.bf16.msrb.mxu3 %v8180_v5  ;;  %v8127_v5 = vld [vmem:[%s13771_s5 + $0x8] sm:$0xf] }
 0x756   : > { %v8128_v28 = vor.u32 %v9211_v22, %v8127_v5 }
 0x757   : > { %4862 = vmatpush.bf16.msrb.mxu0 %v8136_v1  ;;  %4875 = vmatpush.bf16.msrb.mxu1 %v8140_v14 }
 0x759   : > { %4900 = vmatpush.bf16.msrb.mxu3 %v8164_v21 }
 0x75d   : > { %4901 = vmatpush.bf16.msrb.mxu3 %v8148_v41 }
 0x7c6   : > { %v4547_v36 = vpop.f32.mrf.mxu0  ;;  %v4560_v56 = vpop.f32.mrf.mxu1 }
 0x7c7   : > { %v4590_v42 = vadd.f32 %v4547_v36, %v3569_v19  ;;  %v4591_v44 = vadd.f32 %v4560_v56, %v3598_v48  ;;  %v9215_v48 = vld [vmem:[%s13771_s5 + $0x34] sm:$0xf0] }
 0x7c8   : > { %v8144_v56 = vor.u32 %v9215_v48, %v8143_v23 }
 0x7c9   : > { %v8113_v31 = vmul.f32 -1.442695, %v4590_v42  ;;  %v8114_v45 = vmul.f32 -1.442695, %v4591_v44  ;;  %v8120_v42 = vor.u32 %v9210_v3, %v8119_v2  ;;  %v8121_v44 = vld [vmem:[%s13771_s5 + $0x10] sm:$0xf0] }
 0x7ca   : > { %v8124_v4 = vor.u32 %v9208_v10, %v8121_v44  ;;  %4888 = vmatpush.bf16.msrb.mxu2 %v8144_v56 }
 0x7cb   : > { %9552 = vpow2.f32 %v8113_v31  ;;  %v9209_v31 = vld [vmem:[%s13771_s5 + $0xc] sm:$0xf]  ;;  %4863 = vmatpush.bf16.msrb.mxu0 %v8120_v42 }
 0x7cc   : > { %9554 = vpow2.f32 %v8114_v45  ;;  %v8129_v45 = vld [vmem:[%s13771_s5 + $0x18] sm:$0xf0]  ;;  %4876 = vmatpush.bf16.msrb.mxu1 %v8124_v4 }
 0x7cd   : > { %v4573_v17 = vpop.f32.mrf.mxu2  ;;  %v4586_v19 = vpop.f32.mrf.mxu3  ;;  %v8132_v27 = vor.u32 %v9209_v31, %v8129_v45 }
 0x7ce   : > { %v4593_v39 = vadd.f32 %v4586_v19, %v3656_v33  ;;  %v4549_v51 = vpop.f32.mrf.mxu0  ;;  %v4562_v36 = vpop.f32.mrf.mxu1  ;;  %4889 = vmatpush.bf16.msrb.mxu2 %v8128_v28  ;;  %v4592_v1 = vadd.f32 %v4573_v17, %v3627_v0 }
 0x7cf   : > { %4902 = vmatpush.bf16.msrb.mxu3 %v8132_v27 }
 0x7d0   : > { %v8115_v11 = vmul.f32 -1.442695, %v4593_v39 }
 0x7d1   : > { %v9553_v59 = vpop.eup %9552 }
 0x7d2   : > { %v9555_v20 = vpop.eup %9554  ;;  %v4597_v46 = vadd.f32 1.0, %v9553_v59  ;;  %9556 = vpow2.f32 %v8115_v11 }
 0x7d3   : > { %v4616_v53 = vadd.f32 1.0, %v9555_v20 }
 0x7d4   : > { %9558 = vrcp.f32 %v4597_v46  ;;  %v4609_v48 = vand.u32 2147483648, %v4597_v46  ;;  %v4607_v39 = vand.u32 2147483647, %v4597_v46  ;;  %vm4603_vm10 = vweird.f32 %v4597_v46 }
 0x7d5   : > { %9560 = vrcp.f32 %v4616_v53  ;;  %v4575_v55 = vpop.f32.mrf.mxu2  ;;  %v4588_v47 = vpop.f32.mrf.mxu3  ;;  %v4628_v24 = vand.u32 2147483648, %v4616_v53  ;;  %v4626_v36 = vand.u32 2147483647, %v4616_v53  ;;  %vm4622_vm11 = vweird.f32 %v4616_v53 }
 0x7d6   : > { %v4610_v17 = vor.u32 1.1754944e-38, %v4609_v48  ;;  %vm4608_vm14 = vcmp.eq.f32.partialorder %v4607_v39, 8.507059e+37  ;;  %v9269_v48 = vld [vmem:[%s13771_s5 + $0xec] sm:$0xf]  ;;  %v8347_v39 = vld [vmem:[%s13771_s5 + $0xc0] sm:$0xf] }
 0x7d7   : > { %v4629_v3 = vor.u32 1.1754944e-38, %v4628_v24  ;;  %vm4627_vm15 = vcmp.eq.f32.partialorder %v4626_v36, 8.507059e+37  ;;  %v8373_v24 = vld [vmem:[%s13771_s5 + $0xf8] sm:$0xf0]  ;;  %v9264_v36 = vld [vmem:[%s13771_s5 + $0xc4] sm:$0xf] }
 0x7d8   : > { %v9557_v13 = vpop.eup %9556 }
 0x7d9   : > { %v4636_v33 = vadd.f32 1.0, %v9557_v13 }
 0x7da   : > { %v9559_v21 = vpop.eup %9558 }
 0x7db   : > { %v9561_v16 = vpop.eup %9560  ;;  %v4599_v38 = vmul.f32 %v9559_v21, %v4597_v46  ;;  %9562 = vrcp.f32 %v4636_v33  ;;  %vm4604_vm8 = vweird.f32 %v9559_v21  ;;  %v4648_v20 = vand.u32 2147483648, %v4636_v33 }
 0x7dc   : > { %v4618_v23 = vmul.f32 %v9561_v16, %v4616_v53  ;;  %9564 = vtanh.f32 %v4592_v1  ;;  %vm4623_vm9 = vweird.f32 %v9561_v16  ;;  %vm4605_vm12 = vmor %vm4603_vm10, %vm4604_vm8  ;;  %vm4642_vm1 = vweird.f32 %v4636_v33 }
 0x7dd   : > { %v4600_v19 = vsub.f32 1.0, %v4599_v38  ;;  %vm4624_vm13 = vmor %vm4622_vm11, %vm4623_vm9  ;;  %v4646_v46 = vand.u32 2147483647, %v4636_v33  ;;  %v4649_v53 = vor.u32 1.1754944e-38, %v4648_v20  ;;  %v8371_v38 = vld [vmem:[%s13771_s5 + $0xe8] sm:$0xf] }
 0x7de   : > { %v4619_v14 = vsub.f32 1.0, %v4618_v23  ;;  %v9271_v23 = vld [vmem:[%s13771_s5 + $0xf4] sm:$0xf0] }
 0x7df   : > { %v4601_v35 = vmul.f32 %v9559_v21, %v4600_v19  ;;  %vm4647_vm3 = vcmp.eq.f32.partialorder %v4646_v46, 8.507059e+37 }
 0x7e0   : > { %v4620_v51 = vmul.f32 %v9561_v16, %v4619_v14  ;;  %v8372_v14 = vor.u32 %v9271_v23, %v8371_v38  ;;  %v9257_v23 = vld [vmem:[%s13771_s5 + $0x8c] sm:$0xf] }
 0x7e1   : > { %v9563_v56 = vpop.eup %9562  ;;  %v4602_v52 = vadd.f32 %v9559_v21, %v4601_v35  ;;  %v8376_v35 = vor.u32 %v9269_v48, %v8373_v24  ;;  %v8299_v48 = vld [vmem:[%s13771_s5 + $0x60] sm:$0xf]  ;;  %v9254_v24 = vld [vmem:[%s13771_s5 + $0x6c] sm:$0xf0] }
 0x7e2   : > { %v4621_v41 = vadd.f32 %v9561_v16, %v4620_v51  ;;  %v4638_v2 = vmul.f32 %v9563_v56, %v4636_v33  ;;  %v9565_v42 = vpop.eup %9564  ;;  %vm4643_vm0 = vweird.f32 %v9563_v56  ;;  %v9270_v33 = vld [vmem:[%s13771_s5 + $0xec] sm:$0xf0]  ;;  %5200 = vmatpush.bf16.msra.mxu2 %v8372_v14 }
 0x7e3   : > { %v4606_v10 = vsel %vm4605_vm12, %v9559_v21, %v4602_v52  ;;  %vm4644_vm2 = vmor %vm4642_vm1, %vm4643_vm0  ;;  %v9268_v21 = vld [vmem:[%s13771_s5 + $0xe4] sm:$0xf]  ;;  %v9266_v51 = vld [vmem:[%s13771_s5 + $0xcc] sm:$0xf0]  ;;  %5213 = vmatpush.bf16.msra.mxu3 %v8376_v35 }
 0x7e4   : > { %v4611_v44 = vsel %vm4608_vm14, %v4610_v17, %v4606_v10  ;;  %v4625_v5 = vsel %vm4624_vm13, %v9561_v16, %v4621_v41  ;;  %v4639_v22 = vsub.f32 1.0, %v4638_v2  ;;  %v8365_v16 = vld [vmem:[%s13771_s5 + $0xf0] sm:$0xf0]  ;;  %v8355_v17 = vld [vmem:[%s13771_s5 + $0xc8] sm:$0xf] }
 0x7e5   : > { %v4630_v11 = vsel %vm4627_vm15, %v4629_v3, %v4625_v5  ;;  %v4653_v4 = vmul.f32 %v9565_v42, %v4611_v44  ;;  %v8368_v19 = vor.u32 %v9268_v21, %v8365_v16  ;;  %v8349_v52 = vld [vmem:[%s13771_s5 + $0xd0] sm:$0xf0]  ;;  %v9267_v41 = vld [vmem:[%s13771_s5 + $0xd4] sm:$0xf0]  ;;  %v9265_v10 = vld [vmem:[%s13771_s5 + $0xcc] sm:$0xf] }
 0x7e6   : > { %v4652_v31 = vmul.f32 %v4630_v11, %v12704_v26  ;;  %v4640_v45 = vmul.f32 %v9563_v56, %v4639_v22  ;;  %v8363_v26 = vld [vmem:[%s13771_s5 + $0xe0] sm:$0xf]  ;;  %v8352_v2 = vor.u32 %v9264_v36, %v8349_v52  ;;  %v8356_v3 = vor.u32 %v9267_v41, %v8355_v17  ;;  %v8357_v42 = vld [vmem:[%s13771_s5 + $0xd8] sm:$0xf0]  ;;  %v9262_v22 = vld [vmem:[%s13771_s5 + $0xac] sm:$0xf0] }
 0x7e7   : > { %v8364_v1 = vor.u32 %v9270_v33, %v8363_v26  ;;  %5187 = vmatpush.bf16.msra.mxu1 %v8368_v19  ;;  %v8360_v44 = vor.u32 %v9265_v10, %v8357_v42  ;;  %v8331_v5 = vld [vmem:[%s13771_s5 + $0xa0] sm:$0xf]  ;;  %v9260_v11 = vld [vmem:[%s13771_s5 + $0xa4] sm:$0xf]  ;;  %v8317_v33 = vld [vmem:[%s13771_s5 + $0x90] sm:$0xf0]  ;;  %v8300_v36 = vor.u32 %v9254_v24, %v8299_v48 }
 0x7e8   : > { %v12909_v59 = vadd.f32 %v4653_v4, %v4652_v31  ;;  %v4641_v28 = vadd.f32 %v9563_v56, %v4640_v45  ;;  %5201 = vmatpush.bf16.msra.mxu2 %v8356_v3  ;;  %v8332_v4 = vor.u32 %v9262_v22, %v8331_v5  ;;  %v8333_v31 = vld [vmem:[%s13771_s5 + $0xb0] sm:$0xf0]  ;;  %v8339_v45 = vld [vmem:[%s13771_s5 + $0xa8] sm:$0xf]  ;;  %v8325_v19 = vld [vmem:[%s13771_s5 + $0x98] sm:$0xf0] }
 0x7e9   : > { %5174 = vmatpush.bf16.msra.mxu0 %v8364_v1  ;;  %5214 = vmatpush.bf16.msra.mxu3 %v8360_v44  ;;  %v8336_v20 = vor.u32 %v9260_v11, %v8333_v31  ;;  %v8323_v21 = vld [vmem:[%s13771_s5 + $0x88] sm:$0xf]  ;;  %v9259_v1 = vld [vmem:[%s13771_s5 + $0x94] sm:$0xf0]  ;;  %v8328_v14 = vor.u32 %v9257_v23, %v8325_v19  ;;  %v9252_v35 = vld [vmem:[%s13771_s5 + $0x64] sm:$0xf] }
 0x7ea   : > { %9566 = vtanh.f32 %v12909_v59  ;;  %v4645_v27 = vsel %vm4644_vm2, %v9563_v56, %v4641_v28  ;;  %v8348_v56 = vor.u32 %v9266_v51, %v8347_v39  ;;  %v9263_v28 = vld [vmem:[%s13771_s5 + $0xb4] sm:$0xf0]  ;;  %v8324_v38 = vor.u32 %v9259_v1, %v8323_v21  ;;  %v8307_v52 = vld [vmem:[%s13771_s5 + $0x68] sm:$0xf]  ;;  %v8309_v10 = vld [vmem:[%s13771_s5 + $0x78] sm:$0xf0] }
 0x7eb   : > { %v4650_v47 = vsel %vm4647_vm3, %v4649_v53, %v4645_v27  ;;  %5188 = vmatpush.bf16.msra.mxu1 %v8352_v2  ;;  %v8340_v46 = vor.u32 %v9263_v28, %v8339_v45  ;;  %v9261_v27 = vld [vmem:[%s13771_s5 + $0xac] sm:$0xf]  ;;  %v8341_v53 = vld [vmem:[%s13771_s5 + $0xb8] sm:$0xf0]  ;;  %v3571_v39 = vadd.f32 %v12242_v54, %v12356_v62  ;;  %v3600_v51 = vadd.f32 %v12244_v7, %v12359_v63  ;;  %v9255_v17 = vld [vmem:[%s13771_s5 + $0x74] sm:$0xf0] }
 0x7ec   : > { %v8308_v3 = vor.u32 %v9255_v17, %v8307_v52  ;;  %v9253_v7 = vld [vmem:[%s13771_s5 + $0x6c] sm:$0xf]  ;;  %v8283_v22 = vld [vmem:[%s13771_s5 + $0x40] sm:$0xf]  ;;  %v9250_v11 = vld [vmem:[%s13771_s5 + $0x4c] sm:$0xf0] }
 0x7ed   : > { %5175 = vmatpush.bf16.msra.mxu0 %v8348_v56  ;;  %5202 = vmatpush.bf16.msra.mxu2 %v8340_v46  ;;  %v8301_v56 = vld [vmem:[%s13771_s5 + $0x70] sm:$0xf0]  ;;  %v8312_v5 = vor.u32 %v9253_v7, %v8309_v10  ;;  %v8284_v28 = vor.u32 %v9250_v11, %v8283_v22  ;;  %v8275_v23 = vld [vmem:[%s13771_s5 + $0x28] sm:$0xf]  ;;  %v9247_v48 = vld [vmem:[%s13771_s5 + $0x34] sm:$0xf0] }
 0x7ee   : > { %v8304_v54 = vor.u32 %v9252_v35, %v8301_v56  ;;  %v9245_v24 = vld [vmem:[%s13771_s5 + $0x2c] sm:$0xf]  ;;  %v8277_v35 = vld [vmem:[%s13771_s5 + $0x38] sm:$0xf0]  ;;  %v8276_v56 = vor.u32 %v9247_v48, %v8275_v23  ;;  %v8251_v17 = vld [vmem:[%s13771_s5] sm:$0xf] }
 0x7ef   : > { %5189 = vmatpush.bf16.msra.mxu1 %v8336_v20  ;;  %v8285_v20 = vld [vmem:[%s13771_s5 + $0x50] sm:$0xf0]  ;;  %v8280_v52 = vor.u32 %v9245_v24, %v8277_v35  ;;  %v8259_v7 = vld [vmem:[%s13771_s5 + $0x8] sm:$0xf]  ;;  %v9243_v10 = vld [vmem:[%s13771_s5 + $0x14] sm:$0xf0] }
 0x7f0   : > { %v9567_v55 = vpop.eup %9566  ;;  %v8261_v22 = vld [vmem:[%s13771_s5 + $0x18] sm:$0xf0] }
 0x7f1   : > { %v4656_v13 = vmul.f32 %v9567_v55, %v4650_v47  ;;  %5176 = vmatpush.bf16.msra.mxu0 %v8332_v4  ;;  %v8344_v55 = vor.u32 %v9261_v27, %v8341_v53  ;;  %v8315_v47 = vld [vmem:[%s13771_s5 + $0x80] sm:$0xf]  ;;  %5203 = vmatpush.bf16.msra.mxu2 %v8324_v38  ;;  %v9248_v4 = vld [vmem:[%s13771_s5 + $0x44] sm:$0xf]  ;;  %v8291_v27 = vld [vmem:[%s13771_s5 + $0x48] sm:$0xf] }
 0x7f2   : > { %v8288_v46 = vor.u32 %v9248_v4, %v8285_v20  ;;  %v9251_v53 = vld [vmem:[%s13771_s5 + $0x54] sm:$0xf0]  ;;  %v8269_v38 = vld [vmem:[%s13771_s5 + $0x30] sm:$0xf0]  ;;  %v8260_v4 = vor.u32 %v9243_v10, %v8259_v7 }
 0x7f3   : > { %v4657_v0 = vpack.c.bf16 %v4656_v13, %v4656_v13  ;;  %v9258_v13 = vld [vmem:[%s13771_s5 + $0x8c] sm:$0xf0]  ;;  %5215 = vmatpush.bf16.msra.mxu3 %v8344_v55  ;;  %v9249_v55 = vld [vmem:[%s13771_s5 + $0x4c] sm:$0xf] }
 0x7f4   : > { %v8316_v26 = vor.u32 %v9258_v13, %v8315_v47  ;;  %v8292_v47 = vor.u32 %v9251_v53, %v8291_v27  ;;  %v8293_v13 = vld [vmem:[%s13771_s5 + $0x58] sm:$0xf0] }
 0x7f5   : > { %8116 = vst [vmem:[%s9803_s26 + $0x8] sm:$0xf] %v4657_v0  ;;  %4864 = vmatmul.bf16.vlgmr.msrb.gmra.mxu0 %v4657_v0  ;;  %4877 = vmatmul.bf16.vlgmr.msrb.gmra.mxu1 %v4657_v0  ;;  %v8296_v21 = vor.u32 %v9249_v55, %v8293_v13  ;;  %v3629_v55 = vadd.f32 %v12246_v25, %v12495_v30 }
 0x7f6   : > { %4890 = vmatmul.bf16.vlgmr.msrb.gmra.mxu2 %v4657_v0  ;;  %4903 = vmatmul.bf16.vlgmr.msrb.gmra.mxu3 %v4657_v0  ;;  %v9256_v0 = vld [vmem:[%s13771_s5 + $0x84] sm:$0xf] }
 0x7f7   : > { %v8320_v16 = vor.u32 %v9256_v0, %v8317_v33  ;;  %5177 = vmatpush.bf16.msra.mxu0 %v8316_v26  ;;  %5216 = vmatpush.bf16.msra.mxu3 %v8328_v14  ;;  %v8267_v0 = vld [vmem:[%s13771_s5 + $0x20] sm:$0xf]  ;;  %v9246_v26 = vld [vmem:[%s13771_s5 + $0x2c] sm:$0xf0]  ;;  %v3658_v33 = vadd.f32 %v12248_v8, %v12418_v40 }
 0x7f8   : > { %5204 = vmatpush.bf16.msra.mxu2 %v8308_v3  ;;  %v8268_v1 = vor.u32 %v9246_v26, %v8267_v0  ;;  %v8253_v3 = vld [vmem:[%s13771_s5 + $0x10] sm:$0xf0] }
 0x7f9   : > { %5190 = vmatpush.bf16.msra.mxu1 %v8320_v16  ;;  %v9244_v16 = vld [vmem:[%s13771_s5 + $0x24] sm:$0xf] }
 0x7fa   : > { %v8272_v8 = vor.u32 %v9244_v16, %v8269_v38 }
 0x7fb   : > { %5178 = vmatpush.bf16.msra.mxu0 %v8300_v36  ;;  %5217 = vmatpush.bf16.msra.mxu3 %v8312_v5  ;;  %v9241_v5 = vld [vmem:[%s13771_s5 + $0xc] sm:$0xf] }
 0x7fc   : > { %5205 = vmatpush.bf16.msra.mxu2 %v8292_v47 }
 0x7fd   : > { %5191 = vmatpush.bf16.msra.mxu1 %v8304_v54 }
 0x7ff   : > { %5179 = vmatpush.bf16.msra.mxu0 %v8284_v28  ;;  %5218 = vmatpush.bf16.msra.mxu3 %v8296_v21  ;;  %v8264_v28 = vor.u32 %v9241_v5, %v8261_v22 }
 0x800   : > { %5206 = vmatpush.bf16.msra.mxu2 %v8276_v56 }
 0x801   : > { %5192 = vmatpush.bf16.msra.mxu1 %v8288_v46 }
 0x803   : > { %5180 = vmatpush.bf16.msra.mxu0 %v8268_v1  ;;  %5219 = vmatpush.bf16.msra.mxu3 %v8280_v52 }
 0x804   : > { %5207 = vmatpush.bf16.msra.mxu2 %v8260_v4 }
 0x805   : > { %5193 = vmatpush.bf16.msra.mxu1 %v8272_v8 }
 0x807   : > { %5220 = vmatpush.bf16.msra.mxu3 %v8264_v28 }
 0x872   : > { %v4865_v41 = vpop.f32.mrf.mxu0  ;;  %v4878_v2 = vpop.f32.mrf.mxu1 }
 0x873   : > { %v4908_v42 = vadd.f32 %v4865_v41, %v3571_v39  ;;  %v4909_v44 = vadd.f32 %v4878_v2, %v3600_v51  ;;  %v9242_v41 = vld [vmem:[%s13771_s5 + $0xc] sm:$0xf0]  ;;  %v9240_v2 = vld [vmem:[%s13771_s5 + $0x4] sm:$0xf] }
 0x874   : > { %v8252_v54 = vor.u32 %v9242_v41, %v8251_v17 }
 0x875   : > { %v8245_v31 = vmul.f32 -1.442695, %v4908_v42  ;;  %v8246_v45 = vmul.f32 -1.442695, %v4909_v44  ;;  %v8256_v44 = vor.u32 %v9240_v2, %v8253_v3 }
 0x876   : > { %5181 = vmatpush.bf16.msra.mxu0 %v8252_v54 }
 0x877   : > { %9568 = vpow2.f32 %v8245_v31  ;;  %5194 = vmatpush.bf16.msra.mxu1 %v8256_v44 }
 0x878   : > { %9570 = vpow2.f32 %v8246_v45 }
 0x879   : > { %v4891_v19 = vpop.f32.mrf.mxu2  ;;  %v4904_v14 = vpop.f32.mrf.mxu3 }
 0x87a   : > { %v4911_v39 = vadd.f32 %v4904_v14, %v3658_v33  ;;  %v4867_v51 = vpop.f32.mrf.mxu0  ;;  %v4880_v36 = vpop.f32.mrf.mxu1  ;;  %v4910_v0 = vadd.f32 %v4891_v19, %v3629_v55  ;;  %v8497_v55 = vld [vmem:[%s13771_s5 + $0xf0] sm:$0xf0] }
 0x87c   : > { %v8247_v42 = vmul.f32 -1.442695, %v4911_v39 }
 0x87d   : > { %v9569_v11 = vpop.eup %9568 }
 0x87e   : > { %v9571_v31 = vpop.eup %9570  ;;  %v4915_v45 = vadd.f32 1.0, %v9569_v11  ;;  %9572 = vpow2.f32 %v8247_v42 }
 0x87f   : > { %v4934_v20 = vadd.f32 1.0, %v9571_v31 }
 0x880   : > { %9574 = vrcp.f32 %v4915_v45  ;;  %v4927_v38 = vand.u32 2147483648, %v4915_v45  ;;  %v4925_v8 = vand.u32 2147483647, %v4915_v45  ;;  %vm4921_vm6 = vweird.f32 %v4915_v45 }
 0x881   : > { %9576 = vrcp.f32 %v4934_v20  ;;  %v4893_v46 = vpop.f32.mrf.mxu2  ;;  %v4906_v27 = vpop.f32.mrf.mxu3  ;;  %v4946_v23 = vand.u32 2147483648, %v4934_v20  ;;  %v4944_v24 = vand.u32 2147483647, %v4934_v20  ;;  %vm4940_vm7 = vweird.f32 %v4934_v20 }
 0x882   : > { %v4928_v19 = vor.u32 1.1754944e-38, %v4927_v38  ;;  %vm4926_vm10 = vcmp.eq.f32.partialorder %v4925_v8, 8.507059e+37  ;;  %v9302_v46 = vld [vmem:[%s13771_s5 + $0xec] sm:$0xf0]  ;;  %v9300_v27 = vld [vmem:[%s13771_s5 + $0xe4] sm:$0xf] }
 0x883   : > { %v4947_v36 = vor.u32 1.1754944e-38, %v4946_v23  ;;  %vm4945_vm11 = vcmp.eq.f32.partialorder %v4944_v24, 8.507059e+37  ;;  %v9298_v38 = vld [vmem:[%s13771_s5 + $0xcc] sm:$0xf0]  ;;  %v9296_v23 = vld [vmem:[%s13771_s5 + $0xc4] sm:$0xf] }
 0x884   : > { %v9573_v53 = vpop.eup %9572  ;;  %v8481_v8 = vld [vmem:[%s13771_s5 + $0xd0] sm:$0xf0]  ;;  %v9299_v24 = vld [vmem:[%s13771_s5 + $0xd4] sm:$0xf0] }
 0x885   : > { %v4954_v47 = vadd.f32 1.0, %v9573_v53 }
 0x886   : > { %v9575_v13 = vpop.eup %9574 }
 0x887   : > { %v9577_v26 = vpop.eup %9576  ;;  %v4917_v33 = vmul.f32 %v9575_v13, %v4915_v45  ;;  %9578 = vrcp.f32 %v4954_v47  ;;  %vm4922_vm4 = vweird.f32 %v9575_v13  ;;  %v4966_v5 = vand.u32 2147483648, %v4954_v47 }
 0x888   : > { %v4936_v21 = vmul.f32 %v9577_v26, %v4934_v20  ;;  %9580 = vtanh.f32 %v4910_v0  ;;  %vm4941_vm5 = vweird.f32 %v9577_v26  ;;  %vm4923_vm8 = vmor %vm4921_vm6, %vm4922_vm4  ;;  %vm4960_vm13 = vweird.f32 %v4954_v47 }
 0x889   : > { %v4918_v1 = vsub.f32 1.0, %v4917_v33  ;;  %vm4942_vm9 = vmor %vm4940_vm7, %vm4941_vm5  ;;  %v4964_v22 = vand.u32 2147483647, %v4954_v47  ;;  %v4967_v4 = vor.u32 1.1754944e-38, %v4966_v5  ;;  %v8500_v0 = vor.u32 %v9300_v27, %v8497_v55  ;;  %v9301_v33 = vld [vmem:[%s13771_s5 + $0xec] sm:$0xf] }
 0x88a   : > { %v4937_v16 = vsub.f32 1.0, %v4936_v21  ;;  %v8505_v21 = vld [vmem:[%s13771_s5 + $0xf8] sm:$0xf0]  ;;  %v9289_v27 = vld [vmem:[%s13771_s5 + $0x8c] sm:$0xf] }
 0x88b   : > { %v4919_v14 = vmul.f32 %v9575_v13, %v4918_v1  ;;  %vm4965_vm15 = vcmp.eq.f32.partialorder %v4964_v22, 8.507059e+37  ;;  %v8508_v1 = vor.u32 %v9301_v33, %v8505_v21  ;;  %5505 = vmatpush.bf16.msrb.mxu1 %v8500_v0  ;;  %v8447_v22 = vld [vmem:[%s13771_s5 + $0x80] sm:$0xf]  ;;  %v9284_v0 = vld [vmem:[%s13771_s5 + $0x64] sm:$0xf]  ;;  %v3603_v33 = vadd.f32 %v12252_v43, %v12359_v63 }
 0x88c   : > { %v4938_v48 = vmul.f32 %v9577_v26, %v4937_v16  ;;  %v8479_v16 = vld [vmem:[%s13771_s5 + $0xc0] sm:$0xf]  ;;  %v9285_v43 = vld [vmem:[%s13771_s5 + $0x6c] sm:$0xf] }
 0x88d   : > { %v9579_v35 = vpop.eup %9578  ;;  %v4920_v25 = vadd.f32 %v9575_v13, %v4919_v14  ;;  %5531 = vmatpush.bf16.msrb.mxu3 %v8508_v1  ;;  %v8480_v14 = vor.u32 %v9298_v38, %v8479_v16  ;;  %v8433_v1 = vld [vmem:[%s13771_s5 + $0x70] sm:$0xf0]  ;;  %v8439_v16 = vld [vmem:[%s13771_s5 + $0x68] sm:$0xf]  ;;  %v9287_v38 = vld [vmem:[%s13771_s5 + $0x74] sm:$0xf0] }
 0x88e   : > { %v4939_v39 = vadd.f32 %v9577_v26, %v4938_v48  ;;  %v4956_v51 = vmul.f32 %v9579_v35, %v4954_v47  ;;  %v9581_v52 = vpop.eup %9580  ;;  %vm4961_vm12 = vweird.f32 %v9579_v35  ;;  %v8503_v47 = vld [vmem:[%s13771_s5 + $0xe8] sm:$0xf] }
 0x88f   : > { %v4924_v56 = vsel %vm4923_vm8, %v9575_v13, %v4920_v25  ;;  %vm4962_vm14 = vmor %vm4960_vm13, %vm4961_vm12  ;;  %v9303_v13 = vld [vmem:[%s13771_s5 + $0xf4] sm:$0xf0]  ;;  %v8487_v48 = vld [vmem:[%s13771_s5 + $0xc8] sm:$0xf] }
 0x890   : > { %v4929_v17 = vsel %vm4926_vm10, %v4928_v19, %v4924_v56  ;;  %v4943_v41 = vsel %vm4942_vm9, %v9577_v26, %v4939_v39  ;;  %v4957_v2 = vsub.f32 1.0, %v4956_v51  ;;  %v8504_v26 = vor.u32 %v9303_v13, %v8503_v47  ;;  %v9297_v19 = vld [vmem:[%s13771_s5 + $0xcc] sm:$0xf]  ;;  %v8489_v39 = vld [vmem:[%s13771_s5 + $0xd8] sm:$0xf0] }
 0x891   : > { %v4948_v54 = vsel %vm4945_vm11, %v4947_v36, %v4943_v41  ;;  %v4971_v3 = vmul.f32 %v9581_v52, %v4929_v17  ;;  %v8488_v25 = vor.u32 %v9299_v24, %v8487_v48  ;;  %v8492_v51 = vor.u32 %v9297_v19, %v8489_v39  ;;  %v8463_v36 = vld [vmem:[%s13771_s5 + $0xa0] sm:$0xf]  ;;  %v9294_v56 = vld [vmem:[%s13771_s5 + $0xac] sm:$0xf0]  ;;  %v9292_v52 = vld [vmem:[%s13771_s5 + $0xa4] sm:$0xf] }
 0x892   : > { %v4970_v7 = vmul.f32 %v4948_v54, %v12909_v59  ;;  %v4958_v10 = vmul.f32 %v9579_v35, %v4957_v2  ;;  %v8495_v59 = vld [vmem:[%s13771_s5 + $0xe0] sm:$0xf]  ;;  %5518 = vmatpush.bf16.msrb.mxu2 %v8504_v26  ;;  %v8464_v17 = vor.u32 %v9294_v56, %v8463_v36  ;;  %v8465_v41 = vld [vmem:[%s13771_s5 + $0xb0] sm:$0xf0]  ;;  %v8471_v2 = vld [vmem:[%s13771_s5 + $0xa8] sm:$0xf]  ;;  %v3574_v26 = vadd.f32 %v12250_v15, %v12356_v62 }
 0x893   : > { %v8496_v53 = vor.u32 %v9302_v46, %v8495_v59  ;;  %5532 = vmatpush.bf16.msrb.mxu3 %v8492_v51  ;;  %v9295_v54 = vld [vmem:[%s13771_s5 + $0xb4] sm:$0xf0]  ;;  %v8431_v47 = vld [vmem:[%s13771_s5 + $0x60] sm:$0xf]  ;;  %v9286_v13 = vld [vmem:[%s13771_s5 + $0x6c] sm:$0xf0]  ;;  %v8436_v15 = vor.u32 %v9284_v0, %v8433_v1 }
 0x894   : > { %v13114_v42 = vadd.f32 %v4971_v3, %v4970_v7  ;;  %v4959_v44 = vadd.f32 %v9579_v35, %v4958_v10  ;;  %v8468_v3 = vor.u32 %v9292_v52, %v8465_v41  ;;  %v8472_v7 = vor.u32 %v9295_v54, %v8471_v2  ;;  %v9293_v10 = vld [vmem:[%s13771_s5 + $0xac] sm:$0xf]  ;;  %v8441_v48 = vld [vmem:[%s13771_s5 + $0x78] sm:$0xf0]  ;;  %v8415_v19 = vld [vmem:[%s13771_s5 + $0x40] sm:$0xf] }
 0x895   : > { %5492 = vmatpush.bf16.msrb.mxu0 %v8496_v53  ;;  %v8457_v53 = vld [vmem:[%s13771_s5 + $0x98] sm:$0xf0]  ;;  %v8432_v21 = vor.u32 %v9286_v13, %v8431_v47  ;;  %v9282_v39 = vld [vmem:[%s13771_s5 + $0x4c] sm:$0xf0]  ;;  %v9280_v51 = vld [vmem:[%s13771_s5 + $0x44] sm:$0xf] }
 0x896   : > { %9582 = vtanh.f32 %v13114_v42  ;;  %v4963_v11 = vsel %vm4962_vm14, %v9579_v35, %v4959_v44  ;;  %v8484_v35 = vor.u32 %v9296_v23, %v8481_v8  ;;  %5519 = vmatpush.bf16.msrb.mxu2 %v8488_v25  ;;  %v8473_v44 = vld [vmem:[%s13771_s5 + $0xb8] sm:$0xf0]  ;;  %v8460_v55 = vor.u32 %v9289_v27, %v8457_v53  ;;  %v8423_v2 = vld [vmem:[%s13771_s5 + $0x48] sm:$0xf]  ;;  %v9283_v54 = vld [vmem:[%s13771_s5 + $0x54] sm:$0xf0] }
 0x897   : > { %v4968_v45 = vsel %vm4965_vm15, %v4967_v4, %v4963_v11  ;;  %v8476_v5 = vor.u32 %v9293_v10, %v8473_v44  ;;  %v9290_v11 = vld [vmem:[%s13771_s5 + $0x8c] sm:$0xf0]  ;;  %v9288_v4 = vld [vmem:[%s13771_s5 + $0x84] sm:$0xf]  ;;  %v8440_v8 = vor.u32 %v9287_v38, %v8439_v16  ;;  %v8444_v25 = vor.u32 %v9285_v43, %v8441_v48  ;;  %v8425_v10 = vld [vmem:[%s13771_s5 + $0x58] sm:$0xf0] }
 0x898   : > { %5506 = vmatpush.bf16.msrb.mxu1 %v8484_v35  ;;  %v8416_v52 = vor.u32 %v9282_v39, %v8415_v19  ;;  %v8399_v44 = vld [vmem:[%s13771_s5 + $0x20] sm:$0xf]  ;;  %v9277_v27 = vld [vmem:[%s13771_s5 + $0x2c] sm:$0xf]  ;;  %v8409_v53 = vld [vmem:[%s13771_s5 + $0x38] sm:$0xf0] }
 0x899   : > { %5493 = vmatpush.bf16.msrb.mxu0 %v8480_v14  ;;  %5533 = vmatpush.bf16.msrb.mxu3 %v8476_v5  ;;  %v9278_v5 = vld [vmem:[%s13771_s5 + $0x2c] sm:$0xf0]  ;;  %v9272_v1 = vld [vmem:[%s13771_s5 + $0x4] sm:$0xf]  ;;  %v8385_v38 = vld [vmem:[%s13771_s5 + $0x10] sm:$0xf0] }
 0x89a   : > { %5520 = vmatpush.bf16.msrb.mxu2 %v8472_v7  ;;  %v8424_v7 = vor.u32 %v9283_v54, %v8423_v2  ;;  %v9273_v43 = vld [vmem:[%s13771_s5 + $0xc] sm:$0xf]  ;;  %v8393_v48 = vld [vmem:[%s13771_s5 + $0x18] sm:$0xf0] }
 0x89b   : > { %v8396_v39 = vor.u32 %v9273_v43, %v8393_v48 }
 0x89c   : > { %v9583_v31 = vpop.eup %9582  ;;  %5507 = vmatpush.bf16.msrb.mxu1 %v8468_v3  ;;  %v9281_v3 = vld [vmem:[%s13771_s5 + $0x4c] sm:$0xf] }
 0x89d   : > { %v4974_v28 = vmul.f32 %v9583_v31, %v4968_v45  ;;  %5494 = vmatpush.bf16.msrb.mxu0 %v8464_v17  ;;  %v8448_v31 = vor.u32 %v9290_v11, %v8447_v22  ;;  %v8449_v45 = vld [vmem:[%s13771_s5 + $0x90] sm:$0xf0]  ;;  %5534 = vmatpush.bf16.msrb.mxu3 %v8460_v55  ;;  %v3661_v22 = vadd.f32 %v12256_v49, %v12418_v40 }
 0x89e   : > { %v8452_v59 = vor.u32 %v9288_v4, %v8449_v45  ;;  %v8417_v17 = vld [vmem:[%s13771_s5 + $0x50] sm:$0xf0]  ;;  %v8428_v11 = vor.u32 %v9281_v3, %v8425_v10  ;;  %v8400_v4 = vor.u32 %v9278_v5, %v8399_v44 }
 0x89f   : > { %v4975_v20 = vpack.c.bf16 %v4974_v28, %v4974_v28  ;;  %v8455_v28 = vld [vmem:[%s13771_s5 + $0x88] sm:$0xf]  ;;  %v8420_v41 = vor.u32 %v9280_v51, %v8417_v17  ;;  %v8401_v45 = vld [vmem:[%s13771_s5 + $0x30] sm:$0xf0]  ;;  %v3632_v17 = vadd.f32 %v12254_v9, %v12495_v30 }
 0x8a0   : > { %5508 = vmatpush.bf16.msrb.mxu1 %v8452_v59 }
 0x8a1   : > { %8248 = vst [vmem:[%s9803_s26 + $0xc] sm:$0xf] %v4975_v20  ;;  %5182 = vmatmul.bf16.vlgmr.msra.gmra.mxu0 %v4975_v20  ;;  %5195 = vmatmul.bf16.vlgmr.msra.gmra.mxu1 %v4975_v20 }
 0x8a2   : > { %5208 = vmatmul.bf16.vlgmr.msra.gmra.mxu2 %v4975_v20  ;;  %5221 = vmatmul.bf16.vlgmr.msra.gmra.mxu3 %v4975_v20  ;;  %v9291_v20 = vld [vmem:[%s13771_s5 + $0x94] sm:$0xf0] }
 0x8a3   : > { %v8456_v46 = vor.u32 %v9291_v20, %v8455_v28  ;;  %5495 = vmatpush.bf16.msrb.mxu0 %v8448_v31  ;;  %5535 = vmatpush.bf16.msrb.mxu3 %v8444_v25  ;;  %v9276_v31 = vld [vmem:[%s13771_s5 + $0x24] sm:$0xf]  ;;  %v8407_v28 = vld [vmem:[%s13771_s5 + $0x28] sm:$0xf] }
 0x8a4   : > { %5509 = vmatpush.bf16.msrb.mxu1 %v8436_v15  ;;  %v8404_v49 = vor.u32 %v9276_v31, %v8401_v45 }
 0x8a5   : > { %5521 = vmatpush.bf16.msrb.mxu2 %v8456_v46  ;;  %v9279_v46 = vld [vmem:[%s13771_s5 + $0x34] sm:$0xf0] }
 0x8a6   : > { %v8408_v0 = vor.u32 %v9279_v46, %v8407_v28 }
 0x8a7   : > { %5496 = vmatpush.bf16.msrb.mxu0 %v8432_v21  ;;  %5536 = vmatpush.bf16.msrb.mxu3 %v8428_v11  ;;  %v9274_v21 = vld [vmem:[%s13771_s5 + $0xc] sm:$0xf0] }
 0x8a8   : > { %5510 = vmatpush.bf16.msrb.mxu1 %v8420_v41 }
 0x8a9   : > { %5522 = vmatpush.bf16.msrb.mxu2 %v8440_v8  ;;  %v8388_v8 = vor.u32 %v9272_v1, %v8385_v38 }
 0x8ab   : > { %5497 = vmatpush.bf16.msrb.mxu0 %v8416_v52 }
 0x8ac   : > { %5511 = vmatpush.bf16.msrb.mxu1 %v8404_v49 }
 0x8ad   : > { %5523 = vmatpush.bf16.msrb.mxu2 %v8424_v7 }
 0x8af   : > { %5498 = vmatpush.bf16.msrb.mxu0 %v8400_v4 }
 0x8b0   : > { %5512 = vmatpush.bf16.msrb.mxu1 %v8388_v8 }
 0x8b1   : > { %5524 = vmatpush.bf16.msrb.mxu2 %v8408_v0 }
 0x91e   : > { %v5183_v23 = vpop.f32.mrf.mxu0  ;;  %v5196_v14 = vpop.f32.mrf.mxu1 }
 0x91f   : > { %v5226_v24 = vadd.f32 %v5183_v23, %v3574_v26  ;;  %v5227_v35 = vadd.f32 %v5196_v14, %v3603_v33  ;;  %v8412_v26 = vor.u32 %v9277_v27, %v8409_v53  ;;  %v8383_v33 = vld [vmem:[%s13771_s5] sm:$0xf]  ;;  %v8391_v23 = vld [vmem:[%s13771_s5 + $0x8] sm:$0xf]  ;;  %v9275_v14 = vld [vmem:[%s13771_s5 + $0x14] sm:$0xf0] }
 0x920   : > { %v8384_v16 = vor.u32 %v9274_v21, %v8383_v33 }
 0x921   : > { %v8377_v36 = vmul.f32 -1.442695, %v5226_v24  ;;  %v8378_v56 = vmul.f32 -1.442695, %v5227_v35  ;;  %v8392_v35 = vor.u32 %v9275_v14, %v8391_v23  ;;  %5537 = vmatpush.bf16.msrb.mxu3 %v8412_v26 }
 0x922   : > { %5499 = vmatpush.bf16.msrb.mxu0 %v8384_v16 }
 0x923   : > { %9584 = vpow2.f32 %v8377_v36  ;;  %5525 = vmatpush.bf16.msrb.mxu2 %v8392_v35 }
 0x924   : > { %9586 = vpow2.f32 %v8378_v56 }
 0x925   : > { %v5209_v20 = vpop.f32.mrf.mxu2  ;;  %v5222_v59 = vpop.f32.mrf.mxu3  ;;  %5538 = vmatpush.bf16.msrb.mxu3 %v8396_v39 }
 0x926   : > { %v5229_v55 = vadd.f32 %v5222_v59, %v3661_v22  ;;  %v5185_v47 = vpop.f32.mrf.mxu0  ;;  %v5198_v13 = vpop.f32.mrf.mxu1  ;;  %v5228_v54 = vadd.f32 %v5209_v20, %v3632_v17 }
 0x928   : > { %v8379_v15 = vmul.f32 -1.442695, %v5229_v55 }
 0x929   : > { %v9585_v24 = vpop.eup %9584 }
 0x92a   : > { %v9587_v25 = vpop.eup %9586  ;;  %v5233_v19 = vadd.f32 1.0, %v9585_v24  ;;  %9588 = vpow2.f32 %v8379_v15 }
 0x92b   : > { %v5252_v51 = vadd.f32 1.0, %v9587_v25  ;;  %v9334_v25 = vld [vmem:[%s13771_s5 + $0xec] sm:$0xf0] }
 0x92c   : > { %9590 = vrcp.f32 %v5233_v19  ;;  %v5245_v22 = vand.u32 2147483648, %v5233_v19  ;;  %v5243_v31 = vand.u32 2147483647, %v5233_v19  ;;  %vm5239_vm2 = vweird.f32 %v5233_v19 }
 0x92d   : > { %9592 = vrcp.f32 %v5252_v51  ;;  %v5211_v36 = vpop.f32.mrf.mxu2  ;;  %v5224_v56 = vpop.f32.mrf.mxu3  ;;  %v5264_v11 = vand.u32 2147483648, %v5252_v51  ;;  %v5262_v28 = vand.u32 2147483647, %v5252_v51  ;;  %vm5258_vm3 = vweird.f32 %v5252_v51 }
 0x92e   : > { %v5246_v20 = vor.u32 1.1754944e-38, %v5245_v22  ;;  %vm5244_vm6 = vcmp.eq.f32.partialorder %v5243_v31, 8.507059e+37  ;;  %v8635_v36 = vld [vmem:[%s13771_s5 + $0xe8] sm:$0xf]  ;;  %v9335_v56 = vld [vmem:[%s13771_s5 + $0xf4] sm:$0xf0] }
 0x92f   : > { %v5265_v27 = vor.u32 1.1754944e-38, %v5264_v11  ;;  %vm5263_vm7 = vcmp.eq.f32.partialorder %v5262_v28, 8.507059e+37  ;;  %v8636_v17 = vor.u32 %v9335_v56, %v8635_v36  ;;  %v8619_v22 = vld [vmem:[%s13771_s5 + $0xc8] sm:$0xf]  ;;  %v9331_v11 = vld [vmem:[%s13771_s5 + $0xd4] sm:$0xf0]  ;;  %v3605_v36 = vadd.f32 %v12260_v58, %v12359_v63 }
 0x930   : > { %v9589_v52 = vpop.eup %9588  ;;  %v8620_v31 = vor.u32 %v9331_v11, %v8619_v22  ;;  %v8621_v28 = vld [vmem:[%s13771_s5 + $0xd8] sm:$0xf0]  ;;  %v9317_v58 = vld [vmem:[%s13771_s5 + $0x6c] sm:$0xf]  ;;  %v8547_v22 = vld [vmem:[%s13771_s5 + $0x40] sm:$0xf] }
 0x931   : > { %v5272_v41 = vadd.f32 1.0, %v9589_v52  ;;  %5836 = vmatpush.bf16.msra.mxu2 %v8636_v17  ;;  %v8571_v17 = vld [vmem:[%s13771_s5 + $0x68] sm:$0xf]  ;;  %v9314_v11 = vld [vmem:[%s13771_s5 + $0x4c] sm:$0xf0] }
 0x932   : > { %v9591_v2 = vpop.eup %9590 }
 0x933   : > { %v9593_v3 = vpop.eup %9592  ;;  %v5235_v7 = vmul.f32 %v9591_v2, %v5233_v19  ;;  %9594 = vrcp.f32 %v5272_v41  ;;  %vm5240_vm0 = vweird.f32 %v9591_v2  ;;  %v5284_v23 = vand.u32 2147483648, %v5272_v41  ;;  %v9332_v19 = vld [vmem:[%s13771_s5 + $0xe4] sm:$0xf] }
 0x934   : > { %v5254_v10 = vmul.f32 %v9593_v3, %v5252_v51  ;;  %9596 = vtanh.f32 %v5228_v54  ;;  %vm5259_vm1 = vweird.f32 %v9593_v3  ;;  %vm5241_vm4 = vmor %vm5239_vm2, %vm5240_vm0  ;;  %vm5278_vm9 = vweird.f32 %v5272_v41  ;;  %v8629_v51 = vld [vmem:[%s13771_s5 + $0xf0] sm:$0xf0] }
 0x935   : > { %v5236_v44 = vsub.f32 1.0, %v5235_v7  ;;  %vm5260_vm5 = vmor %vm5258_vm3, %vm5259_vm1  ;;  %v5282_v14 = vand.u32 2147483647, %v5272_v41  ;;  %v5285_v8 = vor.u32 1.1754944e-38, %v5284_v23  ;;  %v8632_v52 = vor.u32 %v9332_v19, %v8629_v51  ;;  %v9330_v7 = vld [vmem:[%s13771_s5 + $0xcc] sm:$0xf0]  ;;  %5837 = vmatpush.bf16.msra.mxu2 %v8620_v31 }
 0x936   : > { %v5255_v5 = vsub.f32 1.0, %v5254_v10  ;;  %v9328_v10 = vld [vmem:[%s13771_s5 + $0xc4] sm:$0xf]  ;;  %v9318_v19 = vld [vmem:[%s13771_s5 + $0x6c] sm:$0xf0]  ;;  %v3576_v51 = vadd.f32 %v12258_v57, %v12356_v62 }
 0x937   : > { %v5237_v4 = vmul.f32 %v9591_v2, %v5236_v44  ;;  %vm5283_vm11 = vcmp.eq.f32.partialorder %v5282_v14, 8.507059e+37  ;;  %5823 = vmatpush.bf16.msra.mxu1 %v8632_v52  ;;  %v8581_v14 = vld [vmem:[%s13771_s5 + $0x90] sm:$0xf0] }
 0x938   : > { %v5256_v45 = vmul.f32 %v9593_v3, %v5255_v5  ;;  %v8613_v5 = vld [vmem:[%s13771_s5 + $0xd0] sm:$0xf0] }
 0x939   : > { %v9595_v59 = vpop.eup %9594  ;;  %v5238_v9 = vadd.f32 %v9591_v2, %v5237_v4  ;;  %v8616_v4 = vor.u32 %v9328_v10, %v8613_v5  ;;  %v8565_v52 = vld [vmem:[%s13771_s5 + $0x70] sm:$0xf0] }
 0x93a   : > { %v5257_v49 = vadd.f32 %v9593_v3, %v5256_v45  ;;  %v5274_v46 = vmul.f32 %v9595_v59, %v5272_v41  ;;  %v9597_v55 = vpop.eup %9596  ;;  %vm5279_vm8 = vweird.f32 %v9595_v59  ;;  %v9333_v41 = vld [vmem:[%s13771_s5 + $0xec] sm:$0xf] }
 0x93b   : > { %v5242_v53 = vsel %vm5241_vm4, %v9591_v2, %v5238_v9  ;;  %vm5280_vm10 = vmor %vm5278_vm9, %vm5279_vm8  ;;  %v8637_v2 = vld [vmem:[%s13771_s5 + $0xf8] sm:$0xf0]  ;;  %v9329_v45 = vld [vmem:[%s13771_s5 + $0xcc] sm:$0xf]  ;;  %5824 = vmatpush.bf16.msra.mxu1 %v8616_v4 }
 0x93c   : > { %v5247_v47 = vsel %vm5244_vm6, %v5246_v20, %v5242_v53  ;;  %v5261_v13 = vsel %vm5260_vm5, %v9593_v3, %v5257_v49  ;;  %v5275_v0 = vsub.f32 1.0, %v5274_v46  ;;  %v8640_v54 = vor.u32 %v9333_v41, %v8637_v2  ;;  %v8611_v3 = vld [vmem:[%s13771_s5 + $0xc0] sm:$0xf]  ;;  %v9326_v20 = vld [vmem:[%s13771_s5 + $0xac] sm:$0xf0] }
 0x93d   : > { %v5266_v26 = vsel %vm5263_vm7, %v5265_v27, %v5261_v13  ;;  %v5289_v33 = vmul.f32 %v9597_v55, %v5247_v47  ;;  %v8612_v44 = vor.u32 %v9330_v7, %v8611_v3  ;;  %v8595_v9 = vld [vmem:[%s13771_s5 + $0xa0] sm:$0xf]  ;;  %v9324_v49 = vld [vmem:[%s13771_s5 + $0xa4] sm:$0xf]  ;;  %v8597_v27 = vld [vmem:[%s13771_s5 + $0xb0] sm:$0xf0] }
 0x93e   : > { %v5288_v21 = vmul.f32 %v5266_v26, %v13114_v42  ;;  %v5276_v1 = vmul.f32 %v9595_v59, %v5275_v0  ;;  %v8627_v42 = vld [vmem:[%s13771_s5 + $0xe0] sm:$0xf]  ;;  %5849 = vmatpush.bf16.msra.mxu3 %v8640_v54  ;;  %v8596_v46 = vor.u32 %v9326_v20, %v8595_v9  ;;  %v8603_v53 = vld [vmem:[%s13771_s5 + $0xa8] sm:$0xf]  ;;  %v9327_v55 = vld [vmem:[%s13771_s5 + $0xb4] sm:$0xf0]  ;;  %v8600_v47 = vor.u32 %v9324_v49, %v8597_v27 }
 0x93f   : > { %v8628_v39 = vor.u32 %v9334_v25, %v8627_v42  ;;  %v8604_v13 = vor.u32 %v9327_v55, %v8603_v53  ;;  %v9325_v0 = vld [vmem:[%s13771_s5 + $0xac] sm:$0xf]  ;;  %v8605_v26 = vld [vmem:[%s13771_s5 + $0xb8] sm:$0xf0]  ;;  %v8563_v25 = vld [vmem:[%s13771_s5 + $0x60] sm:$0xf] }
 0x940   : > { %v13319_v16 = vadd.f32 %v5289_v33, %v5288_v21  ;;  %v5277_v38 = vadd.f32 %v9595_v59, %v5276_v1  ;;  %v8608_v33 = vor.u32 %v9325_v0, %v8605_v26  ;;  %5825 = vmatpush.bf16.msra.mxu1 %v8600_v47  ;;  %v8579_v21 = vld [vmem:[%s13771_s5 + $0x80] sm:$0xf]  ;;  %v9322_v1 = vld [vmem:[%s13771_s5 + $0x8c] sm:$0xf0]  ;;  %v8564_v56 = vor.u32 %v9318_v19, %v8563_v25  ;;  %v9319_v41 = vld [vmem:[%s13771_s5 + $0x74] sm:$0xf0] }
 0x941   : > { %5810 = vmatpush.bf16.msra.mxu0 %v8628_v39  ;;  %5838 = vmatpush.bf16.msra.mxu2 %v8604_v13  ;;  %v8580_v23 = vor.u32 %v9322_v1, %v8579_v21  ;;  %v9316_v39 = vld [vmem:[%s13771_s5 + $0x64] sm:$0xf]  ;;  %v8572_v3 = vor.u32 %v9319_v41, %v8571_v17  ;;  %v8573_v7 = vld [vmem:[%s13771_s5 + $0x78] sm:$0xf0]  ;;  %v8555_v20 = vld [vmem:[%s13771_s5 + $0x48] sm:$0xf]  ;;  %v3663_v13 = vadd.f32 %v12273_v34, %v12418_v40 }
 0x942   : > { %9598 = vtanh.f32 %v13319_v16  ;;  %v5281_v15 = vsel %vm5280_vm10, %v9595_v59, %v5277_v38  ;;  %v8624_v59 = vor.u32 %v9329_v45, %v8621_v28  ;;  %v9320_v38 = vld [vmem:[%s13771_s5 + $0x84] sm:$0xf]  ;;  %v8568_v57 = vor.u32 %v9316_v39, %v8565_v52  ;;  %v9315_v49 = vld [vmem:[%s13771_s5 + $0x54] sm:$0xf0]  ;;  %v8557_v53 = vld [vmem:[%s13771_s5 + $0x58] sm:$0xf0] }
 0x943   : > { %v5286_v48 = vsel %vm5283_vm11, %v5285_v8, %v5281_v15  ;;  %v8587_v15 = vld [vmem:[%s13771_s5 + $0x88] sm:$0xf]  ;;  %v9323_v8 = vld [vmem:[%s13771_s5 + $0x94] sm:$0xf0]  ;;  %v8576_v5 = vor.u32 %v9317_v58, %v8573_v7  ;;  %v9312_v4 = vld [vmem:[%s13771_s5 + $0x44] sm:$0xf]  ;;  %v8548_v28 = vor.u32 %v9314_v11, %v8547_v22  ;;  %v8556_v27 = vor.u32 %v9315_v49, %v8555_v20 }
 0x944   : > { %5850 = vmatpush.bf16.msra.mxu3 %v8624_v59  ;;  %v8549_v59 = vld [vmem:[%s13771_s5 + $0x50] sm:$0xf0]  ;;  %v8531_v55 = vld [vmem:[%s13771_s5 + $0x20] sm:$0xf]  ;;  %v9310_v47 = vld [vmem:[%s13771_s5 + $0x2c] sm:$0xf0] }
 0x945   : > { %5811 = vmatpush.bf16.msra.mxu0 %v8612_v44  ;;  %v8552_v9 = vor.u32 %v9312_v4, %v8549_v59  ;;  %v8532_v26 = vor.u32 %v9310_v47, %v8531_v55  ;;  %v8533_v21 = vld [vmem:[%s13771_s5 + $0x30] sm:$0xf0]  ;;  %v8539_v1 = vld [vmem:[%s13771_s5 + $0x28] sm:$0xf]  ;;  %v8515_v25 = vld [vmem:[%s13771_s5] sm:$0xf]  ;;  %v3634_v4 = vadd.f32 %v12271_v50, %v12495_v30 }
 0x946   : > { %v9306_v19 = vld [vmem:[%s13771_s5 + $0xc] sm:$0xf0]  ;;  %v9304_v39 = vld [vmem:[%s13771_s5 + $0x4] sm:$0xf]  ;;  %v9307_v52 = vld [vmem:[%s13771_s5 + $0x14] sm:$0xf0] }
 0x948   : > { %v9599_v43 = vpop.eup %9598  ;;  %5851 = vmatpush.bf16.msra.mxu3 %v8608_v33  ;;  %v9308_v33 = vld [vmem:[%s13771_s5 + $0x24] sm:$0xf] }
 0x949   : > { %v5292_v24 = vmul.f32 %v9599_v43, %v5286_v48  ;;  %5812 = vmatpush.bf16.msra.mxu0 %v8596_v46  ;;  %v8584_v43 = vor.u32 %v9320_v38, %v8581_v14  ;;  %v8588_v48 = vor.u32 %v9323_v8, %v8587_v15  ;;  %v9313_v46 = vld [vmem:[%s13771_s5 + $0x4c] sm:$0xf]  ;;  %v8536_v34 = vor.u32 %v9308_v33, %v8533_v21  ;;  %v9311_v14 = vld [vmem:[%s13771_s5 + $0x34] sm:$0xf0]  ;;  %v8541_v8 = vld [vmem:[%s13771_s5 + $0x38] sm:$0xf0] }
 0x94a   : > { %v8560_v0 = vor.u32 %v9313_v46, %v8557_v53  ;;  %v9309_v15 = vld [vmem:[%s13771_s5 + $0x2c] sm:$0xf] }
 0x94b   : > { %v5293_v35 = vpack.c.bf16 %v5292_v24, %v5292_v24  ;;  %v9321_v24 = vld [vmem:[%s13771_s5 + $0x8c] sm:$0xf]  ;;  %5826 = vmatpush.bf16.msra.mxu1 %v8584_v43  ;;  %5839 = vmatpush.bf16.msra.mxu2 %v8588_v48 }
 0x94d   : > { %8380 = vst [vmem:[%s9803_s26 + $0x10] sm:$0xf] %v5293_v35  ;;  %5500 = vmatmul.bf16.vlgmr.msrb.gmra.mxu0 %v5293_v35  ;;  %5513 = vmatmul.bf16.vlgmr.msrb.gmra.mxu1 %v5293_v35 }
 0x94e   : > { %5526 = vmatmul.bf16.vlgmr.msrb.gmra.mxu2 %v5293_v35  ;;  %5539 = vmatmul.bf16.vlgmr.msrb.gmra.mxu3 %v5293_v35  ;;  %v8589_v35 = vld [vmem:[%s13771_s5 + $0x98] sm:$0xf0] }
 0x94f   : > { %5813 = vmatpush.bf16.msra.mxu0 %v8580_v23  ;;  %v8592_v42 = vor.u32 %v9321_v24, %v8589_v35  ;;  %5827 = vmatpush.bf16.msra.mxu1 %v8568_v57  ;;  %v8540_v35 = vor.u32 %v9311_v14, %v8539_v1 }
 0x950   : > { %5840 = vmatpush.bf16.msra.mxu2 %v8572_v3 }
 0x951   : > { %5852 = vmatpush.bf16.msra.mxu3 %v8592_v42  ;;  %v8544_v42 = vor.u32 %v9309_v15, %v8541_v8 }
 0x953   : > { %5814 = vmatpush.bf16.msra.mxu0 %v8564_v56  ;;  %5828 = vmatpush.bf16.msra.mxu1 %v8552_v9  ;;  %v8523_v56 = vld [vmem:[%s13771_s5 + $0x8] sm:$0xf] }
 0x954   : > { %5841 = vmatpush.bf16.msra.mxu2 %v8556_v27  ;;  %v8524_v3 = vor.u32 %v9307_v52, %v8523_v56 }
 0x955   : > { %5853 = vmatpush.bf16.msra.mxu3 %v8576_v5 }
 0x957   : > { %5815 = vmatpush.bf16.msra.mxu0 %v8548_v28  ;;  %5829 = vmatpush.bf16.msra.mxu1 %v8536_v34 }
 0x958   : > { %5842 = vmatpush.bf16.msra.mxu2 %v8540_v35 }
 0x959   : > { %5854 = vmatpush.bf16.msra.mxu3 %v8560_v0 }
 0x95b   : > { %5816 = vmatpush.bf16.msra.mxu0 %v8532_v26 }
 0x95c   : > { %5843 = vmatpush.bf16.msra.mxu2 %v8524_v3  ;;  %v8761_v3 = vld [vmem:[%s13771_s5 + $0xf0] sm:$0xf0] }
 0x95d   : > { %5855 = vmatpush.bf16.msra.mxu3 %v8544_v42 }
 0x9ca   : > { %v5501_v2 = vpop.f32.mrf.mxu0  ;;  %v5514_v54 = vpop.f32.mrf.mxu1 }
 0x9cb   : > { %v5544_v10 = vadd.f32 %v5501_v2, %v3576_v51  ;;  %v5545_v44 = vadd.f32 %v5514_v54, %v3605_v36  ;;  %v8516_v51 = vor.u32 %v9306_v19, %v8515_v25  ;;  %v8517_v36 = vld [vmem:[%s13771_s5 + $0x10] sm:$0xf0]  ;;  %v9305_v2 = vld [vmem:[%s13771_s5 + $0xc] sm:$0xf]  ;;  %v8525_v54 = vld [vmem:[%s13771_s5 + $0x18] sm:$0xf0] }
 0x9cc   : > { %v8520_v41 = vor.u32 %v9304_v39, %v8517_v36 }
 0x9cd   : > { %v8509_v31 = vmul.f32 -1.442695, %v5544_v10  ;;  %v8510_v45 = vmul.f32 -1.442695, %v5545_v44  ;;  %v8528_v10 = vor.u32 %v9305_v2, %v8525_v54  ;;  %5817 = vmatpush.bf16.msra.mxu0 %v8516_v51  ;;  %v9366_v2 = vld [vmem:[%s13771_s5 + $0xec] sm:$0xf0] }
 0x9ce   : > { %5830 = vmatpush.bf16.msra.mxu1 %v8520_v41  ;;  %v9364_v54 = vld [vmem:[%s13771_s5 + $0xe4] sm:$0xf] }
 0x9cf   : > { %9600 = vpow2.f32 %v8509_v31  ;;  %5856 = vmatpush.bf16.msra.mxu3 %v8528_v10  ;;  %v8764_v10 = vor.u32 %v9364_v54, %v8761_v3  ;;  %v8703_v3 = vld [vmem:[%s13771_s5 + $0x68] sm:$0xf] }
 0x9d0   : > { %9602 = vpow2.f32 %v8510_v45 }
 0x9d1   : > { %v5527_v38 = vpop.f32.mrf.mxu2  ;;  %v5540_v23 = vpop.f32.mrf.mxu3 }
 0x9d2   : > { %v5547_v43 = vadd.f32 %v5540_v23, %v3663_v13  ;;  %v5503_v48 = vpop.f32.mrf.mxu0  ;;  %v5516_v24 = vpop.f32.mrf.mxu1  ;;  %v5546_v28 = vadd.f32 %v5527_v38, %v3634_v4  ;;  %6141 = vmatpush.bf16.msrb.mxu1 %v8764_v10  ;;  %v8743_v4 = vld [vmem:[%s13771_s5 + $0xc0] sm:$0xf] }
 0x9d4   : > { %v8511_v17 = vmul.f32 -1.442695, %v5547_v43 }
 0x9d5   : > { %v9601_v57 = vpop.eup %9600 }
 0x9d6   : > { %v9603_v58 = vpop.eup %9602  ;;  %v5551_v7 = vadd.f32 1.0, %v9601_v57  ;;  %9604 = vpow2.f32 %v8511_v17 }
 0x9d7   : > { %v5570_v44 = vadd.f32 1.0, %v9603_v58  ;;  %v8767_v58 = vld [vmem:[%s13771_s5 + $0xe8] sm:$0xf] }
 0x9d8   : > { %9606 = vrcp.f32 %v5551_v7  ;;  %v5563_v27 = vand.u32 2147483648, %v5551_v7  ;;  %v5561_v47 = vand.u32 2147483647, %v5551_v7  ;;  %vm5557_vm14 = vweird.f32 %v5551_v7 }
 0x9d9   : > { %9608 = vrcp.f32 %v5570_v44  ;;  %v5529_v5 = vpop.f32.mrf.mxu2  ;;  %v5542_v22 = vpop.f32.mrf.mxu3  ;;  %v5582_v53 = vand.u32 2147483648, %v5570_v44  ;;  %v5580_v0 = vand.u32 2147483647, %v5570_v44  ;;  %vm5576_vm15 = vweird.f32 %v5570_v44 }
 0x9da   : > { %v5564_v33 = vor.u32 1.1754944e-38, %v5563_v27  ;;  %vm5562_vm2 = vcmp.eq.f32.partialorder %v5561_v47, 8.507059e+37  ;;  %v9365_v5 = vld [vmem:[%s13771_s5 + $0xec] sm:$0xf]  ;;  %v8769_v22 = vld [vmem:[%s13771_s5 + $0xf8] sm:$0xf0] }
 0x9db   : > { %v5583_v38 = vor.u32 1.1754944e-38, %v5582_v53  ;;  %vm5581_vm3 = vcmp.eq.f32.partialorder %v5580_v0, 8.507059e+37  ;;  %v9361_v27 = vld [vmem:[%s13771_s5 + $0xcc] sm:$0xf]  ;;  %v8753_v53 = vld [vmem:[%s13771_s5 + $0xd8] sm:$0xf0] }
 0x9dc   : > { %v9605_v11 = vpop.eup %9604  ;;  %v8727_v47 = vld [vmem:[%s13771_s5 + $0xa0] sm:$0xf]  ;;  %v9356_v0 = vld [vmem:[%s13771_s5 + $0xa4] sm:$0xf] }
 0x9dd   : > { %v5590_v31 = vadd.f32 1.0, %v9605_v11  ;;  %v8772_v11 = vor.u32 %v9365_v5, %v8769_v22  ;;  %v8705_v5 = vld [vmem:[%s13771_s5 + $0x78] sm:$0xf0] }
 0x9de   : > { %v9607_v45 = vpop.eup %9606 }
 0x9df   : > { %v9609_v59 = vpop.eup %9608  ;;  %v5553_v9 = vmul.f32 %v9607_v45, %v5551_v7  ;;  %9610 = vrcp.f32 %v5590_v31  ;;  %vm5558_vm12 = vweird.f32 %v9607_v45  ;;  %v5602_v19 = vand.u32 2147483648, %v5590_v31  ;;  %v9367_v7 = vld [vmem:[%s13771_s5 + $0xf4] sm:$0xf0]  ;;  %6167 = vmatpush.bf16.msrb.mxu3 %v8772_v11 }
 0x9e0   : > { %v5572_v20 = vmul.f32 %v9609_v59, %v5570_v44  ;;  %9612 = vtanh.f32 %v5546_v28  ;;  %vm5577_vm13 = vweird.f32 %v9609_v59  ;;  %vm5559_vm0 = vmor %vm5557_vm14, %vm5558_vm12  ;;  %vm5596_vm5 = vweird.f32 %v5590_v31 }
 0x9e1   : > { %v5554_v49 = vsub.f32 1.0, %v5553_v9  ;;  %vm5578_vm1 = vmor %vm5576_vm15, %vm5577_vm13  ;;  %v5600_v39 = vand.u32 2147483647, %v5590_v31  ;;  %v5603_v36 = vor.u32 1.1754944e-38, %v5602_v19  ;;  %v8768_v44 = vor.u32 %v9367_v7, %v8767_v58  ;;  %v8751_v9 = vld [vmem:[%s13771_s5 + $0xc8] sm:$0xf] }
 0x9e2   : > { %v5573_v46 = vsub.f32 1.0, %v5572_v20  ;;  %v9363_v20 = vld [vmem:[%s13771_s5 + $0xd4] sm:$0xf0] }
 0x9e3   : > { %v5555_v55 = vmul.f32 %v9607_v45, %v5554_v49  ;;  %vm5601_vm7 = vcmp.eq.f32.partialorder %v5600_v39, 8.507059e+37  ;;  %6154 = vmatpush.bf16.msrb.mxu2 %v8768_v44  ;;  %v9351_v58 = vld [vmem:[%s13771_s5 + $0x74] sm:$0xf0] }
 0x9e4   : > { %v5574_v13 = vmul.f32 %v9609_v59, %v5573_v46  ;;  %v8752_v46 = vor.u32 %v9363_v20, %v8751_v9  ;;  %v8704_v44 = vor.u32 %v9351_v58, %v8703_v3 }
 0x9e5   : > { %v9611_v26 = vpop.eup %9610  ;;  %v5556_v50 = vadd.f32 %v9607_v45, %v5555_v55  ;;  %v8756_v55 = vor.u32 %v9361_v27, %v8753_v53  ;;  %v8687_v27 = vld [vmem:[%s13771_s5 + $0x48] sm:$0xf]  ;;  %v9347_v53 = vld [vmem:[%s13771_s5 + $0x54] sm:$0xf0] }
 0x9e6   : > { %v5575_v21 = vadd.f32 %v9609_v59, %v5574_v13  ;;  %v5592_v1 = vmul.f32 %v9611_v26, %v5590_v31  ;;  %v9613_v34 = vpop.eup %9612  ;;  %vm5597_vm4 = vweird.f32 %v9611_v26  ;;  %v9362_v31 = vld [vmem:[%s13771_s5 + $0xcc] sm:$0xf0] }
 0x9e7   : > { %v5560_v23 = vsel %vm5559_vm0, %v9607_v45, %v5556_v50  ;;  %vm5598_vm6 = vmor %vm5596_vm5, %vm5597_vm4  ;;  %v9360_v45 = vld [vmem:[%s13771_s5 + $0xc4] sm:$0xf]  ;;  %v8744_v28 = vor.u32 %v9362_v31, %v8743_v4  ;;  %6155 = vmatpush.bf16.msrb.mxu2 %v8752_v46  ;;  %v9358_v13 = vld [vmem:[%s13771_s5 + $0xac] sm:$0xf0]  ;;  %6168 = vmatpush.bf16.msrb.mxu3 %v8756_v55 }
 0x9e8   : > { %v5565_v14 = vsel %vm5562_vm2, %v5564_v33, %v5560_v23  ;;  %v5579_v15 = vsel %vm5578_vm1, %v9609_v59, %v5575_v21  ;;  %v5593_v8 = vsub.f32 1.0, %v5592_v1  ;;  %v8745_v59 = vld [vmem:[%s13771_s5 + $0xd0] sm:$0xf0]  ;;  %v8735_v33 = vld [vmem:[%s13771_s5 + $0xa8] sm:$0xf] }
 0x9e9   : > { %v5584_v43 = vsel %vm5581_vm3, %v5583_v38, %v5579_v15  ;;  %v5607_v48 = vmul.f32 %v9613_v34, %v5565_v14  ;;  %v8748_v49 = vor.u32 %v9360_v45, %v8745_v59  ;;  %v8729_v50 = vld [vmem:[%s13771_s5 + $0xb0] sm:$0xf0]  ;;  %v9359_v21 = vld [vmem:[%s13771_s5 + $0xb4] sm:$0xf0]  ;;  %v9357_v23 = vld [vmem:[%s13771_s5 + $0xac] sm:$0xf] }
 0x9ea   : > { %v5606_v24 = vmul.f32 %v5584_v43, %v13319_v16  ;;  %v5594_v35 = vmul.f32 %v9611_v26, %v5593_v8  ;;  %v8759_v16 = vld [vmem:[%s13771_s5 + $0xe0] sm:$0xf]  ;;  %v8732_v1 = vor.u32 %v9356_v0, %v8729_v50  ;;  %v8736_v38 = vor.u32 %v9359_v21, %v8735_v33  ;;  %v8737_v34 = vld [vmem:[%s13771_s5 + $0xb8] sm:$0xf0]  ;;  %v9354_v8 = vld [vmem:[%s13771_s5 + $0x8c] sm:$0xf0] }
 0x9eb   : > { %v8760_v57 = vor.u32 %v9366_v2, %v8759_v16  ;;  %6142 = vmatpush.bf16.msrb.mxu1 %v8748_v49  ;;  %v8740_v14 = vor.u32 %v9357_v23, %v8737_v34  ;;  %v8711_v15 = vld [vmem:[%s13771_s5 + $0x80] sm:$0xf]  ;;  %v9352_v43 = vld [vmem:[%s13771_s5 + $0x84] sm:$0xf]  ;;  %v3579_v16 = vadd.f32 %v12284_v60, %v12356_v62  ;;  %v3608_v2 = vadd.f32 %v12286_v12, %v12359_v63  ;;  %v9349_v12 = vld [vmem:[%s13771_s5 + $0x6c] sm:$0xf] }
 0x9ec   : > { %v13524_v42 = vadd.f32 %v5607_v48, %v5606_v24  ;;  %v5595_v25 = vadd.f32 %v9611_v26, %v5594_v35  ;;  %6156 = vmatpush.bf16.msrb.mxu2 %v8736_v38  ;;  %v8712_v48 = vor.u32 %v9354_v8, %v8711_v15  ;;  %v8713_v24 = vld [vmem:[%s13771_s5 + $0x90] sm:$0xf0]  ;;  %v8719_v35 = vld [vmem:[%s13771_s5 + $0x88] sm:$0xf]  ;;  %v8708_v4 = vor.u32 %v9349_v12, %v8705_v5  ;;  %v8679_v31 = vld [vmem:[%s13771_s5 + $0x40] sm:$0xf] }
 0x9ed   : > { %6128 = vmatpush.bf16.msrb.mxu0 %v8760_v57  ;;  %6169 = vmatpush.bf16.msrb.mxu3 %v8740_v14  ;;  %v8716_v19 = vor.u32 %v9352_v43, %v8713_v24  ;;  %v8697_v57 = vld [vmem:[%s13771_s5 + $0x70] sm:$0xf0]  ;;  %v9346_v45 = vld [vmem:[%s13771_s5 + $0x4c] sm:$0xf0]  ;;  %v9345_v55 = vld [vmem:[%s13771_s5 + $0x4c] sm:$0xf]  ;;  %v3666_v50 = vadd.f32 %v12334_v6, %v12418_v40 }
 0x9ee   : > { %9614 = vtanh.f32 %v13524_v42  ;;  %v5599_v51 = vsel %vm5598_vm6, %v9611_v26, %v5595_v25  ;;  %v8728_v26 = vor.u32 %v9358_v13, %v8727_v47  ;;  %v9355_v25 = vld [vmem:[%s13771_s5 + $0x94] sm:$0xf0]  ;;  %v8680_v20 = vor.u32 %v9346_v45, %v8679_v31  ;;  %v8681_v49 = vld [vmem:[%s13771_s5 + $0x50] sm:$0xf0]  ;;  %v8689_v13 = vld [vmem:[%s13771_s5 + $0x58] sm:$0xf0] }
 0x9ef   : > { %v5604_v52 = vsel %vm5601_vm7, %v5603_v36, %v5599_v51  ;;  %6143 = vmatpush.bf16.msrb.mxu1 %v8732_v1  ;;  %v8720_v39 = vor.u32 %v9355_v25, %v8719_v35  ;;  %v9353_v51 = vld [vmem:[%s13771_s5 + $0x8c] sm:$0xf]  ;;  %v8721_v36 = vld [vmem:[%s13771_s5 + $0x98] sm:$0xf0]  ;;  %v8688_v47 = vor.u32 %v9347_v53, %v8687_v27  ;;  %v8663_v0 = vld [vmem:[%s13771_s5 + $0x20] sm:$0xf]  ;;  %v8692_v33 = vor.u32 %v9345_v55, %v8689_v13 }
 0x9f0   : > { %v9340_v1 = vld [vmem:[%s13771_s5 + $0x24] sm:$0xf]  ;;  %v8665_v38 = vld [vmem:[%s13771_s5 + $0x30] sm:$0xf0]  ;;  %v8671_v23 = vld [vmem:[%s13771_s5 + $0x28] sm:$0xf] }
 0x9f1   : > { %6129 = vmatpush.bf16.msrb.mxu0 %v8744_v28  ;;  %6157 = vmatpush.bf16.msrb.mxu2 %v8720_v39  ;;  %v9344_v28 = vld [vmem:[%s13771_s5 + $0x44] sm:$0xf]  ;;  %v8668_v6 = vor.u32 %v9340_v1, %v8665_v38  ;;  %v9343_v15 = vld [vmem:[%s13771_s5 + $0x34] sm:$0xf0]  ;;  %v9341_v8 = vld [vmem:[%s13771_s5 + $0x2c] sm:$0xf] }
 0x9f2   : > { %v8684_v46 = vor.u32 %v9344_v28, %v8681_v49  ;;  %v8673_v43 = vld [vmem:[%s13771_s5 + $0x38] sm:$0xf0]  ;;  %v8672_v25 = vor.u32 %v9343_v15, %v8671_v23  ;;  %v8647_v39 = vld [vmem:[%s13771_s5] sm:$0xf] }
 0x9f3   : > { %6144 = vmatpush.bf16.msrb.mxu1 %v8716_v19  ;;  %v8676_v19 = vor.u32 %v9341_v8, %v8673_v43 }
 0x9f4   : > { %v9615_v56 = vpop.eup %9614 }
 0x9f5   : > { %v5610_v17 = vmul.f32 %v9615_v56, %v5604_v52  ;;  %6130 = vmatpush.bf16.msrb.mxu0 %v8728_v26  ;;  %v8724_v56 = vor.u32 %v9353_v51, %v8721_v36  ;;  %v8695_v52 = vld [vmem:[%s13771_s5 + $0x60] sm:$0xf]  ;;  %6158 = vmatpush.bf16.msrb.mxu2 %v8704_v44  ;;  %v9342_v26 = vld [vmem:[%s13771_s5 + $0x2c] sm:$0xf0]  ;;  %v9336_v36 = vld [vmem:[%s13771_s5 + $0x4] sm:$0xf] }
 0x9f6   : > { %v8664_v21 = vor.u32 %v9342_v26, %v8663_v0  ;;  %v9338_v51 = vld [vmem:[%s13771_s5 + $0xc] sm:$0xf0] }
 0x9f7   : > { %v5611_v41 = vpack.c.bf16 %v5610_v17, %v5610_v17  ;;  %v9350_v17 = vld [vmem:[%s13771_s5 + $0x6c] sm:$0xf0]  ;;  %6170 = vmatpush.bf16.msrb.mxu3 %v8724_v56  ;;  %v8648_v56 = vor.u32 %v9338_v51, %v8647_v39 }
 0x9f8   : > { %v8696_v54 = vor.u32 %v9350_v17, %v8695_v52  ;;  %v8649_v52 = vld [vmem:[%s13771_s5 + $0x10] sm:$0xf0]  ;;  %v8655_v17 = vld [vmem:[%s13771_s5 + $0x8] sm:$0xf] }
 0x9f9   : > { %8512 = vst [vmem:[%s9803_s26 + $0x14] sm:$0xf] %v5611_v41  ;;  %5818 = vmatmul.bf16.vlgmr.msra.gmra.mxu0 %v5611_v41  ;;  %5831 = vmatmul.bf16.vlgmr.msra.gmra.mxu1 %v5611_v41 }
 0x9fa   : > { %5844 = vmatmul.bf16.vlgmr.msra.gmra.mxu2 %v5611_v41  ;;  %5857 = vmatmul.bf16.vlgmr.msra.gmra.mxu3 %v5611_v41  ;;  %v9348_v41 = vld [vmem:[%s13771_s5 + $0x64] sm:$0xf] }
 0x9fb   : > { %6131 = vmatpush.bf16.msrb.mxu0 %v8712_v48  ;;  %v8700_v60 = vor.u32 %v9348_v41, %v8697_v57  ;;  %6171 = vmatpush.bf16.msrb.mxu3 %v8708_v4  ;;  %v9339_v41 = vld [vmem:[%s13771_s5 + $0x14] sm:$0xf0]  ;;  %v8657_v57 = vld [vmem:[%s13771_s5 + $0x18] sm:$0xf0] }
 0x9fc   : > { %6159 = vmatpush.bf16.msrb.mxu2 %v8688_v47  ;;  %v8656_v58 = vor.u32 %v9339_v41, %v8655_v17  ;;  %v3610_v17 = vadd.f32 %v12347_v37, %v12359_v63 }
 0x9fd   : > { %6145 = vmatpush.bf16.msrb.mxu1 %v8700_v60 }
 0x9ff   : > { %6132 = vmatpush.bf16.msrb.mxu0 %v8696_v54  ;;  %6172 = vmatpush.bf16.msrb.mxu3 %v8692_v33  ;;  %v9337_v54 = vld [vmem:[%s13771_s5 + $0xc] sm:$0xf] }
 0xa00   : > { %6160 = vmatpush.bf16.msrb.mxu2 %v8672_v25  ;;  %v8660_v60 = vor.u32 %v9337_v54, %v8657_v57 }
 0xa01   : > { %6146 = vmatpush.bf16.msrb.mxu1 %v8684_v46 }
 0xa03   : > { %6133 = vmatpush.bf16.msrb.mxu0 %v8680_v20  ;;  %6173 = vmatpush.bf16.msrb.mxu3 %v8676_v19 }
 0xa04   : > { %6161 = vmatpush.bf16.msrb.mxu2 %v8656_v58  ;;  %v3668_v58 = vadd.f32 %v12400_v61, %v12418_v40  ;;  %v3639_v61 = vadd.f32 %v12398_v18, %v12495_v30 }
 0xa05   : > { %6147 = vmatpush.bf16.msrb.mxu1 %v8668_v6 }
 0xa07   : > { %6134 = vmatpush.bf16.msrb.mxu0 %v8664_v21  ;;  %6174 = vmatpush.bf16.msrb.mxu3 %v8660_v60 }
 0xa0b   : > { %6135 = vmatpush.bf16.msrb.mxu0 %v8648_v56 }
 0xa76   : > { %v5819_v7 = vpop.f32.mrf.mxu0  ;;  %v5832_v10 = vpop.f32.mrf.mxu1 }
 0xa77   : > { %v5862_v22 = vadd.f32 %v5819_v7, %v3579_v16  ;;  %v5863_v11 = vadd.f32 %v5832_v10, %v3608_v2  ;;  %v8652_v2 = vor.u32 %v9336_v36, %v8649_v52 }
 0xa79   : > { %v8641_v59 = vmul.f32 -1.442695, %v5862_v22  ;;  %v8642_v9 = vmul.f32 -1.442695, %v5863_v11  ;;  %6148 = vmatpush.bf16.msrb.mxu1 %v8652_v2  ;;  %v3637_v11 = vadd.f32 %v12332_v32, %v12495_v30 }
 0xa7b   : > { %9616 = vpow2.f32 %v8641_v59 }
 0xa7c   : > { %9618 = vpow2.f32 %v8642_v9 }
 0xa7d   : > { %v5845_v34 = vpop.f32.mrf.mxu2  ;;  %v5858_v14 = vpop.f32.mrf.mxu3 }
 0xa7e   : > { %v5865_v48 = vadd.f32 %v5858_v14, %v3666_v50  ;;  %v5821_v24 = vpop.f32.mrf.mxu0  ;;  %v5834_v35 = vpop.f32.mrf.mxu1  ;;  %v5864_v45 = vadd.f32 %v5845_v34, %v3637_v11 }
 0xa80   : > { %v8643_v16 = vmul.f32 -1.442695, %v5865_v48 }
 0xa81   : > { %v9617_v3 = vpop.eup %9616 }
 0xa82   : > { %v9619_v7 = vpop.eup %9618  ;;  %v5869_v10 = vadd.f32 1.0, %v9617_v3  ;;  %9620 = vpow2.f32 %v8643_v16 }
 0xa83   : > { %v5888_v44 = vadd.f32 1.0, %v9619_v7 }
 0xa84   : > { %9622 = vrcp.f32 %v5869_v10  ;;  %v5881_v46 = vand.u32 2147483648, %v5869_v10  ;;  %v5879_v55 = vand.u32 2147483647, %v5869_v10  ;;  %vm5875_vm10 = vweird.f32 %v5869_v10 }
 0xa85   : > { %9624 = vrcp.f32 %v5888_v44  ;;  %v5847_v12 = vpop.f32.mrf.mxu2  ;;  %v5860_v5 = vpop.f32.mrf.mxu3  ;;  %v5900_v27 = vand.u32 2147483648, %v5888_v44  ;;  %v5898_v13 = vand.u32 2147483647, %v5888_v44  ;;  %vm5894_vm11 = vweird.f32 %v5888_v44 }
 0xa86   : > { %v5882_v26 = vor.u32 1.1754944e-38, %v5881_v46  ;;  %vm5880_vm14 = vcmp.eq.f32.partialorder %v5879_v55, 8.507059e+37 }
 0xa87   : > { %v5901_v21 = vor.u32 1.1754944e-38, %v5900_v27  ;;  %vm5899_vm15 = vcmp.eq.f32.partialorder %v5898_v13, 8.507059e+37 }
 0xa88   : > { %v9621_v22 = vpop.eup %9620 }
 0xa89   : > { %v5908_v4 = vadd.f32 1.0, %v9621_v22 }
 0xa8a   : > { %v9623_v31 = vpop.eup %9622 }
 0xa8b   : > { %v9625_v28 = vpop.eup %9624  ;;  %v5871_v59 = vmul.f32 %v9623_v31, %v5869_v10  ;;  %9626 = vrcp.f32 %v5908_v4  ;;  %vm5876_vm8 = vweird.f32 %v9623_v31  ;;  %v5920_v35 = vand.u32 2147483648, %v5908_v4 }
 0xa8c   : > { %v5890_v9 = vmul.f32 %v9625_v28, %v5888_v44  ;;  %9628 = vtanh.f32 %v5864_v45  ;;  %vm5895_vm9 = vweird.f32 %v9625_v28  ;;  %vm5877_vm12 = vmor %vm5875_vm10, %vm5876_vm8  ;;  %vm5914_vm1 = vweird.f32 %v5908_v4 }
 0xa8d   : > { %v5872_v20 = vsub.f32 1.0, %v5871_v59  ;;  %vm5896_vm13 = vmor %vm5894_vm11, %vm5895_vm9  ;;  %v5918_v25 = vand.u32 2147483647, %v5908_v4  ;;  %v5921_v39 = vor.u32 1.1754944e-38, %v5920_v35 }
 0xa8e   : > { %v5891_v49 = vsub.f32 1.0, %v5890_v9 }
 0xa8f   : > { %v5873_v53 = vmul.f32 %v9623_v31, %v5872_v20  ;;  %vm5919_vm3 = vcmp.eq.f32.partialorder %v5918_v25, 8.507059e+37 }
 0xa90   : > { %v5892_v47 = vmul.f32 %v9625_v28, %v5891_v49 }
 0xa91   : > { %v9627_v0 = vpop.eup %9626  ;;  %v5874_v32 = vadd.f32 %v9623_v31, %v5873_v53 }
 0xa92   : > { %v5893_v50 = vadd.f32 %v9625_v28, %v5892_v47  ;;  %v5910_v33 = vmul.f32 %v9627_v0, %v5908_v4  ;;  %v9629_v38 = vpop.eup %9628  ;;  %vm5915_vm0 = vweird.f32 %v9627_v0 }
 0xa93   : > { %v5878_v1 = vsel %vm5877_vm12, %v9623_v31, %v5874_v32  ;;  %vm5916_vm2 = vmor %vm5914_vm1, %vm5915_vm0 }
 0xa94   : > { %v5883_v23 = vsel %vm5880_vm14, %v5882_v26, %v5878_v1  ;;  %v5897_v34 = vsel %vm5896_vm13, %v9625_v28, %v5893_v50  ;;  %v5911_v14 = vsub.f32 1.0, %v5910_v33 }
 0xa95   : > { %v5902_v6 = vsel %vm5899_vm15, %v5901_v21, %v5897_v34  ;;  %v5925_v15 = vmul.f32 %v9629_v38, %v5883_v23 }
 0xa96   : > { %v5924_v8 = vmul.f32 %v5902_v6, %v13524_v42  ;;  %v5912_v43 = vmul.f32 %v9627_v0, %v5911_v14  ;;  %v3581_v42 = vadd.f32 %v12345_v29, %v12356_v62 }
 0xa98   : > { %v13729_v48 = vadd.f32 %v5925_v15, %v5924_v8  ;;  %v5913_v24 = vadd.f32 %v9627_v0, %v5912_v43 }
 0xa9a   : > { %9630 = vtanh.f32 %v13729_v48  ;;  %v5917_v19 = vsel %vm5916_vm2, %v9627_v0, %v5913_v24 }
 0xa9b   : > { %v5922_v36 = vsel %vm5919_vm3, %v5921_v39, %v5917_v19 }
 0xaa0   : > { %v9631_v51 = vpop.eup %9630 }
 0xaa1   : > { %v5928_v56 = vmul.f32 %v9631_v51, %v5922_v36 }
 0xaa3   : > { %v5929_v52 = vpack.c.bf16 %v5928_v56, %v5928_v56 }
 0xaa5   : > { %8644 = vst [vmem:[%s9803_s26 + $0x18] sm:$0xf] %v5929_v52  ;;  %6136 = vmatmul.bf16.vlgmr.msrb.gmra.mxu0 %v5929_v52  ;;  %6149 = vmatmul.bf16.vlgmr.msrb.gmra.mxu1 %v5929_v52 }
 0xaa6   : > { %6162 = vmatmul.bf16.vlgmr.msrb.gmra.mxu2 %v5929_v52  ;;  %6175 = vmatmul.bf16.vlgmr.msrb.gmra.mxu3 %v5929_v52 }
 0xb22   : > { %v6137_v41 = vpop.f32.mrf.mxu0  ;;  %v6150_v16 = vpop.f32.mrf.mxu1 }
 0xb23   : > { %v6180_v2 = vadd.f32 %v6137_v41, %v3581_v42  ;;  %v6181_v54 = vadd.f32 %v6150_v16, %v3610_v17 }
 0xb25   : > { %v8773_v57 = vmul.f32 -1.442695, %v6180_v2  ;;  %v8774_v3 = vmul.f32 -1.442695, %v6181_v54 }
 0xb27   : > { %9632 = vpow2.f32 %v8773_v57 }
 0xb28   : > { %9634 = vpow2.f32 %v8774_v3 }
 0xb29   : > { %v6163_v7 = vpop.f32.mrf.mxu2  ;;  %v6176_v10 = vpop.f32.mrf.mxu3 }
 0xb2a   : > { %v6183_v60 = vadd.f32 %v6176_v10, %v3668_v58  ;;  %v6139_v44 = vpop.f32.mrf.mxu0  ;;  %v6152_v12 = vpop.f32.mrf.mxu1  ;;  %v6182_v45 = vadd.f32 %v6163_v7, %v3639_v61 }
 0xb2c   : > { %v8775_v29 = vmul.f32 -1.442695, %v6183_v60 }
 0xb2d   : > { %v9633_v62 = vpop.eup %9632 }
 0xb2e   : > { %v9635_v5 = vpop.eup %9634  ;;  %v6187_v37 = vadd.f32 1.0, %v9633_v62  ;;  %9636 = vpow2.f32 %v8775_v29 }
 0xb2f   : > { %v6206_v63 = vadd.f32 1.0, %v9635_v5 }
 0xb30   : > { %9638 = vrcp.f32 %v6187_v37  ;;  %v6199_v46 = vand.u32 2147483648, %v6187_v37  ;;  %v6197_v55 = vand.u32 2147483647, %v6187_v37  ;;  %vm6193_vm6 = vweird.f32 %v6187_v37 }
 0xb31   : > { %9640 = vrcp.f32 %v6206_v63  ;;  %v6165_v22 = vpop.f32.mrf.mxu2  ;;  %v6178_v11 = vpop.f32.mrf.mxu3  ;;  %v6218_v27 = vand.u32 2147483648, %v6206_v63  ;;  %v6216_v13 = vand.u32 2147483647, %v6206_v63  ;;  %vm6212_vm7 = vweird.f32 %v6206_v63 }
 0xb32   : > { %v6200_v30 = vor.u32 1.1754944e-38, %v6199_v46  ;;  %vm6198_vm10 = vcmp.eq.f32.partialorder %v6197_v55, 8.507059e+37 }
 0xb33   : > { %v6219_v50 = vor.u32 1.1754944e-38, %v6218_v27  ;;  %vm6217_vm11 = vcmp.eq.f32.partialorder %v6216_v13, 8.507059e+37 }
 0xb34   : > { %v9637_v4 = vpop.eup %9636 }
 0xb35   : > { %v6226_v40 = vadd.f32 1.0, %v9637_v4 }
 0xb36   : > { %v9639_v31 = vpop.eup %9638 }
 0xb37   : > { %v9641_v28 = vpop.eup %9640  ;;  %v6189_v59 = vmul.f32 %v9639_v31, %v6187_v37  ;;  %9642 = vrcp.f32 %v6226_v40  ;;  %vm6194_vm4 = vweird.f32 %v9639_v31  ;;  %v6238_v24 = vand.u32 2147483648, %v6226_v40 }
 0xb38   : > { %v6208_v9 = vmul.f32 %v9641_v28, %v6206_v63  ;;  %9644 = vtanh.f32 %v6182_v45  ;;  %vm6213_vm5 = vweird.f32 %v9641_v28  ;;  %vm6195_vm8 = vmor %vm6193_vm6, %vm6194_vm4  ;;  %vm6232_vm13 = vweird.f32 %v6226_v40 }
 0xb39   : > { %v6190_v20 = vsub.f32 1.0, %v6189_v59  ;;  %vm6214_vm9 = vmor %vm6212_vm7, %vm6213_vm5  ;;  %v6236_v35 = vand.u32 2147483647, %v6226_v40  ;;  %v6239_v19 = vor.u32 1.1754944e-38, %v6238_v24 }
 0xb3a   : > { %v6209_v49 = vsub.f32 1.0, %v6208_v9 }
 0xb3b   : > { %v6191_v53 = vmul.f32 %v9639_v31, %v6190_v20  ;;  %vm6237_vm15 = vcmp.eq.f32.partialorder %v6236_v35, 8.507059e+37 }
 0xb3c   : > { %v6210_v47 = vmul.f32 %v9641_v28, %v6209_v49 }
 0xb3d   : > { %v9643_v0 = vpop.eup %9642  ;;  %v6192_v18 = vadd.f32 %v9639_v31, %v6191_v53 }
 0xb3e   : > { %v6211_v32 = vadd.f32 %v9641_v28, %v6210_v47  ;;  %v6228_v26 = vmul.f32 %v9643_v0, %v6226_v40  ;;  %v9645_v21 = vpop.eup %9644  ;;  %vm6233_vm12 = vweird.f32 %v9643_v0 }
 0xb3f   : > { %v6196_v33 = vsel %vm6195_vm8, %v9639_v31, %v6192_v18  ;;  %vm6234_vm14 = vmor %vm6232_vm13, %vm6233_vm12 }
 0xb40   : > { %v6201_v1 = vsel %vm6198_vm10, %v6200_v30, %v6196_v33  ;;  %v6215_v38 = vsel %vm6214_vm9, %v9641_v28, %v6211_v32  ;;  %v6229_v23 = vsub.f32 1.0, %v6228_v26 }
 0xb41   : > { %v6220_v34 = vsel %vm6217_vm11, %v6219_v50, %v6215_v38  ;;  %v6243_v14 = vmul.f32 %v9645_v21, %v6201_v1 }
 0xb42   : > { %v6242_v6 = vmul.f32 %v6220_v34, %v13729_v48  ;;  %v6230_v15 = vmul.f32 %v9643_v0, %v6229_v23 }
 0xb44   : > { %v6244_v8 = vadd.f32 %v6243_v14, %v6242_v6  ;;  %v6231_v43 = vadd.f32 %v9643_v0, %v6230_v15 }
 0xb46   : > { %9646 = vtanh.f32 %v6244_v8  ;;  %6253 = vst [vmem:[#allocation3] sm:$0xff] %v6244_v8  ;;  %v6235_v25 = vsel %vm6234_vm14, %v9643_v0, %v6231_v43 }
 0xb47   : > { %v6240_v51 = vsel %vm6237_vm15, %v6239_v19, %v6235_v25 }
 0xb4c   : > { %v9647_v39 = vpop.eup %9646 }
 0xb4d   : > { %v6246_v36 = vmul.f32 %v9647_v39, %v6240_v51  ;;  %6257 = sbr.rel (%p8777_p5) target bundleno = 2904 (0xb58), region = 64 }
 0xb4f   : > { %v6247_v56 = vpack.c.bf16 %v6246_v36, %v6246_v36  ;;  %6252 = vst [vmem:[#allocation2 + $0x8] sm:$0xff] %v6246_v36 }
 0xb51   : > { %8776 = vst [vmem:[%s9803_s26 + $0x1c] sm:$0xf] %v6247_v56 }
 0xb52   : > { %v6258_v48 = vld [vmem:[#allocation2] sm:$0xff]  ;;  %v6262_v42 = vld [vmem:[#allocation3 + $0x8] sm:$0xff]  ;;  %v6263_v17 = vld [vmem:[#allocation3] sm:$0xff] }
 0xb53   : > { %6260 = vst [vmem:[#allocation6] sm:$0xff] %v6258_v48 }
 0xb54   : > { %6264 = vst [vmem:[#allocation8] sm:$0xff] %v6262_v42 }
 0xb55   : > { %6265 = vst [vmem:[#allocation8 + $0x8] sm:$0xff] %v6263_v17 }
 0xb56   : > { %v6259_v52 = vld [vmem:[#allocation2 + $0x8] sm:$0xff] }
 0xb57   : > { %6261 = vst [vmem:[#allocation6 + $0x8] sm:$0xff] %v6259_v52 }
 0xb58 PF: > { %p9376_p6 = scmp.eq.s32.totalorder %s9790_s18, 1  ;;  %s9720_s22 = smov [#allocation6]  }
 0xb59   : > { %s6280_s24 = sshll.u32 %s9720_s22, 4  ;;  %s6282_s27 = sshll.u32 %s13776_s10, 4  ;;  %s6281_s24 = int_to_ptr.vmem [resolvable:$true] %s6280_s24  ;;  %s6283_s27 = int_to_ptr.hbm [resolvable:$true] %s6282_s27 }
 0xb5a   : > { %s9721_s28 = smov 128   ;;  %s9722_s29 = smov 8  }
 0xb5b   : > { %9369 = dma.vmem_to_hbm [thread:$0]  (%p9376_p6), %s6281_s24, 256, %s6283_s27, [#allocation7], %s9721_s28, %s9721_s28, %s9722_s29  }
 0xb5c   : > { %s6296_s13 = sshll.u32 %s13777_s11, 4  ;;  %s9723_s14 = smov [#allocation8]   ;;  %s6297_s13 = int_to_ptr.hbm [resolvable:$true] %s6296_s13 }
 0xb5d   : > { %s6294_s15 = sshll.u32 %s9723_s14, 4  ;;  %s6295_s15 = int_to_ptr.vmem [resolvable:$true] %s6294_s15 }
 0xb5e   : > { %9371 = dma.vmem_to_hbm [thread:$0]  (%p9376_p6), %s6295_s15, 256, %s6297_s13, [#allocation9], %s9721_s28, %s9721_s28, %s9722_s29  }
 0xb5f   : > { %9709 = dma.done.wait (%p9376_p6), [#allocation7], 256  }
 0xb60   : > { %9711 = vsyncadd (%p9376_p6), [#allocation7], 4294967040 }
 0xb61   : > { %9713 = dma.done.wait (%p9376_p6), [#allocation9], 256  }
 0xb62   : > { %9715 = vsyncadd (%p9376_p6), [#allocation9], 4294967040 }
 0xb63 PF: > { %s24_s17 = sadd.s32 1, %s9718_s17  }
 0xb64   : > { %p21_p7 = scmp.ge.s32.totalorder %s24_s17, 4  }
 0xb66   :  { %23 = sbr.rel (!%p21_p7) target bundleno = 2 (0x2), region = 120 }
 0xb6b   :  { %6326 = vsyncpa [#allocation7], 1 }
 0xb6c   :  { %6328 = vsyncpa [#allocation7 + $0x1], 1 }
 0xb6d   :  { %6329 = vsyncpa [#allocation9], 1 }

</bundles_post_ra>
